<compile_context>
chip_gen: v5e
topology: v5e:2x2
jax: 0.10.0
libtpu: 0.0.40
codegen_flags: <defaults>
</compile_context>

<pallas_src>
import jax
import jax.numpy as jnp
from jax.experimental import pallas as pl
from jax.experimental.pallas import tpu as pltpu

EPS = 1e-5
NUM_CLASSES = 10


# ---------------------------------------------------------------------------
# Pallas kernels
# ---------------------------------------------------------------------------
def _conv_block_kernel(x_ref, w_ref, b_ref, sc_ref, sh_ref, o_ref):
    """(cols @ W) + bias -> ReLU -> BatchNorm(eval) scale/shift. f32 epilogue, bf16 store."""
    y = jnp.dot(x_ref[...], w_ref[...], preferred_element_type=jnp.float32)
    y = jnp.maximum(y + b_ref[...], 0.0)
    y = y * sc_ref[...] + sh_ref[...]
    o_ref[...] = y.astype(o_ref.dtype)


def _conv_block(cols, wmat, b, sc, sh, m_tiles=1):
    """Fused conv-as-matmul block. cols: (M, K) bf16, wmat: (K, Cout) bf16."""
    M, K = cols.shape
    Kw, Nc = wmat.shape
    assert K == Kw and M % m_tiles == 0
    tm = M // m_tiles
    return pl.pallas_call(
        _conv_block_kernel,
        out_shape=jax.ShapeDtypeStruct((M, Nc), jnp.bfloat16),
        grid=(m_tiles,),
        in_specs=[
            pl.BlockSpec((tm, K), lambda i: (i, 0)),
            pl.BlockSpec((Kw, Nc), lambda i: (0, 0)),
            pl.BlockSpec((1, Nc), lambda i: (0, 0)),
            pl.BlockSpec((1, Nc), lambda i: (0, 0)),
            pl.BlockSpec((1, Nc), lambda i: (0, 0)),
        ],
        out_specs=pl.BlockSpec((tm, Nc), lambda i: (i, 0)),
        compiler_params=pltpu.CompilerParams(dimension_semantics=("parallel",)),
    )(cols, wmat, b, sc, sh)


def _heads_kernel(cols3_ref, cw_ref, cb_ref, csc_ref, csh_ref,
                  w1_ref, b1_ref, w2_ref, b2_ref, w3_ref, b3_ref, o_ref):
    """conv3(+ReLU+BN3) -> features -> one full head (fc1->ReLU->fc2->ReLU->fc3).

    Grid point h in {0: classification, 1: domain}. Head BN is pre-folded into W/b.
    All matmuls bf16 x bf16 -> f32 accumulate; epilogue math stays in f32 (v5e-safe).
    """
    # conv3: the 4x4 kernel covers the whole 4x4 map -> one output position == matmul.
    f = jnp.dot(cols3_ref[...], cw_ref[...], preferred_element_type=jnp.float32)
    f = jnp.maximum(f + cb_ref[...], 0.0) * csc_ref[...] + csh_ref[...]   # (N, 128) features
    # fc1 (Linear + BN folded) -> ReLU
    h = jnp.dot(f.astype(jnp.bfloat16), w1_ref[0], preferred_element_type=jnp.float32)
    h = jnp.maximum(h + b1_ref[0], 0.0)
    # fc2 (Linear + BN folded) -> ReLU
    h = jnp.dot(h.astype(jnp.bfloat16), w2_ref[0], preferred_element_type=jnp.float32)
    h = jnp.maximum(h + b2_ref[0], 0.0)
    # fc3 (logits, padded to 128 lanes for lane-dense stores)
    o = jnp.dot(h.astype(jnp.bfloat16), w3_ref[0], preferred_element_type=jnp.float32)
    o_ref[0] = (o + b3_ref[0]).astype(o_ref.dtype)


def _heads(cols3, cw, cb, csc, csh, w1s, b1s, w2s, b2s, w3s, b3s):
    N, K3 = cols3.shape
    return pl.pallas_call(
        _heads_kernel,
        out_shape=jax.ShapeDtypeStruct((2, N, 128), jnp.float32),
        grid=(2,),
        in_specs=[
            pl.BlockSpec((N, K3), lambda h: (0, 0)),          # cols3 (shared)
            pl.BlockSpec((K3, 128), lambda h: (0, 0)),        # conv3 weight (shared)
            pl.BlockSpec((1, 128), lambda h: (0, 0)),         # conv3 bias
            pl.BlockSpec((1, 128), lambda h: (0, 0)),         # bn3 scale
            pl.BlockSpec((1, 128), lambda h: (0, 0)),         # bn3 shift
            pl.BlockSpec((1, 128, 1024), lambda h: (h, 0, 0)),   # fc1 W (per head)
            pl.BlockSpec((1, 1, 1024), lambda h: (h, 0, 0)),     # fc1 b
            pl.BlockSpec((1, 1024, 1024), lambda h: (h, 0, 0)),  # fc2 W
            pl.BlockSpec((1, 1, 1024), lambda h: (h, 0, 0)),     # fc2 b
            pl.BlockSpec((1, 1024, 128), lambda h: (h, 0, 0)),   # fc3 W (padded)
            pl.BlockSpec((1, 1, 128), lambda h: (h, 0, 0)),      # fc3 b (padded)
        ],
        out_specs=pl.BlockSpec((1, N, 128), lambda h: (h, 0, 0)),
        compiler_params=pltpu.CompilerParams(dimension_semantics=("parallel",)),
    )(cols3, cw, cb, csc, csh, w1s, b1s, w2s, b2s, w3s, b3s)


# ---------------------------------------------------------------------------
# Plain-XLA glue (fuses; no Pallas launches, no extra materialization)
# ---------------------------------------------------------------------------
def _im2col(x_nhwc, kh, kw):
    """(N,H,W,C) -> (N*OH*OW, kh*kw*C), (kh,kw,c)-minor ordering, bf16."""
    N, H, W, C = x_nhwc.shape
    OH, OW = H - kh + 1, W - kw + 1
    taps = [x_nhwc[:, i:i + OH, j:j + OW, :] for i in range(kh) for j in range(kw)]
    cols = jnp.concatenate(taps, axis=-1)                    # (N, OH, OW, kh*kw*C)
    return cols.reshape(N * OH * OW, kh * kw * C)


def _maxpool_3x3_s2(x):
    """MaxPool2d(kernel_size=3, stride=2), floor mode, NHWC — jnp.maximum reduction tree."""
    N, H, W, C = x.shape
    OH = (H - 3) // 2 + 1
    OW = (W - 3) // 2 + 1
    out = None
    for i in range(3):
        for j in range(3):
            tap = x[:, i:i + 2 * (OH - 1) + 1:2, j:j + 2 * (OW - 1) + 1:2, :]
            out = tap if out is None else jnp.maximum(out, tap)
    return out


# ---------------------------------------------------------------------------
# Parameter init (deterministic, matches nn.Module shapes) + one-time prep
# ---------------------------------------------------------------------------
def init_params(key, num_classes=NUM_CLASSES):
    ks = list(jax.random.split(key, 32))

    def conv_p(k, cout, cin, ksz):
        k1, k2 = jax.random.split(k)
        fan_in = cin * ksz * ksz
        w = jax.random.normal(k1, (cout, cin, ksz, ksz), jnp.float32) / jnp.sqrt(fan_in)
        b = 0.01 * jax.random.normal(k2, (cout,), jnp.float32)
        return w, b

    def bn_p(k, c):
        k1, k2, k3, k4 = jax.random.split(k, 4)
        gamma = 1.0 + 0.1 * jax.random.normal(k1, (c,), jnp.float32)
        beta = 0.1 * jax.random.normal(k2, (c,), jnp.float32)
        mean = 0.1 * jax.random.normal(k3, (c,), jnp.float32)
        var = 1.0 + 0.1 * jax.random.uniform(k4, (c,), jnp.float32)
        return gamma, beta, mean, var

    def lin_p(k, out_f, in_f):
        k1, k2 = jax.random.split(k)
        w = jax.random.normal(k1, (out_f, in_f), jnp.float32) / jnp.sqrt(in_f)
        b = 0.01 * jax.random.normal(k2, (out_f,), jnp.float32)
        return w, b

    p = {}
    p["conv1"] = conv_p(ks[0], 64, 3, 5);    p["bn1"] = bn_p(ks[1], 64)
    p["conv2"] = conv_p(ks[2], 64, 64, 5);   p["bn2"] = bn_p(ks[3], 64)
    p["conv3"] = conv_p(ks[4], 128, 64, 4);  p["bn3"] = bn_p(ks[5], 128)

    p["cls_fc1"] = lin_p(ks[6], 1024, 128);  p["cls_bn1"] = bn_p(ks[7], 1024)
    p["cls_fc2"] = lin_p(ks[8], 1024, 1024); p["cls_bn2"] = bn_p(ks[9], 1024)
    p["cls_fc3"] = lin_p(ks[10], num_classes, 1024)

    p["dom_fc1"] = lin_p(ks[11], 1000, 128);  p["dom_bn1"] = bn_p(ks[12], 1000)
    p["dom_fc2"] = lin_p(ks[13], 1000, 1000); p["dom_bn2"] = bn_p(ks[14], 1000)
    p["dom_fc3"] = lin_p(ks[15], 1, 1000)
    return p


def prepare_params(p):
    """One-time prep: weight reshapes, bf16 casts, BN folding, head padding/stacking."""
    f32, bf16 = jnp.float32, jnp.bfloat16

    def conv_prep(conv, bn):
        # Conv -> ReLU -> BN: BN stays as a scale/shift epilogue (cannot fold across ReLU).
        w, b = conv
        gamma, beta, mean, var = bn
        cout, cin, kh, kw = w.shape
        wmat = jnp.transpose(w, (2, 3, 1, 0)).reshape(kh * kw * cin, cout).astype(bf16)
        sc = (gamma / jnp.sqrt(var + EPS)).astype(f32)
        sh = (beta - mean * sc).astype(f32)
        return wmat, b.reshape(1, cout).astype(f32), sc.reshape(1, cout), sh.reshape(1, cout)

    def fold_lin_bn(lin, bn, in_pad, out_pad):
        # Linear -> BN -> ReLU: relu((xW+b)*s+t) == relu(x(W*s) + (b*s+t))  (exact).
        w, b = lin                                  # torch layout: (out, in)
        gamma, beta, mean, var = bn
        s = gamma / jnp.sqrt(var + EPS)
        t = beta - mean * s
        W = (w.T * s[None, :]).astype(f32)          # (in, out)
        B = (b * s + t).astype(f32)
        W = jnp.pad(W, ((0, in_pad - W.shape[0]), (0, out_pad - W.shape[1])))
        B = jnp.pad(B, ((0, out_pad - B.shape[0]),))
        return W.astype(bf16), B.reshape(1, out_pad)

    def pad_lin(lin, in_pad, out_pad):
        w, b = lin
        W = jnp.pad(w.T.astype(f32), ((0, in_pad - w.shape[1]), (0, out_pad - w.shape[0])))
        B = jnp.pad(b.astype(f32), ((0, out_pad - b.shape[0]),))
        return W.astype(bf16), B.reshape(1, out_pad)

    prep = {}
    prep["conv1"] = conv_prep(p["conv1"], p["bn1"])       # (75, 64)
    prep["conv2"] = conv_prep(p["conv2"], p["bn2"])       # (1600, 64)
    prep["conv3"] = conv_prep(p["conv3"], p["bn3"])       # (1024, 128)

    # Heads: BN folded into W/b; domain widths padded 1000->1024; logits padded to 128.
    w1c, b1c = fold_lin_bn(p["cls_fc1"], p["cls_bn1"], 128, 1024)
    w2c, b2c = fold_lin_bn(p["cls_fc2"], p["cls_bn2"], 1024, 1024)
    w3c, b3c = pad_lin(p["cls_fc3"], 1024, 128)
    w1d, b1d = fold_lin_bn(p["dom_fc1"], p["dom_bn1"], 128, 1024)
    w2d, b2d = fold_lin_bn(p["dom_fc2"], p["dom_bn2"], 1024, 1024)
    w3d, b3d = pad_lin(p["dom_fc3"], 1024, 128)

    prep["head_w1"] = jnp.stack([w1c, w1d])               # (2, 128, 1024) bf16
    prep["head_b1"] = jnp.stack([b1c, b1d])               # (2, 1, 1024) f32
    prep["head_w2"] = jnp.stack([w2c, w2d])               # (2, 1024, 1024) bf16
    prep["head_b2"] = jnp.stack([b2c, b2d])
    prep["head_w3"] = jnp.stack([w3c, w3d])               # (2, 1024, 128) bf16
    prep["head_b3"] = jnp.stack([b3c, b3d])
    return prep


# ---------------------------------------------------------------------------
# Full forward pass
# ---------------------------------------------------------------------------
def svhn_custom_cnn_forward(prep, x_nchw, alpha=1.0, num_classes=NUM_CLASSES):
    # PyTorch NCHW -> NHWC once; bf16 activations (f32 accumulation inside kernels).
    x = jnp.transpose(x_nchw, (0, 2, 3, 1)).astype(jnp.bfloat16)
    N = x.shape[0]

    # block1: Dropout(id) -> Conv(3->64,k5)+ReLU+BN (Pallas) -> MaxPool3x3/2 (XLA) -> Dropout(id)
    cols1 = _im2col(x, 5, 5)                                        # (N*28*28, 75) bf16
    a1 = _conv_block(cols1, *prep["conv1"], m_tiles=2).reshape(N, 28, 28, 64)
    p1 = _maxpool_3x3_s2(a1)                                        # (N, 13, 13, 64)

    # block2: Conv(64->64,k5)+ReLU+BN (Pallas) -> MaxPool3x3/2 (XLA) -> Dropout(id)
    cols2 = _im2col(p1, 5, 5)                                       # (N*9*9, 1600) bf16
    a2 = _conv_block(cols2, *prep["conv2"]).reshape(N, 9, 9, 64)
    p2 = _maxpool_3x3_s2(a2)                                        # (N, 4, 4, 64)

    # block3 conv is a 4x4 kernel over a 4x4 map -> pure matmul on the flattened window;
    # fused with ReLU+BN3 and BOTH heads inside one Pallas kernel (grid over head index).
    cols3 = p2.reshape(N, 1024)                                     # bf16
    out = _heads(cols3, *prep["conv3"],
                 prep["head_w1"], prep["head_b1"],
                 prep["head_w2"], prep["head_b2"],
                 prep["head_w3"], prep["head_b3"])                  # (2, N, 128) f32

    classification_out = out[0, :, :num_classes]
    # gradient reversal: forward is identity (alpha only scales the backward pass)
    # TODO(synk): GRL backward (-alpha * grad) not implemented; forward-only kernels.
    domain_out = out[1, :, :1]
    return classification_out, domain_out


# ---------------------------------------------------------------------------
if __name__ == "__main__":
    key = jax.random.PRNGKey(0)
    k_params, k_x = jax.random.split(key)

    params = init_params(k_params, NUM_CLASSES)
    prep = prepare_params(params)
    # SVHN-style input: batch=2, 3 channels, 32x32 (required so features are (N,128)).
    x = jax.random.normal(k_x, (2, 3, 32, 32), jnp.float32)

    fwd = jax.jit(svhn_custom_cnn_forward)
    cls_out, dom_out = fwd(prep, x)
    jax.block_until_ready((cls_out, dom_out))

    assert cls_out.shape == (2, NUM_CLASSES), cls_out.shape
    assert dom_out.shape == (2, 1), dom_out.shape
    assert bool(jnp.isfinite(cls_out).all()) and bool(jnp.isfinite(dom_out).all())
    print("KERNEL_OK")
</pallas_src>

<mosaic_0001>
module attributes {stable_mosaic.version = 11 : i64} {
  func.func @_conv_block_kernel(%arg0: i32, %arg1: memref<784x75xbf16, #tpu.memory_space<vmem>>, %arg2: memref<75x64xbf16, #tpu.memory_space<vmem>>, %arg3: memref<1x64xf32, #tpu.memory_space<vmem>>, %arg4: memref<1x64xf32, #tpu.memory_space<vmem>>, %arg5: memref<1x64xf32, #tpu.memory_space<vmem>>, %arg6: memref<784x64xbf16, #tpu.memory_space<vmem>>) attributes {dimension_semantics = [#tpu.dimension_semantics<parallel>], iteration_bounds = array<i64: 2>, scalar_prefetch = 0 : i64, scratch_operands = 0 : i64, tpu.core_type = #tpu.core_type<tc>, window_params = [{transform_indices = @transform_0, window_bounds = array<i64: 784, 75>}, {pipeline_mode = #tpu.pipeline_mode<synchronous>, transform_indices = @transform_1, window_bounds = array<i64: 75, 64>}, {pipeline_mode = #tpu.pipeline_mode<synchronous>, transform_indices = @transform_2, window_bounds = array<i64: 1, 64>}, {pipeline_mode = #tpu.pipeline_mode<synchronous>, transform_indices = @transform_3, window_bounds = array<i64: 1, 64>}, {pipeline_mode = #tpu.pipeline_mode<synchronous>, transform_indices = @transform_4, window_bounds = array<i64: 1, 64>}, {transform_indices = @transform_5, window_bounds = array<i64: 784, 64>}]} {
    %c0 = arith.constant 0 : index
    %c0_0 = arith.constant 0 : index
    %0 = vector.load %arg1[%c0, %c0_0] : memref<784x75xbf16, #tpu.memory_space<vmem>>, vector<784x75xbf16>
    %c0_1 = arith.constant 0 : index
    %c0_2 = arith.constant 0 : index
    %1 = vector.load %arg2[%c0_1, %c0_2] : memref<75x64xbf16, #tpu.memory_space<vmem>>, vector<75x64xbf16>
    %cst = arith.constant dense<0.000000e+00> : vector<784x64xf32>
    %2 = tpu.matmul %0, %1, %cst {dimension_numbers = #tpu.dot_dimension_numbers<[1], [0], [0], [1], [0, 0, 1, 1], [], []>} : vector<784x75xbf16>, vector<75x64xbf16>, vector<784x64xf32> -> vector<784x64xf32>
    %c0_3 = arith.constant 0 : index
    %c0_4 = arith.constant 0 : index
    %3 = vector.load %arg3[%c0_3, %c0_4] : memref<1x64xf32, #tpu.memory_space<vmem>>, vector<1x64xf32>
    %4 = vector.broadcast %3 : vector<1x64xf32> to vector<784x64xf32>
    %5 = arith.addf %2, %4 : vector<784x64xf32>
    %cst_5 = arith.constant 0.000000e+00 : f32
    %6 = vector.broadcast %cst_5 : f32 to vector<784x64xf32>
    %7 = arith.maximumf %5, %6 : vector<784x64xf32>
    %c0_6 = arith.constant 0 : index
    %c0_7 = arith.constant 0 : index
    %8 = vector.load %arg4[%c0_6, %c0_7] : memref<1x64xf32, #tpu.memory_space<vmem>>, vector<1x64xf32>
    %9 = vector.broadcast %8 : vector<1x64xf32> to vector<784x64xf32>
    %10 = arith.mulf %7, %9 : vector<784x64xf32>
    %c0_8 = arith.constant 0 : index
    %c0_9 = arith.constant 0 : index
    %11 = vector.load %arg5[%c0_8, %c0_9] : memref<1x64xf32, #tpu.memory_space<vmem>>, vector<1x64xf32>
    %12 = vector.broadcast %11 : vector<1x64xf32> to vector<784x64xf32>
    %13 = arith.addf %10, %12 : vector<784x64xf32>
    %14 = arith.truncf %13 : vector<784x64xf32> to vector<784x64xbf16>
    %c0_10 = arith.constant 0 : index
    %c0_11 = arith.constant 0 : index
    %15 = vector.load %arg6[%c0_10, %c0_11] : memref<784x64xbf16, #tpu.memory_space<vmem>>, vector<784x64xbf16>
    tpu.vector_store %arg6[%c0_10, %c0_11], %14 {strides = array<i32>} : memref<784x64xbf16, #tpu.memory_space<vmem>>, vector<784x64xbf16>,
    return
  }
  func.func @transform_0(%arg0: i32) -> (i32, i32) {
    %c0_i32 = arith.constant 0 : i32
    %c0_i32_0 = arith.constant 0 : i32
    return %arg0, %c0_i32 : i32, i32
  }
  func.func @transform_1(%arg0: i32) -> (i32, i32) {
    %c0_i32 = arith.constant 0 : i32
    %c0_i32_0 = arith.constant 0 : i32
    %c0_i32_1 = arith.constant 0 : i32
    return %c0_i32, %c0_i32_0 : i32, i32
  }
  func.func @transform_2(%arg0: i32) -> (i32, i32) {
    %c0_i32 = arith.constant 0 : i32
    %c0_i32_0 = arith.constant 0 : i32
    %c0_i32_1 = arith.constant 0 : i32
    return %c0_i32, %c0_i32_0 : i32, i32
  }
  func.func @transform_3(%arg0: i32) -> (i32, i32) {
    %c0_i32 = arith.constant 0 : i32
    %c0_i32_0 = arith.constant 0 : i32
    %c0_i32_1 = arith.constant 0 : i32
    return %c0_i32, %c0_i32_0 : i32, i32
  }
  func.func @transform_4(%arg0: i32) -> (i32, i32) {
    %c0_i32 = arith.constant 0 : i32
    %c0_i32_0 = arith.constant 0 : i32
    %c0_i32_1 = arith.constant 0 : i32
    return %c0_i32, %c0_i32_0 : i32, i32
  }
  func.func @transform_5(%arg0: i32) -> (i32, i32) {
    %c0_i32 = arith.constant 0 : i32
    %c0_i32_0 = arith.constant 0 : i32
    return %arg0, %c0_i32 : i32, i32
  }
}

module attributes {stable_mosaic.version = 11 : i64} {
  func.func @_conv_block_kernel(%arg0: i32, %arg1: memref<162x1600xbf16, #tpu.memory_space<vmem>>, %arg2: memref<1600x64xbf16, #tpu.memory_space<vmem>>, %arg3: memref<1x64xf32, #tpu.memory_space<vmem>>, %arg4: memref<1x64xf32, #tpu.memory_space<vmem>>, %arg5: memref<1x64xf32, #tpu.memory_space<vmem>>, %arg6: memref<162x64xbf16, #tpu.memory_space<vmem>>) attributes {dimension_semantics = [#tpu.dimension_semantics<parallel>], iteration_bounds = array<i64: 1>, scalar_prefetch = 0 : i64, scratch_operands = 0 : i64, tpu.core_type = #tpu.core_type<tc>, window_params = [{transform_indices = @transform_0, window_bounds = array<i64: 162, 1600>}, {pipeline_mode = #tpu.pipeline_mode<synchronous>, transform_indices = @transform_1, window_bounds = array<i64: 1600, 64>}, {pipeline_mode = #tpu.pipeline_mode<synchronous>, transform_indices = @transform_2, window_bounds = array<i64: 1, 64>}, {pipeline_mode = #tpu.pipeline_mode<synchronous>, transform_indices = @transform_3, window_bounds = array<i64: 1, 64>}, {pipeline_mode = #tpu.pipeline_mode<synchronous>, transform_indices = @transform_4, window_bounds = array<i64: 1, 64>}, {transform_indices = @transform_5, window_bounds = array<i64: 162, 64>}]} {
    %c0 = arith.constant 0 : index
    %c0_0 = arith.constant 0 : index
    %0 = vector.load %arg1[%c0, %c0_0] : memref<162x1600xbf16, #tpu.memory_space<vmem>>, vector<162x1600xbf16>
    %c0_1 = arith.constant 0 : index
    %c0_2 = arith.constant 0 : index
    %1 = vector.load %arg2[%c0_1, %c0_2] : memref<1600x64xbf16, #tpu.memory_space<vmem>>, vector<1600x64xbf16>
    %cst = arith.constant dense<0.000000e+00> : vector<162x64xf32>
    %2 = tpu.matmul %0, %1, %cst {dimension_numbers = #tpu.dot_dimension_numbers<[1], [0], [0], [1], [0, 0, 1, 1], [], []>} : vector<162x1600xbf16>, vector<1600x64xbf16>, vector<162x64xf32> -> vector<162x64xf32>
    %c0_3 = arith.constant 0 : index
    %c0_4 = arith.constant 0 : index
    %3 = vector.load %arg3[%c0_3, %c0_4] : memref<1x64xf32, #tpu.memory_space<vmem>>, vector<1x64xf32>
    %4 = vector.broadcast %3 : vector<1x64xf32> to vector<162x64xf32>
    %5 = arith.addf %2, %4 : vector<162x64xf32>
    %cst_5 = arith.constant 0.000000e+00 : f32
    %6 = vector.broadcast %cst_5 : f32 to vector<162x64xf32>
    %7 = arith.maximumf %5, %6 : vector<162x64xf32>
    %c0_6 = arith.constant 0 : index
    %c0_7 = arith.constant 0 : index
    %8 = vector.load %arg4[%c0_6, %c0_7] : memref<1x64xf32, #tpu.memory_space<vmem>>, vector<1x64xf32>
    %9 = vector.broadcast %8 : vector<1x64xf32> to vector<162x64xf32>
    %10 = arith.mulf %7, %9 : vector<162x64xf32>
    %c0_8 = arith.constant 0 : index
    %c0_9 = arith.constant 0 : index
    %11 = vector.load %arg5[%c0_8, %c0_9] : memref<1x64xf32, #tpu.memory_space<vmem>>, vector<1x64xf32>
    %12 = vector.broadcast %11 : vector<1x64xf32> to vector<162x64xf32>
    %13 = arith.addf %10, %12 : vector<162x64xf32>
    %14 = arith.truncf %13 : vector<162x64xf32> to vector<162x64xbf16>
    %c0_10 = arith.constant 0 : index
    %c0_11 = arith.constant 0 : index
    %15 = vector.load %arg6[%c0_10, %c0_11] : memref<162x64xbf16, #tpu.memory_space<vmem>>, vector<162x64xbf16>
    tpu.vector_store %arg6[%c0_10, %c0_11], %14 {strides = array<i32>} : memref<162x64xbf16, #tpu.memory_space<vmem>>, vector<162x64xbf16>,
    return
  }
  func.func @transform_0(%arg0: i32) -> (i32, i32) {
    %c0_i32 = arith.constant 0 : i32
    %c0_i32_0 = arith.constant 0 : i32
    return %arg0, %c0_i32 : i32, i32
  }
  func.func @transform_1(%arg0: i32) -> (i32, i32) {
    %c0_i32 = arith.constant 0 : i32
    %c0_i32_0 = arith.constant 0 : i32
    %c0_i32_1 = arith.constant 0 : i32
    return %c0_i32, %c0_i32_0 : i32, i32
  }
  func.func @transform_2(%arg0: i32) -> (i32, i32) {
    %c0_i32 = arith.constant 0 : i32
    %c0_i32_0 = arith.constant 0 : i32
    %c0_i32_1 = arith.constant 0 : i32
    return %c0_i32, %c0_i32_0 : i32, i32
  }
  func.func @transform_3(%arg0: i32) -> (i32, i32) {
    %c0_i32 = arith.constant 0 : i32
    %c0_i32_0 = arith.constant 0 : i32
    %c0_i32_1 = arith.constant 0 : i32
    return %c0_i32, %c0_i32_0 : i32, i32
  }
  func.func @transform_4(%arg0: i32) -> (i32, i32) {
    %c0_i32 = arith.constant 0 : i32
    %c0_i32_0 = arith.constant 0 : i32
    %c0_i32_1 = arith.constant 0 : i32
    return %c0_i32, %c0_i32_0 : i32, i32
  }
  func.func @transform_5(%arg0: i32) -> (i32, i32) {
    %c0_i32 = arith.constant 0 : i32
    %c0_i32_0 = arith.constant 0 : i32
    return %arg0, %c0_i32 : i32, i32
  }
}

module attributes {stable_mosaic.version = 11 : i64} {
  func.func @_heads_kernel(%arg0: i32, %arg1: memref<2x1024xbf16, #tpu.memory_space<vmem>>, %arg2: memref<1024x128xbf16, #tpu.memory_space<vmem>>, %arg3: memref<1x128xf32, #tpu.memory_space<vmem>>, %arg4: memref<1x128xf32, #tpu.memory_space<vmem>>, %arg5: memref<1x128xf32, #tpu.memory_space<vmem>>, %arg6: memref<1x128x1024xbf16, #tpu.memory_space<vmem>>, %arg7: memref<1x1x1024xf32, #tpu.memory_space<vmem>>, %arg8: memref<1x1024x1024xbf16, #tpu.memory_space<vmem>>, %arg9: memref<1x1x1024xf32, #tpu.memory_space<vmem>>, %arg10: memref<1x1024x128xbf16, #tpu.memory_space<vmem>>, %arg11: memref<1x1x128xf32, #tpu.memory_space<vmem>>, %arg12: memref<1x2x128xf32, #tpu.memory_space<vmem>>) attributes {dimension_semantics = [#tpu.dimension_semantics<parallel>], iteration_bounds = array<i64: 2>, scalar_prefetch = 0 : i64, scratch_operands = 0 : i64, tpu.core_type = #tpu.core_type<tc>, window_params = [{pipeline_mode = #tpu.pipeline_mode<synchronous>, transform_indices = @transform_0, window_bounds = array<i64: 2, 1024>}, {pipeline_mode = #tpu.pipeline_mode<synchronous>, transform_indices = @transform_1, window_bounds = array<i64: 1024, 128>}, {pipeline_mode = #tpu.pipeline_mode<synchronous>, transform_indices = @transform_2, window_bounds = array<i64: 1, 128>}, {pipeline_mode = #tpu.pipeline_mode<synchronous>, transform_indices = @transform_3, window_bounds = array<i64: 1, 128>}, {pipeline_mode = #tpu.pipeline_mode<synchronous>, transform_indices = @transform_4, window_bounds = array<i64: 1, 128>}, {transform_indices = @transform_5, window_bounds = array<i64: 1, 128, 1024>}, {transform_indices = @transform_6, window_bounds = array<i64: 1, 1, 1024>}, {transform_indices = @transform_7, window_bounds = array<i64: 1, 1024, 1024>}, {transform_indices = @transform_8, window_bounds = array<i64: 1, 1, 1024>}, {transform_indices = @transform_9, window_bounds = array<i64: 1, 1024, 128>}, {transform_indices = @transform_10, window_bounds = array<i64: 1, 1, 128>}, {transform_indices = @transform_11, window_bounds = array<i64: 1, 2, 128>}]} {
    %c0 = arith.constant 0 : index
    %c0_0 = arith.constant 0 : index
    %0 = vector.load %arg1[%c0, %c0_0] : memref<2x1024xbf16, #tpu.memory_space<vmem>>, vector<2x1024xbf16>
    %c0_1 = arith.constant 0 : index
    %c0_2 = arith.constant 0 : index
    %1 = vector.load %arg2[%c0_1, %c0_2] : memref<1024x128xbf16, #tpu.memory_space<vmem>>, vector<1024x128xbf16>
    %cst = arith.constant dense<0.000000e+00> : vector<2x128xf32>
    %2 = tpu.matmul %0, %1, %cst {dimension_numbers = #tpu.dot_dimension_numbers<[1], [0], [0], [1], [0, 0, 1, 1], [], []>} : vector<2x1024xbf16>, vector<1024x128xbf16>, vector<2x128xf32> -> vector<2x128xf32>
    %c0_3 = arith.constant 0 : index
    %c0_4 = arith.constant 0 : index
    %3 = vector.load %arg3[%c0_3, %c0_4] : memref<1x128xf32, #tpu.memory_space<vmem>>, vector<1x128xf32>
    %4 = vector.broadcast %3 : vector<1x128xf32> to vector<2x128xf32>
    %5 = arith.addf %2, %4 : vector<2x128xf32>
    %cst_5 = arith.constant 0.000000e+00 : f32
    %6 = vector.broadcast %cst_5 : f32 to vector<2x128xf32>
    %7 = arith.maximumf %5, %6 : vector<2x128xf32>
    %c0_6 = arith.constant 0 : index
    %c0_7 = arith.constant 0 : index
    %8 = vector.load %arg4[%c0_6, %c0_7] : memref<1x128xf32, #tpu.memory_space<vmem>>, vector<1x128xf32>
    %9 = vector.broadcast %8 : vector<1x128xf32> to vector<2x128xf32>
    %10 = arith.mulf %7, %9 : vector<2x128xf32>
    %c0_8 = arith.constant 0 : index
    %c0_9 = arith.constant 0 : index
    %11 = vector.load %arg5[%c0_8, %c0_9] : memref<1x128xf32, #tpu.memory_space<vmem>>, vector<1x128xf32>
    %12 = vector.broadcast %11 : vector<1x128xf32> to vector<2x128xf32>
    %13 = arith.addf %10, %12 : vector<2x128xf32>
    %14 = arith.truncf %13 : vector<2x128xf32> to vector<2x128xbf16>
    %c0_10 = arith.constant 0 : index
    %c0_11 = arith.constant 0 : index
    %c0_12 = arith.constant 0 : index
    %15 = vector.load %arg6[%c0_10, %c0_11, %c0_12] : memref<1x128x1024xbf16, #tpu.memory_space<vmem>>, vector<1x128x1024xbf16>
    %16 = vector.shape_cast %15 : vector<1x128x1024xbf16> to vector<128x1024xbf16>
    %cst_13 = arith.constant dense<0.000000e+00> : vector<2x1024xf32>
    %17 = tpu.matmul %14, %16, %cst_13 {dimension_numbers = #tpu.dot_dimension_numbers<[1], [0], [0], [1], [0, 0, 1, 1], [], []>} : vector<2x128xbf16>, vector<128x1024xbf16>, vector<2x1024xf32> -> vector<2x1024xf32>
    %c0_14 = arith.constant 0 : index
    %c0_15 = arith.constant 0 : index
    %c0_16 = arith.constant 0 : index
    %18 = vector.load %arg7[%c0_14, %c0_15, %c0_16] : memref<1x1x1024xf32, #tpu.memory_space<vmem>>, vector<1x1x1024xf32>
    %19 = vector.shape_cast %18 : vector<1x1x1024xf32> to vector<1x1024xf32>
    %20 = vector.broadcast %19 : vector<1x1024xf32> to vector<2x1024xf32>
    %21 = arith.addf %17, %20 : vector<2x1024xf32>
    %cst_17 = arith.constant 0.000000e+00 : f32
    %22 = vector.broadcast %cst_17 : f32 to vector<2x1024xf32>
    %23 = arith.maximumf %21, %22 : vector<2x1024xf32>
    %24 = arith.truncf %23 : vector<2x1024xf32> to vector<2x1024xbf16>
    %c0_18 = arith.constant 0 : index
    %c0_19 = arith.constant 0 : index
    %c0_20 = arith.constant 0 : index
    %25 = vector.load %arg8[%c0_18, %c0_19, %c0_20] : memref<1x1024x1024xbf16, #tpu.memory_space<vmem>>, vector<1x1024x1024xbf16>
    %26 = vector.shape_cast %25 : vector<1x1024x1024xbf16> to vector<1024x1024xbf16>
    %cst_21 = arith.constant dense<0.000000e+00> : vector<2x1024xf32>
    %27 = tpu.matmul %24, %26, %cst_21 {dimension_numbers = #tpu.dot_dimension_numbers<[1], [0], [0], [1], [0, 0, 1, 1], [], []>} : vector<2x1024xbf16>, vector<1024x1024xbf16>, vector<2x1024xf32> -> vector<2x1024xf32>
    %c0_22 = arith.constant 0 : index
    %c0_23 = arith.constant 0 : index
    %c0_24 = arith.constant 0 : index
    %28 = vector.load %arg9[%c0_22, %c0_23, %c0_24] : memref<1x1x1024xf32, #tpu.memory_space<vmem>>, vector<1x1x1024xf32>
    %29 = vector.shape_cast %28 : vector<1x1x1024xf32> to vector<1x1024xf32>
    %30 = vector.broadcast %29 : vector<1x1024xf32> to vector<2x1024xf32>
    %31 = arith.addf %27, %30 : vector<2x1024xf32>
    %cst_25 = arith.constant 0.000000e+00 : f32
    %32 = vector.broadcast %cst_25 : f32 to vector<2x1024xf32>
    %33 = arith.maximumf %31, %32 : vector<2x1024xf32>
    %34 = arith.truncf %33 : vector<2x1024xf32> to vector<2x1024xbf16>
    %c0_26 = arith.constant 0 : index
    %c0_27 = arith.constant 0 : index
    %c0_28 = arith.constant 0 : index
    %35 = vector.load %arg10[%c0_26, %c0_27, %c0_28] : memref<1x1024x128xbf16, #tpu.memory_space<vmem>>, vector<1x1024x128xbf16>
    %36 = vector.shape_cast %35 : vector<1x1024x128xbf16> to vector<1024x128xbf16>
    %cst_29 = arith.constant dense<0.000000e+00> : vector<2x128xf32>
    %37 = tpu.matmul %34, %36, %cst_29 {dimension_numbers = #tpu.dot_dimension_numbers<[1], [0], [0], [1], [0, 0, 1, 1], [], []>} : vector<2x1024xbf16>, vector<1024x128xbf16>, vector<2x128xf32> -> vector<2x128xf32>
    %c0_30 = arith.constant 0 : index
    %c0_31 = arith.constant 0 : index
    %c0_32 = arith.constant 0 : index
    %38 = vector.load %arg11[%c0_30, %c0_31, %c0_32] : memref<1x1x128xf32, #tpu.memory_space<vmem>>, vector<1x1x128xf32>
    %39 = vector.shape_cast %38 : vector<1x1x128xf32> to vector<1x128xf32>
    %40 = vector.broadcast %39 : vector<1x128xf32> to vector<2x128xf32>
    %41 = arith.addf %37, %40 : vector<2x128xf32>
    %c0_33 = arith.constant 0 : index
    %c0_34 = arith.constant 0 : index
    %c0_35 = arith.constant 0 : index
    %42 = vector.load %arg12[%c0_33, %c0_34, %c0_35] : memref<1x2x128xf32, #tpu.memory_space<vmem>>, vector<1x2x128xf32>
    %43 = vector.shape_cast %42 : vector<1x2x128xf32> to vector<2x128xf32>
    %44 = vector.shape_cast %41 : vector<2x128xf32> to vector<1x2x128xf32>
    tpu.vector_store %arg12[%c0_33, %c0_34, %c0_35], %44 {strides = array<i32>} : memref<1x2x128xf32, #tpu.memory_space<vmem>>, vector<1x2x128xf32>,
    return
  }
  func.func @transform_0(%arg0: i32) -> (i32, i32) {
    %c0_i32 = arith.constant 0 : i32
    %c0_i32_0 = arith.constant 0 : i32
    %c0_i32_1 = arith.constant 0 : i32
    return %c0_i32, %c0_i32_0 : i32, i32
  }
  func.func @transform_1(%arg0: i32) -> (i32, i32) {
    %c0_i32 = arith.constant 0 : i32
    %c0_i32_0 = arith.constant 0 : i32
    %c0_i32_1 = arith.constant 0 : i32
    return %c0_i32, %c0_i32_0 : i32, i32
  }
  func.func @transform_2(%arg0: i32) -> (i32, i32) {
    %c0_i32 = arith.constant 0 : i32
    %c0_i32_0 = arith.constant 0 : i32
    %c0_i32_1 = arith.constant 0 : i32
    return %c0_i32, %c0_i32_0 : i32, i32
  }
  func.func @transform_3(%arg0: i32) -> (i32, i32) {
    %c0_i32 = arith.constant 0 : i32
    %c0_i32_0 = arith.constant 0 : i32
    %c0_i32_1 = arith.constant 0 : i32
    return %c0_i32, %c0_i32_0 : i32, i32
  }
  func.func @transform_4(%arg0: i32) -> (i32, i32) {
    %c0_i32 = arith.constant 0 : i32
    %c0_i32_0 = arith.constant 0 : i32
    %c0_i32_1 = arith.constant 0 : i32
    return %c0_i32, %c0_i32_0 : i32, i32
  }
  func.func @transform_5(%arg0: i32) -> (i32, i32, i32) {
    %c0_i32 = arith.constant 0 : i32
    %c0_i32_0 = arith.constant 0 : i32
    %c0_i32_1 = arith.constant 0 : i32
    return %arg0, %c0_i32, %c0_i32_0 : i32, i32, i32
  }
  func.func @transform_6(%arg0: i32) -> (i32, i32, i32) {
    %c0_i32 = arith.constant 0 : i32
    %c0_i32_0 = arith.constant 0 : i32
    %c0_i32_1 = arith.constant 0 : i32
    return %arg0, %c0_i32, %c0_i32_0 : i32, i32, i32
  }
  func.func @transform_7(%arg0: i32) -> (i32, i32, i32) {
    %c0_i32 = arith.constant 0 : i32
    %c0_i32_0 = arith.constant 0 : i32
    %c0_i32_1 = arith.constant 0 : i32
    return %arg0, %c0_i32, %c0_i32_0 : i32, i32, i32
  }
  func.func @transform_8(%arg0: i32) -> (i32, i32, i32) {
    %c0_i32 = arith.constant 0 : i32
    %c0_i32_0 = arith.constant 0 : i32
    %c0_i32_1 = arith.constant 0 : i32
    return %arg0, %c0_i32, %c0_i32_0 : i32, i32, i32
  }
  func.func @transform_9(%arg0: i32) -> (i32, i32, i32) {
    %c0_i32 = arith.constant 0 : i32
    %c0_i32_0 = arith.constant 0 : i32
    %c0_i32_1 = arith.constant 0 : i32
    return %arg0, %c0_i32, %c0_i32_0 : i32, i32, i32
  }
  func.func @transform_10(%arg0: i32) -> (i32, i32, i32) {
    %c0_i32 = arith.constant 0 : i32
    %c0_i32_0 = arith.constant 0 : i32
    %c0_i32_1 = arith.constant 0 : i32
    return %arg0, %c0_i32, %c0_i32_0 : i32, i32, i32
  }
  func.func @transform_11(%arg0: i32) -> (i32, i32, i32) {
    %c0_i32 = arith.constant 0 : i32
    %c0_i32_0 = arith.constant 0 : i32
    %c0_i32_1 = arith.constant 0 : i32
    return %arg0, %c0_i32, %c0_i32_0 : i32, i32, i32
  }
}

</mosaic_0001>

<bundles_post_ra>
// kernel: svhn_custom_cnn_forward.3
= control target key start
LH: loop header
LB: loop body
LE: loop exit
PB: predicated region body
PF: predicated region fallthrough
CT: control target
= control target key end

     0   :  { %s1976_s18 = smov 0   ;;  %s2640_s0 = inlined_call_operand.vmem [shape: bf16[1568,75], index: 0, kind: input, shape index: {}]   ;;  %s2641_s1 = inlined_call_operand.vmem [shape: bf16[75,64], index: 1, kind: input, shape index: {}]   ;;  %s2642_s2 = inlined_call_operand.vmem [shape: f32[1,64], index: 2, kind: input, shape index: {}]   ;;  %s2643_s3 = inlined_call_operand.vmem [shape: f32[1,64], index: 3, kind: input, shape index: {}]   ;;  %s2644_s4 = inlined_call_operand.vmem [shape: f32[1,64], index: 4, kind: input, shape index: {}]   ;;  %s2645_s5 = inlined_call_operand.vmem [shape: bf16[1568,64], index: 5, kind: output, shape index: {}]  }
   0x1 LB: > { %s1579_s19 = sadd.s32 4294967295, %s1943_s18   ;;  %p1583_p0 = scmp.ge.s32.totalorder %s1943_s18, 1  ;;  %s1943_s18 = sphi %s1976_s18, %s15_s18  }
   0x2   : > { %p188_p1 = scmp.lt.s32.totalorder %s1943_s18, 3 }
   0x4   : > { %p189_p2 = pnand %p1583_p0, %p188_p1 }
   0x5   : > { %s216_s24 = smul.u32 (!%p189_p2), 98, %s1579_s19 }
   0x6   : > { %192 = sbr.rel (%p189_p2) target bundleno = 379 (0x17b), region = 40 }
   0x7   : > { %p217_p3 = scmp.lt.s32.totalorder (!%p189_p2), %s216_s24, 195 }
   0xb   : > { %v1800_v0 = vld [vmem:[%s2641_s1 + $0x20] sm:$0xf]  ;;  %v1906_v1 = vld [vmem:[%s2641_s1 + $0x20] sm:$0x30]  ;;  %vm763_vm0 = vcmask 1044480   ;;  %vm764_vm1 = vcmask 1045504  }
   0xc   : > { %v1801_v2 = vor.u32 %v1906_v1, %v1800_v0  ;;  %v1945_v3 = vmov 65535   ;;  %v1905_v7 = vld [vmem:[%s2641_s1 + $0x18] sm:$0xff]  ;;  %v1904_v8 = vld [vmem:[%s2641_s1 + $0x10] sm:$0xff]  ;;  %s2647_s24 = smov (!%p217_p3, %s216_s24), 195  ;;  %v1903_v9 = vld [vmem:[%s2641_s1 + $0x8] sm:$0xff]  ;;  %vm615_vm2 = vcmask 613376  }
   0xd   : > { %v765_v4 = vsel %vm763_vm0, 4294967295, %v1945_v3  ;;  %s1584_s6 = sshll.u32 %s2647_s24, 2  ;;  %v1902_v10 = vld [vmem:[%s2641_s1] sm:$0xff]  ;;  %vm1424_vm3 = vcmask 519168  }
   0xe   : > { %v766_v5 = vsel %vm764_vm1, %v765_v4, 0  ;;  %s2010_s11 = scalar_lea.vmem %s2640_s0, %s1584_s6  ;;  %v2081_v45 = vld [vmem:[%s2642_s2] ss:$0 sm:$0xff]  ;;  %s2114_s21 = scalar_lea.vmem %s2645_s5, %s1584_s6 }
   0xf   : > { %v768_v6 = vand.u32 %v1801_v2, %v766_v5  ;;  %v1877_v11 = vld [vmem:[%s2010_s11 + $0xc0] sm:$0xff]  ;;  %v1890_v12 = vld [vmem:[%s2010_s11 + $0x128] sm:$0xff]  ;;  %v1891_v16 = vld [vmem:[%s2010_s11 + $0x130] sm:$0xff] }
  0x10   : > { %v1853_v13 = vld [vmem:[%s2010_s11] sm:$0xff]  ;;  %v1878_v15 = vld [vmem:[%s2010_s11 + $0xc8] sm:$0xff]  ;;  %v1879_v19 = vld [vmem:[%s2010_s11 + $0xd0] sm:$0xff] }
  0x11   : > { %1908 = vmatpush.bf16.msra.mxu2 %v768_v6  ;;  %1909 = vmatpush.bf16.msra.mxu3 %v768_v6  ;;  %v1865_v14 = vld [vmem:[%s2010_s11 + $0x60] sm:$0xff]  ;;  %v1854_v17 = vld [vmem:[%s2010_s11 + $0x8] sm:$0xff]  ;;  %v1892_v20 = vld [vmem:[%s2010_s11 + $0x138] sm:$0xff] }
  0x12   : > { %773 = vmatpush.bf16.msra.mxu0 %v768_v6  ;;  %1907 = vmatpush.bf16.msra.mxu1 %v768_v6  ;;  %v1866_v18 = vld [vmem:[%s2010_s11 + $0x68] sm:$0xff]  ;;  %v1855_v21 = vld [vmem:[%s2010_s11 + $0x10] sm:$0xff]  ;;  %v1880_v23 = vld [vmem:[%s2010_s11 + $0xd8] sm:$0xff] }
  0x13   : > { %v1867_v22 = vld [vmem:[%s2010_s11 + $0x70] sm:$0xff]  ;;  %v1893_v24 = vld [vmem:[%s2010_s11 + $0x140] sm:$0xff]  ;;  %v1856_v25 = vld [vmem:[%s2010_s11 + $0x18] sm:$0xff] }
  0x14   : > { %v1868_v26 = vld [vmem:[%s2010_s11 + $0x78] sm:$0xff]  ;;  %v1881_v27 = vld [vmem:[%s2010_s11 + $0xe0] sm:$0xff]  ;;  %v1894_v28 = vld [vmem:[%s2010_s11 + $0x148] sm:$0xff] }
  0x15   : > { %1911 = vmatpush.bf16.msra.mxu2 %v1905_v7  ;;  %1912 = vmatpush.bf16.msra.mxu3 %v1905_v7  ;;  %v1857_v29 = vld [vmem:[%s2010_s11 + $0x20] sm:$0xff]  ;;  %v1882_v31 = vld [vmem:[%s2010_s11 + $0xe8] sm:$0xff]  ;;  %v1895_v32 = vld [vmem:[%s2010_s11 + $0x150] sm:$0xff] }
  0x16   : > { %774 = vmatpush.bf16.msra.mxu0 %v1905_v7  ;;  %1910 = vmatpush.bf16.msra.mxu1 %v1905_v7  ;;  %v1869_v30 = vld [vmem:[%s2010_s11 + $0x80] sm:$0xff]  ;;  %v1858_v33 = vld [vmem:[%s2010_s11 + $0x28] sm:$0xff]  ;;  %v1883_v35 = vld [vmem:[%s2010_s11 + $0xf0] sm:$0xff] }
  0x17   : > { %v1870_v34 = vld [vmem:[%s2010_s11 + $0x88] sm:$0xff]  ;;  %v1896_v36 = vld [vmem:[%s2010_s11 + $0x158] sm:$0xff]  ;;  %v1859_v37 = vld [vmem:[%s2010_s11 + $0x30] sm:$0xff] }
  0x18   : > { %v1871_v38 = vld [vmem:[%s2010_s11 + $0x90] sm:$0xff]  ;;  %v1884_v39 = vld [vmem:[%s2010_s11 + $0xf8] sm:$0xff]  ;;  %v1897_v40 = vld [vmem:[%s2010_s11 + $0x160] sm:$0xff] }
  0x19   : > { %1914 = vmatpush.bf16.msra.mxu2 %v1904_v8  ;;  %1915 = vmatpush.bf16.msra.mxu3 %v1904_v8  ;;  %v1860_v41 = vld [vmem:[%s2010_s11 + $0x38] sm:$0xff]  ;;  %v1885_v43 = vld [vmem:[%s2010_s11 + $0x100] sm:$0xff]  ;;  %v1898_v44 = vld [vmem:[%s2010_s11 + $0x168] sm:$0xff] }
  0x1a   : > { %775 = vmatpush.bf16.msra.mxu0 %v1904_v8  ;;  %1913 = vmatpush.bf16.msra.mxu1 %v1904_v8  ;;  %v1872_v42 = vld [vmem:[%s2010_s11 + $0x98] sm:$0xff]  ;;  %v1861_v46 = vld [vmem:[%s2010_s11 + $0x40] sm:$0xff] }
  0x1b   : > { %v1873_v47 = vld [vmem:[%s2010_s11 + $0xa0] sm:$0xff] }
  0x1c   : > { %v2092_v52 = vld [vmem:[%s2643_s3] ss:$0 sm:$0xff] }
  0x1d   : > { %1917 = vmatpush.bf16.msra.mxu2 %v1903_v9  ;;  %1918 = vmatpush.bf16.msra.mxu3 %v1903_v9  ;;  %v2099_v56 = vld [vmem:[%s2644_s4] ss:$0 sm:$0xff] }
  0x1e   : > { %776 = vmatpush.bf16.msra.mxu0 %v1903_v9  ;;  %1916 = vmatpush.bf16.msra.mxu1 %v1903_v9 }
  0x21   : > { %1920 = vmatpush.bf16.msra.mxu2 %v1902_v10  ;;  %1921 = vmatpush.bf16.msra.mxu3 %v1902_v10 }
  0x22   : > { %777 = vmatpush.bf16.msra.mxu0 %v1902_v10  ;;  %1919 = vmatpush.bf16.msra.mxu1 %v1902_v10 }
  0x24   : > { %1826 = vmatmul.msk.bf16.vlgmr.msra.gmra.mxu2 %vm615_vm2, %v1877_v11  ;;  %1839 = vmatmul.msk.bf16.vlgmr.msra.gmra.mxu3 %vm615_vm2, %v1890_v12 }
  0x25   : > { %1802 = vmatmul.msk.bf16.vlgmr.msra.gmra.mxu0 %vm615_vm2, %v1853_v13  ;;  %1814 = vmatmul.msk.bf16.vlgmr.msra.gmra.mxu1 %vm615_vm2, %v1865_v14 }
  0x34   : > { %1827 = vmatmul.msk.bf16.gmra.mxu2 %vm615_vm2, %v1878_v15  ;;  %1840 = vmatmul.msk.bf16.gmra.mxu3 %vm615_vm2, %v1891_v16 }
  0x35   : > { %1803 = vmatmul.msk.bf16.gmra.mxu0 %vm615_vm2, %v1854_v17  ;;  %1815 = vmatmul.msk.bf16.gmra.mxu1 %vm615_vm2, %v1866_v18 }
  0x44   : > { %1828 = vmatmul.msk.bf16.gmra.mxu2 %vm615_vm2, %v1879_v19  ;;  %1841 = vmatmul.msk.bf16.gmra.mxu3 %vm615_vm2, %v1892_v20 }
  0x45   : > { %1804 = vmatmul.msk.bf16.gmra.mxu0 %vm615_vm2, %v1855_v21  ;;  %1816 = vmatmul.msk.bf16.gmra.mxu1 %vm615_vm2, %v1867_v22  ;;  %v1886_v21 = vld [vmem:[%s2010_s11 + $0x108] sm:$0xff] }
  0x54   : > { %1829 = vmatmul.msk.bf16.gmra.mxu2 %vm615_vm2, %v1880_v23  ;;  %1842 = vmatmul.msk.bf16.gmra.mxu3 %vm615_vm2, %v1893_v24  ;;  %v1899_v23 = vld [vmem:[%s2010_s11 + $0x170] sm:$0xff] }
  0x55   : > { %1805 = vmatmul.msk.bf16.gmra.mxu0 %vm615_vm2, %v1856_v25  ;;  %1817 = vmatmul.msk.bf16.gmra.mxu1 %vm615_vm2, %v1868_v26  ;;  %v1862_v26 = vld [vmem:[%s2010_s11 + $0x48] sm:$0xff] }
  0x64   : > { %1830 = vmatmul.msk.bf16.gmra.mxu2 %vm615_vm2, %v1881_v27  ;;  %1843 = vmatmul.msk.bf16.gmra.mxu3 %vm615_vm2, %v1894_v28  ;;  %v1874_v27 = vld [vmem:[%s2010_s11 + $0xa8] sm:$0xff] }
  0x65   : > { %1806 = vmatmul.msk.bf16.gmra.mxu0 %vm615_vm2, %v1857_v29  ;;  %1818 = vmatmul.msk.bf16.gmra.mxu1 %vm615_vm2, %v1869_v30 }
  0x74   : > { %1831 = vmatmul.msk.bf16.gmra.mxu2 %vm615_vm2, %v1882_v31  ;;  %1844 = vmatmul.msk.bf16.gmra.mxu3 %vm615_vm2, %v1895_v32 }
  0x75   : > { %1807 = vmatmul.msk.bf16.gmra.mxu0 %vm615_vm2, %v1858_v33  ;;  %1819 = vmatmul.msk.bf16.gmra.mxu1 %vm615_vm2, %v1870_v34 }
  0x84   : > { %1832 = vmatmul.msk.bf16.gmra.mxu2 %vm615_vm2, %v1883_v35  ;;  %1845 = vmatmul.msk.bf16.gmra.mxu3 %vm615_vm2, %v1896_v36 }
  0x85   : > { %1808 = vmatmul.msk.bf16.gmra.mxu0 %vm615_vm2, %v1859_v37  ;;  %1820 = vmatmul.msk.bf16.gmra.mxu1 %vm615_vm2, %v1871_v38 }
  0x94   : > { %1833 = vmatmul.msk.bf16.gmra.mxu2 %vm615_vm2, %v1884_v39  ;;  %1846 = vmatmul.msk.bf16.gmra.mxu3 %vm615_vm2, %v1897_v40 }
  0x95   : > { %1809 = vmatmul.msk.bf16.gmra.mxu0 %vm615_vm2, %v1860_v41  ;;  %1821 = vmatmul.msk.bf16.gmra.mxu1 %vm615_vm2, %v1872_v42 }
  0xa2   : > { %v779_v48 = vpop.f32.mrf.mxu0  ;;  %v839_v49 = vpop.f32.mrf.mxu1 }
  0xa3   : > { %v780_v50 = vadd.f32 %v2081_v45, %v779_v48  ;;  %v840_v51 = vadd.f32 %v2081_v45, %v839_v49 }
  0xa4   : > { %1834 = vmatmul.msk.bf16.gmra.mxu2 %vm615_vm2, %v1885_v43  ;;  %1847 = vmatmul.msk.bf16.gmra.mxu3 %vm615_vm2, %v1898_v44 }
  0xa5   : > { %v1024_v53 = vmax.f32 %v780_v50, 0.0  ;;  %v1048_v54 = vmax.f32 %v840_v51, 0.0  ;;  %1810 = vmatmul.msk.bf16.gmra.mxu0 %vm615_vm2, %v1861_v46  ;;  %1822 = vmatmul.msk.bf16.gmra.mxu1 %vm615_vm2, %v1873_v47 }
  0xa7   : > { %v899_v55 = vpop.f32.mrf.mxu2  ;;  %v1126_v57 = vmul.f32 %v2092_v52, %v1024_v53  ;;  %v1150_v58 = vmul.f32 %v2092_v52, %v1048_v54  ;;  %v964_v59 = vpop.f32.mrf.mxu3 }
  0xa8   : > { %v900_v60 = vadd.f32 %v2081_v45, %v899_v55  ;;  %v965_v61 = vadd.f32 %v2081_v45, %v964_v59 }
  0xa9   : > { %v1228_v62 = vadd.f32 %v2099_v56, %v1126_v57  ;;  %v1252_v63 = vadd.f32 %v2099_v56, %v1150_v58 }
  0xaa   : > { %v1072_v0 = vmax.f32 %v900_v60, 0.0  ;;  %v1098_v1 = vmax.f32 %v965_v61, 0.0  ;;  %v781_v2 = vpop.f32.mrf.mxu0  ;;  %v841_v3 = vpop.f32.mrf.mxu1 }
  0xab   : > { %v1326_v4 = vpack.c.bf16 %v1228_v62, %v1228_v62  ;;  %v1350_v5 = vpack.c.bf16 %v1252_v63, %v1252_v63  ;;  %v782_v6 = vadd.f32 %v2081_v45, %v781_v2  ;;  %v842_v7 = vadd.f32 %v2081_v45, %v841_v3 }
  0xac   : > { %v1174_v8 = vmul.f32 %v2092_v52, %v1072_v0  ;;  %v1200_v9 = vmul.f32 %v2092_v52, %v1098_v1 }
  0xad   : > { %1425 = vst.msk [vmem:[%s2114_s21] sm:$0xf] %vm1424_vm3, %v1326_v4  ;;  %v1025_v10 = vmax.f32 %v782_v6, 0.0  ;;  %v1049_v11 = vmax.f32 %v842_v7, 0.0 }
  0xae   : > { %v1276_v12 = vadd.f32 %v2099_v56, %v1174_v8  ;;  %1449 = vst.msk [vmem:[%s2114_s21 + $0x60] sm:$0xf] %vm1424_vm3, %v1350_v5  ;;  %v1302_v13 = vadd.f32 %v2099_v56, %v1200_v9 }
  0xaf   : > { %v901_v14 = vpop.f32.mrf.mxu2  ;;  %v1127_v15 = vmul.f32 %v2092_v52, %v1025_v10  ;;  %v1151_v16 = vmul.f32 %v2092_v52, %v1049_v11  ;;  %v966_v17 = vpop.f32.mrf.mxu3 }
  0xb0   : > { %v1374_v18 = vpack.c.bf16 %v1276_v12, %v1276_v12  ;;  %v902_v19 = vadd.f32 %v2081_v45, %v901_v14  ;;  %v1400_v20 = vpack.c.bf16 %v1302_v13, %v1302_v13  ;;  %v967_v22 = vadd.f32 %v2081_v45, %v966_v17  ;;  %v1887_v12 = vld [vmem:[%s2010_s11 + $0x110] sm:$0xff]  ;;  %v1900_v14 = vld [vmem:[%s2010_s11 + $0x178] sm:$0xff] }
  0xb1   : > { %v1229_v24 = vadd.f32 %v2099_v56, %v1127_v15  ;;  %v1253_v25 = vadd.f32 %v2099_v56, %v1151_v16  ;;  %v1863_v17 = vld [vmem:[%s2010_s11 + $0x50] sm:$0xff] }
  0xb2   : > { %1473 = vst.msk [vmem:[%s2114_s21 + $0xc0] sm:$0xf] %vm1424_vm3, %v1374_v18  ;;  %v1073_v28 = vmax.f32 %v902_v19, 0.0  ;;  %v1099_v29 = vmax.f32 %v967_v22, 0.0  ;;  %v784_v30 = vpop.f32.mrf.mxu0  ;;  %v844_v31 = vpop.f32.mrf.mxu1  ;;  %v1875_v18 = vld [vmem:[%s2010_s11 + $0xb0] sm:$0xff] }
  0xb3   : > { %1499 = vst.msk [vmem:[%s2114_s21 + $0x128] sm:$0xf] %vm1424_vm3, %v1400_v20  ;;  %v1327_v32 = vpack.c.bf16 %v1229_v24, %v1229_v24  ;;  %v1351_v33 = vpack.c.bf16 %v1253_v25, %v1253_v25  ;;  %v785_v34 = vadd.f32 %v2081_v45, %v784_v30  ;;  %v845_v35 = vadd.f32 %v2081_v45, %v844_v31 }
  0xb4   : > { %v1175_v36 = vmul.f32 %v2092_v52, %v1073_v28  ;;  %1835 = vmatmul.msk.bf16.gmra.mxu2 %vm615_vm2, %v1886_v21  ;;  %v1201_v37 = vmul.f32 %v2092_v52, %v1099_v29  ;;  %1848 = vmatmul.msk.bf16.gmra.mxu3 %vm615_vm2, %v1899_v23 }
  0xb5   : > { %1426 = vst.msk [vmem:[%s2114_s21 + $0x4] sm:$0xf] %vm1424_vm3, %v1327_v32  ;;  %v1026_v38 = vmax.f32 %v785_v34, 0.0  ;;  %v1050_v39 = vmax.f32 %v845_v35, 0.0  ;;  %1811 = vmatmul.msk.bf16.gmra.mxu0 %vm615_vm2, %v1862_v26  ;;  %1823 = vmatmul.msk.bf16.gmra.mxu1 %vm615_vm2, %v1874_v27 }
  0xb6   : > { %v1277_v40 = vadd.f32 %v2099_v56, %v1175_v36  ;;  %1450 = vst.msk [vmem:[%s2114_s21 + $0x64] sm:$0xf] %vm1424_vm3, %v1351_v33  ;;  %v1303_v41 = vadd.f32 %v2099_v56, %v1201_v37 }
  0xb7   : > { %v904_v42 = vpop.f32.mrf.mxu2  ;;  %v1128_v43 = vmul.f32 %v2092_v52, %v1026_v38  ;;  %v1152_v44 = vmul.f32 %v2092_v52, %v1050_v39  ;;  %v969_v46 = vpop.f32.mrf.mxu3 }
  0xb8   : > { %v1375_v47 = vpack.c.bf16 %v1277_v40, %v1277_v40  ;;  %v905_v48 = vadd.f32 %v2081_v45, %v904_v42  ;;  %v1401_v49 = vpack.c.bf16 %v1303_v41, %v1303_v41  ;;  %v970_v50 = vadd.f32 %v2081_v45, %v969_v46 }
  0xb9   : > { %v1230_v51 = vadd.f32 %v2099_v56, %v1128_v43  ;;  %v1254_v53 = vadd.f32 %v2099_v56, %v1152_v44 }
  0xba   : > { %1474 = vst.msk [vmem:[%s2114_s21 + $0xc4] sm:$0xf] %vm1424_vm3, %v1375_v47  ;;  %v1074_v54 = vmax.f32 %v905_v48, 0.0  ;;  %v1100_v55 = vmax.f32 %v970_v50, 0.0  ;;  %v786_v57 = vpop.f32.mrf.mxu0  ;;  %v846_v58 = vpop.f32.mrf.mxu1 }
  0xbb   : > { %1500 = vst.msk [vmem:[%s2114_s21 + $0x12c] sm:$0xf] %vm1424_vm3, %v1401_v49  ;;  %v1328_v59 = vpack.c.bf16 %v1230_v51, %v1230_v51  ;;  %v1352_v60 = vpack.c.bf16 %v1254_v53, %v1254_v53  ;;  %v787_v61 = vadd.f32 %v2081_v45, %v786_v57  ;;  %v847_v62 = vadd.f32 %v2081_v45, %v846_v58 }
  0xbc   : > { %v1176_v63 = vmul.f32 %v2092_v52, %v1074_v54  ;;  %v1202_v0 = vmul.f32 %v2092_v52, %v1100_v55 }
  0xbd   : > { %1427 = vst.msk [vmem:[%s2114_s21 + $0x8] sm:$0xf] %vm1424_vm3, %v1328_v59  ;;  %v1027_v1 = vmax.f32 %v787_v61, 0.0  ;;  %v1051_v2 = vmax.f32 %v847_v62, 0.0 }
  0xbe   : > { %v1278_v3 = vadd.f32 %v2099_v56, %v1176_v63  ;;  %1451 = vst.msk [vmem:[%s2114_s21 + $0x68] sm:$0xf] %vm1424_vm3, %v1352_v60  ;;  %v1304_v4 = vadd.f32 %v2099_v56, %v1202_v0 }
  0xbf   : > { %v906_v5 = vpop.f32.mrf.mxu2  ;;  %v1129_v6 = vmul.f32 %v2092_v52, %v1027_v1  ;;  %v1153_v7 = vmul.f32 %v2092_v52, %v1051_v2  ;;  %v971_v8 = vpop.f32.mrf.mxu3 }
  0xc0   : > { %v1376_v9 = vpack.c.bf16 %v1278_v3, %v1278_v3  ;;  %v907_v10 = vadd.f32 %v2081_v45, %v906_v5  ;;  %v1402_v11 = vpack.c.bf16 %v1304_v4, %v1304_v4  ;;  %v972_v13 = vadd.f32 %v2081_v45, %v971_v8  ;;  %v1888_v3 = vld [vmem:[%s2010_s11 + $0x118] sm:$0xff]  ;;  %v1901_v5 = vld [vmem:[%s2010_s11 + $0x180] sm:$0xff] }
  0xc1   : > { %v1231_v15 = vadd.f32 %v2099_v56, %v1129_v6  ;;  %v1255_v16 = vadd.f32 %v2099_v56, %v1153_v7  ;;  %v1864_v8 = vld [vmem:[%s2010_s11 + $0x58] sm:$0xff] }
  0xc2   : > { %1475 = vst.msk [vmem:[%s2114_s21 + $0xc8] sm:$0xf] %vm1424_vm3, %v1376_v9  ;;  %v1075_v19 = vmax.f32 %v907_v10, 0.0  ;;  %v1101_v20 = vmax.f32 %v972_v13, 0.0  ;;  %v789_v21 = vpop.f32.mrf.mxu0  ;;  %v849_v22 = vpop.f32.mrf.mxu1  ;;  %v1876_v9 = vld [vmem:[%s2010_s11 + $0xb8] sm:$0xff] }
  0xc3   : > { %1501 = vst.msk [vmem:[%s2114_s21 + $0x130] sm:$0xf] %vm1424_vm3, %v1402_v11  ;;  %v1329_v23 = vpack.c.bf16 %v1231_v15, %v1231_v15  ;;  %v1353_v24 = vpack.c.bf16 %v1255_v16, %v1255_v16  ;;  %v790_v25 = vadd.f32 %v2081_v45, %v789_v21  ;;  %v850_v26 = vadd.f32 %v2081_v45, %v849_v22 }
  0xc4   : > { %v1177_v27 = vmul.f32 %v2092_v52, %v1075_v19  ;;  %1836 = vmatmul.msk.bf16.gmra.mxu2 %vm615_vm2, %v1887_v12  ;;  %v1203_v28 = vmul.f32 %v2092_v52, %v1101_v20  ;;  %1849 = vmatmul.msk.bf16.gmra.mxu3 %vm615_vm2, %v1900_v14 }
  0xc5   : > { %1428 = vst.msk [vmem:[%s2114_s21 + $0xc] sm:$0xf] %vm1424_vm3, %v1329_v23  ;;  %v1028_v29 = vmax.f32 %v790_v25, 0.0  ;;  %v1052_v30 = vmax.f32 %v850_v26, 0.0  ;;  %1812 = vmatmul.msk.bf16.gmra.mxu0 %vm615_vm2, %v1863_v17  ;;  %1824 = vmatmul.msk.bf16.gmra.mxu1 %vm615_vm2, %v1875_v18 }
  0xc6   : > { %v1279_v31 = vadd.f32 %v2099_v56, %v1177_v27  ;;  %1452 = vst.msk [vmem:[%s2114_s21 + $0x6c] sm:$0xf] %vm1424_vm3, %v1353_v24  ;;  %v1305_v32 = vadd.f32 %v2099_v56, %v1203_v28 }
  0xc7   : > { %v909_v33 = vpop.f32.mrf.mxu2  ;;  %v1130_v34 = vmul.f32 %v2092_v52, %v1028_v29  ;;  %v1154_v35 = vmul.f32 %v2092_v52, %v1052_v30  ;;  %v974_v36 = vpop.f32.mrf.mxu3 }
  0xc8   : > { %v1377_v37 = vpack.c.bf16 %v1279_v31, %v1279_v31  ;;  %v910_v38 = vadd.f32 %v2081_v45, %v909_v33  ;;  %v1403_v39 = vpack.c.bf16 %v1305_v32, %v1305_v32  ;;  %v975_v40 = vadd.f32 %v2081_v45, %v974_v36 }
  0xc9   : > { %v1232_v41 = vadd.f32 %v2099_v56, %v1130_v34  ;;  %v1256_v42 = vadd.f32 %v2099_v56, %v1154_v35 }
  0xca   : > { %1476 = vst.msk [vmem:[%s2114_s21 + $0xcc] sm:$0xf] %vm1424_vm3, %v1377_v37  ;;  %v1076_v43 = vmax.f32 %v910_v38, 0.0  ;;  %v1102_v44 = vmax.f32 %v975_v40, 0.0  ;;  %v791_v46 = vpop.f32.mrf.mxu0  ;;  %v851_v47 = vpop.f32.mrf.mxu1 }
  0xcb   : > { %1502 = vst.msk [vmem:[%s2114_s21 + $0x134] sm:$0xf] %vm1424_vm3, %v1403_v39  ;;  %v1330_v48 = vpack.c.bf16 %v1232_v41, %v1232_v41  ;;  %v1354_v49 = vpack.c.bf16 %v1256_v42, %v1256_v42  ;;  %v792_v50 = vadd.f32 %v2081_v45, %v791_v46  ;;  %v852_v51 = vadd.f32 %v2081_v45, %v851_v47 }
  0xcc   : > { %v1178_v53 = vmul.f32 %v2092_v52, %v1076_v43  ;;  %v1204_v54 = vmul.f32 %v2092_v52, %v1102_v44 }
  0xcd   : > { %1429 = vst.msk [vmem:[%s2114_s21 + $0x10] sm:$0xf] %vm1424_vm3, %v1330_v48  ;;  %v1029_v55 = vmax.f32 %v792_v50, 0.0  ;;  %v1053_v57 = vmax.f32 %v852_v51, 0.0 }
  0xce   : > { %v1280_v58 = vadd.f32 %v2099_v56, %v1178_v53  ;;  %1453 = vst.msk [vmem:[%s2114_s21 + $0x70] sm:$0xf] %vm1424_vm3, %v1354_v49  ;;  %v1306_v59 = vadd.f32 %v2099_v56, %v1204_v54 }
  0xcf   : > { %v911_v60 = vpop.f32.mrf.mxu2  ;;  %v1131_v61 = vmul.f32 %v2092_v52, %v1029_v55  ;;  %v1155_v62 = vmul.f32 %v2092_v52, %v1053_v57  ;;  %v976_v63 = vpop.f32.mrf.mxu3 }
  0xd0   : > { %v1378_v0 = vpack.c.bf16 %v1280_v58, %v1280_v58  ;;  %v912_v1 = vadd.f32 %v2081_v45, %v911_v60  ;;  %v1404_v2 = vpack.c.bf16 %v1306_v59, %v1306_v59  ;;  %v977_v4 = vadd.f32 %v2081_v45, %v976_v63  ;;  %v1889_v58 = vld [vmem:[%s2010_s11 + $0x120] sm:$0xff] }
  0xd1   : > { %v1233_v6 = vadd.f32 %v2099_v56, %v1131_v61  ;;  %v1257_v7 = vadd.f32 %v2099_v56, %v1155_v62 }
  0xd2   : > { %1477 = vst.msk [vmem:[%s2114_s21 + $0xd0] sm:$0xf] %vm1424_vm3, %v1378_v0  ;;  %v1077_v10 = vmax.f32 %v912_v1, 0.0  ;;  %v1103_v11 = vmax.f32 %v977_v4, 0.0  ;;  %v794_v12 = vpop.f32.mrf.mxu0  ;;  %v854_v13 = vpop.f32.mrf.mxu1 }
  0xd3   : > { %1503 = vst.msk [vmem:[%s2114_s21 + $0x138] sm:$0xf] %vm1424_vm3, %v1404_v2  ;;  %v1331_v14 = vpack.c.bf16 %v1233_v6, %v1233_v6  ;;  %v1355_v15 = vpack.c.bf16 %v1257_v7, %v1257_v7  ;;  %v795_v16 = vadd.f32 %v2081_v45, %v794_v12  ;;  %v855_v17 = vadd.f32 %v2081_v45, %v854_v13 }
  0xd4   : > { %v1179_v18 = vmul.f32 %v2092_v52, %v1077_v10  ;;  %1837 = vmatmul.msk.bf16.gmra.mxu2 %vm615_vm2, %v1888_v3  ;;  %v1205_v19 = vmul.f32 %v2092_v52, %v1103_v11  ;;  %1850 = vmatmul.msk.bf16.gmra.mxu3 %vm615_vm2, %v1901_v5 }
  0xd5   : > { %1430 = vst.msk [vmem:[%s2114_s21 + $0x14] sm:$0xf] %vm1424_vm3, %v1331_v14  ;;  %v1030_v20 = vmax.f32 %v795_v16, 0.0  ;;  %v1054_v21 = vmax.f32 %v855_v17, 0.0  ;;  %1813 = vmatmul.msk.bf16.gmra.mxu0 %vm615_vm2, %v1864_v8  ;;  %1825 = vmatmul.msk.bf16.gmra.mxu1 %vm615_vm2, %v1876_v9 }
  0xd6   : > { %v1281_v22 = vadd.f32 %v2099_v56, %v1179_v18  ;;  %1454 = vst.msk [vmem:[%s2114_s21 + $0x74] sm:$0xf] %vm1424_vm3, %v1355_v15  ;;  %v1307_v23 = vadd.f32 %v2099_v56, %v1205_v19 }
  0xd7   : > { %v914_v24 = vpop.f32.mrf.mxu2  ;;  %v1132_v25 = vmul.f32 %v2092_v52, %v1030_v20  ;;  %v1156_v26 = vmul.f32 %v2092_v52, %v1054_v21  ;;  %v979_v27 = vpop.f32.mrf.mxu3 }
  0xd8   : > { %v1379_v28 = vpack.c.bf16 %v1281_v22, %v1281_v22  ;;  %v915_v29 = vadd.f32 %v2081_v45, %v914_v24  ;;  %v1405_v30 = vpack.c.bf16 %v1307_v23, %v1307_v23  ;;  %v980_v31 = vadd.f32 %v2081_v45, %v979_v27 }
  0xd9   : > { %v1234_v32 = vadd.f32 %v2099_v56, %v1132_v25  ;;  %v1258_v33 = vadd.f32 %v2099_v56, %v1156_v26 }
  0xda   : > { %1478 = vst.msk [vmem:[%s2114_s21 + $0xd4] sm:$0xf] %vm1424_vm3, %v1379_v28  ;;  %v1078_v34 = vmax.f32 %v915_v29, 0.0  ;;  %v1104_v35 = vmax.f32 %v980_v31, 0.0  ;;  %v796_v36 = vpop.f32.mrf.mxu0  ;;  %v856_v37 = vpop.f32.mrf.mxu1 }
  0xdb   : > { %1504 = vst.msk [vmem:[%s2114_s21 + $0x13c] sm:$0xf] %vm1424_vm3, %v1405_v30  ;;  %v1332_v38 = vpack.c.bf16 %v1234_v32, %v1234_v32  ;;  %v1356_v39 = vpack.c.bf16 %v1258_v33, %v1258_v33  ;;  %v797_v40 = vadd.f32 %v2081_v45, %v796_v36  ;;  %v857_v41 = vadd.f32 %v2081_v45, %v856_v37 }
  0xdc   : > { %v1180_v42 = vmul.f32 %v2092_v52, %v1078_v34  ;;  %v1206_v43 = vmul.f32 %v2092_v52, %v1104_v35 }
  0xdd   : > { %1431 = vst.msk [vmem:[%s2114_s21 + $0x18] sm:$0xf] %vm1424_vm3, %v1332_v38  ;;  %v1031_v44 = vmax.f32 %v797_v40, 0.0  ;;  %v1055_v46 = vmax.f32 %v857_v41, 0.0 }
  0xde   : > { %v1282_v47 = vadd.f32 %v2099_v56, %v1180_v42  ;;  %1455 = vst.msk [vmem:[%s2114_s21 + $0x78] sm:$0xf] %vm1424_vm3, %v1356_v39  ;;  %v1308_v48 = vadd.f32 %v2099_v56, %v1206_v43 }
  0xdf   : > { %v916_v49 = vpop.f32.mrf.mxu2  ;;  %v1133_v50 = vmul.f32 %v2092_v52, %v1031_v44  ;;  %v1157_v51 = vmul.f32 %v2092_v52, %v1055_v46  ;;  %v981_v53 = vpop.f32.mrf.mxu3 }
  0xe0   : > { %v1380_v54 = vpack.c.bf16 %v1282_v47, %v1282_v47  ;;  %v917_v55 = vadd.f32 %v2081_v45, %v916_v49  ;;  %v1406_v57 = vpack.c.bf16 %v1308_v48, %v1308_v48  ;;  %v982_v59 = vadd.f32 %v2081_v45, %v981_v53 }
  0xe1   : > { %v1235_v60 = vadd.f32 %v2099_v56, %v1133_v50  ;;  %v1259_v61 = vadd.f32 %v2099_v56, %v1157_v51 }
  0xe2   : > { %1479 = vst.msk [vmem:[%s2114_s21 + $0xd8] sm:$0xf] %vm1424_vm3, %v1380_v54  ;;  %v1079_v62 = vmax.f32 %v917_v55, 0.0  ;;  %v1105_v63 = vmax.f32 %v982_v59, 0.0  ;;  %v799_v0 = vpop.f32.mrf.mxu0  ;;  %v859_v1 = vpop.f32.mrf.mxu1 }
  0xe3   : > { %1505 = vst.msk [vmem:[%s2114_s21 + $0x140] sm:$0xf] %vm1424_vm3, %v1406_v57  ;;  %v1333_v2 = vpack.c.bf16 %v1235_v60, %v1235_v60  ;;  %v1357_v3 = vpack.c.bf16 %v1259_v61, %v1259_v61  ;;  %v800_v4 = vadd.f32 %v2081_v45, %v799_v0  ;;  %v860_v5 = vadd.f32 %v2081_v45, %v859_v1 }
  0xe4   : > { %v1181_v6 = vmul.f32 %v2092_v52, %v1079_v62  ;;  %1838 = vmatmul.msk.bf16.gmra.mxu2 %vm615_vm2, %v1889_v58  ;;  %v1207_v7 = vmul.f32 %v2092_v52, %v1105_v63 }
  0xe5   : > { %1432 = vst.msk [vmem:[%s2114_s21 + $0x1c] sm:$0xf] %vm1424_vm3, %v1333_v2  ;;  %v1032_v8 = vmax.f32 %v800_v4, 0.0  ;;  %v1056_v9 = vmax.f32 %v860_v5, 0.0 }
  0xe6   : > { %v1283_v10 = vadd.f32 %v2099_v56, %v1181_v6  ;;  %1456 = vst.msk [vmem:[%s2114_s21 + $0x7c] sm:$0xf] %vm1424_vm3, %v1357_v3  ;;  %v1309_v11 = vadd.f32 %v2099_v56, %v1207_v7 }
  0xe7   : > { %v919_v12 = vpop.f32.mrf.mxu2  ;;  %v1134_v13 = vmul.f32 %v2092_v52, %v1032_v8  ;;  %v1158_v14 = vmul.f32 %v2092_v52, %v1056_v9  ;;  %v984_v15 = vpop.f32.mrf.mxu3 }
  0xe8   : > { %v1381_v16 = vpack.c.bf16 %v1283_v10, %v1283_v10  ;;  %v920_v17 = vadd.f32 %v2081_v45, %v919_v12  ;;  %v1407_v18 = vpack.c.bf16 %v1309_v11, %v1309_v11  ;;  %v985_v19 = vadd.f32 %v2081_v45, %v984_v15 }
  0xe9   : > { %v1236_v20 = vadd.f32 %v2099_v56, %v1134_v13  ;;  %v1260_v21 = vadd.f32 %v2099_v56, %v1158_v14 }
  0xea   : > { %1480 = vst.msk [vmem:[%s2114_s21 + $0xdc] sm:$0xf] %vm1424_vm3, %v1381_v16  ;;  %v1080_v22 = vmax.f32 %v920_v17, 0.0  ;;  %v1106_v23 = vmax.f32 %v985_v19, 0.0  ;;  %v801_v24 = vpop.f32.mrf.mxu0  ;;  %v861_v25 = vpop.f32.mrf.mxu1 }
  0xeb   : > { %1506 = vst.msk [vmem:[%s2114_s21 + $0x144] sm:$0xf] %vm1424_vm3, %v1407_v18  ;;  %v1334_v26 = vpack.c.bf16 %v1236_v20, %v1236_v20  ;;  %v1358_v27 = vpack.c.bf16 %v1260_v21, %v1260_v21  ;;  %v802_v28 = vadd.f32 %v2081_v45, %v801_v24  ;;  %v862_v29 = vadd.f32 %v2081_v45, %v861_v25 }
  0xec   : > { %v1182_v30 = vmul.f32 %v2092_v52, %v1080_v22  ;;  %v1208_v31 = vmul.f32 %v2092_v52, %v1106_v23 }
  0xed   : > { %1433 = vst.msk [vmem:[%s2114_s21 + $0x20] sm:$0xf] %vm1424_vm3, %v1334_v26  ;;  %v1033_v32 = vmax.f32 %v802_v28, 0.0  ;;  %v1057_v33 = vmax.f32 %v862_v29, 0.0 }
  0xee   : > { %v1284_v34 = vadd.f32 %v2099_v56, %v1182_v30  ;;  %1457 = vst.msk [vmem:[%s2114_s21 + $0x80] sm:$0xf] %vm1424_vm3, %v1358_v27  ;;  %v1310_v35 = vadd.f32 %v2099_v56, %v1208_v31 }
  0xef   : > { %v921_v36 = vpop.f32.mrf.mxu2  ;;  %v1135_v37 = vmul.f32 %v2092_v52, %v1033_v32  ;;  %v1159_v38 = vmul.f32 %v2092_v52, %v1057_v33  ;;  %v986_v39 = vpop.f32.mrf.mxu3 }
  0xf0   : > { %v1382_v40 = vpack.c.bf16 %v1284_v34, %v1284_v34  ;;  %v922_v41 = vadd.f32 %v2081_v45, %v921_v36  ;;  %v1408_v42 = vpack.c.bf16 %v1310_v35, %v1310_v35  ;;  %v987_v43 = vadd.f32 %v2081_v45, %v986_v39 }
  0xf1   : > { %v1237_v44 = vadd.f32 %v2099_v56, %v1135_v37  ;;  %v1261_v46 = vadd.f32 %v2099_v56, %v1159_v38 }
  0xf2   : > { %1481 = vst.msk [vmem:[%s2114_s21 + $0xe0] sm:$0xf] %vm1424_vm3, %v1382_v40  ;;  %v1081_v47 = vmax.f32 %v922_v41, 0.0  ;;  %v1107_v48 = vmax.f32 %v987_v43, 0.0  ;;  %v804_v49 = vpop.f32.mrf.mxu0  ;;  %v864_v50 = vpop.f32.mrf.mxu1 }
  0xf3   : > { %1507 = vst.msk [vmem:[%s2114_s21 + $0x148] sm:$0xf] %vm1424_vm3, %v1408_v42  ;;  %v1335_v51 = vpack.c.bf16 %v1237_v44, %v1237_v44  ;;  %v1359_v53 = vpack.c.bf16 %v1261_v46, %v1261_v46  ;;  %v805_v54 = vadd.f32 %v2081_v45, %v804_v49  ;;  %v865_v55 = vadd.f32 %v2081_v45, %v864_v50 }
  0xf4   : > { %v1183_v57 = vmul.f32 %v2092_v52, %v1081_v47  ;;  %v1209_v58 = vmul.f32 %v2092_v52, %v1107_v48 }
  0xf5   : > { %1434 = vst.msk [vmem:[%s2114_s21 + $0x24] sm:$0xf] %vm1424_vm3, %v1335_v51  ;;  %v1034_v59 = vmax.f32 %v805_v54, 0.0  ;;  %v1058_v60 = vmax.f32 %v865_v55, 0.0 }
  0xf6   : > { %v1285_v61 = vadd.f32 %v2099_v56, %v1183_v57  ;;  %1458 = vst.msk [vmem:[%s2114_s21 + $0x84] sm:$0xf] %vm1424_vm3, %v1359_v53  ;;  %v1311_v62 = vadd.f32 %v2099_v56, %v1209_v58 }
  0xf7   : > { %v924_v63 = vpop.f32.mrf.mxu2  ;;  %v1136_v0 = vmul.f32 %v2092_v52, %v1034_v59  ;;  %v1160_v1 = vmul.f32 %v2092_v52, %v1058_v60  ;;  %v989_v2 = vpop.f32.mrf.mxu3 }
  0xf8   : > { %v1383_v3 = vpack.c.bf16 %v1285_v61, %v1285_v61  ;;  %v925_v4 = vadd.f32 %v2081_v45, %v924_v63  ;;  %v1409_v5 = vpack.c.bf16 %v1311_v62, %v1311_v62  ;;  %v990_v6 = vadd.f32 %v2081_v45, %v989_v2 }
  0xf9   : > { %v1238_v7 = vadd.f32 %v2099_v56, %v1136_v0  ;;  %v1262_v8 = vadd.f32 %v2099_v56, %v1160_v1 }
  0xfa   : > { %1482 = vst.msk [vmem:[%s2114_s21 + $0xe4] sm:$0xf] %vm1424_vm3, %v1383_v3  ;;  %v1082_v9 = vmax.f32 %v925_v4, 0.0  ;;  %v1108_v10 = vmax.f32 %v990_v6, 0.0  ;;  %v806_v11 = vpop.f32.mrf.mxu0  ;;  %v866_v12 = vpop.f32.mrf.mxu1 }
  0xfb   : > { %1508 = vst.msk [vmem:[%s2114_s21 + $0x14c] sm:$0xf] %vm1424_vm3, %v1409_v5  ;;  %v1336_v13 = vpack.c.bf16 %v1238_v7, %v1238_v7  ;;  %v1360_v14 = vpack.c.bf16 %v1262_v8, %v1262_v8  ;;  %v807_v15 = vadd.f32 %v2081_v45, %v806_v11  ;;  %v867_v16 = vadd.f32 %v2081_v45, %v866_v12 }
  0xfc   : > { %v1184_v17 = vmul.f32 %v2092_v52, %v1082_v9  ;;  %v1210_v18 = vmul.f32 %v2092_v52, %v1108_v10 }
  0xfd   : > { %1435 = vst.msk [vmem:[%s2114_s21 + $0x28] sm:$0xf] %vm1424_vm3, %v1336_v13  ;;  %v1035_v19 = vmax.f32 %v807_v15, 0.0  ;;  %v1059_v20 = vmax.f32 %v867_v16, 0.0 }
  0xfe   : > { %v1286_v21 = vadd.f32 %v2099_v56, %v1184_v17  ;;  %1459 = vst.msk [vmem:[%s2114_s21 + $0x88] sm:$0xf] %vm1424_vm3, %v1360_v14  ;;  %v1312_v22 = vadd.f32 %v2099_v56, %v1210_v18 }
  0xff   : > { %v926_v23 = vpop.f32.mrf.mxu2  ;;  %v1137_v24 = vmul.f32 %v2092_v52, %v1035_v19  ;;  %v1161_v25 = vmul.f32 %v2092_v52, %v1059_v20  ;;  %v991_v26 = vpop.f32.mrf.mxu3 }
 0x100   : > { %v1384_v27 = vpack.c.bf16 %v1286_v21, %v1286_v21  ;;  %v927_v28 = vadd.f32 %v2081_v45, %v926_v23  ;;  %v1410_v29 = vpack.c.bf16 %v1312_v22, %v1312_v22  ;;  %v992_v30 = vadd.f32 %v2081_v45, %v991_v26 }
 0x101   : > { %v1239_v31 = vadd.f32 %v2099_v56, %v1137_v24  ;;  %v1263_v32 = vadd.f32 %v2099_v56, %v1161_v25 }
 0x102   : > { %1483 = vst.msk [vmem:[%s2114_s21 + $0xe8] sm:$0xf] %vm1424_vm3, %v1384_v27  ;;  %v1083_v33 = vmax.f32 %v927_v28, 0.0  ;;  %v1109_v34 = vmax.f32 %v992_v30, 0.0  ;;  %v809_v35 = vpop.f32.mrf.mxu0  ;;  %v869_v36 = vpop.f32.mrf.mxu1 }
 0x103   : > { %1509 = vst.msk [vmem:[%s2114_s21 + $0x150] sm:$0xf] %vm1424_vm3, %v1410_v29  ;;  %v1337_v37 = vpack.c.bf16 %v1239_v31, %v1239_v31  ;;  %v1361_v38 = vpack.c.bf16 %v1263_v32, %v1263_v32  ;;  %v810_v39 = vadd.f32 %v2081_v45, %v809_v35  ;;  %v870_v40 = vadd.f32 %v2081_v45, %v869_v36 }
 0x104   : > { %v1185_v41 = vmul.f32 %v2092_v52, %v1083_v33  ;;  %v1211_v42 = vmul.f32 %v2092_v52, %v1109_v34 }
 0x105   : > { %1436 = vst.msk [vmem:[%s2114_s21 + $0x2c] sm:$0xf] %vm1424_vm3, %v1337_v37  ;;  %v1036_v43 = vmax.f32 %v810_v39, 0.0  ;;  %v1060_v44 = vmax.f32 %v870_v40, 0.0 }
 0x106   : > { %v1287_v46 = vadd.f32 %v2099_v56, %v1185_v41  ;;  %1460 = vst.msk [vmem:[%s2114_s21 + $0x8c] sm:$0xf] %vm1424_vm3, %v1361_v38  ;;  %v1313_v47 = vadd.f32 %v2099_v56, %v1211_v42 }
 0x107   : > { %v929_v48 = vpop.f32.mrf.mxu2  ;;  %v1138_v49 = vmul.f32 %v2092_v52, %v1036_v43  ;;  %v1162_v50 = vmul.f32 %v2092_v52, %v1060_v44  ;;  %v994_v51 = vpop.f32.mrf.mxu3 }
 0x108   : > { %v1385_v53 = vpack.c.bf16 %v1287_v46, %v1287_v46  ;;  %v930_v54 = vadd.f32 %v2081_v45, %v929_v48  ;;  %v1411_v55 = vpack.c.bf16 %v1313_v47, %v1313_v47  ;;  %v995_v57 = vadd.f32 %v2081_v45, %v994_v51 }
 0x109   : > { %v1240_v58 = vadd.f32 %v2099_v56, %v1138_v49  ;;  %v1264_v59 = vadd.f32 %v2099_v56, %v1162_v50 }
 0x10a   : > { %1484 = vst.msk [vmem:[%s2114_s21 + $0xec] sm:$0xf] %vm1424_vm3, %v1385_v53  ;;  %v1084_v60 = vmax.f32 %v930_v54, 0.0  ;;  %v1110_v61 = vmax.f32 %v995_v57, 0.0  ;;  %v811_v62 = vpop.f32.mrf.mxu0  ;;  %v871_v63 = vpop.f32.mrf.mxu1 }
 0x10b   : > { %1510 = vst.msk [vmem:[%s2114_s21 + $0x154] sm:$0xf] %vm1424_vm3, %v1411_v55  ;;  %v1338_v0 = vpack.c.bf16 %v1240_v58, %v1240_v58  ;;  %v1362_v1 = vpack.c.bf16 %v1264_v59, %v1264_v59  ;;  %v812_v2 = vadd.f32 %v2081_v45, %v811_v62  ;;  %v872_v3 = vadd.f32 %v2081_v45, %v871_v63 }
 0x10c   : > { %v1186_v4 = vmul.f32 %v2092_v52, %v1084_v60  ;;  %v1212_v5 = vmul.f32 %v2092_v52, %v1110_v61 }
 0x10d   : > { %1437 = vst.msk [vmem:[%s2114_s21 + $0x30] sm:$0xf] %vm1424_vm3, %v1338_v0  ;;  %v1037_v6 = vmax.f32 %v812_v2, 0.0  ;;  %v1061_v7 = vmax.f32 %v872_v3, 0.0 }
 0x10e   : > { %v1288_v8 = vadd.f32 %v2099_v56, %v1186_v4  ;;  %1461 = vst.msk [vmem:[%s2114_s21 + $0x90] sm:$0xf] %vm1424_vm3, %v1362_v1  ;;  %v1314_v9 = vadd.f32 %v2099_v56, %v1212_v5 }
 0x10f   : > { %v931_v10 = vpop.f32.mrf.mxu2  ;;  %v1139_v11 = vmul.f32 %v2092_v52, %v1037_v6  ;;  %v1163_v12 = vmul.f32 %v2092_v52, %v1061_v7  ;;  %v996_v13 = vpop.f32.mrf.mxu3 }
 0x110   : > { %v1386_v14 = vpack.c.bf16 %v1288_v8, %v1288_v8  ;;  %v932_v15 = vadd.f32 %v2081_v45, %v931_v10  ;;  %v1412_v16 = vpack.c.bf16 %v1314_v9, %v1314_v9  ;;  %v997_v17 = vadd.f32 %v2081_v45, %v996_v13 }
 0x111   : > { %v1241_v18 = vadd.f32 %v2099_v56, %v1139_v11  ;;  %v1265_v19 = vadd.f32 %v2099_v56, %v1163_v12 }
 0x112   : > { %1485 = vst.msk [vmem:[%s2114_s21 + $0xf0] sm:$0xf] %vm1424_vm3, %v1386_v14  ;;  %v1085_v20 = vmax.f32 %v932_v15, 0.0  ;;  %v1111_v21 = vmax.f32 %v997_v17, 0.0  ;;  %v814_v22 = vpop.f32.mrf.mxu0  ;;  %v874_v23 = vpop.f32.mrf.mxu1 }
 0x113   : > { %1511 = vst.msk [vmem:[%s2114_s21 + $0x158] sm:$0xf] %vm1424_vm3, %v1412_v16  ;;  %v1339_v24 = vpack.c.bf16 %v1241_v18, %v1241_v18  ;;  %v1363_v25 = vpack.c.bf16 %v1265_v19, %v1265_v19  ;;  %v815_v26 = vadd.f32 %v2081_v45, %v814_v22  ;;  %v875_v27 = vadd.f32 %v2081_v45, %v874_v23 }
 0x114   : > { %v1187_v28 = vmul.f32 %v2092_v52, %v1085_v20  ;;  %v1213_v29 = vmul.f32 %v2092_v52, %v1111_v21 }
 0x115   : > { %1438 = vst.msk [vmem:[%s2114_s21 + $0x34] sm:$0xf] %vm1424_vm3, %v1339_v24  ;;  %v1038_v30 = vmax.f32 %v815_v26, 0.0  ;;  %v1062_v31 = vmax.f32 %v875_v27, 0.0 }
 0x116   : > { %v1289_v32 = vadd.f32 %v2099_v56, %v1187_v28  ;;  %1462 = vst.msk [vmem:[%s2114_s21 + $0x94] sm:$0xf] %vm1424_vm3, %v1363_v25  ;;  %v1315_v33 = vadd.f32 %v2099_v56, %v1213_v29 }
 0x117   : > { %v934_v34 = vpop.f32.mrf.mxu2  ;;  %v1140_v35 = vmul.f32 %v2092_v52, %v1038_v30  ;;  %v1164_v36 = vmul.f32 %v2092_v52, %v1062_v31  ;;  %v999_v37 = vpop.f32.mrf.mxu3 }
 0x118   : > { %v1387_v38 = vpack.c.bf16 %v1289_v32, %v1289_v32  ;;  %v935_v39 = vadd.f32 %v2081_v45, %v934_v34  ;;  %v1413_v40 = vpack.c.bf16 %v1315_v33, %v1315_v33  ;;  %v1000_v41 = vadd.f32 %v2081_v45, %v999_v37 }
 0x119   : > { %v1242_v42 = vadd.f32 %v2099_v56, %v1140_v35  ;;  %v1266_v43 = vadd.f32 %v2099_v56, %v1164_v36 }
 0x11a   : > { %1486 = vst.msk [vmem:[%s2114_s21 + $0xf4] sm:$0xf] %vm1424_vm3, %v1387_v38  ;;  %v1086_v44 = vmax.f32 %v935_v39, 0.0  ;;  %v1112_v46 = vmax.f32 %v1000_v41, 0.0  ;;  %v816_v47 = vpop.f32.mrf.mxu0  ;;  %v876_v48 = vpop.f32.mrf.mxu1 }
 0x11b   : > { %1512 = vst.msk [vmem:[%s2114_s21 + $0x15c] sm:$0xf] %vm1424_vm3, %v1413_v40  ;;  %v1340_v49 = vpack.c.bf16 %v1242_v42, %v1242_v42  ;;  %v1364_v50 = vpack.c.bf16 %v1266_v43, %v1266_v43  ;;  %v817_v51 = vadd.f32 %v2081_v45, %v816_v47  ;;  %v877_v53 = vadd.f32 %v2081_v45, %v876_v48 }
 0x11c   : > { %v1188_v54 = vmul.f32 %v2092_v52, %v1086_v44  ;;  %v1214_v55 = vmul.f32 %v2092_v52, %v1112_v46 }
 0x11d   : > { %1439 = vst.msk [vmem:[%s2114_s21 + $0x38] sm:$0xf] %vm1424_vm3, %v1340_v49  ;;  %v1039_v57 = vmax.f32 %v817_v51, 0.0  ;;  %v1063_v58 = vmax.f32 %v877_v53, 0.0 }
 0x11e   : > { %v1290_v59 = vadd.f32 %v2099_v56, %v1188_v54  ;;  %1463 = vst.msk [vmem:[%s2114_s21 + $0x98] sm:$0xf] %vm1424_vm3, %v1364_v50  ;;  %v1316_v60 = vadd.f32 %v2099_v56, %v1214_v55  ;;  %v2475_v50 = vld [vmem:[%s2642_s2] ss:$0 sm:$0xff] }
 0x11f   : > { %v936_v61 = vpop.f32.mrf.mxu2  ;;  %v1141_v62 = vmul.f32 %v2092_v52, %v1039_v57  ;;  %v1165_v63 = vmul.f32 %v2092_v52, %v1063_v58  ;;  %v1001_v0 = vpop.f32.mrf.mxu3 }
 0x120   : > { %v1388_v1 = vpack.c.bf16 %v1290_v59, %v1290_v59  ;;  %v937_v2 = vadd.f32 %v2081_v45, %v936_v61  ;;  %v1414_v3 = vpack.c.bf16 %v1316_v60, %v1316_v60  ;;  %v1002_v4 = vadd.f32 %v2081_v45, %v1001_v0 }
 0x121   : > { %v1243_v5 = vadd.f32 %v2099_v56, %v1141_v62  ;;  %v1267_v6 = vadd.f32 %v2099_v56, %v1165_v63 }
 0x122   : > { %1487 = vst.msk [vmem:[%s2114_s21 + $0xf8] sm:$0xf] %vm1424_vm3, %v1388_v1  ;;  %v1087_v7 = vmax.f32 %v937_v2, 0.0  ;;  %v1113_v8 = vmax.f32 %v1002_v4, 0.0  ;;  %v819_v9 = vpop.f32.mrf.mxu0  ;;  %v879_v10 = vpop.f32.mrf.mxu1  ;;  %v2490_v1 = vld [vmem:[%s2643_s3] ss:$0 sm:$0xff] }
 0x123   : > { %1513 = vst.msk [vmem:[%s2114_s21 + $0x160] sm:$0xf] %vm1424_vm3, %v1414_v3  ;;  %v1341_v11 = vpack.c.bf16 %v1243_v5, %v1243_v5  ;;  %v1365_v12 = vpack.c.bf16 %v1267_v6, %v1267_v6  ;;  %v820_v13 = vadd.f32 %v2081_v45, %v819_v9  ;;  %v880_v14 = vadd.f32 %v2081_v45, %v879_v10  ;;  %v2499_v5 = vld [vmem:[%s2644_s4] ss:$0 sm:$0xff] }
 0x124   : > { %v1189_v15 = vmul.f32 %v2092_v52, %v1087_v7  ;;  %v1215_v16 = vmul.f32 %v2092_v52, %v1113_v8 }
 0x125   : > { %1440 = vst.msk [vmem:[%s2114_s21 + $0x3c] sm:$0xf] %vm1424_vm3, %v1341_v11  ;;  %v1040_v17 = vmax.f32 %v820_v13, 0.0  ;;  %v1064_v18 = vmax.f32 %v880_v14, 0.0 }
 0x126   : > { %v1291_v19 = vadd.f32 %v2099_v56, %v1189_v15  ;;  %1464 = vst.msk [vmem:[%s2114_s21 + $0x9c] sm:$0xf] %vm1424_vm3, %v1365_v12  ;;  %v1317_v20 = vadd.f32 %v2099_v56, %v1215_v16 }
 0x127   : > { %v939_v21 = vpop.f32.mrf.mxu2  ;;  %v1142_v22 = vmul.f32 %v2092_v52, %v1040_v17  ;;  %v1166_v23 = vmul.f32 %v2092_v52, %v1064_v18  ;;  %v1004_v24 = vpop.f32.mrf.mxu3 }
 0x128   : > { %v1389_v25 = vpack.c.bf16 %v1291_v19, %v1291_v19  ;;  %v940_v26 = vadd.f32 %v2081_v45, %v939_v21  ;;  %v1415_v27 = vpack.c.bf16 %v1317_v20, %v1317_v20  ;;  %v1005_v28 = vadd.f32 %v2081_v45, %v1004_v24 }
 0x129   : > { %v1244_v29 = vadd.f32 %v2099_v56, %v1142_v22  ;;  %v1268_v30 = vadd.f32 %v2099_v56, %v1166_v23 }
 0x12a   : > { %1488 = vst.msk [vmem:[%s2114_s21 + $0xfc] sm:$0xf] %vm1424_vm3, %v1389_v25  ;;  %v1088_v31 = vmax.f32 %v940_v26, 0.0  ;;  %v1114_v32 = vmax.f32 %v1005_v28, 0.0  ;;  %v821_v33 = vpop.f32.mrf.mxu0  ;;  %v881_v34 = vpop.f32.mrf.mxu1 }
 0x12b   : > { %1514 = vst.msk [vmem:[%s2114_s21 + $0x164] sm:$0xf] %vm1424_vm3, %v1415_v27  ;;  %v1342_v35 = vpack.c.bf16 %v1244_v29, %v1244_v29  ;;  %v1366_v36 = vpack.c.bf16 %v1268_v30, %v1268_v30  ;;  %v822_v37 = vadd.f32 %v2081_v45, %v821_v33  ;;  %v882_v38 = vadd.f32 %v2081_v45, %v881_v34 }
 0x12c   : > { %v1190_v39 = vmul.f32 %v2092_v52, %v1088_v31  ;;  %v1216_v40 = vmul.f32 %v2092_v52, %v1114_v32 }
 0x12d   : > { %1441 = vst.msk [vmem:[%s2114_s21 + $0x40] sm:$0xf] %vm1424_vm3, %v1342_v35  ;;  %v1041_v41 = vmax.f32 %v822_v37, 0.0  ;;  %v1065_v42 = vmax.f32 %v882_v38, 0.0 }
 0x12e   : > { %v1292_v43 = vadd.f32 %v2099_v56, %v1190_v39  ;;  %1465 = vst.msk [vmem:[%s2114_s21 + $0xa0] sm:$0xf] %vm1424_vm3, %v1366_v36  ;;  %v1318_v44 = vadd.f32 %v2099_v56, %v1216_v40 }
 0x12f   : > { %v941_v46 = vpop.f32.mrf.mxu2  ;;  %v1143_v47 = vmul.f32 %v2092_v52, %v1041_v41  ;;  %v1167_v45 = vmul.f32 %v2092_v52, %v1065_v42  ;;  %v1006_v48 = vpop.f32.mrf.mxu3 }
 0x130   : > { %v1390_v49 = vpack.c.bf16 %v1292_v43, %v1292_v43  ;;  %v942_v51 = vadd.f32 %v2475_v50, %v941_v46  ;;  %v1416_v53 = vpack.c.bf16 %v1318_v44, %v1318_v44  ;;  %v1007_v54 = vadd.f32 %v2475_v50, %v1006_v48 }
 0x131   : > { %v1245_v55 = vadd.f32 %v2099_v56, %v1143_v47  ;;  %v1269_v57 = vadd.f32 %v2099_v56, %v1167_v45 }
 0x132   : > { %1489 = vst.msk [vmem:[%s2114_s21 + $0x100] sm:$0xf] %vm1424_vm3, %v1390_v49  ;;  %v1089_v52 = vmax.f32 %v942_v51, 0.0  ;;  %v1115_v58 = vmax.f32 %v1007_v54, 0.0  ;;  %v824_v59 = vpop.f32.mrf.mxu0  ;;  %v884_v60 = vpop.f32.mrf.mxu1 }
 0x133   : > { %1515 = vst.msk [vmem:[%s2114_s21 + $0x168] sm:$0xf] %vm1424_vm3, %v1416_v53  ;;  %v1343_v61 = vpack.c.bf16 %v1245_v55, %v1245_v55  ;;  %v1367_v62 = vpack.c.bf16 %v1269_v57, %v1269_v57  ;;  %v825_v63 = vadd.f32 %v2475_v50, %v824_v59  ;;  %v885_v0 = vadd.f32 %v2475_v50, %v884_v60 }
 0x134   : > { %v1191_v56 = vmul.f32 %v2490_v1, %v1089_v52  ;;  %v1217_v2 = vmul.f32 %v2490_v1, %v1115_v58 }
 0x135   : > { %1442 = vst.msk [vmem:[%s2114_s21 + $0x44] sm:$0xf] %vm1424_vm3, %v1343_v61  ;;  %v1042_v3 = vmax.f32 %v825_v63, 0.0  ;;  %v1066_v4 = vmax.f32 %v885_v0, 0.0 }
 0x136   : > { %v1293_v6 = vadd.f32 %v2499_v5, %v1191_v56  ;;  %1466 = vst.msk [vmem:[%s2114_s21 + $0xa4] sm:$0xf] %vm1424_vm3, %v1367_v62  ;;  %v1319_v7 = vadd.f32 %v2499_v5, %v1217_v2 }
 0x137   : > { %v944_v8 = vpop.f32.mrf.mxu2  ;;  %v1144_v9 = vmul.f32 %v2490_v1, %v1042_v3  ;;  %v1168_v10 = vmul.f32 %v2490_v1, %v1066_v4  ;;  %v1009_v11 = vpop.f32.mrf.mxu3 }
 0x138   : > { %v1391_v12 = vpack.c.bf16 %v1293_v6, %v1293_v6  ;;  %v945_v13 = vadd.f32 %v2475_v50, %v944_v8  ;;  %v1417_v14 = vpack.c.bf16 %v1319_v7, %v1319_v7  ;;  %v1010_v15 = vadd.f32 %v2475_v50, %v1009_v11 }
 0x139   : > { %v1246_v16 = vadd.f32 %v2499_v5, %v1144_v9  ;;  %v1270_v17 = vadd.f32 %v2499_v5, %v1168_v10 }
 0x13a   : > { %1490 = vst.msk [vmem:[%s2114_s21 + $0x104] sm:$0xf] %vm1424_vm3, %v1391_v12  ;;  %v1090_v18 = vmax.f32 %v945_v13, 0.0  ;;  %v1116_v19 = vmax.f32 %v1010_v15, 0.0  ;;  %v826_v20 = vpop.f32.mrf.mxu0  ;;  %v886_v21 = vpop.f32.mrf.mxu1 }
 0x13b   : > { %1516 = vst.msk [vmem:[%s2114_s21 + $0x16c] sm:$0xf] %vm1424_vm3, %v1417_v14  ;;  %v1344_v22 = vpack.c.bf16 %v1246_v16, %v1246_v16  ;;  %v1368_v23 = vpack.c.bf16 %v1270_v17, %v1270_v17  ;;  %v827_v24 = vadd.f32 %v2475_v50, %v826_v20  ;;  %v887_v25 = vadd.f32 %v2475_v50, %v886_v21 }
 0x13c   : > { %v1192_v26 = vmul.f32 %v2490_v1, %v1090_v18  ;;  %v1218_v27 = vmul.f32 %v2490_v1, %v1116_v19 }
 0x13d   : > { %1443 = vst.msk [vmem:[%s2114_s21 + $0x48] sm:$0xf] %vm1424_vm3, %v1344_v22  ;;  %v1043_v28 = vmax.f32 %v827_v24, 0.0  ;;  %v1067_v29 = vmax.f32 %v887_v25, 0.0 }
 0x13e   : > { %v1294_v30 = vadd.f32 %v2499_v5, %v1192_v26  ;;  %1467 = vst.msk [vmem:[%s2114_s21 + $0xa8] sm:$0xf] %vm1424_vm3, %v1368_v23  ;;  %v1320_v31 = vadd.f32 %v2499_v5, %v1218_v27 }
 0x13f   : > { %v946_v32 = vpop.f32.mrf.mxu2  ;;  %v1145_v33 = vmul.f32 %v2490_v1, %v1043_v28  ;;  %v1169_v34 = vmul.f32 %v2490_v1, %v1067_v29  ;;  %v1011_v35 = vpop.f32.mrf.mxu3 }
 0x140   : > { %v1392_v36 = vpack.c.bf16 %v1294_v30, %v1294_v30  ;;  %v947_v37 = vadd.f32 %v2475_v50, %v946_v32  ;;  %v1418_v38 = vpack.c.bf16 %v1320_v31, %v1320_v31  ;;  %v1012_v39 = vadd.f32 %v2475_v50, %v1011_v35 }
 0x141   : > { %v1247_v40 = vadd.f32 %v2499_v5, %v1145_v33  ;;  %v1271_v41 = vadd.f32 %v2499_v5, %v1169_v34 }
 0x142   : > { %1491 = vst.msk [vmem:[%s2114_s21 + $0x108] sm:$0xf] %vm1424_vm3, %v1392_v36  ;;  %v1091_v42 = vmax.f32 %v947_v37, 0.0  ;;  %v1117_v43 = vmax.f32 %v1012_v39, 0.0  ;;  %v829_v44 = vpop.f32.mrf.mxu0  ;;  %v889_v46 = vpop.f32.mrf.mxu1 }
 0x143   : > { %1517 = vst.msk [vmem:[%s2114_s21 + $0x170] sm:$0xf] %vm1424_vm3, %v1418_v38  ;;  %v1345_v47 = vpack.c.bf16 %v1247_v40, %v1247_v40  ;;  %v1369_v45 = vpack.c.bf16 %v1271_v41, %v1271_v41  ;;  %v830_v48 = vadd.f32 %v2475_v50, %v829_v44  ;;  %v890_v49 = vadd.f32 %v2475_v50, %v889_v46 }
 0x144   : > { %v1193_v51 = vmul.f32 %v2490_v1, %v1091_v42  ;;  %v1219_v53 = vmul.f32 %v2490_v1, %v1117_v43 }
 0x145   : > { %1444 = vst.msk [vmem:[%s2114_s21 + $0x4c] sm:$0xf] %vm1424_vm3, %v1345_v47  ;;  %v1044_v54 = vmax.f32 %v830_v48, 0.0  ;;  %v1068_v55 = vmax.f32 %v890_v49, 0.0 }
 0x146   : > { %v1295_v57 = vadd.f32 %v2499_v5, %v1193_v51  ;;  %1468 = vst.msk [vmem:[%s2114_s21 + $0xac] sm:$0xf] %vm1424_vm3, %v1369_v45  ;;  %v1321_v52 = vadd.f32 %v2499_v5, %v1219_v53 }
 0x147   : > { %v949_v58 = vpop.f32.mrf.mxu2  ;;  %v1146_v59 = vmul.f32 %v2490_v1, %v1044_v54  ;;  %v1170_v60 = vmul.f32 %v2490_v1, %v1068_v55  ;;  %v1014_v61 = vpop.f32.mrf.mxu3 }
 0x148   : > { %v1393_v62 = vpack.c.bf16 %v1295_v57, %v1295_v57  ;;  %v950_v63 = vadd.f32 %v2475_v50, %v949_v58  ;;  %v1419_v0 = vpack.c.bf16 %v1321_v52, %v1321_v52  ;;  %v1015_v56 = vadd.f32 %v2475_v50, %v1014_v61 }
 0x149   : > { %v1248_v2 = vadd.f32 %v2499_v5, %v1146_v59  ;;  %v1272_v3 = vadd.f32 %v2499_v5, %v1170_v60 }
 0x14a   : > { %1492 = vst.msk [vmem:[%s2114_s21 + $0x10c] sm:$0xf] %vm1424_vm3, %v1393_v62  ;;  %v1092_v4 = vmax.f32 %v950_v63, 0.0  ;;  %v1118_v6 = vmax.f32 %v1015_v56, 0.0  ;;  %v831_v7 = vpop.f32.mrf.mxu0  ;;  %v891_v8 = vpop.f32.mrf.mxu1 }
 0x14b   : > { %1518 = vst.msk [vmem:[%s2114_s21 + $0x174] sm:$0xf] %vm1424_vm3, %v1419_v0  ;;  %v1346_v9 = vpack.c.bf16 %v1248_v2, %v1248_v2  ;;  %v1370_v10 = vpack.c.bf16 %v1272_v3, %v1272_v3  ;;  %v832_v11 = vadd.f32 %v2475_v50, %v831_v7  ;;  %v892_v12 = vadd.f32 %v2475_v50, %v891_v8 }
 0x14c   : > { %v1194_v13 = vmul.f32 %v2490_v1, %v1092_v4  ;;  %v1220_v14 = vmul.f32 %v2490_v1, %v1118_v6 }
 0x14d   : > { %1445 = vst.msk [vmem:[%s2114_s21 + $0x50] sm:$0xf] %vm1424_vm3, %v1346_v9  ;;  %v1045_v15 = vmax.f32 %v832_v11, 0.0  ;;  %v1069_v16 = vmax.f32 %v892_v12, 0.0 }
 0x14e   : > { %v1296_v17 = vadd.f32 %v2499_v5, %v1194_v13  ;;  %1469 = vst.msk [vmem:[%s2114_s21 + $0xb0] sm:$0xf] %vm1424_vm3, %v1370_v10  ;;  %v1322_v18 = vadd.f32 %v2499_v5, %v1220_v14 }
 0x14f   : > { %v951_v19 = vpop.f32.mrf.mxu2  ;;  %v1147_v20 = vmul.f32 %v2490_v1, %v1045_v15  ;;  %v1171_v21 = vmul.f32 %v2490_v1, %v1069_v16  ;;  %v1016_v22 = vpop.f32.mrf.mxu3 }
 0x150   : > { %v1394_v23 = vpack.c.bf16 %v1296_v17, %v1296_v17  ;;  %v952_v24 = vadd.f32 %v2475_v50, %v951_v19  ;;  %v1420_v25 = vpack.c.bf16 %v1322_v18, %v1322_v18  ;;  %v1017_v26 = vadd.f32 %v2475_v50, %v1016_v22 }
 0x151   : > { %v1249_v27 = vadd.f32 %v2499_v5, %v1147_v20  ;;  %v1273_v28 = vadd.f32 %v2499_v5, %v1171_v21 }
 0x152   : > { %1493 = vst.msk [vmem:[%s2114_s21 + $0x110] sm:$0xf] %vm1424_vm3, %v1394_v23  ;;  %v1093_v29 = vmax.f32 %v952_v24, 0.0  ;;  %v1119_v30 = vmax.f32 %v1017_v26, 0.0  ;;  %v834_v31 = vpop.f32.mrf.mxu0  ;;  %v894_v32 = vpop.f32.mrf.mxu1 }
 0x153   : > { %1519 = vst.msk [vmem:[%s2114_s21 + $0x178] sm:$0xf] %vm1424_vm3, %v1420_v25  ;;  %v1347_v33 = vpack.c.bf16 %v1249_v27, %v1249_v27  ;;  %v1371_v34 = vpack.c.bf16 %v1273_v28, %v1273_v28  ;;  %v835_v35 = vadd.f32 %v2475_v50, %v834_v31  ;;  %v895_v36 = vadd.f32 %v2475_v50, %v894_v32 }
 0x154   : > { %v1195_v37 = vmul.f32 %v2490_v1, %v1093_v29  ;;  %v1221_v38 = vmul.f32 %v2490_v1, %v1119_v30 }
 0x155   : > { %1446 = vst.msk [vmem:[%s2114_s21 + $0x54] sm:$0xf] %vm1424_vm3, %v1347_v33  ;;  %v1046_v39 = vmax.f32 %v835_v35, 0.0  ;;  %v1070_v40 = vmax.f32 %v895_v36, 0.0 }
 0x156   : > { %v1297_v41 = vadd.f32 %v2499_v5, %v1195_v37  ;;  %1470 = vst.msk [vmem:[%s2114_s21 + $0xb4] sm:$0xf] %vm1424_vm3, %v1371_v34  ;;  %v1323_v42 = vadd.f32 %v2499_v5, %v1221_v38 }
 0x157   : > { %v954_v43 = vpop.f32.mrf.mxu2  ;;  %v1148_v44 = vmul.f32 %v2490_v1, %v1046_v39  ;;  %v1172_v46 = vmul.f32 %v2490_v1, %v1070_v40  ;;  %v1019_v47 = vpop.f32.mrf.mxu3 }
 0x158   : > { %v1395_v45 = vpack.c.bf16 %v1297_v41, %v1297_v41  ;;  %v955_v48 = vadd.f32 %v2475_v50, %v954_v43  ;;  %v1421_v49 = vpack.c.bf16 %v1323_v42, %v1323_v42  ;;  %v1020_v51 = vadd.f32 %v2475_v50, %v1019_v47 }
 0x159   : > { %v1250_v53 = vadd.f32 %v2499_v5, %v1148_v44  ;;  %v1274_v54 = vadd.f32 %v2499_v5, %v1172_v46 }
 0x15a   : > { %1494 = vst.msk [vmem:[%s2114_s21 + $0x114] sm:$0xf] %vm1424_vm3, %v1395_v45  ;;  %v1094_v55 = vmax.f32 %v955_v48, 0.0  ;;  %v1120_v57 = vmax.f32 %v1020_v51, 0.0  ;;  %v836_v52 = vpop.f32.mrf.mxu0  ;;  %v896_v58 = vpop.f32.mrf.mxu1 }
 0x15b   : > { %1520 = vst.msk [vmem:[%s2114_s21 + $0x17c] sm:$0xf] %vm1424_vm3, %v1421_v49  ;;  %v1348_v59 = vpack.c.bf16 %v1250_v53, %v1250_v53  ;;  %v1372_v60 = vpack.c.bf16 %v1274_v54, %v1274_v54  ;;  %v837_v61 = vadd.f32 %v2475_v50, %v836_v52  ;;  %v897_v62 = vadd.f32 %v2475_v50, %v896_v58 }
 0x15c   : > { %v1196_v63 = vmul.f32 %v2490_v1, %v1094_v55  ;;  %v1222_v0 = vmul.f32 %v2490_v1, %v1120_v57 }
 0x15d   : > { %1447 = vst.msk [vmem:[%s2114_s21 + $0x58] sm:$0xf] %vm1424_vm3, %v1348_v59  ;;  %v1047_v56 = vmax.f32 %v837_v61, 0.0  ;;  %v1071_v2 = vmax.f32 %v897_v62, 0.0 }
 0x15e   : > { %v1298_v3 = vadd.f32 %v2499_v5, %v1196_v63  ;;  %1471 = vst.msk [vmem:[%s2114_s21 + $0xb8] sm:$0xf] %vm1424_vm3, %v1372_v60  ;;  %v1324_v4 = vadd.f32 %v2499_v5, %v1222_v0 }
 0x15f   : > { %v956_v6 = vpop.f32.mrf.mxu2  ;;  %v1149_v7 = vmul.f32 %v2490_v1, %v1047_v56  ;;  %v1173_v8 = vmul.f32 %v2490_v1, %v1071_v2  ;;  %v1021_v9 = vpop.f32.mrf.mxu3 }
 0x160   : > { %v1396_v10 = vpack.c.bf16 %v1298_v3, %v1298_v3  ;;  %v957_v11 = vadd.f32 %v2475_v50, %v956_v6  ;;  %v1422_v12 = vpack.c.bf16 %v1324_v4, %v1324_v4  ;;  %v1022_v13 = vadd.f32 %v2475_v50, %v1021_v9 }
 0x161   : > { %v1251_v14 = vadd.f32 %v2499_v5, %v1149_v7  ;;  %v1275_v15 = vadd.f32 %v2499_v5, %v1173_v8 }
 0x162   : > { %1495 = vst.msk [vmem:[%s2114_s21 + $0x118] sm:$0xf] %vm1424_vm3, %v1396_v10  ;;  %v1095_v16 = vmax.f32 %v957_v11, 0.0  ;;  %v1121_v17 = vmax.f32 %v1022_v13, 0.0 }
 0x163   : > { %1521 = vst.msk [vmem:[%s2114_s21 + $0x180] sm:$0xf] %vm1424_vm3, %v1422_v12  ;;  %v1349_v18 = vpack.c.bf16 %v1251_v14, %v1251_v14  ;;  %v1373_v19 = vpack.c.bf16 %v1275_v15, %v1275_v15 }
 0x164   : > { %v1197_v20 = vmul.f32 %v2490_v1, %v1095_v16  ;;  %v1223_v21 = vmul.f32 %v2490_v1, %v1121_v17 }
 0x165   : > { %1448 = vst.msk [vmem:[%s2114_s21 + $0x5c] sm:$0xf] %vm1424_vm3, %v1349_v18 }
 0x166   : > { %v1299_v22 = vadd.f32 %v2499_v5, %v1197_v20  ;;  %1472 = vst.msk [vmem:[%s2114_s21 + $0xbc] sm:$0xf] %vm1424_vm3, %v1373_v19  ;;  %v1325_v23 = vadd.f32 %v2499_v5, %v1223_v21 }
 0x167   : > { %v959_v24 = vpop.f32.mrf.mxu2 }
 0x168   : > { %v1397_v25 = vpack.c.bf16 %v1299_v22, %v1299_v22  ;;  %v960_v26 = vadd.f32 %v2475_v50, %v959_v24  ;;  %v1423_v27 = vpack.c.bf16 %v1325_v23, %v1325_v23 }
 0x16a   : > { %1496 = vst.msk [vmem:[%s2114_s21 + $0x11c] sm:$0xf] %vm1424_vm3, %v1397_v25  ;;  %v1096_v28 = vmax.f32 %v960_v26, 0.0 }
 0x16b   : > { %1522 = vst.msk [vmem:[%s2114_s21 + $0x184] sm:$0xf] %vm1424_vm3, %v1423_v27 }
 0x16c   : > { %v1198_v29 = vmul.f32 %v2490_v1, %v1096_v28 }
 0x16e   : > { %v1300_v30 = vadd.f32 %v2499_v5, %v1198_v29 }
 0x16f   : > { %v961_v31 = vpop.f32.mrf.mxu2 }
 0x170   : > { %v1398_v32 = vpack.c.bf16 %v1300_v30, %v1300_v30  ;;  %v962_v33 = vadd.f32 %v2475_v50, %v961_v31 }
 0x172   : > { %1497 = vst.msk [vmem:[%s2114_s21 + $0x120] sm:$0xf] %vm1424_vm3, %v1398_v32  ;;  %v1097_v34 = vmax.f32 %v962_v33, 0.0 }
 0x174   : > { %v1199_v35 = vmul.f32 %v2490_v1, %v1097_v34 }
 0x176   : > { %v1301_v36 = vadd.f32 %v2499_v5, %v1199_v35 }
 0x178   : > { %v1399_v37 = vpack.c.bf16 %v1301_v36, %v1301_v36 }
 0x17a   : > { %1498 = vst.msk [vmem:[%s2114_s21 + $0x124] sm:$0xf] %vm1424_vm3, %v1399_v37 }
 0x17b PF: > { %s15_s18 = sadd.s32 1, %s1943_s18  }
 0x17c   : > { %p12_p4 = scmp.ge.s32.totalorder %s15_s18, 4  }
 0x17e   :  { %14 = sbr.rel (!%p12_p4) target bundleno = 1 (0x1), region = 70 }

// kernel: svhn_custom_cnn_forward.4
= control target key start
LH: loop header
LB: loop body
LE: loop exit
PB: predicated region body
PF: predicated region fallthrough
CT: control target
= control target key end

     0   :  { %vm1667_vm0 = vcmask 523264   ;;  %vm2612_vm1 = vcmask 519168   ;;  %vm2633_vm2 = vcmask 516096   ;;  %s5331_s1 = inlined_call_operand.vmem [shape: bf16[1600,64], index: 1, kind: input, shape index: {}]   ;;  %s5332_s2 = inlined_call_operand.vmem [shape: f32[1,64], index: 2, kind: input, shape index: {}]   ;;  %s5333_s0 = inlined_call_operand.vmem [shape: bf16[162,1600], index: 0, kind: input, shape index: {}]   ;;  %s5334_s3 = inlined_call_operand.vmem [shape: f32[1,64], index: 3, kind: input, shape index: {}]   ;;  %s5335_s4 = inlined_call_operand.vmem [shape: f32[1,64], index: 4, kind: input, shape index: {}]   ;;  %s5336_s5 = inlined_call_operand.vmem [shape: bf16[162,64], index: 5, kind: output, shape index: {}]  }
   0x1   :  { %v3707_v0 = vld [vmem:[%s5331_s1 + $0x38] sm:$0xff]  ;;  %v3706_v1 = vld [vmem:[%s5331_s1 + $0x30] sm:$0xff]  ;;  %v3705_v2 = vld [vmem:[%s5331_s1 + $0x28] sm:$0xff] }
   0x2   :  { %1701 = vmatpush.bf16.msra.mxu0 %v3707_v0  ;;  %3800 = vmatpush.bf16.msra.mxu1 %v3707_v0  ;;  %v3704_v3 = vld [vmem:[%s5331_s1 + $0x20] sm:$0xff]  ;;  %v3703_v4 = vld [vmem:[%s5331_s1 + $0x18] sm:$0xff]  ;;  %v3702_v5 = vld [vmem:[%s5331_s1 + $0x10] sm:$0xff] }
   0x3   :  { %3802 = vmatpush.bf16.msra.mxu3 %v3707_v0  ;;  %3801 = vmatpush.bf16.msra.mxu2 %v3707_v0  ;;  %v3701_v6 = vld [vmem:[%s5331_s1 + $0x8] sm:$0xff]  ;;  %v3700_v7 = vld [vmem:[%s5331_s1] sm:$0xff]  ;;  %v3576_v9 = vld [vmem:[%s5333_s0 + $0x30] sm:$0xf0] }
   0x4   :  { %v2641_v8 = vld [vmem:[%s5333_s0] sm:$0xf]  ;;  %v2797_v10 = vld [vmem:[%s5333_s0 + $0x138] sm:$0xf]  ;;  %v3615_v11 = vld [vmem:[%s5333_s0 + $0x168] sm:$0xf0] }
   0x5   :  { %v3057_v12 = vld [vmem:[%s5333_s0 + $0x340] sm:$0xf]  ;;  %v3680_v13 = vld [vmem:[%s5333_s0 + $0x370] sm:$0xf0]  ;;  %v3715_v14 = vld [vmem:[%s5331_s1 + $0x78] sm:$0xff]  ;;  %v2642_v18 = vor.u32 %v3576_v9, %v2641_v8  ;;  %v2798_v19 = vor.u32 %v3615_v11, %v2797_v10 }
   0x6   :  { %1702 = vmatpush.bf16.msra.mxu0 %v3706_v1  ;;  %3803 = vmatpush.bf16.msra.mxu1 %v3706_v1  ;;  %v3731_v15 = vld [vmem:[%s5331_s1 + $0xf8] sm:$0xff]  ;;  %v2953_v16 = vld [vmem:[%s5333_s0 + $0x270] sm:$0xf]  ;;  %v3654_v17 = vld [vmem:[%s5333_s0 + $0x2a0] sm:$0xf0]  ;;  %v3058_v20 = vor.u32 %v3680_v13, %v3057_v12 }
   0x7   :  { %3805 = vmatpush.bf16.msra.mxu3 %v3706_v1  ;;  %3804 = vmatpush.bf16.msra.mxu2 %v3706_v1  ;;  %v3723_v21 = vld [vmem:[%s5331_s1 + $0xb8] sm:$0xff]  ;;  %v2954_v22 = vor.u32 %v3654_v17, %v2953_v16  ;;  %v3714_v23 = vld [vmem:[%s5331_s1 + $0x70] sm:$0xff]  ;;  %v3713_v27 = vld [vmem:[%s5331_s1 + $0x68] sm:$0xff] }
   0x8   :  { %v3730_v24 = vld [vmem:[%s5331_s1 + $0xf0] sm:$0xff]  ;;  %v3739_v25 = vld [vmem:[%s5331_s1 + $0x138] sm:$0xff]  ;;  %v3729_v28 = vld [vmem:[%s5331_s1 + $0xe8] sm:$0xff] }
   0x9   :  { %v3722_v26 = vld [vmem:[%s5331_s1 + $0xb0] sm:$0xff]  ;;  %v3721_v30 = vld [vmem:[%s5331_s1 + $0xa8] sm:$0xff]  ;;  %v3712_v31 = vld [vmem:[%s5331_s1 + $0x60] sm:$0xff] }
   0xa   :  { %1703 = vmatpush.bf16.msra.mxu0 %v3705_v2  ;;  %3806 = vmatpush.bf16.msra.mxu1 %v3705_v2  ;;  %v3738_v29 = vld [vmem:[%s5331_s1 + $0x130] sm:$0xff]  ;;  %v3728_v32 = vld [vmem:[%s5331_s1 + $0xe0] sm:$0xff]  ;;  %v3737_v33 = vld [vmem:[%s5331_s1 + $0x128] sm:$0xff] }
   0xb   :  { %3808 = vmatpush.bf16.msra.mxu3 %v3705_v2  ;;  %3807 = vmatpush.bf16.msra.mxu2 %v3705_v2  ;;  %v2693_v34 = vld [vmem:[%s5333_s0 + $0x68] sm:$0xf]  ;;  %v3589_v35 = vld [vmem:[%s5333_s0 + $0x98] sm:$0xf0]  ;;  %v2849_v36 = vld [vmem:[%s5333_s0 + $0x1a0] sm:$0xf] }
   0xc   :  { %v3628_v37 = vld [vmem:[%s5333_s0 + $0x1d0] sm:$0xf0]  ;;  %v3109_v38 = vld [vmem:[%s5333_s0 + $0x3a8] sm:$0xf]  ;;  %v3720_v39 = vld [vmem:[%s5331_s1 + $0xa0] sm:$0xff]  ;;  %v2694_v46 = vor.u32 %v3589_v35, %v2693_v34 }
   0xd   :  { %v3693_v40 = vld [vmem:[%s5333_s0 + $0x3d8] sm:$0xf0]  ;;  %v3005_v41 = vld [vmem:[%s5333_s0 + $0x2d8] sm:$0xf]  ;;  %v3667_v43 = vld [vmem:[%s5333_s0 + $0x308] sm:$0xf0]  ;;  %v2850_v47 = vor.u32 %v3628_v37, %v2849_v36 }
   0xe   :  { %1704 = vmatpush.bf16.msra.mxu0 %v3704_v3  ;;  %3809 = vmatpush.bf16.msra.mxu1 %v3704_v3  ;;  %v3711_v42 = vld [vmem:[%s5331_s1 + $0x58] sm:$0xff]  ;;  %v3736_v45 = vld [vmem:[%s5331_s1 + $0x120] sm:$0xff]  ;;  %v3110_v48 = vor.u32 %v3693_v40, %v3109_v38  ;;  %v3006_v50 = vor.u32 %v3667_v43, %v3005_v41  ;;  %v3710_v51 = vld [vmem:[%s5331_s1 + $0x50] sm:$0xff] }
   0xf   :  { %3811 = vmatpush.bf16.msra.mxu3 %v3704_v3  ;;  %3810 = vmatpush.bf16.msra.mxu2 %v3704_v3  ;;  %v3727_v44 = vld [vmem:[%s5331_s1 + $0xd8] sm:$0xff]  ;;  %v3726_v52 = vld [vmem:[%s5331_s1 + $0xd0] sm:$0xff]  ;;  %v3709_v55 = vld [vmem:[%s5331_s1 + $0x48] sm:$0xff] }
  0x10   :  { %v3719_v49 = vld [vmem:[%s5331_s1 + $0x98] sm:$0xff]  ;;  %v3718_v54 = vld [vmem:[%s5331_s1 + $0x90] sm:$0xff]  ;;  %v3725_v56 = vld [vmem:[%s5331_s1 + $0xc8] sm:$0xff] }
  0x11   :  { %v3735_v53 = vld [vmem:[%s5331_s1 + $0x118] sm:$0xff]  ;;  %v3734_v57 = vld [vmem:[%s5331_s1 + $0x110] sm:$0xff]  ;;  %v3717_v58 = vld [vmem:[%s5331_s1 + $0x88] sm:$0xff] }
  0x12   :  { %1705 = vmatpush.bf16.msra.mxu0 %v3703_v4  ;;  %3812 = vmatpush.bf16.msra.mxu1 %v3703_v4  ;;  %v4013_v59 = vld [vmem:[%s5333_s0 + $0x410] sm:$0x11]  ;;  %v3708_v60 = vld [vmem:[%s5331_s1 + $0x40] sm:$0xff]  ;;  %v3733_v62 = vld [vmem:[%s5331_s1 + $0x108] sm:$0xff] }
  0x13   :  { %3814 = vmatpush.bf16.msra.mxu3 %v3703_v4  ;;  %3813 = vmatpush.bf16.msra.mxu2 %v3703_v4  ;;  %v2745_v61 = vld [vmem:[%s5333_s0 + $0xd0] sm:$0xf]  ;;  %v3724_v63 = vld [vmem:[%s5331_s1 + $0xc0] sm:$0xff]  ;;  %v3763_v1 = vld [vmem:[%s5331_s1 + $0x1f8] sm:$0xff] }
  0x14   :  { %v3602_v0 = vld [vmem:[%s5333_s0 + $0x100] sm:$0xf0]  ;;  %v3747_v2 = vld [vmem:[%s5331_s1 + $0x178] sm:$0xff]  ;;  %v2901_v3 = vld [vmem:[%s5333_s0 + $0x208] sm:$0xf] }
  0x15   :  { %v3641_v4 = vld [vmem:[%s5333_s0 + $0x238] sm:$0xf0]  ;;  %v2649_v8 = vld [vmem:[%s5333_s0 + $0x8] sm:$0xf]  ;;  %v3732_v10 = vld [vmem:[%s5331_s1 + $0x100] sm:$0xff]  ;;  %v2746_v11 = vor.u32 %v3602_v0, %v2745_v61 }
  0x16   :  { %1706 = vmatpush.bf16.msra.mxu0 %v3702_v5  ;;  %3815 = vmatpush.bf16.msra.mxu1 %v3702_v5  ;;  %v3577_v9 = vld [vmem:[%s5333_s0 + $0x38] sm:$0xf0]  ;;  %v2902_v12 = vor.u32 %v3641_v4, %v2901_v3  ;;  %v3754_v16 = vld [vmem:[%s5331_s1 + $0x1b0] sm:$0xff]  ;;  %v3745_v34 = vld [vmem:[%s5331_s1 + $0x168] sm:$0xff] }
  0x17   :  { %3817 = vmatpush.bf16.msra.mxu3 %v3702_v5  ;;  %3816 = vmatpush.bf16.msra.mxu2 %v3702_v5  ;;  %v779_v5 = vunpack.c.l.b16 %v4013_v59  ;;  %v3762_v17 = vld [vmem:[%s5331_s1 + $0x1f0] sm:$0xff]  ;;  %v3583_v35 = vld [vmem:[%s5333_s0 + $0x6c] sm:$0xf]  ;;  %v2695_v36 = vld [vmem:[%s5333_s0 + $0x9c] sm:$0xf0] }
  0x18   :  { %v2709_v37 = vld [vmem:[%s5333_s0 + $0x78] sm:$0xf]  ;;  %v3591_v38 = vld [vmem:[%s5333_s0 + $0xa8] sm:$0xf0]  ;;  %v2703_v40 = vld [vmem:[%s5333_s0 + $0xa4] sm:$0xf0]  ;;  %v2698_v43 = vor.u32 %v3583_v35, %v2695_v36 }
  0x19   :  { %v922_v13 = vpack.c.b16 %v779_v5, %v779_v5  ;;  %v2753_v41 = vld [vmem:[%s5333_s0 + $0xd8] sm:$0xf]  ;;  %v3752_v61 = vld [vmem:[%s5331_s1 + $0x1a0] sm:$0xff]  ;;  %v2813_v3 = vld [vmem:[%s5333_s0 + $0x148] sm:$0xf] }
  0x1a   :  { %1707 = vmatpush.bf16.msra.mxu0 %v3701_v6  ;;  %3818 = vmatpush.bf16.msra.mxu1 %v3701_v6  ;;  %v3768_v0 = vld [vmem:[%s5331_s1 + $0x220] sm:$0xff]  ;;  %v3617_v4 = vld [vmem:[%s5333_s0 + $0x178] sm:$0xf0]  ;;  %v2961_v35 = vld [vmem:[%s5333_s0 + $0x278] sm:$0xf] }
  0x1b   :  { %3820 = vmatpush.bf16.msra.mxu3 %v3701_v6  ;;  %3819 = vmatpush.bf16.msra.mxu2 %v3701_v6  ;;  %v3716_v6 = vld [vmem:[%s5331_s1 + $0x80] sm:$0xff]  ;;  %v3655_v36 = vld [vmem:[%s5333_s0 + $0x2a8] sm:$0xf0] }
  0x1c   :  { %v3610_v5 = vld [vmem:[%s5333_s0 + $0x144] sm:$0xf] }
  0x1e   :  { %1708 = vmatpush.bf16.msra.mxu0 %v3700_v7  ;;  %3821 = vmatpush.bf16.msra.mxu1 %v3700_v7 }
  0x1f   :  { %3823 = vmatpush.bf16.msra.mxu3 %v3700_v7  ;;  %3822 = vmatpush.bf16.msra.mxu2 %v3700_v7  ;;  %v3755_v7 = vld [vmem:[%s5331_s1 + $0x1b8] sm:$0xff] }
  0x21   :  { %1709 = vmatmul.bf16.vlgmr.msra.gmra.mxu0 %v2642_v18  ;;  %1724 = vmatmul.bf16.vlgmr.msra.gmra.mxu1 %v2798_v19  ;;  %v3746_v18 = vld [vmem:[%s5331_s1 + $0x170] sm:$0xff] }
  0x22   :  { %1764 = vmatpush.bf16.msrb.mxu1 %v3715_v14  ;;  %1749 = vmatmul.bf16.vlgmr.msra.gmra.mxu3 %v3058_v20  ;;  %v3771_v14 = vld [vmem:[%s5331_s1 + $0x238] sm:$0xff]  ;;  %v3770_v19 = vld [vmem:[%s5331_s1 + $0x230] sm:$0xff]  ;;  %v3570_v20 = vld [vmem:[%s5333_s0 + $0x4] sm:$0xf] }
  0x23   :  { %1890 = vmatpush.bf16.msrb.mxu3 %v3731_v15  ;;  %1827 = vmatpush.bf16.msrb.mxu2 %v3723_v21  ;;  %v2650_v15 = vor.u32 %v3577_v9, %v2649_v8  ;;  %v2643_v21 = vld [vmem:[%s5333_s0 + $0x34] sm:$0xf0]  ;;  %v3629_v8 = vld [vmem:[%s5333_s0 + $0x1d8] sm:$0xf0] }
  0x24   :  { %1739 = vmatmul.bf16.vlgmr.msra.gmra.mxu2 %v2954_v22  ;;  %1953 = vmatpush.bf16.msrb.mxu0 %v3739_v25  ;;  %v2657_v22 = vld [vmem:[%s5333_s0 + $0x10] sm:$0xf]  ;;  %v2651_v25 = vld [vmem:[%s5333_s0 + $0x3c] sm:$0xf0] }
  0x26   :  { %1765 = vmatpush.bf16.msrb.mxu1 %v3714_v23  ;;  %v3578_v23 = vld [vmem:[%s5333_s0 + $0x40] sm:$0xf0] }
  0x27   :  { %1891 = vmatpush.bf16.msrb.mxu3 %v3730_v24  ;;  %1828 = vmatpush.bf16.msrb.mxu2 %v3722_v26  ;;  %v3571_v24 = vld [vmem:[%s5333_s0 + $0xc] sm:$0xf]  ;;  %v2701_v26 = vld [vmem:[%s5333_s0 + $0x70] sm:$0xf] }
  0x28   :  { %1954 = vmatpush.bf16.msrb.mxu0 %v3738_v29  ;;  %v2658_v29 = vor.u32 %v3578_v23, %v2657_v22  ;;  %v2909_v22 = vld [vmem:[%s5333_s0 + $0x210] sm:$0xf]  ;;  %v3642_v23 = vld [vmem:[%s5333_s0 + $0x240] sm:$0xf0] }
  0x2a   :  { %1766 = vmatpush.bf16.msrb.mxu1 %v3713_v27  ;;  %v3590_v27 = vld [vmem:[%s5333_s0 + $0xa0] sm:$0xf0] }
  0x2b   :  { %1892 = vmatpush.bf16.msrb.mxu3 %v3729_v28  ;;  %1829 = vmatpush.bf16.msrb.mxu2 %v3721_v30  ;;  %v2646_v28 = vor.u32 %v3570_v20, %v2643_v21  ;;  %v2654_v30 = vor.u32 %v3571_v24, %v2651_v25  ;;  %v3623_v20 = vld [vmem:[%s5333_s0 + $0x1ac] sm:$0xf]  ;;  %v2859_v21 = vld [vmem:[%s5333_s0 + $0x1dc] sm:$0xf0] }
  0x2c   :  { %1955 = vmatpush.bf16.msrb.mxu0 %v3737_v33  ;;  %v3761_v33 = vld [vmem:[%s5331_s1 + $0x1e8] sm:$0xff] }
  0x2e   :  { %1767 = vmatpush.bf16.msrb.mxu1 %v3712_v31  ;;  %v2702_v31 = vor.u32 %v3590_v27, %v2701_v26  ;;  %v2862_v26 = vor.u32 %v3623_v20, %v2859_v21  ;;  %v2910_v27 = vor.u32 %v3642_v23, %v2909_v22  ;;  %v3661_v20 = vld [vmem:[%s5333_s0 + $0x2dc] sm:$0xf]  ;;  %v3007_v21 = vld [vmem:[%s5333_s0 + $0x30c] sm:$0xf0]  ;;  %v3021_v22 = vld [vmem:[%s5333_s0 + $0x2e8] sm:$0xf] }
  0x2f   :  { %1893 = vmatpush.bf16.msrb.mxu3 %v3728_v32  ;;  %1830 = vmatpush.bf16.msrb.mxu2 %v3720_v39  ;;  %v3753_v32 = vld [vmem:[%s5331_s1 + $0x1a8] sm:$0xff]  ;;  %v3584_v39 = vld [vmem:[%s5333_s0 + $0x74] sm:$0xf]  ;;  %v3669_v23 = vld [vmem:[%s5333_s0 + $0x318] sm:$0xf0] }
  0x30   :  { %1956 = vmatpush.bf16.msrb.mxu0 %v3736_v45  ;;  %v2706_v45 = vor.u32 %v3584_v39, %v2703_v40 }
  0x31   :  { %1714 = vmatmul.bf16.gmra.mxu0 %v2694_v46  ;;  %1729 = vmatmul.bf16.gmra.mxu1 %v2850_v47  ;;  %v3769_v47 = vld [vmem:[%s5331_s1 + $0x228] sm:$0xff] }
  0x32   :  { %1768 = vmatpush.bf16.msrb.mxu1 %v3711_v42  ;;  %1754 = vmatmul.bf16.gmra.mxu3 %v3110_v48  ;;  %v3603_v42 = vld [vmem:[%s5333_s0 + $0x108] sm:$0xf0]  ;;  %v3596_v48 = vld [vmem:[%s5333_s0 + $0xd4] sm:$0xf] }
  0x33   :  { %1894 = vmatpush.bf16.msrb.mxu3 %v3727_v44  ;;  %1831 = vmatpush.bf16.msrb.mxu2 %v3719_v49  ;;  %v2710_v44 = vor.u32 %v3591_v38, %v2709_v37  ;;  %v2754_v46 = vor.u32 %v3603_v42, %v2753_v41  ;;  %v2747_v49 = vld [vmem:[%s5333_s0 + $0x104] sm:$0xf0]  ;;  %v3750_v42 = vld [vmem:[%s5331_s1 + $0x190] sm:$0xff] }
  0x34   :  { %1744 = vmatmul.bf16.gmra.mxu2 %v3006_v50  ;;  %1957 = vmatpush.bf16.msrb.mxu0 %v3735_v53  ;;  %v2761_v50 = vld [vmem:[%s5333_s0 + $0xe0] sm:$0xf]  ;;  %v2755_v53 = vld [vmem:[%s5333_s0 + $0x10c] sm:$0xf0] }
  0x36   :  { %1769 = vmatpush.bf16.msrb.mxu1 %v3710_v51  ;;  %v3604_v51 = vld [vmem:[%s5333_s0 + $0x110] sm:$0xf0] }
  0x37   :  { %1895 = vmatpush.bf16.msrb.mxu3 %v3726_v52  ;;  %1832 = vmatpush.bf16.msrb.mxu2 %v3718_v54  ;;  %v3597_v52 = vld [vmem:[%s5333_s0 + $0xdc] sm:$0xf]  ;;  %v2805_v54 = vld [vmem:[%s5333_s0 + $0x140] sm:$0xf] }
  0x38   :  { %1958 = vmatpush.bf16.msrb.mxu0 %v3734_v57  ;;  %v2762_v57 = vor.u32 %v3604_v51, %v2761_v50 }
  0x3a   :  { %1770 = vmatpush.bf16.msrb.mxu1 %v3709_v55  ;;  %v3616_v55 = vld [vmem:[%s5333_s0 + $0x170] sm:$0xf0] }
  0x3b   :  { %1896 = vmatpush.bf16.msrb.mxu3 %v3725_v56  ;;  %1833 = vmatpush.bf16.msrb.mxu2 %v3717_v58  ;;  %v2750_v56 = vor.u32 %v3596_v48, %v2747_v49  ;;  %v2758_v58 = vor.u32 %v3597_v52, %v2755_v53  ;;  %v3766_v52 = vld [vmem:[%s5331_s1 + $0x210] sm:$0xff] }
  0x3c   :  { %1959 = vmatpush.bf16.msrb.mxu0 %v3733_v62  ;;  %v3760_v62 = vld [vmem:[%s5331_s1 + $0x1e0] sm:$0xff] }
  0x3e   :  { %1771 = vmatpush.bf16.msrb.mxu1 %v3708_v60  ;;  %v2806_v60 = vor.u32 %v3616_v55, %v2805_v54  ;;  %v3648_v54 = vld [vmem:[%s5333_s0 + $0x274] sm:$0xf]  ;;  %v2955_v55 = vld [vmem:[%s5333_s0 + $0x2a4] sm:$0xf0] }
  0x3f   :  { %1897 = vmatpush.bf16.msrb.mxu3 %v3724_v63  ;;  %1834 = vmatpush.bf16.msrb.mxu2 %v3716_v6  ;;  %v3744_v63 = vld [vmem:[%s5331_s1 + $0x160] sm:$0xff]  ;;  %v2807_v6 = vld [vmem:[%s5333_s0 + $0x174] sm:$0xf0] }
  0x40   :  { %1960 = vmatpush.bf16.msrb.mxu0 %v3732_v10  ;;  %v2814_v10 = vor.u32 %v3617_v4, %v2813_v3 }
  0x41   :  { %1719 = vmatmul.bf16.gmra.mxu0 %v2746_v11  ;;  %1734 = vmatmul.bf16.gmra.mxu1 %v2902_v12  ;;  %v2810_v11 = vor.u32 %v3610_v5, %v2807_v6 }
  0x42   :  { %2016 = vmatpush.bf16.msra.mxu1 %v3747_v2  ;;  %1759 = vmatmul.bf16.gmra.mxu3 %v922_v13  ;;  %v2799_v2 = vld [vmem:[%s5333_s0 + $0x16c] sm:$0xf0]  ;;  %v3751_v13 = vld [vmem:[%s5331_s1 + $0x198] sm:$0xff] }
  0x43   :  { %2142 = vmatpush.bf16.msra.mxu3 %v3763_v1  ;;  %2079 = vmatpush.bf16.msra.mxu2 %v3755_v7  ;;  %v3609_v1 = vld [vmem:[%s5333_s0 + $0x13c] sm:$0xf]  ;;  %v2857_v7 = vld [vmem:[%s5333_s0 + $0x1a8] sm:$0xf] }
  0x44   :  { %2205 = vmatpush.bf16.msra.mxu0 %v3771_v14  ;;  %1835 = vmatmul.bf16.vlgmr.msrb.gmra.mxu2 %v2650_v15  ;;  %v2802_v9 = vor.u32 %v3609_v1, %v2799_v2  ;;  %v2858_v12 = vor.u32 %v3629_v8, %v2857_v7  ;;  %v3759_v14 = vld [vmem:[%s5331_s1 + $0x1d8] sm:$0xff] }
  0x45   :  { %v3743_v15 = vld [vmem:[%s5331_s1 + $0x158] sm:$0xff] }
  0x46   :  { %2017 = vmatpush.bf16.msra.mxu1 %v3746_v18  ;;  %v2865_v18 = vld [vmem:[%s5333_s0 + $0x1b0] sm:$0xf] }
  0x47   :  { %2080 = vmatpush.bf16.msra.mxu2 %v3754_v16  ;;  %2143 = vmatpush.bf16.msra.mxu3 %v3762_v17  ;;  %v3622_v16 = vld [vmem:[%s5333_s0 + $0x1a4] sm:$0xf]  ;;  %v2851_v17 = vld [vmem:[%s5333_s0 + $0x1d4] sm:$0xf0] }
  0x48   :  { %2206 = vmatpush.bf16.msra.mxu0 %v3770_v19  ;;  %v3630_v19 = vld [vmem:[%s5333_s0 + $0x1e0] sm:$0xf0]  ;;  %v2854_v24 = vor.u32 %v3622_v16, %v2851_v17 }
  0x49   :  { %v2866_v25 = vor.u32 %v3630_v19, %v2865_v18  ;;  %v3741_v18 = vld [vmem:[%s5331_s1 + $0x148] sm:$0xff] }
  0x4a   :  { %2018 = vmatpush.bf16.msra.mxu1 %v3745_v34  ;;  %v2911_v34 = vld [vmem:[%s5333_s0 + $0x244] sm:$0xf0] }
  0x4b   :  { %2081 = vmatpush.bf16.msra.mxu2 %v3753_v32  ;;  %2144 = vmatpush.bf16.msra.mxu3 %v3761_v33  ;;  %v3643_v32 = vld [vmem:[%s5333_s0 + $0x248] sm:$0xf0]  ;;  %v3636_v33 = vld [vmem:[%s5333_s0 + $0x214] sm:$0xf] }
  0x4c   :  { %2207 = vmatpush.bf16.msra.mxu0 %v3769_v47  ;;  %v2914_v41 = vor.u32 %v3636_v33, %v2911_v34 }
  0x4e   :  { %2019 = vmatpush.bf16.msra.mxu1 %v3744_v63 }
  0x4f   :  { %2082 = vmatpush.bf16.msra.mxu2 %v3752_v61  ;;  %2145 = vmatpush.bf16.msra.mxu3 %v3760_v62  ;;  %v3013_v61 = vld [vmem:[%s5333_s0 + $0x2e0] sm:$0xf]  ;;  %v3668_v62 = vld [vmem:[%s5333_s0 + $0x310] sm:$0xf0] }
  0x50   :  { %2208 = vmatpush.bf16.msra.mxu0 %v3768_v0  ;;  %v2958_v0 = vor.u32 %v3648_v54, %v2955_v55  ;;  %v3014_v8 = vor.u32 %v3668_v62, %v3013_v61  ;;  %v3756_v54 = vld [vmem:[%s5331_s1 + $0x1c0] sm:$0xff]  ;;  %v3117_v62 = vld [vmem:[%s5333_s0 + $0x3b0] sm:$0xf] }
  0x51   :  { %1772 = vmatmul.bf16.vlgmr.msrb.gmra.mxu1 %v2646_v28  ;;  %1961 = vmatmul.bf16.vlgmr.msrb.gmra.mxu0 %v2658_v29  ;;  %v3767_v28 = vld [vmem:[%s5331_s1 + $0x218] sm:$0xff]  ;;  %v3635_v29 = vld [vmem:[%s5333_s0 + $0x20c] sm:$0xf]  ;;  %v3674_v55 = vld [vmem:[%s5333_s0 + $0x344] sm:$0xf] }
  0x52   :  { %1898 = vmatmul.bf16.vlgmr.msrb.gmra.mxu3 %v2654_v30  ;;  %2020 = vmatpush.bf16.msra.mxu1 %v3743_v15  ;;  %v2903_v30 = vld [vmem:[%s5333_s0 + $0x23c] sm:$0xf0]  ;;  %v3757_v15 = vld [vmem:[%s5331_s1 + $0x1c8] sm:$0xff] }
  0x53   :  { %2083 = vmatpush.bf16.msra.mxu2 %v3751_v13  ;;  %2146 = vmatpush.bf16.msra.mxu3 %v3759_v14  ;;  %v2906_v37 = vor.u32 %v3635_v29, %v2903_v30  ;;  %v3010_v29 = vor.u32 %v3661_v20, %v3007_v21  ;;  %v3022_v30 = vor.u32 %v3669_v23, %v3021_v22  ;;  %v3067_v61 = vld [vmem:[%s5333_s0 + $0x37c] sm:$0xf0] }
  0x54   :  { %1840 = vmatmul.bf16.gmra.mxu2 %v2702_v31  ;;  %2209 = vmatpush.bf16.msra.mxu0 %v3767_v28  ;;  %v2917_v31 = vld [vmem:[%s5333_s0 + $0x218] sm:$0xf] }
  0x55   :  { %v2918_v38 = vor.u32 %v3643_v32, %v2917_v31 }
  0x57   :  { %2084 = vmatpush.bf16.msra.mxu2 %v3750_v42 }
  0x58   :  { %2210 = vmatpush.bf16.msra.mxu0 %v3766_v52  ;;  %v3748_v52 = vld [vmem:[%s5331_s1 + $0x180] sm:$0xff] }
  0x61   :  { %1777 = vmatmul.bf16.gmra.mxu1 %v2698_v43  ;;  %1966 = vmatmul.bf16.gmra.mxu0 %v2710_v44  ;;  %v2962_v43 = vor.u32 %v3655_v36, %v2961_v35  ;;  %v3758_v44 = vld [vmem:[%s5331_s1 + $0x1d0] sm:$0xff]  ;;  %v3765_v35 = vld [vmem:[%s5331_s1 + $0x208] sm:$0xff] }
  0x62   :  { %1903 = vmatmul.bf16.gmra.mxu3 %v2706_v45  ;;  %v3742_v45 = vld [vmem:[%s5331_s1 + $0x150] sm:$0xff]  ;;  %2211 = vmatpush.bf16.msra.mxu0 %v3765_v35 }
  0x63   :  { %2147 = vmatpush.bf16.msra.mxu3 %v3758_v44  ;;  %2021 = vmatpush.bf16.msra.mxu1 %v3742_v45  ;;  %v3688_v35 = vld [vmem:[%s5333_s0 + $0x3b4] sm:$0xf] }
  0x64   :  { %1845 = vmatmul.bf16.gmra.mxu2 %v2754_v46  ;;  %v4269_v46 = vld [vmem:[%s5332_s2] ss:$0 sm:$0xff] }
  0x67   :  { %2148 = vmatpush.bf16.msra.mxu3 %v3757_v15  ;;  %2022 = vmatpush.bf16.msra.mxu1 %v3741_v18 }
  0x6b   :  { %2149 = vmatpush.bf16.msra.mxu3 %v3756_v54 }
  0x71   :  { %1782 = vmatmul.bf16.gmra.mxu1 %v2750_v56  ;;  %1971 = vmatmul.bf16.gmra.mxu0 %v2762_v57  ;;  %v2969_v56 = vld [vmem:[%s5333_s0 + $0x280] sm:$0xf]  ;;  %v3656_v57 = vld [vmem:[%s5333_s0 + $0x2b0] sm:$0xf0] }
  0x72   :  { %1908 = vmatmul.bf16.gmra.mxu3 %v2758_v58  ;;  %v3649_v58 = vld [vmem:[%s5333_s0 + $0x27c] sm:$0xf]  ;;  %v2970_v1 = vor.u32 %v3656_v57, %v2969_v56  ;;  %v3059_v56 = vld [vmem:[%s5333_s0 + $0x374] sm:$0xf0]  ;;  %v3073_v57 = vld [vmem:[%s5333_s0 + $0x350] sm:$0xf] }
  0x74   :  { %1850 = vmatmul.bf16.gmra.mxu2 %v2806_v60  ;;  %v2963_v60 = vld [vmem:[%s5333_s0 + $0x2ac] sm:$0xf0] }
  0x75   :  { %v2966_v5 = vor.u32 %v3649_v58, %v2963_v60  ;;  %v3682_v58 = vld [vmem:[%s5333_s0 + $0x380] sm:$0xf0]  ;;  %v3675_v60 = vld [vmem:[%s5333_s0 + $0x34c] sm:$0xf] }
  0x81   :  { %1787 = vmatmul.bf16.gmra.mxu1 %v2802_v9  ;;  %1976 = vmatmul.bf16.gmra.mxu0 %v2814_v10  ;;  %v3749_v10 = vld [vmem:[%s5331_s1 + $0x188] sm:$0xff] }
  0x82   :  { %1913 = vmatmul.bf16.gmra.mxu3 %v2810_v11  ;;  %2085 = vmatpush.bf16.msra.mxu2 %v3749_v10  ;;  %v3070_v10 = vor.u32 %v3675_v60, %v3067_v61 }
  0x84   :  { %1855 = vmatmul.bf16.gmra.mxu2 %v2858_v12 }
  0x86   :  { %2086 = vmatpush.bf16.msra.mxu2 %v3748_v52 }
  0x91   :  { %1792 = vmatmul.bf16.gmra.mxu1 %v2854_v24  ;;  %1981 = vmatmul.bf16.gmra.mxu0 %v2866_v25  ;;  %v3662_v24 = vld [vmem:[%s5333_s0 + $0x2e4] sm:$0xf]  ;;  %v3015_v25 = vld [vmem:[%s5333_s0 + $0x314] sm:$0xf0] }
  0x92   :  { %1918 = vmatmul.bf16.gmra.mxu3 %v2862_v26  ;;  %v3065_v26 = vld [vmem:[%s5333_s0 + $0x348] sm:$0xf]  ;;  %v3018_v34 = vor.u32 %v3662_v24, %v3015_v25 }
  0x94   :  { %1860 = vmatmul.bf16.gmra.mxu2 %v2910_v27  ;;  %v3681_v27 = vld [vmem:[%s5333_s0 + $0x378] sm:$0xf0] }
  0x9e   :  { %v4253_v39 = vpop.f32.mrf.mxu0  ;;  %v4255_v40 = vpop.f32.mrf.mxu1 }
  0xa1   :  { %1797 = vmatmul.bf16.gmra.mxu1 %v2906_v37  ;;  %1986 = vmatmul.bf16.gmra.mxu0 %v2918_v38  ;;  %v3066_v38 = vor.u32 %v3681_v27, %v3065_v26  ;;  %v162_v27 = vld [vmem:[%s5333_s0 + $0x418] sm:$0x11] }
  0xa2   :  { %1923 = vmatmul.bf16.gmra.mxu3 %v2914_v41 }
  0xa4   :  { %1865 = vmatmul.bf16.gmra.mxu2 %v2962_v43 }
  0xa5   :  { %v1750_v47 = vpop.f32.mrf.mxu3 }
  0xa6   :  { %v4272_v48 = vadd.f32 %v4269_v46, %v1750_v47  ;;  %v4274_v49 = vpop.f32.mrf.mxu0  ;;  %v4276_v50 = vpop.f32.mrf.mxu1 }
  0xa7   :  { %v1740_v51 = vpop.f32.mrf.mxu2  ;;  %v1713_v20 = vadd.f32 %v4269_v46, %v4274_v49  ;;  %v3111_v49 = vld [vmem:[%s5333_s0 + $0x3dc] sm:$0xf0] }
  0xa8   :  { %v4282_v53 = vadd.f32 %v4269_v46, %v1740_v51 }
  0xad   :  { %v1752_v63 = vpop.f32.mrf.mxu3 }
  0xae   :  { %v4309_v2 = vadd.f32 %v4269_v46, %v1752_v63  ;;  %v4311_v3 = vpop.f32.mrf.mxu0  ;;  %v1730_v4 = vpop.f32.mrf.mxu1  ;;  %v3694_v63 = vld [vmem:[%s5333_s0 + $0x3e0] sm:$0xf0] }
  0xaf   :  { %v4314_v6 = vadd.f32 %v4269_v46, %v1730_v4  ;;  %v1742_v7 = vpop.f32.mrf.mxu2  ;;  %v3062_v4 = vor.u32 %v3674_v55, %v3059_v56 }
  0xb0   :  { %v4317_v9 = vadd.f32 %v4269_v46, %v1742_v7 }
  0xb1   :  { %1802 = vmatmul.bf16.gmra.mxu1 %v2958_v0  ;;  %1991 = vmatmul.bf16.gmra.mxu0 %v2970_v1  ;;  %v1711_v0 = vadd.f32 %v4269_v46, %v4253_v39  ;;  %v3764_v39 = vld [vmem:[%s5331_s1 + $0x200] sm:$0xff] }
  0xb2   :  { %1928 = vmatmul.bf16.gmra.mxu3 %v2966_v5  ;;  %v3074_v5 = vor.u32 %v3682_v58, %v3073_v57  ;;  %2212 = vmatpush.bf16.msra.mxu0 %v3764_v39  ;;  %v780_v39 = vunpack.c.h.b16 %v4013_v59 }
  0xb4   :  { %1870 = vmatmul.bf16.gmra.mxu2 %v3014_v8 }
  0xb5   :  { %v1755_v11 = vpop.f32.mrf.mxu3 }
  0xb6   :  { %v4323_v12 = vadd.f32 %v4269_v46, %v1755_v11  ;;  %v4325_v13 = vpop.f32.mrf.mxu0  ;;  %v1732_v14 = vpop.f32.mrf.mxu1  ;;  %v3740_v11 = vld [vmem:[%s5331_s1 + $0x140] sm:$0xff] }
  0xb7   :  { %v4331_v16 = vadd.f32 %v4269_v46, %v1732_v14  ;;  %v1745_v17 = vpop.f32.mrf.mxu2  ;;  %2023 = vmatpush.bf16.msra.mxu1 %v3740_v11  ;;  %v4466_v11 = vld [vmem:[%s5333_s0 + $0x420] sm:$0x11] }
  0xb8   :  { %v4337_v19 = vadd.f32 %v4269_v46, %v1745_v17  ;;  %v3118_v17 = vor.u32 %v3694_v63, %v3117_v62  ;;  %v3787_v62 = vld [vmem:[%s5331_s1 + $0x2b8] sm:$0xff] }
  0xb9   :  { %2331 = vmatpush.bf16.msrb.mxu2 %v3787_v62  ;;  %v2659_v62 = vld [vmem:[%s5333_s0 + $0x44] sm:$0xf0] }
  0xbd   :  { %v1757_v28 = vpop.f32.mrf.mxu3 }
  0xbe   :  { %v4364_v31 = vadd.f32 %v4269_v46, %v1757_v28  ;;  %v4366_v32 = vpop.f32.mrf.mxu0  ;;  %v1735_v33 = vpop.f32.mrf.mxu1 }
  0xbf   :  { %v4372_v36 = vadd.f32 %v4269_v46, %v1735_v33  ;;  %v1747_v37 = vpop.f32.mrf.mxu2  ;;  %v3125_v33 = vld [vmem:[%s5333_s0 + $0x3b8] sm:$0xf] }
  0xc0   :  { %v4375_v41 = vadd.f32 %v4269_v46, %v1747_v37  ;;  %v3119_v37 = vld [vmem:[%s5333_s0 + $0x3e4] sm:$0xf0] }
  0xc1   :  { %1807 = vmatmul.bf16.gmra.mxu1 %v3010_v29  ;;  %1996 = vmatmul.bf16.gmra.mxu0 %v3022_v30  ;;  %v3687_v30 = vld [vmem:[%s5333_s0 + $0x3ac] sm:$0xf]  ;;  %v3122_v57 = vor.u32 %v3688_v35, %v3119_v37 }
  0xc2   :  { %1933 = vmatmul.bf16.gmra.mxu3 %v3018_v34  ;;  %v3695_v34 = vld [vmem:[%s5333_s0 + $0x3e8] sm:$0xf0] }
  0xc3   :  { %v3126_v52 = vor.u32 %v3695_v34, %v3125_v33 }
  0xc4   :  { %1875 = vmatmul.bf16.gmra.mxu2 %v3066_v38  ;;  %v781_v38 = vunpack.c.l.b16 %v162_v27 }
  0xc5   :  { %v1760_v42 = vpop.f32.mrf.mxu3 }
  0xc6   :  { %v4378_v43 = vadd.f32 %v4269_v46, %v1760_v42  ;;  %v4380_v44 = vpop.f32.mrf.mxu0  ;;  %v1737_v45 = vpop.f32.mrf.mxu1  ;;  %v1716_v42 = vadd.f32 %v4269_v46, %v4311_v3  ;;  %v924_v61 = vpack.c.b16 %v781_v38, %v781_v38  ;;  %v3795_v3 = vld [vmem:[%s5331_s1 + $0x2f8] sm:$0xff] }
  0xc7   :  { %v4383_v47 = vadd.f32 %v4269_v46, %v1737_v45  ;;  %v1836_v51 = vpop.f32.mrf.mxu2  ;;  %2394 = vmatpush.bf16.msrb.mxu3 %v3795_v3  ;;  %v3580_v3 = vld [vmem:[%s5333_s0 + $0x50] sm:$0xf0] }
  0xcd   :  { %v1762_v1 = vpop.f32.mrf.mxu3 }
  0xce   :  { %v1773_v7 = vpop.f32.mrf.mxu1  ;;  %v1962_v8 = vpop.f32.mrf.mxu0  ;;  %v3779_v1 = vld [vmem:[%s5331_s1 + $0x278] sm:$0xff] }
  0xcf   :  { %v1774_v14 = vadd.f32 %v1773_v7, %v1711_v0  ;;  %v1838_v15 = vpop.f32.mrf.mxu2  ;;  %2268 = vmatpush.bf16.msrb.mxu1 %v3779_v1  ;;  %v3573_v1 = vld [vmem:[%s5333_s0 + $0x1c] sm:$0xf] }
  0xd1   :  { %1812 = vmatmul.bf16.gmra.mxu1 %v3062_v4  ;;  %2001 = vmatmul.bf16.gmra.mxu0 %v3074_v5  ;;  %v1837_v18 = vadd.f32 %v1836_v51, %v1774_v14  ;;  %v3114_v51 = vor.u32 %v3687_v30, %v3111_v49  ;;  %v1718_v4 = vadd.f32 %v4269_v46, %v4325_v13 }
  0xd2   :  { %1938 = vmatmul.bf16.gmra.mxu3 %v3070_v10 }
  0xd4   :  { %1880 = vmatmul.bf16.gmra.mxu2 %v3118_v17  ;;  %v3799_v17 = vld [vmem:[%s5331_s1 + $0x318] sm:$0xff] }
  0xd5   :  { %v1899_v21 = vpop.f32.mrf.mxu3  ;;  %2461 = vmatpush.bf16.msrb.mxu0 %v3799_v17 }
  0xd6   :  { %v1900_v22 = vadd.f32 %v1899_v21, %v1837_v18  ;;  %v1775_v23 = vpop.f32.mrf.mxu1  ;;  %v1964_v24 = vpop.f32.mrf.mxu0  ;;  %v782_v21 = vunpack.c.h.b16 %v162_v27 }
  0xd7   :  { %v1776_v25 = vadd.f32 %v1775_v23, %v1713_v20  ;;  %v1841_v26 = vpop.f32.mrf.mxu2  ;;  %v783_v20 = vunpack.c.l.b16 %v4466_v11  ;;  %v3579_v23 = vld [vmem:[%s5333_s0 + $0x48] sm:$0xf0] }
  0xd8   :  { %v4428_v28 = vadd.f32 %v1962_v8, %v1900_v22  ;;  %v2665_v22 = vld [vmem:[%s5333_s0 + $0x18] sm:$0xf]  ;;  %v925_v33 = vpack.c.b16 %v782_v21, %v782_v21 }
  0xd9   :  { %v1839_v29 = vadd.f32 %v1838_v15, %v1776_v25  ;;  %v2666_v35 = vor.u32 %v3579_v23, %v2665_v22 }
  0xdd   :  { %v1901_v45 = vpop.f32.mrf.mxu3 }
  0xde   :  { %v1902_v54 = vadd.f32 %v1901_v45, %v1839_v29  ;;  %v1778_v55 = vpop.f32.mrf.mxu1  ;;  %v1967_v56 = vpop.f32.mrf.mxu0  ;;  %v926_v29 = vpack.c.b16 %v783_v20, %v783_v20 }
  0xdf   :  { %v1779_v58 = vadd.f32 %v1778_v55, %v1716_v42  ;;  %v1843_v60 = vpop.f32.mrf.mxu2 }
  0xe0   :  { %v4453_v63 = vadd.f32 %v1964_v24, %v1902_v54  ;;  %v1721_v24 = vadd.f32 %v4269_v46, %v4366_v32  ;;  %v1723_v32 = vadd.f32 %v4269_v46, %v4380_v44  ;;  %v3786_v54 = vld [vmem:[%s5331_s1 + $0x2b0] sm:$0xff] }
  0xe1   :  { %1817 = vmatmul.bf16.gmra.mxu1 %v3114_v51  ;;  %2006 = vmatmul.bf16.gmra.mxu0 %v3126_v52  ;;  %v1842_v0 = vadd.f32 %v1841_v26, %v1779_v58  ;;  %v923_v26 = vpack.c.b16 %v780_v39, %v780_v39  ;;  %v3778_v58 = vld [vmem:[%s5331_s1 + $0x270] sm:$0xff] }
  0xe2   :  { %1943 = vmatmul.bf16.gmra.mxu3 %v3122_v57  ;;  %v3794_v57 = vld [vmem:[%s5331_s1 + $0x2f0] sm:$0xff]  ;;  %2332 = vmatpush.bf16.msrb.mxu2 %v3786_v54 }
  0xe3   :  { %2395 = vmatpush.bf16.msrb.mxu3 %v3794_v57  ;;  %2269 = vmatpush.bf16.msrb.mxu1 %v3778_v58 }
  0xe4   :  { %1885 = vmatmul.bf16.gmra.mxu2 %v924_v61  ;;  %v3572_v61 = vld [vmem:[%s5333_s0 + $0x14] sm:$0xf] }
  0xe5   :  { %v1904_v5 = vpop.f32.mrf.mxu3 }
  0xe6   :  { %v1905_v7 = vadd.f32 %v1904_v5, %v1842_v0  ;;  %v1780_v8 = vpop.f32.mrf.mxu1  ;;  %v1969_v10 = vpop.f32.mrf.mxu0  ;;  %v2673_v0 = vld [vmem:[%s5333_s0 + $0x20] sm:$0xf] }
  0xe7   :  { %v1781_v14 = vadd.f32 %v1780_v8, %v1718_v4  ;;  %v1846_v15 = vpop.f32.mrf.mxu2  ;;  %v2667_v4 = vld [vmem:[%s5333_s0 + $0x4c] sm:$0xf0]  ;;  %v2717_v5 = vld [vmem:[%s5333_s0 + $0x80] sm:$0xf]  ;;  %v1726_v8 = vadd.f32 %v4269_v46, %v4255_v40  ;;  %v1728_v40 = vadd.f32 %v4269_v46, %v4276_v50  ;;  %v2725_v50 = vld [vmem:[%s5333_s0 + $0x88] sm:$0xf] }
  0xe8   :  { %v4471_v18 = vadd.f32 %v1967_v56, %v1905_v7  ;;  %v3592_v7 = vld [vmem:[%s5333_s0 + $0xb0] sm:$0xf0]  ;;  %v2670_v20 = vor.u32 %v3573_v1, %v2667_v4  ;;  %v2711_v46 = vld [vmem:[%s5333_s0 + $0xac] sm:$0xf0]  ;;  %v3777_v4 = vld [vmem:[%s5331_s1 + $0x268] sm:$0xff] }
  0xe9   :  { %v1844_v13 = vadd.f32 %v1843_v60, %v1781_v14  ;;  %v2662_v14 = vor.u32 %v3572_v61, %v2659_v62  ;;  %v2718_v23 = vor.u32 %v3592_v7, %v2717_v5  ;;  %v3793_v62 = vld [vmem:[%s5331_s1 + $0x2e8] sm:$0xff]  ;;  %2270 = vmatpush.bf16.msrb.mxu1 %v3777_v4  ;;  %v3612_v4 = vld [vmem:[%s5333_s0 + $0x154] sm:$0xf] }
  0xea   :  { %2396 = vmatpush.bf16.msrb.mxu3 %v3793_v62 }
  0xed   :  { %v1906_v25 = vpop.f32.mrf.mxu3 }
  0xee   :  { %v1907_v59 = vadd.f32 %v1906_v25, %v1844_v13  ;;  %v1783_v30 = vpop.f32.mrf.mxu1  ;;  %v1972_v49 = vpop.f32.mrf.mxu0 }
  0xef   :  { %v1784_v34 = vadd.f32 %v1783_v30, %v1721_v24  ;;  %v1848_v27 = vpop.f32.mrf.mxu2 }
  0xf0   :  { %v4483_v37 = vadd.f32 %v1969_v10, %v1907_v59 }
  0xf1   :  { %1822 = vmatmul.bf16.gmra.mxu1 %v923_v26  ;;  %2011 = vmatmul.bf16.gmra.mxu0 %v926_v29  ;;  %v1847_v38 = vadd.f32 %v1846_v15, %v1784_v34  ;;  %v2674_v15 = vor.u32 %v3580_v3, %v2673_v0  ;;  %v3785_v34 = vld [vmem:[%s5331_s1 + $0x2a8] sm:$0xff] }
  0xf2   :  { %1948 = vmatmul.bf16.gmra.mxu3 %v925_v33  ;;  %2333 = vmatpush.bf16.msrb.mxu2 %v3785_v34 }
  0xf4   :  { %2087 = vmatmul.bf16.vlgmr.msra.gmra.mxu2 %v2666_v35 }
  0xf5   :  { %v1909_v42 = vpop.f32.mrf.mxu3 }
  0xf6   :  { %v1910_v45 = vadd.f32 %v1909_v42, %v1847_v38  ;;  %v1785_v51 = vpop.f32.mrf.mxu1  ;;  %v1974_v52 = vpop.f32.mrf.mxu0  ;;  %v3585_v38 = vld [vmem:[%s5333_s0 + $0x7c] sm:$0xf]  ;;  %v3586_v42 = vld [vmem:[%s5333_s0 + $0x84] sm:$0xf] }
  0xf7   :  { %v1786_v55 = vadd.f32 %v1785_v51, %v1723_v32  ;;  %v1851_v56 = vpop.f32.mrf.mxu2  ;;  %v3593_v32 = vld [vmem:[%s5333_s0 + $0xb8] sm:$0xf0]  ;;  %v2769_v51 = vld [vmem:[%s5333_s0 + $0xe8] sm:$0xf] }
  0xf8   :  { %v4496_v44 = vadd.f32 %v1972_v49, %v1910_v45  ;;  %v2719_v45 = vld [vmem:[%s5333_s0 + $0xb4] sm:$0xf0] }
  0xf9   :  { %v1849_v60 = vadd.f32 %v1848_v27, %v1786_v55  ;;  %v2714_v55 = vor.u32 %v3585_v38, %v2711_v46  ;;  %v2722_v61 = vor.u32 %v3586_v42, %v2719_v45 }
  0xfd   :  { %v1911_v10 = vpop.f32.mrf.mxu3 }
  0xfe   :  { %v1912_v17 = vadd.f32 %v1911_v10, %v1849_v60  ;;  %v1788_v39 = vpop.f32.mrf.mxu1  ;;  %v1977_v13 = vpop.f32.mrf.mxu0 }
  0xff   :  { %v1789_v21 = vadd.f32 %v1788_v39, %v1726_v8  ;;  %v1853_v22 = vpop.f32.mrf.mxu2 }
 0x100   :  { %v4524_v24 = vadd.f32 %v1974_v52, %v1912_v17  ;;  %v3605_v52 = vld [vmem:[%s5333_s0 + $0x118] sm:$0xf0] }
 0x101   :  { %2024 = vmatmul.bf16.vlgmr.msra.gmra.mxu1 %v2662_v14  ;;  %2213 = vmatmul.bf16.vlgmr.msra.gmra.mxu0 %v2674_v15  ;;  %v1852_v25 = vadd.f32 %v1851_v56, %v1789_v21  ;;  %v2726_v56 = vor.u32 %v3593_v32, %v2725_v50  ;;  %v2770_v1 = vor.u32 %v3605_v52, %v2769_v51  ;;  %v3598_v21 = vld [vmem:[%s5333_s0 + $0xe4] sm:$0xf] }
 0x102   :  { %2150 = vmatmul.bf16.vlgmr.msra.gmra.mxu3 %v2670_v20  ;;  %v3784_v51 = vld [vmem:[%s5331_s1 + $0x2a0] sm:$0xff] }
 0x103   :  { %v3792_v52 = vld [vmem:[%s5331_s1 + $0x2e0] sm:$0xff]  ;;  %2334 = vmatpush.bf16.msrb.mxu2 %v3784_v51  ;;  %v3625_v51 = vld [vmem:[%s5333_s0 + $0x1bc] sm:$0xf] }
 0x104   :  { %2092 = vmatmul.bf16.gmra.mxu2 %v2718_v23  ;;  %v2777_v23 = vld [vmem:[%s5333_s0 + $0xf0] sm:$0xf]  ;;  %2397 = vmatpush.bf16.msrb.mxu3 %v3792_v52 }
 0x105   :  { %v1914_v26 = vpop.f32.mrf.mxu3  ;;  %v2875_v52 = vld [vmem:[%s5333_s0 + $0x1ec] sm:$0xf0] }
 0x106   :  { %v1915_v29 = vadd.f32 %v1914_v26, %v1852_v25  ;;  %v1790_v59 = vpop.f32.mrf.mxu1  ;;  %v1979_v30 = vpop.f32.mrf.mxu0  ;;  %v3599_v25 = vld [vmem:[%s5333_s0 + $0xec] sm:$0xf]  ;;  %v2821_v26 = vld [vmem:[%s5333_s0 + $0x150] sm:$0xf] }
 0x107   :  { %v1791_v49 = vadd.f32 %v1790_v59, %v1728_v40  ;;  %v1856_v33 = vpop.f32.mrf.mxu2  ;;  %v2771_v40 = vld [vmem:[%s5333_s0 + $0x11c] sm:$0xf0] }
 0x108   :  { %v4531_v27 = vadd.f32 %v1977_v13, %v1915_v29  ;;  %v3618_v29 = vld [vmem:[%s5333_s0 + $0x180] sm:$0xf0]  ;;  %v2774_v38 = vor.u32 %v3599_v25, %v2771_v40 }
 0x109   :  { %v1854_v35 = vadd.f32 %v1853_v22, %v1791_v49  ;;  %v2763_v22 = vld [vmem:[%s5333_s0 + $0x114] sm:$0xf0]  ;;  %v2822_v32 = vor.u32 %v3618_v29, %v2821_v26 }
 0x10d   :  { %v1916_v54 = vpop.f32.mrf.mxu3 }
 0x10e   :  { %v1917_v57 = vadd.f32 %v1916_v54, %v1854_v35  ;;  %v1793_v58 = vpop.f32.mrf.mxu1  ;;  %v1982_v60 = vpop.f32.mrf.mxu0 }
 0x10f   :  { %v1794_v0 = vadd.f32 %v1793_v58, %v4314_v6  ;;  %v1858_v3 = vpop.f32.mrf.mxu2  ;;  %v3798_v6 = vld [vmem:[%s5331_s1 + $0x310] sm:$0xff] }
 0x110   :  { %v4564_v5 = vadd.f32 %v1979_v30, %v1917_v57  ;;  %2462 = vmatpush.bf16.msrb.mxu0 %v3798_v6  ;;  %v2766_v30 = vor.u32 %v3598_v21, %v2763_v22  ;;  %v3776_v57 = vld [vmem:[%s5331_s1 + $0x260] sm:$0xff] }
 0x111   :  { %2029 = vmatmul.bf16.gmra.mxu1 %v2714_v55  ;;  %2218 = vmatmul.bf16.gmra.mxu0 %v2726_v56  ;;  %v1857_v7 = vadd.f32 %v1856_v33, %v1794_v0  ;;  %v3611_v0 = vld [vmem:[%s5333_s0 + $0x14c] sm:$0xf] }
 0x112   :  { %2155 = vmatmul.bf16.gmra.mxu3 %v2722_v61  ;;  %2271 = vmatpush.bf16.msrb.mxu1 %v3776_v57 }
 0x114   :  { %2097 = vmatmul.bf16.gmra.mxu2 %v2770_v1  ;;  %v2829_v1 = vld [vmem:[%s5333_s0 + $0x158] sm:$0xf] }
 0x115   :  { %v1919_v8 = vpop.f32.mrf.mxu3 }
 0x116   :  { %v1920_v10 = vadd.f32 %v1919_v8, %v1857_v7  ;;  %v1795_v14 = vpop.f32.mrf.mxu1  ;;  %v1984_v15 = vpop.f32.mrf.mxu0  ;;  %v2823_v7 = vld [vmem:[%s5333_s0 + $0x184] sm:$0xf0]  ;;  %v2873_v8 = vld [vmem:[%s5333_s0 + $0x1b8] sm:$0xf] }
 0x117   :  { %v1796_v17 = vadd.f32 %v1795_v14, %v4331_v16  ;;  %v1861_v39 = vpop.f32.mrf.mxu2  ;;  %v3606_v16 = vld [vmem:[%s5333_s0 + $0x120] sm:$0xf0]  ;;  %v2826_v21 = vor.u32 %v3612_v4, %v2823_v7 }
 0x118   :  { %v4570_v13 = vadd.f32 %v1982_v60, %v1920_v10  ;;  %v2778_v49 = vor.u32 %v3606_v16, %v2777_v23  ;;  %v3631_v10 = vld [vmem:[%s5333_s0 + $0x1e8] sm:$0xf0] }
 0x119   :  { %v1859_v20 = vadd.f32 %v1858_v3, %v1796_v17  ;;  %v2815_v3 = vld [vmem:[%s5333_s0 + $0x17c] sm:$0xf0]  ;;  %v2874_v16 = vor.u32 %v3631_v10, %v2873_v8  ;;  %v3797_v8 = vld [vmem:[%s5331_s1 + $0x308] sm:$0xff] }
 0x11a   :  { %2463 = vmatpush.bf16.msrb.mxu0 %v3797_v8  ;;  %v3029_v8 = vld [vmem:[%s5333_s0 + $0x2f0] sm:$0xf] }
 0x11d   :  { %v1921_v59 = vpop.f32.mrf.mxu3 }
 0x11e   :  { %v1922_v33 = vadd.f32 %v1921_v59, %v1859_v20  ;;  %v1798_v34 = vpop.f32.mrf.mxu1  ;;  %v1987_v35 = vpop.f32.mrf.mxu0 }
 0x11f   :  { %v1799_v46 = vadd.f32 %v1798_v34, %v4372_v36  ;;  %v1863_v50 = vpop.f32.mrf.mxu2  ;;  %v3791_v34 = vld [vmem:[%s5331_s1 + $0x2d8] sm:$0xff] }
 0x120   :  { %v4597_v42 = vadd.f32 %v1984_v15, %v1922_v33  ;;  %v2818_v15 = vor.u32 %v3611_v0, %v2815_v3  ;;  %2398 = vmatpush.bf16.msrb.mxu3 %v3791_v34  ;;  %v2878_v0 = vor.u32 %v3625_v51, %v2875_v52 }
 0x121   :  { %2034 = vmatmul.bf16.gmra.mxu1 %v2766_v30  ;;  %2223 = vmatmul.bf16.gmra.mxu0 %v2778_v49  ;;  %v1862_v45 = vadd.f32 %v1861_v39, %v1799_v46 }
 0x122   :  { %2160 = vmatmul.bf16.gmra.mxu3 %v2774_v38 }
 0x124   :  { %2102 = vmatmul.bf16.gmra.mxu2 %v2822_v32  ;;  %v2881_v32 = vld [vmem:[%s5333_s0 + $0x1c0] sm:$0xf] }
 0x125   :  { %v1924_v36 = vpop.f32.mrf.mxu3 }
 0x126   :  { %v1925_v54 = vadd.f32 %v1924_v36, %v1862_v45  ;;  %v1800_v55 = vpop.f32.mrf.mxu1  ;;  %v1989_v56 = vpop.f32.mrf.mxu0  ;;  %v3632_v45 = vld [vmem:[%s5333_s0 + $0x1f0] sm:$0xf0]  ;;  %v2925_v36 = vld [vmem:[%s5333_s0 + $0x220] sm:$0xf] }
 0x127   :  { %v1801_v58 = vadd.f32 %v1800_v55, %v4383_v47  ;;  %v1866_v60 = vpop.f32.mrf.mxu2  ;;  %v3619_v47 = vld [vmem:[%s5333_s0 + $0x188] sm:$0xf0]  ;;  %v2882_v57 = vor.u32 %v3632_v45, %v2881_v32  ;;  %v3790_v45 = vld [vmem:[%s5331_s1 + $0x2d0] sm:$0xff] }
 0x128   :  { %v4609_v61 = vadd.f32 %v1987_v35, %v1925_v54  ;;  %v2830_v6 = vor.u32 %v3619_v47, %v2829_v1  ;;  %v3775_v35 = vld [vmem:[%s5331_s1 + $0x258] sm:$0xff]  ;;  %v3644_v54 = vld [vmem:[%s5333_s0 + $0x250] sm:$0xf0]  ;;  %2399 = vmatpush.bf16.msrb.mxu3 %v3790_v45 }
 0x129   :  { %v1864_v62 = vadd.f32 %v1863_v50, %v1801_v58  ;;  %v2867_v50 = vld [vmem:[%s5333_s0 + $0x1e4] sm:$0xf0]  ;;  %2272 = vmatpush.bf16.msrb.mxu1 %v3775_v35  ;;  %v2926_v47 = vor.u32 %v3644_v54, %v2925_v36  ;;  %v3774_v36 = vld [vmem:[%s5331_s1 + $0x250] sm:$0xff] }
 0x12a   :  { %v3664_v45 = vld [vmem:[%s5333_s0 + $0x2f4] sm:$0xf] }
 0x12d   :  { %v1926_v14 = vpop.f32.mrf.mxu3  ;;  %2273 = vmatpush.bf16.msrb.mxu1 %v3774_v36  ;;  %v3081_v36 = vld [vmem:[%s5333_s0 + $0x358] sm:$0xf] }
 0x12e   :  { %v1927_v17 = vadd.f32 %v1926_v14, %v1864_v62  ;;  %v1803_v39 = vpop.f32.mrf.mxu1  ;;  %v1992_v20 = vpop.f32.mrf.mxu0 }
 0x12f   :  { %v1804_v22 = vadd.f32 %v1803_v39, %v4282_v53  ;;  %v1868_v23 = vpop.f32.mrf.mxu2  ;;  %v3783_v53 = vld [vmem:[%s5331_s1 + $0x298] sm:$0xff] }
 0x130   :  { %v4636_v25 = vadd.f32 %v1989_v56, %v1927_v17  ;;  %2335 = vmatpush.bf16.msrb.mxu2 %v3783_v53 }
 0x131   :  { %2039 = vmatmul.bf16.gmra.mxu1 %v2818_v15  ;;  %2228 = vmatmul.bf16.gmra.mxu0 %v2830_v6  ;;  %v1867_v40 = vadd.f32 %v1866_v60, %v1804_v22  ;;  %v2919_v22 = vld [vmem:[%s5333_s0 + $0x24c] sm:$0xf0] }
 0x132   :  { %2165 = vmatmul.bf16.gmra.mxu3 %v2826_v21  ;;  %v3637_v21 = vld [vmem:[%s5333_s0 + $0x21c] sm:$0xf] }
 0x134   :  { %2107 = vmatmul.bf16.gmra.mxu2 %v2874_v16  ;;  %v3638_v16 = vld [vmem:[%s5333_s0 + $0x224] sm:$0xf] }
 0x135   :  { %v1929_v26 = vpop.f32.mrf.mxu3 }
 0x136   :  { %v1930_v29 = vadd.f32 %v1929_v26, %v1867_v40  ;;  %v1805_v59 = vpop.f32.mrf.mxu1  ;;  %v1994_v30 = vpop.f32.mrf.mxu0  ;;  %v2927_v40 = vld [vmem:[%s5333_s0 + $0x254] sm:$0xf0]  ;;  %v2977_v26 = vld [vmem:[%s5333_s0 + $0x288] sm:$0xf] }
 0x137   :  { %v1806_v49 = vadd.f32 %v1805_v59, %v4317_v9  ;;  %v1871_v33 = vpop.f32.mrf.mxu2  ;;  %v3624_v9 = vld [vmem:[%s5333_s0 + $0x1b4] sm:$0xf]  ;;  %v2930_v35 = vor.u32 %v3638_v16, %v2927_v40 }
 0x138   :  { %v4648_v38 = vadd.f32 %v1992_v20, %v1930_v29  ;;  %v2870_v56 = vor.u32 %v3624_v9, %v2867_v50  ;;  %v3657_v29 = vld [vmem:[%s5333_s0 + $0x2b8] sm:$0xf0] }
 0x139   :  { %v1869_v46 = vadd.f32 %v1868_v23, %v1806_v49  ;;  %v2933_v23 = vld [vmem:[%s5333_s0 + $0x228] sm:$0xf]  ;;  %v2978_v32 = vor.u32 %v3657_v29, %v2977_v26 }
 0x13a   :  { %v3781_v26 = vld [vmem:[%s5331_s1 + $0x288] sm:$0xff] }
 0x13d   :  { %v1931_v55 = vpop.f32.mrf.mxu3 }
 0x13e   :  { %v1932_v58 = vadd.f32 %v1931_v55, %v1869_v46  ;;  %v1808_v60 = vpop.f32.mrf.mxu1  ;;  %v1997_v62 = vpop.f32.mrf.mxu0  ;;  %v3782_v46 = vld [vmem:[%s5331_s1 + $0x290] sm:$0xff] }
 0x13f   :  { %v1809_v3 = vadd.f32 %v1808_v60, %v4337_v19  ;;  %v1873_v1 = vpop.f32.mrf.mxu2  ;;  %2336 = vmatpush.bf16.msrb.mxu2 %v3782_v46 }
 0x140   :  { %v4675_v4 = vadd.f32 %v1994_v30, %v1932_v58  ;;  %v2922_v30 = vor.u32 %v3637_v21, %v2919_v22 }
 0x141   :  { %2044 = vmatmul.bf16.gmra.mxu1 %v2870_v56  ;;  %2233 = vmatmul.bf16.gmra.mxu0 %v2882_v57  ;;  %v1872_v7 = vadd.f32 %v1871_v33, %v1809_v3  ;;  %v2971_v3 = vld [vmem:[%s5333_s0 + $0x2b4] sm:$0xf0] }
 0x142   :  { %2170 = vmatmul.bf16.gmra.mxu3 %v2878_v0  ;;  %v3650_v0 = vld [vmem:[%s5333_s0 + $0x284] sm:$0xf] }
 0x143   :  { %2337 = vmatpush.bf16.msrb.mxu2 %v3781_v26  ;;  %v3083_v26 = vld [vmem:[%s5333_s0 + $0x38c] sm:$0xf0] }
 0x144   :  { %2112 = vmatmul.bf16.gmra.mxu2 %v2926_v47  ;;  %v3651_v47 = vld [vmem:[%s5333_s0 + $0x28c] sm:$0xf] }
 0x145   :  { %v1934_v10 = vpop.f32.mrf.mxu3 }
 0x146   :  { %v1935_v14 = vadd.f32 %v1934_v10, %v1872_v7  ;;  %v1810_v15 = vpop.f32.mrf.mxu1  ;;  %v1999_v6 = vpop.f32.mrf.mxu0  ;;  %v2979_v7 = vld [vmem:[%s5333_s0 + $0x2bc] sm:$0xf0]  ;;  %v3670_v10 = vld [vmem:[%s5333_s0 + $0x320] sm:$0xf0] }
 0x147   :  { %v1811_v19 = vadd.f32 %v1810_v15, %v4375_v41  ;;  %v1876_v17 = vpop.f32.mrf.mxu2  ;;  %v3645_v41 = vld [vmem:[%s5333_s0 + $0x258] sm:$0xf0]  ;;  %v2974_v15 = vor.u32 %v3650_v0, %v2971_v3  ;;  %v2982_v21 = vor.u32 %v3651_v47, %v2979_v7  ;;  %v3796_v3 = vld [vmem:[%s5331_s1 + $0x300] sm:$0xff] }
 0x148   :  { %v4681_v39 = vadd.f32 %v1997_v62, %v1935_v14  ;;  %v2934_v49 = vor.u32 %v3645_v41, %v2933_v23  ;;  %v3030_v41 = vor.u32 %v3670_v10, %v3029_v8  ;;  %2464 = vmatpush.bf16.msrb.mxu0 %v3796_v3  ;;  %v3690_v3 = vld [vmem:[%s5333_s0 + $0x3c4] sm:$0xf] }
 0x149   :  { %v1874_v20 = vadd.f32 %v1873_v1, %v1811_v19  ;;  %v2985_v1 = vld [vmem:[%s5333_s0 + $0x290] sm:$0xf] }
 0x14d   :  { %v1936_v59 = vpop.f32.mrf.mxu3 }
 0x14e   :  { %v1937_v33 = vadd.f32 %v1936_v59, %v1874_v20  ;;  %v1813_v53 = vpop.f32.mrf.mxu1  ;;  %v2002_v34 = vpop.f32.mrf.mxu0 }
 0x14f   :  { %v1814_v9 = vadd.f32 %v1813_v53, %v4272_v48  ;;  %v1878_v50 = vpop.f32.mrf.mxu2 }
 0x150   :  { %v4714_v51 = vadd.f32 %v1999_v6, %v1937_v33 }
 0x151   :  { %2049 = vmatmul.bf16.gmra.mxu1 %v2922_v30  ;;  %2238 = vmatmul.bf16.gmra.mxu0 %v2934_v49  ;;  %v1877_v52 = vadd.f32 %v1876_v17, %v1814_v9  ;;  %v3663_v9 = vld [vmem:[%s5333_s0 + $0x2ec] sm:$0xf] }
 0x152   :  { %2175 = vmatmul.bf16.gmra.mxu3 %v2930_v35 }
 0x154   :  { %2117 = vmatmul.bf16.gmra.mxu2 %v2978_v32  ;;  %v3671_v32 = vld [vmem:[%s5333_s0 + $0x328] sm:$0xf0] }
 0x155   :  { %v1939_v48 = vpop.f32.mrf.mxu3 }
 0x156   :  { %v1940_v54 = vadd.f32 %v1939_v48, %v1877_v52  ;;  %v1815_v55 = vpop.f32.mrf.mxu1  ;;  %v2004_v56 = vpop.f32.mrf.mxu0  ;;  %v3031_v52 = vld [vmem:[%s5333_s0 + $0x324] sm:$0xf0]  ;;  %v3683_v48 = vld [vmem:[%s5333_s0 + $0x388] sm:$0xf0] }
 0x157   :  { %v1816_v57 = vadd.f32 %v1815_v55, %v4309_v2  ;;  %v1881_v58 = vpop.f32.mrf.mxu2  ;;  %v3658_v2 = vld [vmem:[%s5333_s0 + $0x2c0] sm:$0xf0]  ;;  %v3034_v0 = vor.u32 %v3664_v45, %v3031_v52  ;;  %v3082_v47 = vor.u32 %v3683_v48, %v3081_v36 }
 0x158   :  { %v4720_v60 = vadd.f32 %v2002_v34, %v1940_v54  ;;  %v2986_v6 = vor.u32 %v3658_v2, %v2985_v1  ;;  %v3773_v34 = vld [vmem:[%s5331_s1 + $0x248] sm:$0xff] }
 0x159   :  { %v1879_v62 = vadd.f32 %v1878_v50, %v1816_v57  ;;  %2274 = vmatpush.bf16.msrb.mxu1 %v3773_v34  ;;  %v3023_v50 = vld [vmem:[%s5333_s0 + $0x31c] sm:$0xf0] }
 0x15a   :  { %v3026_v55 = vor.u32 %v3663_v9, %v3023_v50 }
 0x15d   :  { %v1941_v14 = vpop.f32.mrf.mxu3 }
 0x15e   :  { %v1942_v19 = vadd.f32 %v1941_v14, %v1879_v62  ;;  %v1818_v17 = vpop.f32.mrf.mxu1  ;;  %v2007_v20 = vpop.f32.mrf.mxu0 }
 0x15f   :  { %v1819_v22 = vadd.f32 %v1818_v17, %v4323_v12  ;;  %v1883_v23 = vpop.f32.mrf.mxu2  ;;  %v3789_v12 = vld [vmem:[%s5331_s1 + $0x2c8] sm:$0xff]  ;;  %v3780_v17 = vld [vmem:[%s5331_s1 + $0x280] sm:$0xff] }
 0x160   :  { %v4747_v16 = vadd.f32 %v2004_v56, %v1942_v19  ;;  %2400 = vmatpush.bf16.msrb.mxu3 %v3789_v12  ;;  %2338 = vmatpush.bf16.msrb.mxu2 %v3780_v17 }
 0x161   :  { %2054 = vmatmul.bf16.gmra.mxu1 %v2974_v15  ;;  %2243 = vmatmul.bf16.gmra.mxu0 %v2986_v6  ;;  %v1882_v40 = vadd.f32 %v1881_v58, %v1819_v22  ;;  %v3075_v22 = vld [vmem:[%s5333_s0 + $0x384] sm:$0xf0] }
 0x162   :  { %2180 = vmatmul.bf16.gmra.mxu3 %v2982_v21  ;;  %v3676_v21 = vld [vmem:[%s5333_s0 + $0x354] sm:$0xf] }
 0x164   :  { %2122 = vmatmul.bf16.gmra.mxu2 %v3030_v41  ;;  %v3684_v41 = vld [vmem:[%s5333_s0 + $0x390] sm:$0xf0] }
 0x165   :  { %v1944_v29 = vpop.f32.mrf.mxu3 }
 0x166   :  { %v1945_v59 = vadd.f32 %v1944_v29, %v1882_v40  ;;  %v1820_v30 = vpop.f32.mrf.mxu1  ;;  %v2009_v49 = vpop.f32.mrf.mxu0  ;;  %v3677_v40 = vld [vmem:[%s5333_s0 + $0x35c] sm:$0xf]  ;;  %v3133_v29 = vld [vmem:[%s5333_s0 + $0x3c0] sm:$0xf] }
 0x167   :  { %v1821_v33 = vadd.f32 %v1820_v30, %v4364_v31  ;;  %v1886_v53 = vpop.f32.mrf.mxu2  ;;  %v3037_v31 = vld [vmem:[%s5333_s0 + $0x2f8] sm:$0xf]  ;;  %v3086_v34 = vor.u32 %v3677_v40, %v3083_v26 }
 0x168   :  { %v4759_v35 = vadd.f32 %v2007_v20, %v1945_v59  ;;  %v3038_v56 = vor.u32 %v3671_v32, %v3037_v31  ;;  %v3696_v59 = vld [vmem:[%s5333_s0 + $0x3f0] sm:$0xf0] }
 0x169   :  { %v1884_v46 = vadd.f32 %v1883_v23, %v1821_v33  ;;  %v3089_v23 = vld [vmem:[%s5333_s0 + $0x360] sm:$0xf]  ;;  %v3134_v31 = vor.u32 %v3696_v59, %v3133_v29  ;;  %v4857_v59 = vld [vmem:[%s5333_s0 + $0x430] sm:$0x11] }
 0x16a   :  { %v3090_v12 = vor.u32 %v3684_v41, %v3089_v23 }
 0x16d   :  { %v1946_v54 = vpop.f32.mrf.mxu3 }
 0x16e   :  { %v1947_v57 = vadd.f32 %v1946_v54, %v1884_v46  ;;  %v1823_v58 = vpop.f32.mrf.mxu1  ;;  %v2012_v62 = vpop.f32.mrf.mxu0  ;;  %v3772_v46 = vld [vmem:[%s5331_s1 + $0x240] sm:$0xff] }
 0x16f   :  { %v1824_v1 = vadd.f32 %v1823_v58, %v4378_v43  ;;  %v1888_v2 = vpop.f32.mrf.mxu2  ;;  %v3788_v43 = vld [vmem:[%s5331_s1 + $0x2c0] sm:$0xff]  ;;  %2275 = vmatpush.bf16.msrb.mxu1 %v3772_v46  ;;  %v3689_v58 = vld [vmem:[%s5333_s0 + $0x3bc] sm:$0xf]  ;;  %v2681_v46 = vld [vmem:[%s5333_s0 + $0x28] sm:$0xf] }
 0x170   :  { %v4789_v7 = vadd.f32 %v2009_v49, %v1947_v57  ;;  %2401 = vmatpush.bf16.msrb.mxu3 %v3788_v43  ;;  %v3078_v49 = vor.u32 %v3676_v21, %v3075_v22 }
 0x171   :  { %2059 = vmatmul.bf16.gmra.mxu1 %v3026_v55  ;;  %2248 = vmatmul.bf16.gmra.mxu0 %v3038_v56  ;;  %v1887_v8 = vadd.f32 %v1886_v53, %v1824_v1  ;;  %v164_v56 = vld [vmem:[%s5333_s0 + $0x428] sm:$0x11]  ;;  %v3135_v1 = vld [vmem:[%s5333_s0 + $0x3f4] sm:$0xf0] }
 0x172   :  { %2185 = vmatmul.bf16.gmra.mxu3 %v3034_v0  ;;  %v3697_v0 = vld [vmem:[%s5333_s0 + $0x3f8] sm:$0xf0]  ;;  %v785_v2 = vunpack.c.l.b16 %v164_v56 }
 0x174   :  { %2127 = vmatmul.bf16.gmra.mxu2 %v3082_v47  ;;  %v928_v21 = vpack.c.b16 %v785_v2, %v785_v2 }
 0x175   :  { %v1949_v10 = vpop.f32.mrf.mxu3 }
 0x176   :  { %v1950_v14 = vadd.f32 %v1949_v10, %v1887_v8  ;;  %v1825_v15 = vpop.f32.mrf.mxu1  ;;  %v2014_v6 = vpop.f32.mrf.mxu0 }
 0x177   :  { %v2088_v19 = vpop.f32.mrf.mxu2 }
 0x178   :  { %v4797_v20 = vadd.f32 %v2012_v62, %v1950_v14  ;;  %v3127_v62 = vld [vmem:[%s5333_s0 + $0x3ec] sm:$0xf0] }
 0x179   :  { %v3130_v8 = vor.u32 %v3689_v58, %v3127_v62 }
 0x17d   :  { %v1951_v30 = vpop.f32.mrf.mxu3 }
 0x17e   :  { %v2025_v33 = vpop.f32.mrf.mxu1  ;;  %v2214_v53 = vpop.f32.mrf.mxu0 }
 0x17f   :  { %v2026_v9 = vadd.f32 %v2025_v33, %v4428_v28  ;;  %v2090_v50 = vpop.f32.mrf.mxu2  ;;  %v784_v33 = vunpack.c.h.b16 %v4466_v11 }
 0x181   :  { %2064 = vmatmul.bf16.gmra.mxu1 %v3078_v49  ;;  %2253 = vmatmul.bf16.gmra.mxu0 %v3090_v12  ;;  %v2089_v32 = vadd.f32 %v2088_v19, %v2026_v9  ;;  %v3138_v19 = vor.u32 %v3690_v3, %v3135_v1  ;;  %v3581_v9 = vld [vmem:[%s5333_s0 + $0x58] sm:$0xf0] }
 0x182   :  { %2190 = vmatmul.bf16.gmra.mxu3 %v3086_v34  ;;  %v786_v34 = vunpack.c.h.b16 %v164_v56 }
 0x184   :  { %2132 = vmatmul.bf16.gmra.mxu2 %v3134_v31  ;;  %v927_v31 = vpack.c.b16 %v784_v33, %v784_v33 }
 0x185   :  { %v2151_v45 = vpop.f32.mrf.mxu3 }
 0x186   :  { %v2152_v52 = vadd.f32 %v2151_v45, %v2089_v32  ;;  %v2027_v36 = vpop.f32.mrf.mxu1  ;;  %v2216_v48 = vpop.f32.mrf.mxu0 }
 0x187   :  { %v2028_v54 = vadd.f32 %v2027_v36, %v4453_v63  ;;  %v2093_v55 = vpop.f32.mrf.mxu2  ;;  %v3141_v63 = vld [vmem:[%s5333_s0 + $0x3c8] sm:$0xf]  ;;  %v929_v36 = vpack.c.b16 %v786_v34, %v786_v34 }
 0x188   :  { %v4831_v28 = vadd.f32 %v2214_v53, %v2152_v52  ;;  %v3142_v10 = vor.u32 %v3697_v0, %v3141_v63  ;;  %v787_v53 = vunpack.c.l.b16 %v4857_v59 }
 0x189   :  { %v2091_v57 = vadd.f32 %v2090_v50, %v2028_v54  ;;  %v2682_v54 = vor.u32 %v3581_v9, %v2681_v46 }
 0x18d   :  { %v2153_v47 = vpop.f32.mrf.mxu3 }
 0x18e   :  { %v2154_v14 = vadd.f32 %v2153_v47, %v2091_v57  ;;  %v2030_v15 = vpop.f32.mrf.mxu1  ;;  %v2219_v6 = vpop.f32.mrf.mxu0  ;;  %v2675_v47 = vld [vmem:[%s5333_s0 + $0x54] sm:$0xf0] }
 0x18f   :  { %v2031_v17 = vadd.f32 %v2030_v15, %v4471_v18  ;;  %v2095_v43 = vpop.f32.mrf.mxu2  ;;  %v2733_v15 = vld [vmem:[%s5333_s0 + $0x90] sm:$0xf] }
 0x190   :  { %v4852_v22 = vadd.f32 %v2216_v48, %v2154_v14  ;;  %v2683_v14 = vld [vmem:[%s5333_s0 + $0x5c] sm:$0xf0] }
 0x191   :  { %2069 = vmatmul.bf16.gmra.mxu1 %v3130_v8  ;;  %2258 = vmatmul.bf16.gmra.mxu0 %v3142_v10  ;;  %v2094_v23 = vadd.f32 %v2093_v55, %v2031_v17  ;;  %v2689_v8 = vld [vmem:[%s5333_s0 + $0x30] sm:$0xf]  ;;  %v3575_v10 = vld [vmem:[%s5333_s0 + $0x2c] sm:$0xf] }
 0x192   :  { %2195 = vmatmul.bf16.gmra.mxu3 %v3138_v19 }
 0x194   :  { %2137 = vmatmul.bf16.gmra.mxu2 %v928_v21 }
 0x195   :  { %v2156_v41 = vpop.f32.mrf.mxu3 }
 0x196   :  { %v2157_v40 = vadd.f32 %v2156_v41, %v2094_v23  ;;  %v2032_v26 = vpop.f32.mrf.mxu1  ;;  %v2221_v29 = vpop.f32.mrf.mxu0 }
 0x197   :  { %v2033_v18 = vadd.f32 %v2032_v26, %v4483_v37  ;;  %v2098_v30 = vpop.f32.mrf.mxu2  ;;  %v930_v37 = vpack.c.b16 %v787_v53, %v787_v53 }
 0x198   :  { %v4860_v49 = vadd.f32 %v2219_v6, %v2157_v40  ;;  %v3594_v6 = vld [vmem:[%s5333_s0 + $0xc0] sm:$0xf0]  ;;  %v2686_v40 = vor.u32 %v3575_v10, %v2683_v14 }
 0x199   :  { %v2096_v12 = vadd.f32 %v2095_v43, %v2033_v18  ;;  %v2734_v18 = vor.u32 %v3594_v6, %v2733_v15 }
 0x19d   :  { %v2158_v50 = vpop.f32.mrf.mxu3 }
 0x19e   :  { %v2159_v32 = vadd.f32 %v2158_v50, %v2096_v12  ;;  %v2035_v45 = vpop.f32.mrf.mxu1  ;;  %v2224_v52 = vpop.f32.mrf.mxu0 }
 0x19f   :  { %v2036_v11 = vadd.f32 %v2035_v45, %v4496_v44  ;;  %v2100_v48 = vpop.f32.mrf.mxu2  ;;  %v3574_v44 = vld [vmem:[%s5333_s0 + $0x24] sm:$0xf]  ;;  %v2741_v45 = vld [vmem:[%s5333_s0 + $0x98] sm:$0xf] }
 0x1a0   :  { %v4871_v55 = vadd.f32 %v2221_v29, %v2159_v32  ;;  %v2678_v17 = vor.u32 %v3574_v44, %v2675_v47  ;;  %v2727_v32 = vld [vmem:[%s5333_s0 + $0xbc] sm:$0xf0] }
 0x1a1   :  { %2074 = vmatmul.bf16.gmra.mxu1 %v927_v31  ;;  %2263 = vmatmul.bf16.gmra.mxu0 %v930_v37  ;;  %v2099_v56 = vadd.f32 %v2098_v30, %v2036_v11  ;;  %v3587_v37 = vld [vmem:[%s5333_s0 + $0x8c] sm:$0xf]  ;;  %v2785_v11 = vld [vmem:[%s5333_s0 + $0xf8] sm:$0xf] }
 0x1a2   :  { %2200 = vmatmul.bf16.gmra.mxu3 %v929_v36  ;;  %v2735_v36 = vld [vmem:[%s5333_s0 + $0xc4] sm:$0xf0] }
 0x1a4   :  { %2339 = vmatmul.bf16.vlgmr.msrb.gmra.mxu2 %v2682_v54 }
 0x1a5   :  { %v2161_v57 = vpop.f32.mrf.mxu3 }
 0x1a6   :  { %v2162_v58 = vadd.f32 %v2161_v57, %v2099_v56  ;;  %v2037_v62 = vpop.f32.mrf.mxu1  ;;  %v2226_v63 = vpop.f32.mrf.mxu0  ;;  %v2730_v56 = vor.u32 %v3587_v37, %v2727_v32 }
 0x1a7   :  { %v2038_v0 = vadd.f32 %v2037_v62, %v4524_v24  ;;  %v2103_v3 = vpop.f32.mrf.mxu2  ;;  %v3582_v24 = vld [vmem:[%s5333_s0 + $0x60] sm:$0xf0] }
 0x1a8   :  { %v4874_v1 = vadd.f32 %v2224_v52, %v2162_v58  ;;  %v2690_v43 = vor.u32 %v3582_v24, %v2689_v8  ;;  %v3588_v52 = vld [vmem:[%s5333_s0 + $0x94] sm:$0xf] }
 0x1a9   :  { %v2101_v2 = vadd.f32 %v2100_v48, %v2038_v0  ;;  %v3607_v48 = vld [vmem:[%s5333_s0 + $0x128] sm:$0xf0]  ;;  %v2738_v0 = vor.u32 %v3588_v52, %v2735_v36 }
 0x1aa   :  { %v2786_v44 = vor.u32 %v3607_v48, %v2785_v11 }
 0x1ad   :  { %v2163_v19 = vpop.f32.mrf.mxu3 }
 0x1ae   :  { %v2164_v21 = vadd.f32 %v2163_v19, %v2101_v2  ;;  %v2040_v23 = vpop.f32.mrf.mxu1  ;;  %v2229_v41 = vpop.f32.mrf.mxu0 }
 0x1af   :  { %v2041_v26 = vadd.f32 %v2040_v23, %v4531_v27  ;;  %v2105_v29 = vpop.f32.mrf.mxu2  ;;  %v2793_v23 = vld [vmem:[%s5333_s0 + $0x100] sm:$0xf] }
 0x1b0   :  { %v4901_v30 = vadd.f32 %v2226_v63, %v2164_v21  ;;  %v2779_v21 = vld [vmem:[%s5333_s0 + $0x124] sm:$0xf0] }
 0x1b1   :  { %2276 = vmatmul.bf16.vlgmr.msrb.gmra.mxu1 %v2678_v17  ;;  %3559 = vmatmul.msk.bf16.vlgmr.msrb.gmra.mxu0 %vm1667_vm0, %v2690_v43  ;;  %v2104_v12 = vadd.f32 %v2103_v3, %v2041_v26  ;;  %v3600_v43 = vld [vmem:[%s5333_s0 + $0xf4] sm:$0xf]  ;;  %v2837_v26 = vld [vmem:[%s5333_s0 + $0x160] sm:$0xf] }
 0x1b2   :  { %2402 = vmatmul.bf16.vlgmr.msrb.gmra.mxu3 %v2686_v40  ;;  %v2787_v40 = vld [vmem:[%s5333_s0 + $0x12c] sm:$0xf0] }
 0x1b4   :  { %2344 = vmatmul.bf16.gmra.mxu2 %v2734_v18 }
 0x1b5   :  { %v2166_v33 = vpop.f32.mrf.mxu3 }
 0x1b6   :  { %v2167_v53 = vadd.f32 %v2166_v33, %v2104_v12  ;;  %v2042_v34 = vpop.f32.mrf.mxu1  ;;  %v2231_v46 = vpop.f32.mrf.mxu0  ;;  %v2782_v12 = vor.u32 %v3600_v43, %v2779_v21 }
 0x1b7   :  { %v2043_v9 = vadd.f32 %v2042_v34, %v4564_v5  ;;  %v2108_v50 = vpop.f32.mrf.mxu2  ;;  %v3595_v5 = vld [vmem:[%s5333_s0 + $0xc8] sm:$0xf0] }
 0x1b8   :  { %v4905_v31 = vadd.f32 %v2229_v41, %v2167_v53  ;;  %v2742_v57 = vor.u32 %v3595_v5, %v2741_v45  ;;  %v3601_v41 = vld [vmem:[%s5333_s0 + $0xfc] sm:$0xf] }
 0x1b9   :  { %v2106_v27 = vadd.f32 %v2105_v29, %v2043_v9  ;;  %v3620_v29 = vld [vmem:[%s5333_s0 + $0x190] sm:$0xf0]  ;;  %v2790_v9 = vor.u32 %v3601_v41, %v2787_v40 }
 0x1ba   :  { %v2838_v37 = vor.u32 %v3620_v29, %v2837_v26 }
 0x1bd   :  { %v2168_v54 = vpop.f32.mrf.mxu3 }
 0x1be   :  { %v2169_v58 = vadd.f32 %v2168_v54, %v2106_v27  ;;  %v2045_v62 = vpop.f32.mrf.mxu1  ;;  %v2234_v63 = vpop.f32.mrf.mxu0 }
 0x1bf   :  { %v2046_v3 = vadd.f32 %v2045_v62, %v4570_v13  ;;  %v2110_v2 = vpop.f32.mrf.mxu2  ;;  %v2845_v62 = vld [vmem:[%s5333_s0 + $0x168] sm:$0xf] }
 0x1c0   :  { %v4932_v47 = vadd.f32 %v2231_v46, %v2169_v58  ;;  %v2831_v58 = vld [vmem:[%s5333_s0 + $0x18c] sm:$0xf0] }
 0x1c1   :  { %2281 = vmatmul.bf16.gmra.mxu1 %v2730_v56  ;;  %3560 = vmatmul.msk.bf16.gmra.mxu0 %vm1667_vm0, %v2742_v57  ;;  %v2109_v8 = vadd.f32 %v2108_v50, %v2046_v3  ;;  %v3613_v57 = vld [vmem:[%s5333_s0 + $0x15c] sm:$0xf]  ;;  %v2889_v3 = vld [vmem:[%s5333_s0 + $0x1c8] sm:$0xf] }
 0x1c2   :  { %2407 = vmatmul.bf16.gmra.mxu3 %v2738_v0  ;;  %v2839_v0 = vld [vmem:[%s5333_s0 + $0x194] sm:$0xf0] }
 0x1c4   :  { %2349 = vmatmul.bf16.gmra.mxu2 %v2786_v44 }
 0x1c5   :  { %v2171_v24 = vpop.f32.mrf.mxu3 }
 0x1c6   :  { %v2172_v10 = vadd.f32 %v2171_v24, %v2109_v8  ;;  %v2047_v14 = vpop.f32.mrf.mxu1  ;;  %v2236_v15 = vpop.f32.mrf.mxu0  ;;  %v2834_v8 = vor.u32 %v3613_v57, %v2831_v58 }
 0x1c7   :  { %v2048_v6 = vadd.f32 %v2047_v14, %v4597_v42  ;;  %v2113_v19 = vpop.f32.mrf.mxu2  ;;  %v3608_v42 = vld [vmem:[%s5333_s0 + $0x130] sm:$0xf0] }
 0x1c8   :  { %v4936_v17 = vadd.f32 %v2234_v63, %v2172_v10  ;;  %v2794_v33 = vor.u32 %v3608_v42, %v2793_v23  ;;  %v3614_v63 = vld [vmem:[%s5333_s0 + $0x164] sm:$0xf] }
 0x1c9   :  { %v2111_v13 = vadd.f32 %v2110_v2, %v2048_v6  ;;  %v3633_v2 = vld [vmem:[%s5333_s0 + $0x1f8] sm:$0xf0]  ;;  %v2842_v6 = vor.u32 %v3614_v63, %v2839_v0 }
 0x1ca   :  { %v2890_v43 = vor.u32 %v3633_v2, %v2889_v3 }
 0x1cd   :  { %v2173_v18 = vpop.f32.mrf.mxu3 }
 0x1ce   :  { %v2174_v53 = vadd.f32 %v2173_v18, %v2111_v13  ;;  %v2050_v34 = vpop.f32.mrf.mxu1  ;;  %v2239_v46 = vpop.f32.mrf.mxu0 }
 0x1cf   :  { %v2051_v50 = vadd.f32 %v2050_v34, %v4609_v61  ;;  %v2115_v27 = vpop.f32.mrf.mxu2  ;;  %v2897_v34 = vld [vmem:[%s5333_s0 + $0x1d0] sm:$0xf] }
 0x1d0   :  { %v4963_v32 = vadd.f32 %v2236_v15, %v2174_v53  ;;  %v2883_v53 = vld [vmem:[%s5333_s0 + $0x1f4] sm:$0xf0] }
 0x1d1   :  { %2286 = vmatmul.bf16.gmra.mxu1 %v2782_v12  ;;  %3561 = vmatmul.msk.bf16.gmra.mxu0 %vm1667_vm0, %v2794_v33  ;;  %v2114_v45 = vadd.f32 %v2113_v19, %v2051_v50  ;;  %v3626_v33 = vld [vmem:[%s5333_s0 + $0x1c4] sm:$0xf]  ;;  %v2941_v50 = vld [vmem:[%s5333_s0 + $0x230] sm:$0xf] }
 0x1d2   :  { %2412 = vmatmul.bf16.gmra.mxu3 %v2790_v9  ;;  %v2891_v9 = vld [vmem:[%s5333_s0 + $0x1fc] sm:$0xf0] }
 0x1d4   :  { %2354 = vmatmul.bf16.gmra.mxu2 %v2838_v37 }
 0x1d5   :  { %v2176_v5 = vpop.f32.mrf.mxu3 }
 0x1d6   :  { %v2177_v52 = vadd.f32 %v2176_v5, %v2114_v45  ;;  %v2052_v36 = vpop.f32.mrf.mxu1  ;;  %v2241_v11 = vpop.f32.mrf.mxu0  ;;  %v2886_v45 = vor.u32 %v3626_v33, %v2883_v53 }
 0x1d7   :  { %v2053_v48 = vadd.f32 %v2052_v36, %v4636_v25  ;;  %v2118_v54 = vpop.f32.mrf.mxu2  ;;  %v3621_v25 = vld [vmem:[%s5333_s0 + $0x198] sm:$0xf0] }
 0x1d8   :  { %v4967_v56 = vadd.f32 %v2239_v46, %v2177_v52  ;;  %v2846_v24 = vor.u32 %v3621_v25, %v2845_v62  ;;  %v3627_v46 = vld [vmem:[%s5333_s0 + $0x1cc] sm:$0xf] }
 0x1d9   :  { %v2116_v61 = vadd.f32 %v2115_v27, %v2053_v48  ;;  %v3646_v27 = vld [vmem:[%s5333_s0 + $0x260] sm:$0xf0]  ;;  %v2894_v48 = vor.u32 %v3627_v46, %v2891_v9 }
 0x1da   :  { %v2942_v57 = vor.u32 %v3646_v27, %v2941_v50 }
 0x1dd   :  { %v2178_v44 = vpop.f32.mrf.mxu3 }
 0x1de   :  { %v2179_v10 = vadd.f32 %v2178_v44, %v2116_v61  ;;  %v2055_v14 = vpop.f32.mrf.mxu1  ;;  %v2244_v15 = vpop.f32.mrf.mxu0 }
 0x1df   :  { %v2056_v19 = vadd.f32 %v2055_v14, %v4648_v38  ;;  %v2120_v13 = vpop.f32.mrf.mxu2  ;;  %v2949_v14 = vld [vmem:[%s5333_s0 + $0x238] sm:$0xf] }
 0x1e0   :  { %v4994_v21 = vadd.f32 %v2241_v11, %v2179_v10  ;;  %v2935_v10 = vld [vmem:[%s5333_s0 + $0x25c] sm:$0xf0] }
 0x1e1   :  { %2291 = vmatmul.bf16.gmra.mxu1 %v2834_v8  ;;  %3562 = vmatmul.msk.bf16.gmra.mxu0 %vm1667_vm0, %v2846_v24  ;;  %v2119_v23 = vadd.f32 %v2118_v54, %v2056_v19  ;;  %v3639_v24 = vld [vmem:[%s5333_s0 + $0x22c] sm:$0xf]  ;;  %v2993_v19 = vld [vmem:[%s5333_s0 + $0x298] sm:$0xf] }
 0x1e2   :  { %2417 = vmatmul.bf16.gmra.mxu3 %v2842_v6  ;;  %v2943_v6 = vld [vmem:[%s5333_s0 + $0x264] sm:$0xf0] }
 0x1e4   :  { %2359 = vmatmul.bf16.gmra.mxu2 %v2890_v43 }
 0x1e5   :  { %v2181_v42 = vpop.f32.mrf.mxu3 }
 0x1e6   :  { %v2182_v41 = vadd.f32 %v2181_v42, %v2119_v23  ;;  %v2057_v40 = vpop.f32.mrf.mxu1  ;;  %v2246_v26 = vpop.f32.mrf.mxu0  ;;  %v2938_v23 = vor.u32 %v3639_v24, %v2935_v10 }
 0x1e7   :  { %v2058_v29 = vadd.f32 %v2057_v40, %v4675_v4  ;;  %v2123_v18 = vpop.f32.mrf.mxu2  ;;  %v3634_v4 = vld [vmem:[%s5333_s0 + $0x200] sm:$0xf0] }
 0x1e8   :  { %v4998_v12 = vadd.f32 %v2244_v15, %v2182_v41  ;;  %v2898_v5 = vor.u32 %v3634_v4, %v2897_v34  ;;  %v3640_v15 = vld [vmem:[%s5333_s0 + $0x234] sm:$0xf] }
 0x1e9   :  { %v2121_v38 = vadd.f32 %v2120_v13, %v2058_v29  ;;  %v3659_v13 = vld [vmem:[%s5333_s0 + $0x2c8] sm:$0xf0]  ;;  %v2946_v29 = vor.u32 %v3640_v15, %v2943_v6 }
 0x1ea   :  { %v2994_v33 = vor.u32 %v3659_v13, %v2993_v19 }
 0x1ed   :  { %v2183_v37 = vpop.f32.mrf.mxu3 }
 0x1ee   :  { %v2184_v52 = vadd.f32 %v2183_v37, %v2121_v38  ;;  %v2060_v36 = vpop.f32.mrf.mxu1  ;;  %v2249_v11 = vpop.f32.mrf.mxu0 }
 0x1ef   :  { %v2061_v54 = vadd.f32 %v2060_v36, %v4681_v39  ;;  %v2125_v61 = vpop.f32.mrf.mxu2  ;;  %v3001_v36 = vld [vmem:[%s5333_s0 + $0x2a0] sm:$0xf] }
 0x1f0   :  { %v5025_v58 = vadd.f32 %v2246_v26, %v2184_v52  ;;  %v2987_v52 = vld [vmem:[%s5333_s0 + $0x2c4] sm:$0xf0] }
 0x1f1   :  { %2296 = vmatmul.bf16.gmra.mxu1 %v2886_v45  ;;  %3563 = vmatmul.msk.bf16.gmra.mxu0 %vm1667_vm0, %v2898_v5  ;;  %v2124_v62 = vadd.f32 %v2123_v18, %v2061_v54  ;;  %v3652_v5 = vld [vmem:[%s5333_s0 + $0x294] sm:$0xf]  ;;  %v3045_v54 = vld [vmem:[%s5333_s0 + $0x300] sm:$0xf] }
 0x1f2   :  { %2422 = vmatmul.bf16.gmra.mxu3 %v2894_v48  ;;  %v2995_v48 = vld [vmem:[%s5333_s0 + $0x2cc] sm:$0xf0] }
 0x1f4   :  { %2364 = vmatmul.bf16.gmra.mxu2 %v2942_v57 }
 0x1f5   :  { %v2186_v25 = vpop.f32.mrf.mxu3 }
 0x1f6   :  { %v2187_v63 = vadd.f32 %v2186_v25, %v2124_v62  ;;  %v2062_v0 = vpop.f32.mrf.mxu1  ;;  %v2251_v3 = vpop.f32.mrf.mxu0  ;;  %v2990_v62 = vor.u32 %v3652_v5, %v2987_v52 }
 0x1f7   :  { %v2063_v2 = vadd.f32 %v2062_v0, %v4714_v51  ;;  %v2128_v44 = vpop.f32.mrf.mxu2  ;;  %v3647_v51 = vld [vmem:[%s5333_s0 + $0x268] sm:$0xf0] }
 0x1f8   :  { %v5029_v8 = vadd.f32 %v2249_v11, %v2187_v63  ;;  %v2950_v42 = vor.u32 %v3647_v51, %v2949_v14  ;;  %v3653_v11 = vld [vmem:[%s5333_s0 + $0x29c] sm:$0xf] }
 0x1f9   :  { %v2126_v39 = vadd.f32 %v2125_v61, %v2063_v2  ;;  %v3672_v61 = vld [vmem:[%s5333_s0 + $0x330] sm:$0xf0]  ;;  %v2998_v2 = vor.u32 %v3653_v11, %v2995_v48 }
 0x1fa   :  { %v3046_v24 = vor.u32 %v3672_v61, %v3045_v54 }
 0x1fd   :  { %v2188_v43 = vpop.f32.mrf.mxu3 }
 0x1fe   :  { %v2189_v41 = vadd.f32 %v2188_v43, %v2126_v39  ;;  %v2065_v40 = vpop.f32.mrf.mxu1  ;;  %v2254_v26 = vpop.f32.mrf.mxu0 }
 0x1ff   :  { %v2066_v18 = vadd.f32 %v2065_v40, %v4720_v60  ;;  %v2130_v38 = vpop.f32.mrf.mxu2  ;;  %v3053_v40 = vld [vmem:[%s5333_s0 + $0x308] sm:$0xf] }
 0x200   :  { %v5056_v53 = vadd.f32 %v2251_v3, %v2189_v41  ;;  %v3039_v41 = vld [vmem:[%s5333_s0 + $0x32c] sm:$0xf0] }
 0x201   :  { %2301 = vmatmul.bf16.gmra.mxu1 %v2938_v23  ;;  %3564 = vmatmul.msk.bf16.gmra.mxu0 %vm1667_vm0, %v2950_v42  ;;  %v2129_v34 = vadd.f32 %v2128_v44, %v2066_v18  ;;  %v3665_v42 = vld [vmem:[%s5333_s0 + $0x2fc] sm:$0xf]  ;;  %v3097_v18 = vld [vmem:[%s5333_s0 + $0x368] sm:$0xf] }
 0x202   :  { %2427 = vmatmul.bf16.gmra.mxu3 %v2946_v29  ;;  %v3047_v29 = vld [vmem:[%s5333_s0 + $0x334] sm:$0xf0] }
 0x204   :  { %2369 = vmatmul.bf16.gmra.mxu2 %v2994_v33 }
 0x205   :  { %v2191_v4 = vpop.f32.mrf.mxu3 }
 0x206   :  { %v2192_v46 = vadd.f32 %v2191_v4, %v2129_v34  ;;  %v2067_v9 = vpop.f32.mrf.mxu1  ;;  %v2256_v50 = vpop.f32.mrf.mxu0  ;;  %v3042_v34 = vor.u32 %v3665_v42, %v3039_v41 }
 0x207   :  { %v2068_v27 = vadd.f32 %v2067_v9, %v4747_v16  ;;  %v2133_v37 = vpop.f32.mrf.mxu2  ;;  %v3660_v16 = vld [vmem:[%s5333_s0 + $0x2d0] sm:$0xf0] }
 0x208   :  { %v5060_v45 = vadd.f32 %v2254_v26, %v2192_v46  ;;  %v3002_v25 = vor.u32 %v3660_v16, %v3001_v36  ;;  %v3666_v26 = vld [vmem:[%s5333_s0 + $0x304] sm:$0xf] }
 0x209   :  { %v2131_v60 = vadd.f32 %v2130_v38, %v2068_v27  ;;  %v3685_v38 = vld [vmem:[%s5333_s0 + $0x398] sm:$0xf0]  ;;  %v3050_v27 = vor.u32 %v3666_v26, %v3047_v29 }
 0x20a   :  { %v3098_v5 = vor.u32 %v3685_v38, %v3097_v18  ;;  %v5152_v18 = vld [vmem:[%s5334_s3] ss:$0 sm:$0xff] }
 0x20d   :  { %v2193_v57 = vpop.f32.mrf.mxu3 }
 0x20e   :  { %v2194_v63 = vadd.f32 %v2193_v57, %v2131_v60  ;;  %v2070_v0 = vpop.f32.mrf.mxu1  ;;  %v2259_v3 = vpop.f32.mrf.mxu0 }
 0x20f   :  { %v2071_v44 = vadd.f32 %v2070_v0, %v4759_v35  ;;  %v2135_v39 = vpop.f32.mrf.mxu2  ;;  %v3679_v0 = vld [vmem:[%s5333_s0 + $0x36c] sm:$0xf] }
 0x210   :  { %v5087_v10 = vadd.f32 %v2256_v50, %v2194_v63  ;;  %v3686_v63 = vld [vmem:[%s5333_s0 + $0x3a0] sm:$0xf0] }
 0x211   :  { %2306 = vmatmul.bf16.gmra.mxu1 %v2990_v62  ;;  %3565 = vmatmul.msk.bf16.gmra.mxu0 %vm1667_vm0, %v3002_v25  ;;  %v2134_v14 = vadd.f32 %v2133_v37, %v2071_v44  ;;  %v3091_v62 = vld [vmem:[%s5333_s0 + $0x394] sm:$0xf0]  ;;  %v3105_v25 = vld [vmem:[%s5333_s0 + $0x370] sm:$0xf]  ;;  %v3698_v44 = vld [vmem:[%s5333_s0 + $0x400] sm:$0xf0] }
 0x212   :  { %2432 = vmatmul.bf16.gmra.mxu3 %v2998_v2  ;;  %v3149_v2 = vld [vmem:[%s5333_s0 + $0x3d0] sm:$0xf] }
 0x214   :  { %2374 = vmatmul.bf16.gmra.mxu2 %v3046_v24 }
 0x215   :  { %v2196_v51 = vpop.f32.mrf.mxu3 }
 0x216   :  { %v2197_v15 = vadd.f32 %v2196_v51, %v2134_v14  ;;  %v2072_v6 = vpop.f32.mrf.mxu1  ;;  %v2261_v19 = vpop.f32.mrf.mxu0  ;;  %v3106_v14 = vor.u32 %v3686_v63, %v3105_v25 }
 0x217   :  { %v2073_v13 = vadd.f32 %v2072_v6, %v4789_v7  ;;  %v2138_v43 = vpop.f32.mrf.mxu2  ;;  %v3673_v7 = vld [vmem:[%s5333_s0 + $0x338] sm:$0xf0] }
 0x218   :  { %v5091_v23 = vadd.f32 %v2259_v3, %v2197_v15  ;;  %v3054_v4 = vor.u32 %v3673_v7, %v3053_v40  ;;  %v3099_v3 = vld [vmem:[%s5333_s0 + $0x39c] sm:$0xf0] }
 0x219   :  { %v2136_v35 = vadd.f32 %v2135_v39, %v2073_v13  ;;  %v3102_v6 = vor.u32 %v3679_v0, %v3099_v3  ;;  %v3150_v13 = vor.u32 %v3698_v44, %v3149_v2 }
 0x21d   :  { %v2198_v33 = vpop.f32.mrf.mxu3 }
 0x21e   :  { %v2199_v46 = vadd.f32 %v2198_v33, %v2136_v35  ;;  %v2075_v9 = vpop.f32.mrf.mxu1  ;;  %v2264_v50 = vpop.f32.mrf.mxu0  ;;  %v5161_v33 = vld [vmem:[%s5335_s4] ss:$0 sm:$0xff] }
 0x21f   :  { %v2076_v37 = vadd.f32 %v2075_v9, %v4797_v20  ;;  %v2140_v60 = vpop.f32.mrf.mxu2  ;;  %v3678_v20 = vld [vmem:[%s5333_s0 + $0x364] sm:$0xf]  ;;  %v3699_v9 = vld [vmem:[%s5333_s0 + $0x408] sm:$0xf0] }
 0x220   :  { %v5118_v52 = vadd.f32 %v2261_v19, %v2199_v46  ;;  %v3094_v24 = vor.u32 %v3678_v20, %v3091_v62 }
 0x221   :  { %2311 = vmatmul.bf16.gmra.mxu1 %v3042_v34  ;;  %3566 = vmatmul.msk.bf16.gmra.mxu0 %vm1667_vm0, %v3054_v4  ;;  %v2139_v36 = vadd.f32 %v2138_v43, %v2076_v37  ;;  %v3691_v34 = vld [vmem:[%s5333_s0 + $0x3cc] sm:$0xf]  ;;  %v3143_v4 = vld [vmem:[%s5333_s0 + $0x3fc] sm:$0xf0] }
 0x222   :  { %2437 = vmatmul.bf16.gmra.mxu3 %v3050_v27  ;;  %v3151_v27 = vld [vmem:[%s5333_s0 + $0x404] sm:$0xf0] }
 0x224   :  { %2379 = vmatmul.bf16.gmra.mxu2 %v3098_v5 }
 0x225   :  { %v2201_v16 = vpop.f32.mrf.mxu3 }
 0x226   :  { %v2202_v11 = vadd.f32 %v2201_v16, %v2139_v36  ;;  %v2077_v48 = vpop.f32.mrf.mxu1  ;;  %v2266_v54 = vpop.f32.mrf.mxu0  ;;  %v3146_v16 = vor.u32 %v3691_v34, %v3143_v4 }
 0x227   :  { %v2340_v61 = vpop.f32.mrf.mxu2 }
 0x228   :  { %v5121_v57 = vadd.f32 %v2264_v50, %v2202_v11  ;;  %v3692_v50 = vld [vmem:[%s5333_s0 + $0x3d4] sm:$0xf] }
 0x229   :  { %v3154_v62 = vor.u32 %v3692_v50, %v3151_v27 }
 0x22d   :  { %v2203_v39 = vpop.f32.mrf.mxu3 }
 0x22e   :  { %v2277_v51 = vpop.f32.mrf.mxu1  ;;  %v2466_v15 = vpop.f32.mrf.mxu0 }
 0x22f   :  { %v2342_v19 = vpop.f32.mrf.mxu2  ;;  %v2278_v43 = vadd.f32 %v2277_v51, %v4831_v28  ;;  %v166_v28 = vld [vmem:[%s5333_s0 + $0x438] sm:$0x11] }
 0x230   :  { %v789_v37 = vunpack.c.l.b16 %v166_v28 }
 0x231   :  { %2316 = vmatmul.bf16.gmra.mxu1 %v3094_v24  ;;  %3567 = vmatmul.msk.bf16.gmra.mxu0 %vm1667_vm0, %v3106_v14  ;;  %v2341_v35 = vadd.f32 %v2340_v61, %v2278_v43 }
 0x232   :  { %2442 = vmatmul.bf16.gmra.mxu3 %v3102_v6  ;;  %v932_v63 = vpack.c.b16 %v789_v37, %v789_v37 }
 0x234   :  { %2384 = vmatmul.bf16.gmra.mxu2 %v3150_v13 }
 0x235   :  { %v2403_v42 = vpop.f32.mrf.mxu3 }
 0x236   :  { %v2404_v41 = vadd.f32 %v2403_v42, %v2341_v35  ;;  %v2279_v40 = vpop.f32.mrf.mxu1  ;;  %v2468_v7 = vpop.f32.mrf.mxu0 }
 0x237   :  { %v2345_v26 = vpop.f32.mrf.mxu2  ;;  %v2280_v38 = vadd.f32 %v2279_v40, %v4852_v22  ;;  %v3157_v22 = vld [vmem:[%s5333_s0 + $0x3d8] sm:$0xf] }
 0x238   :  { %v2467_v29 = vadd.f32 %v2466_v15, %v2404_v41  ;;  %v3158_v11 = vor.u32 %v3699_v9, %v3157_v22  ;;  %v788_v41 = vunpack.c.h.b16 %v4857_v59 }
 0x239   :  { %v2343_v5 = vadd.f32 %v2342_v19, %v2280_v38  ;;  %v167_v19 = vld [vmem:[%s5333_s0 + $0x440] sm:$0x1] }
 0x23a   :  { %v2520_v46 = vmax.f32 %v2467_v29, 0.0  ;;  %v791_v40 = vunpack.c.l.b16 %v167_v19  ;;  %v931_v4 = vpack.c.b16 %v788_v41, %v788_v41 }
 0x23c   :  { %v2545_v60 = vmul.f32 %v5152_v18, %v2520_v46  ;;  %v934_v46 = vpack.c.b16 %v791_v40, %v791_v40 }
 0x23d   :  { %v2405_v36 = vpop.f32.mrf.mxu3 }
 0x23e   :  { %v2570_v48 = vadd.f32 %v5161_v33, %v2545_v60  ;;  %v2406_v54 = vadd.f32 %v2405_v36, %v2343_v5  ;;  %v2282_v61 = vpop.f32.mrf.mxu1  ;;  %v2471_v20 = vpop.f32.mrf.mxu0 }
 0x23f   :  { %v2347_v25 = vpop.f32.mrf.mxu2  ;;  %v2283_v2 = vadd.f32 %v2282_v61, %v4860_v49 }
 0x240   :  { %v2591_v0 = vpack.c.bf16 %v2570_v48, %v2570_v48  ;;  %v2469_v3 = vadd.f32 %v2468_v7, %v2406_v54 }
 0x241   :  { %2321 = vmatmul.bf16.gmra.mxu1 %v3146_v16  ;;  %3568 = vmatmul.msk.bf16.gmra.mxu0 %vm1667_vm0, %v3158_v11  ;;  %v2346_v24 = vadd.f32 %v2345_v26, %v2283_v2  ;;  %v790_v26 = vunpack.c.h.b16 %v166_v28 }
 0x242   :  { %2613 = vst.msk [vmem:[%s5336_s5] sm:$0xf] %vm2612_vm1, %v2591_v0  ;;  %v2521_v44 = vmax.f32 %v2469_v3, 0.0  ;;  %2447 = vmatmul.bf16.gmra.mxu3 %v3154_v62 }
 0x243   :  { %v933_v59 = vpack.c.b16 %v790_v26, %v790_v26 }
 0x244   :  { %2389 = vmatmul.bf16.gmra.mxu2 %v932_v63  ;;  %v2546_v39 = vmul.f32 %v5152_v18, %v2521_v44 }
 0x245   :  { %v2408_v14 = vpop.f32.mrf.mxu3 }
 0x246   :  { %v2571_v51 = vadd.f32 %v5161_v33, %v2546_v39  ;;  %v2409_v15 = vadd.f32 %v2408_v14, %v2346_v24  ;;  %v2284_v6 = vpop.f32.mrf.mxu1  ;;  %v2473_v49 = vpop.f32.mrf.mxu0 }
 0x247   :  { %v2350_v13 = vpop.f32.mrf.mxu2  ;;  %v2285_v42 = vadd.f32 %v2284_v6, %v4871_v55 }
 0x248   :  { %v2592_v43 = vpack.c.bf16 %v2571_v51, %v2571_v51  ;;  %v2472_v35 = vadd.f32 %v2471_v20, %v2409_v15 }
 0x249   :  { %v2348_v38 = vadd.f32 %v2347_v25, %v2285_v42 }
 0x24a   :  { %2614 = vst.msk [vmem:[%s5336_s5 + $0x4] sm:$0xf] %vm2612_vm1, %v2592_v43  ;;  %v2522_v7 = vmax.f32 %v2472_v35, 0.0 }
 0x24c   :  { %v2547_v29 = vmul.f32 %v5152_v18, %v2522_v7 }
 0x24d   :  { %v2410_v34 = vpop.f32.mrf.mxu3 }
 0x24e   :  { %v2572_v22 = vadd.f32 %v5161_v33, %v2547_v29  ;;  %v2411_v9 = vadd.f32 %v2410_v34, %v2348_v38  ;;  %v2287_v55 = vpop.f32.mrf.mxu1  ;;  %v2476_v50 = vpop.f32.mrf.mxu0 }
 0x24f   :  { %v2352_v27 = vpop.f32.mrf.mxu2  ;;  %v2288_v5 = vadd.f32 %v2287_v55, %v4874_v1 }
 0x250   :  { %v2593_v37 = vpack.c.bf16 %v2572_v22, %v2572_v22  ;;  %v2474_v60 = vadd.f32 %v2473_v49, %v2411_v9 }
 0x251   :  { %2326 = vmatmul.bf16.gmra.mxu1 %v931_v4  ;;  %3569 = vmatmul.msk.bf16.gmra.mxu0 %vm1667_vm0, %v934_v46  ;;  %v2351_v16 = vadd.f32 %v2350_v13, %v2288_v5 }
 0x252   :  { %2615 = vst.msk [vmem:[%s5336_s5 + $0x8] sm:$0xf] %vm2612_vm1, %v2593_v37  ;;  %v2523_v28 = vmax.f32 %v2474_v60, 0.0  ;;  %2452 = vmatmul.bf16.gmra.mxu3 %v933_v59 }
 0x254   :  { %v2548_v36 = vmul.f32 %v5152_v18, %v2523_v28 }
 0x255   :  { %v2413_v11 = vpop.f32.mrf.mxu3 }
 0x256   :  { %v2573_v48 = vadd.f32 %v5161_v33, %v2548_v36  ;;  %v2414_v54 = vadd.f32 %v2413_v11, %v2351_v16  ;;  %v2289_v61 = vpop.f32.mrf.mxu1  ;;  %v2478_v20 = vpop.f32.mrf.mxu0 }
 0x257   :  { %v2355_v1 = vpop.f32.mrf.mxu2  ;;  %v2290_v63 = vadd.f32 %v2289_v61, %v4901_v30 }
 0x258   :  { %v2594_v62 = vpack.c.bf16 %v2573_v48, %v2573_v48  ;;  %v2477_v25 = vadd.f32 %v2476_v50, %v2414_v54 }
 0x259   :  { %v2353_v2 = vadd.f32 %v2352_v27, %v2290_v63 }
 0x25a   :  { %2616 = vst.msk [vmem:[%s5336_s5 + $0xc] sm:$0xf] %vm2612_vm1, %v2594_v62  ;;  %v2524_v0 = vmax.f32 %v2477_v25, 0.0 }
 0x25c   :  { %v2549_v3 = vmul.f32 %v5152_v18, %v2524_v0 }
 0x25d   :  { %v2415_v44 = vpop.f32.mrf.mxu3 }
 0x25e   :  { %v2574_v39 = vadd.f32 %v5161_v33, %v2549_v3  ;;  %v2416_v24 = vadd.f32 %v2415_v44, %v2353_v2  ;;  %v2292_v14 = vpop.f32.mrf.mxu1  ;;  %v2481_v51 = vpop.f32.mrf.mxu0 }
 0x25f   :  { %v2357_v15 = vpop.f32.mrf.mxu2  ;;  %v2293_v30 = vadd.f32 %v2292_v14, %v4905_v31 }
 0x260   :  { %v2595_v6 = vpack.c.bf16 %v2574_v39, %v2574_v39  ;;  %v2479_v49 = vadd.f32 %v2478_v20, %v2416_v24 }
 0x261   :  { %v2356_v43 = vadd.f32 %v2355_v1, %v2293_v30 }
 0x262   :  { %2617 = vst.msk [vmem:[%s5336_s5 + $0x10] sm:$0xf] %vm2612_vm1, %v2595_v6  ;;  %v2525_v19 = vmax.f32 %v2479_v49, 0.0 }
 0x264   :  { %v2550_v13 = vmul.f32 %v5152_v18, %v2525_v19 }
 0x265   :  { %v2418_v35 = vpop.f32.mrf.mxu3 }
 0x266   :  { %v2575_v42 = vadd.f32 %v5161_v33, %v2550_v13  ;;  %v2419_v41 = vadd.f32 %v2418_v35, %v2356_v43  ;;  %v2294_v40 = vpop.f32.mrf.mxu1  ;;  %v2483_v7 = vpop.f32.mrf.mxu0 }
 0x267   :  { %v2360_v26 = vpop.f32.mrf.mxu2  ;;  %v2295_v31 = vadd.f32 %v2294_v40, %v4932_v47 }
 0x268   :  { %v2596_v29 = vpack.c.bf16 %v2575_v42, %v2575_v42  ;;  %v2482_v38 = vadd.f32 %v2481_v51, %v2419_v41 }
 0x269   :  { %v2358_v46 = vadd.f32 %v2357_v15, %v2295_v31 }
 0x26a   :  { %2618 = vst.msk [vmem:[%s5336_s5 + $0x14] sm:$0xf] %vm2612_vm1, %v2596_v29  ;;  %v2526_v34 = vmax.f32 %v2482_v38, 0.0 }
 0x26c   :  { %v2551_v4 = vmul.f32 %v5152_v18, %v2526_v34 }
 0x26d   :  { %v2420_v22 = vpop.f32.mrf.mxu3 }
 0x26e   :  { %v2576_v9 = vadd.f32 %v5161_v33, %v2551_v4  ;;  %v2421_v55 = vadd.f32 %v2420_v22, %v2358_v46  ;;  %v2297_v50 = vpop.f32.mrf.mxu1  ;;  %v2486_v59 = vpop.f32.mrf.mxu0 }
 0x26f   :  { %v2362_v27 = vpop.f32.mrf.mxu2  ;;  %v2298_v47 = vadd.f32 %v2297_v50, %v4936_v17 }
 0x270   :  { %v2597_v37 = vpack.c.bf16 %v2576_v9, %v2576_v9  ;;  %v2484_v60 = vadd.f32 %v2483_v7, %v2421_v55 }
 0x271   :  { %v2361_v36 = vadd.f32 %v2360_v26, %v2298_v47 }
 0x272   :  { %2619 = vst.msk [vmem:[%s5336_s5 + $0x18] sm:$0xf] %vm2612_vm1, %v2597_v37  ;;  %v2527_v5 = vmax.f32 %v2484_v60, 0.0 }
 0x274   :  { %v2552_v28 = vmul.f32 %v5152_v18, %v2527_v5 }
 0x275   :  { %v2423_v16 = vpop.f32.mrf.mxu3 }
 0x276   :  { %v2577_v11 = vadd.f32 %v5161_v33, %v2552_v28  ;;  %v2424_v48 = vadd.f32 %v2423_v16, %v2361_v36  ;;  %v2299_v54 = vpop.f32.mrf.mxu1  ;;  %v2488_v61 = vpop.f32.mrf.mxu0 }
 0x277   :  { %v2365_v20 = vpop.f32.mrf.mxu2  ;;  %v2300_v17 = vadd.f32 %v2299_v54, %v4963_v32 }
 0x278   :  { %v2598_v1 = vpack.c.bf16 %v2577_v11, %v2577_v11  ;;  %v2487_v62 = vadd.f32 %v2486_v59, %v2424_v48 }
 0x279   :  { %v2363_v0 = vadd.f32 %v2362_v27, %v2300_v17 }
 0x27a   :  { %2620 = vst.msk [vmem:[%s5336_s5 + $0x1c] sm:$0xf] %vm2612_vm1, %v2598_v1  ;;  %v2528_v25 = vmax.f32 %v2487_v62, 0.0 }
 0x27c   :  { %v2553_v63 = vmul.f32 %v5152_v18, %v2528_v25 }
 0x27d   :  { %v2425_v3 = vpop.f32.mrf.mxu3 }
 0x27e   :  { %v2578_v2 = vadd.f32 %v5161_v33, %v2553_v63  ;;  %v2426_v44 = vadd.f32 %v2425_v3, %v2363_v0  ;;  %v2302_v39 = vpop.f32.mrf.mxu1  ;;  %v2491_v24 = vpop.f32.mrf.mxu0 }
 0x27f   :  { %v2367_v14 = vpop.f32.mrf.mxu2  ;;  %v2303_v32 = vadd.f32 %v2302_v39, %v4967_v56 }
 0x280   :  { %v2599_v51 = vpack.c.bf16 %v2578_v2, %v2578_v2  ;;  %v2489_v15 = vadd.f32 %v2488_v61, %v2426_v44 }
 0x281   :  { %v2366_v30 = vadd.f32 %v2365_v20, %v2303_v32 }
 0x282   :  { %2621 = vst.msk [vmem:[%s5336_s5 + $0x20] sm:$0xf] %vm2612_vm1, %v2599_v51  ;;  %v2529_v6 = vmax.f32 %v2489_v15, 0.0 }
 0x284   :  { %v2554_v49 = vmul.f32 %v5152_v18, %v2529_v6 }
 0x285   :  { %v2428_v19 = vpop.f32.mrf.mxu3 }
 0x286   :  { %v2579_v13 = vadd.f32 %v5161_v33, %v2554_v49  ;;  %v2429_v43 = vadd.f32 %v2428_v19, %v2366_v30  ;;  %v2304_v35 = vpop.f32.mrf.mxu1  ;;  %v2493_v42 = vpop.f32.mrf.mxu0 }
 0x287   :  { %v2370_v41 = vpop.f32.mrf.mxu2  ;;  %v2305_v56 = vadd.f32 %v2304_v35, %v4994_v21 }
 0x288   :  { %v2600_v40 = vpack.c.bf16 %v2579_v13, %v2579_v13  ;;  %v2492_v7 = vadd.f32 %v2491_v24, %v2429_v43 }
 0x289   :  { %v2368_v38 = vadd.f32 %v2367_v14, %v2305_v56 }
 0x28a   :  { %2622 = vst.msk [vmem:[%s5336_s5 + $0x24] sm:$0xf] %vm2612_vm1, %v2600_v40  ;;  %v2530_v26 = vmax.f32 %v2492_v7, 0.0 }
 0x28c   :  { %v2555_v29 = vmul.f32 %v5152_v18, %v2530_v26 }
 0x28d   :  { %v2430_v31 = vpop.f32.mrf.mxu3 }
 0x28e   :  { %v2580_v34 = vadd.f32 %v5161_v33, %v2555_v29  ;;  %v2431_v4 = vadd.f32 %v2430_v31, %v2368_v38  ;;  %v2307_v46 = vpop.f32.mrf.mxu1  ;;  %v2496_v22 = vpop.f32.mrf.mxu0 }
 0x28f   :  { %v2372_v9 = vpop.f32.mrf.mxu2  ;;  %v2308_v21 = vadd.f32 %v2307_v46, %v4998_v12 }
 0x290   :  { %v2601_v55 = vpack.c.bf16 %v2580_v34, %v2580_v34  ;;  %v2494_v50 = vadd.f32 %v2493_v42, %v2431_v4 }
 0x291   :  { %v2371_v37 = vadd.f32 %v2370_v41, %v2308_v21 }
 0x292   :  { %2623 = vst.msk [vmem:[%s5336_s5 + $0x28] sm:$0xf] %vm2612_vm1, %v2601_v55  ;;  %v2531_v59 = vmax.f32 %v2494_v50, 0.0 }
 0x294   :  { %v2556_v27 = vmul.f32 %v5152_v18, %v2531_v59 }
 0x295   :  { %v2433_v60 = vpop.f32.mrf.mxu3 }
 0x296   :  { %v2581_v47 = vadd.f32 %v5161_v33, %v2556_v27  ;;  %v2434_v5 = vadd.f32 %v2433_v60, %v2371_v37  ;;  %v2309_v28 = vpop.f32.mrf.mxu1  ;;  %v2498_v36 = vpop.f32.mrf.mxu0 }
 0x297   :  { %v2375_v16 = vpop.f32.mrf.mxu2  ;;  %v2310_v12 = vadd.f32 %v2309_v28, %v5025_v58 }
 0x298   :  { %v2602_v11 = vpack.c.bf16 %v2581_v47, %v2581_v47  ;;  %v2497_v48 = vadd.f32 %v2496_v22, %v2434_v5 }
 0x299   :  { %v2373_v20 = vadd.f32 %v2372_v9, %v2310_v12 }
 0x29a   :  { %2624 = vst.msk [vmem:[%s5336_s5 + $0x2c] sm:$0xf] %vm2612_vm1, %v2602_v11  ;;  %v2532_v54 = vmax.f32 %v2497_v48, 0.0 }
 0x29c   :  { %v2557_v61 = vmul.f32 %v5152_v18, %v2532_v54 }
 0x29d   :  { %v2435_v1 = vpop.f32.mrf.mxu3 }
 0x29e   :  { %v2582_v62 = vadd.f32 %v5161_v33, %v2557_v61  ;;  %v2436_v17 = vadd.f32 %v2435_v1, %v2373_v20  ;;  %v2312_v25 = vpop.f32.mrf.mxu1  ;;  %v2501_v63 = vpop.f32.mrf.mxu0 }
 0x29f   :  { %v2377_v0 = vpop.f32.mrf.mxu2  ;;  %v2313_v58 = vadd.f32 %v2312_v25, %v5029_v8 }
 0x2a0   :  { %v2603_v3 = vpack.c.bf16 %v2582_v62, %v2582_v62  ;;  %v2499_v2 = vadd.f32 %v2498_v36, %v2436_v17 }
 0x2a1   :  { %v2376_v24 = vadd.f32 %v2375_v16, %v2313_v58 }
 0x2a2   :  { %2625 = vst.msk [vmem:[%s5336_s5 + $0x30] sm:$0xf] %vm2612_vm1, %v2603_v3  ;;  %v2533_v44 = vmax.f32 %v2499_v2, 0.0 }
 0x2a4   :  { %v2558_v39 = vmul.f32 %v5152_v18, %v2533_v44 }
 0x2a5   :  { %v2438_v14 = vpop.f32.mrf.mxu3 }
 0x2a6   :  { %v2583_v51 = vadd.f32 %v5161_v33, %v2558_v39  ;;  %v2439_v15 = vadd.f32 %v2438_v14, %v2376_v24  ;;  %v2314_v32 = vpop.f32.mrf.mxu1  ;;  %v2503_v6 = vpop.f32.mrf.mxu0 }
 0x2a7   :  { %v2380_v49 = vpop.f32.mrf.mxu2  ;;  %v2315_v8 = vadd.f32 %v2314_v32, %v5056_v53 }
 0x2a8   :  { %v2604_v30 = vpack.c.bf16 %v2583_v51, %v2583_v51  ;;  %v2502_v19 = vadd.f32 %v2501_v63, %v2439_v15 }
 0x2a9   :  { %v2378_v35 = vadd.f32 %v2377_v0, %v2315_v8 }
 0x2aa   :  { %2626 = vst.msk [vmem:[%s5336_s5 + $0x34] sm:$0xf] %vm2612_vm1, %v2604_v30  ;;  %v2534_v13 = vmax.f32 %v2502_v19, 0.0 }
 0x2ac   :  { %v2559_v43 = vmul.f32 %v5152_v18, %v2534_v13 }
 0x2ad   :  { %v2440_v42 = vpop.f32.mrf.mxu3 }
 0x2ae   :  { %v2584_v41 = vadd.f32 %v5161_v33, %v2559_v43  ;;  %v2441_v40 = vadd.f32 %v2440_v42, %v2378_v35  ;;  %v2317_v7 = vpop.f32.mrf.mxu1  ;;  %v2506_v56 = vpop.f32.mrf.mxu0 }
 0x2af   :  { %v2382_v26 = vpop.f32.mrf.mxu2  ;;  %v2318_v53 = vadd.f32 %v2317_v7, %v5060_v45 }
 0x2b0   :  { %v2605_v29 = vpack.c.bf16 %v2584_v41, %v2584_v41  ;;  %v2504_v38 = vadd.f32 %v2503_v6, %v2441_v40 }
 0x2b1   :  { %v2381_v4 = vadd.f32 %v2380_v49, %v2318_v53 }
 0x2b2   :  { %2627 = vst.msk [vmem:[%s5336_s5 + $0x38] sm:$0xf] %vm2612_vm1, %v2605_v29  ;;  %v2535_v31 = vmax.f32 %v2504_v38, 0.0 }
 0x2b4   :  { %v2560_v34 = vmul.f32 %v5152_v18, %v2535_v31 }
 0x2b5   :  { %v2443_v46 = vpop.f32.mrf.mxu3 }
 0x2b6   :  { %v2585_v22 = vadd.f32 %v5161_v33, %v2560_v34  ;;  %v2444_v9 = vadd.f32 %v2443_v46, %v2381_v4  ;;  %v2319_v55 = vpop.f32.mrf.mxu1  ;;  %v2508_v50 = vpop.f32.mrf.mxu0 }
 0x2b7   :  { %v2385_v21 = vpop.f32.mrf.mxu2  ;;  %v2320_v45 = vadd.f32 %v2319_v55, %v5087_v10 }
 0x2b8   :  { %v2606_v59 = vpack.c.bf16 %v2585_v22, %v2585_v22  ;;  %v2507_v27 = vadd.f32 %v2506_v56, %v2444_v9 }
 0x2b9   :  { %v2383_v47 = vadd.f32 %v2382_v26, %v2320_v45 }
 0x2ba   :  { %2628 = vst.msk [vmem:[%s5336_s5 + $0x3c] sm:$0xf] %vm2612_vm1, %v2606_v59  ;;  %v2536_v37 = vmax.f32 %v2507_v27, 0.0 }
 0x2bc   :  { %v2561_v60 = vmul.f32 %v5152_v18, %v2536_v37 }
 0x2bd   :  { %v2445_v5 = vpop.f32.mrf.mxu3 }
 0x2be   :  { %v2586_v28 = vadd.f32 %v5161_v33, %v2561_v60  ;;  %v2446_v36 = vadd.f32 %v2445_v5, %v2383_v47  ;;  %v2322_v16 = vpop.f32.mrf.mxu1  ;;  %v2511_v11 = vpop.f32.mrf.mxu0 }
 0x2bf   :  { %v2387_v48 = vpop.f32.mrf.mxu2  ;;  %v2323_v10 = vadd.f32 %v2322_v16, %v5091_v23 }
 0x2c0   :  { %v2607_v12 = vpack.c.bf16 %v2586_v28, %v2586_v28  ;;  %v2509_v54 = vadd.f32 %v2508_v50, %v2446_v36 }
 0x2c1   :  { %v2386_v1 = vadd.f32 %v2385_v21, %v2323_v10 }
 0x2c2   :  { %2629 = vst.msk [vmem:[%s5336_s5 + $0x40] sm:$0xf] %vm2612_vm1, %v2607_v12  ;;  %v2537_v61 = vmax.f32 %v2509_v54, 0.0 }
 0x2c4   :  { %v2562_v20 = vmul.f32 %v5152_v18, %v2537_v61 }
 0x2c5   :  { %v2448_v62 = vpop.f32.mrf.mxu3 }
 0x2c6   :  { %v2587_v17 = vadd.f32 %v5161_v33, %v2562_v20  ;;  %v2449_v25 = vadd.f32 %v2448_v62, %v2386_v1  ;;  %v2324_v63 = vpop.f32.mrf.mxu1  ;;  %v2513_v0 = vpop.f32.mrf.mxu0 }
 0x2c7   :  { %v2390_v3 = vpop.f32.mrf.mxu2  ;;  %v2325_v23 = vadd.f32 %v2324_v63, %v5118_v52 }
 0x2c8   :  { %v2608_v2 = vpack.c.bf16 %v2587_v17, %v2587_v17  ;;  %v2512_v58 = vadd.f32 %v2511_v11, %v2449_v25 }
 0x2c9   :  { %v2388_v24 = vadd.f32 %v2387_v48, %v2325_v23 }
 0x2ca   :  { %2630 = vst.msk [vmem:[%s5336_s5 + $0x44] sm:$0xf] %vm2612_vm1, %v2608_v2  ;;  %v2538_v44 = vmax.f32 %v2512_v58, 0.0 }
 0x2cc   :  { %v2563_v39 = vmul.f32 %v5152_v18, %v2538_v44 }
 0x2cd   :  { %v2450_v14 = vpop.f32.mrf.mxu3 }
 0x2ce   :  { %v2588_v51 = vadd.f32 %v5161_v33, %v2563_v39  ;;  %v2451_v15 = vadd.f32 %v2450_v14, %v2388_v24  ;;  %v2327_v32 = vpop.f32.mrf.mxu1  ;;  %v2516_v6 = vpop.f32.mrf.mxu0 }
 0x2cf   :  { %v2392_v49 = vpop.f32.mrf.mxu2  ;;  %v2328_v52 = vadd.f32 %v2327_v32, %v5121_v57 }
 0x2d0   :  { %v2609_v30 = vpack.c.bf16 %v2588_v51, %v2588_v51  ;;  %v2514_v19 = vadd.f32 %v2513_v0, %v2451_v15 }
 0x2d1   :  { %v2391_v43 = vadd.f32 %v2390_v3, %v2328_v52 }
 0x2d2   :  { %2631 = vst.msk [vmem:[%s5336_s5 + $0x48] sm:$0xf] %vm2612_vm1, %v2609_v30  ;;  %v2539_v8 = vmax.f32 %v2514_v19, 0.0 }
 0x2d4   :  { %v2564_v13 = vmul.f32 %v5152_v18, %v2539_v8 }
 0x2d5   :  { %v2453_v35 = vpop.f32.mrf.mxu3 }
 0x2d6   :  { %v2589_v42 = vadd.f32 %v5161_v33, %v2564_v13  ;;  %v2454_v41 = vadd.f32 %v2453_v35, %v2391_v43  ;;  %v2329_v40 = vpop.f32.mrf.mxu1  ;;  %v2518_v7 = vpop.f32.mrf.mxu0 }
 0x2d8   :  { %v2610_v56 = vpack.c.bf16 %v2589_v42, %v2589_v42  ;;  %v2517_v26 = vadd.f32 %v2516_v6, %v2454_v41 }
 0x2da   :  { %2632 = vst.msk [vmem:[%s5336_s5 + $0x4c] sm:$0xf] %vm2612_vm1, %v2610_v56  ;;  %v2540_v57 = vmax.f32 %v2517_v26, 0.0 }
 0x2dc   :  { %v2565_v29 = vmul.f32 %v5152_v18, %v2540_v57 }
 0x2dd   :  { %v2455_v38 = vpop.f32.mrf.mxu3 }
 0x2de   :  { %v2590_v53 = vadd.f32 %v5161_v33, %v2565_v29 }
 0x2e0   :  { %v2611_v31 = vpack.c.bf16 %v2590_v53, %v2590_v53 }
 0x2e2   :  { %2634 = vst.msk [vmem:[%s5336_s5 + $0x50] sm:$0x1] %vm2633_vm2, %v2611_v31 }

// kernel: svhn_custom_cnn_forward.5
= control target key start
LH: loop header
LB: loop body
LE: loop exit
PB: predicated region body
PF: predicated region fallthrough
CT: control target
= control target key end

     0   :  { %s9936_s17 = smov 0   ;;  %s11597_s0 = inlined_call_operand.vmem [shape: bf16[2,1024], index: 0, kind: input, shape index: {}]   ;;  %s11598_s1 = inlined_call_operand.vmem [shape: bf16[1024,128], index: 1, kind: input, shape index: {}]   ;;  %s11599_s2 = inlined_call_operand.vmem [shape: f32[1,128], index: 2, kind: input, shape index: {}]   ;;  %s11600_s3 = inlined_call_operand.vmem [shape: f32[1,128], index: 3, kind: input, shape index: {}]   ;;  %s11601_s4 = inlined_call_operand.vmem [shape: f32[1,128], index: 4, kind: input, shape index: {}]   ;;  %s11602_s5 = inlined_call_operand.vmem [shape: bf16[2,128,1024], index: 5, kind: input, shape index: {}]   ;;  %s11603_s6 = inlined_call_operand.vmem [shape: f32[2,1,1024], index: 6, kind: input, shape index: {}]   ;;  %s11604_s7 = inlined_call_operand.vmem [shape: bf16[2,1024,1024], index: 7, kind: input, shape index: {}]   ;;  %s11605_s8 = inlined_call_operand.vmem [shape: f32[2,1,1024], index: 8, kind: input, shape index: {}]   ;;  %s11606_s9 = inlined_call_operand.vmem [shape: bf16[2,1024,128], index: 9, kind: input, shape index: {}]   ;;  %s11607_s10 = inlined_call_operand.vmem [shape: f32[2,1,128], index: 10, kind: input, shape index: {}]   ;;  %s11608_s11 = inlined_call_operand.vmem [shape: f32[2,2,128], index: 11, kind: output, shape index: {}]  }
   0x1 LB: > { %s6315_s18 = sadd.s32 4294967295, %s9874_s17   ;;  %p6319_p0 = scmp.ge.s32.totalorder %s9874_s17, 1  ;;  %s9874_s17 = sphi %s9936_s17, %s21_s17  }
   0x2   : > { %p383_p1 = scmp.lt.s32.totalorder %s9874_s17, 3 }
   0x4   : > { %p384_p2 = pnand %p6319_p0, %p383_p1 }
   0x5   : > { %p443_p3 = scmp.lt.s32.totalorder (!%p384_p2), %s6315_s18, 1 }
   0x6   : > { %387 = sbr.rel (%p384_p2) target bundleno = 1258 (0x4ea), region = 64 }
   0xb   : > { %v9157_v0 = vld [vmem:[%s11598_s1 + $0x38] sm:$0xff]  ;;  %v9156_v4 = vld [vmem:[%s11598_s1 + $0x30] sm:$0xff]  ;;  %v9155_v8 = vld [vmem:[%s11598_s1 + $0x28] sm:$0xff]  ;;  %s11610_s18 = smov (!%p443_p3, %s6315_s18), 1 }
   0xc   : > { %v9165_v1 = vld [vmem:[%s11598_s1 + $0x78] sm:$0xff]  ;;  %1008 = vmatpush.bf16.msra.mxu0 %v9157_v0  ;;  %v9164_v5 = vld [vmem:[%s11598_s1 + $0x70] sm:$0xff]  ;;  %v9163_v9 = vld [vmem:[%s11598_s1 + $0x68] sm:$0xff]  ;;  %s9147_s27 = sshll.u32 %s11610_s18, 9  ;;  %s6322_s29 = sshll.u32 %s11610_s18, 3 }
   0xd   : > { %v9173_v2 = vld [vmem:[%s11598_s1 + $0xb8] sm:$0xff]  ;;  %1021 = vmatpush.bf16.msra.mxu1 %v9165_v1  ;;  %v9172_v6 = vld [vmem:[%s11598_s1 + $0xb0] sm:$0xff]  ;;  %v9171_v10 = vld [vmem:[%s11598_s1 + $0xa8] sm:$0xff]  ;;  %s10127_s15 = scalar_lea.vmem %s11602_s5, %s9147_s27  ;;  %s451_s13 = scalar_lea.vmem %s11603_s6, %s6322_s29 }
   0xe   : > { %v9181_v3 = vld [vmem:[%s11598_s1 + $0xf8] sm:$0xff]  ;;  %1034 = vmatpush.bf16.msra.mxu2 %v9173_v2  ;;  %v9180_v7 = vld [vmem:[%s11598_s1 + $0xf0] sm:$0xff]  ;;  %v9179_v11 = vld [vmem:[%s11598_s1 + $0xe8] sm:$0xff]  ;;  %s10763_s19 = scalar_lea.vmem %s11605_s8, %s6322_s29  ;;  %s11481_s21 = scalar_lea.vmem %s11606_s9, %s9147_s27 }
   0xf   : > { %1047 = vmatpush.bf16.msra.mxu3 %v9181_v3  ;;  %v9154_v12 = vld [vmem:[%s11598_s1 + $0x20] sm:$0xff]  ;;  %v9153_v17 = vld [vmem:[%s11598_s1 + $0x18] sm:$0xff]  ;;  %v9152_v21 = vld [vmem:[%s11598_s1 + $0x10] sm:$0xff]  ;;  %s468_s23 = scalar_lea.vmem %s11607_s10, %s11610_s18  ;;  %s6328_s26 = sshll.u32 %s11610_s18, 1 }
  0x10   : > { %1009 = vmatpush.bf16.msra.mxu0 %v9156_v4  ;;  %v9162_v13 = vld [vmem:[%s11598_s1 + $0x60] sm:$0xff]  ;;  %v9161_v18 = vld [vmem:[%s11598_s1 + $0x58] sm:$0xff]  ;;  %v9160_v22 = vld [vmem:[%s11598_s1 + $0x50] sm:$0xff]  ;;  %s472_s30 = scalar_lea.vmem %s11608_s11, %s6328_s26 }
  0x11   : > { %1022 = vmatpush.bf16.msra.mxu1 %v9164_v5  ;;  %v9170_v14 = vld [vmem:[%s11598_s1 + $0xa0] sm:$0xff]  ;;  %v9169_v19 = vld [vmem:[%s11598_s1 + $0x98] sm:$0xff]  ;;  %v9168_v23 = vld [vmem:[%s11598_s1 + $0x90] sm:$0xff] }
  0x12   : > { %1035 = vmatpush.bf16.msra.mxu2 %v9172_v6  ;;  %v9178_v15 = vld [vmem:[%s11598_s1 + $0xe0] sm:$0xff]  ;;  %v9177_v20 = vld [vmem:[%s11598_s1 + $0xd8] sm:$0xff]  ;;  %v9176_v24 = vld [vmem:[%s11598_s1 + $0xd0] sm:$0xff] }
  0x13   : > { %1048 = vmatpush.bf16.msra.mxu3 %v9180_v7  ;;  %v473_v16 = vld [vmem:[%s11597_s0] sm:$0xff]  ;;  %v9151_v25 = vld [vmem:[%s11598_s1 + $0x8] sm:$0xff]  ;;  %v9189_v33 = vld [vmem:[%s11598_s1 + $0x138] sm:$0xff] }
  0x14   : > { %1010 = vmatpush.bf16.msra.mxu0 %v9155_v8  ;;  %607 = vst [vmem:[#allocation1] ss:$9 sm:$0xff] %v473_v16  ;;  %v9159_v26 = vld [vmem:[%s11598_s1 + $0x48] sm:$0xff]  ;;  %v9150_v29 = vld [vmem:[%s11598_s1] sm:$0xff]  ;;  %v9197_v34 = vld [vmem:[%s11598_s1 + $0x178] sm:$0xff] }
  0x15   : > { %1023 = vmatpush.bf16.msra.mxu1 %v9163_v9  ;;  %v9167_v27 = vld [vmem:[%s11598_s1 + $0x88] sm:$0xff]  ;;  %v9158_v30 = vld [vmem:[%s11598_s1 + $0x40] sm:$0xff]  ;;  %v9205_v35 = vld [vmem:[%s11598_s1 + $0x1b8] sm:$0xff] }
  0x16   : > { %1036 = vmatpush.bf16.msra.mxu2 %v9171_v10  ;;  %v9175_v28 = vld [vmem:[%s11598_s1 + $0xc8] sm:$0xff]  ;;  %v9166_v31 = vld [vmem:[%s11598_s1 + $0x80] sm:$0xff]  ;;  %v9213_v36 = vld [vmem:[%s11598_s1 + $0x1f8] sm:$0xff] }
  0x17   : > { %1049 = vmatpush.bf16.msra.mxu3 %v9179_v11  ;;  %v9174_v32 = vld [vmem:[%s11598_s1 + $0xc0] sm:$0xff]  ;;  %v9188_v37 = vld [vmem:[%s11598_s1 + $0x130] sm:$0xff]  ;;  %v9187_v45 = vld [vmem:[%s11598_s1 + $0x128] sm:$0xff] }
  0x18   : > { %1011 = vmatpush.bf16.msra.mxu0 %v9154_v12  ;;  %v9196_v40 = vld [vmem:[%s11598_s1 + $0x170] sm:$0xff]  ;;  %v9195_v46 = vld [vmem:[%s11598_s1 + $0x168] sm:$0xff]  ;;  %v9186_v49 = vld [vmem:[%s11598_s1 + $0x120] sm:$0xff] }
  0x19   : > { %1024 = vmatpush.bf16.msra.mxu1 %v9162_v13  ;;  %v9204_v43 = vld [vmem:[%s11598_s1 + $0x1b0] sm:$0xff]  ;;  %v9203_v47 = vld [vmem:[%s11598_s1 + $0x1a8] sm:$0xff]  ;;  %v9194_v50 = vld [vmem:[%s11598_s1 + $0x160] sm:$0xff] }
  0x1a   : > { %1037 = vmatpush.bf16.msra.mxu2 %v9170_v14  ;;  %v9212_v44 = vld [vmem:[%s11598_s1 + $0x1f0] sm:$0xff]  ;;  %v9211_v48 = vld [vmem:[%s11598_s1 + $0x1e8] sm:$0xff]  ;;  %v9202_v51 = vld [vmem:[%s11598_s1 + $0x1a0] sm:$0xff] }
  0x1b   : > { %1050 = vmatpush.bf16.msra.mxu3 %v9178_v15  ;;  %v610_v38 = vld [vmem:[#allocation1 + $0x12] sm:$0xff]  ;;  %v608_v39 = vld [vmem:[#allocation1] sm:$0xff]  ;;  %v609_v42 = vld [vmem:[#allocation1 + $0x9] sm:$0xff] }
  0x1c   : > { %1012 = vmatpush.bf16.msra.mxu0 %v9153_v17  ;;  %v611_v41 = vld [vmem:[#allocation1 + $0x1b] sm:$0xff]  ;;  %v9184_v57 = vld [vmem:[%s11598_s1 + $0x110] sm:$0xff]  ;;  %v9183_v61 = vld [vmem:[%s11598_s1 + $0x108] sm:$0xff] }
  0x1d   : > { %1025 = vmatpush.bf16.msra.mxu1 %v9161_v18  ;;  %v9210_v52 = vld [vmem:[%s11598_s1 + $0x1e0] sm:$0xff]  ;;  %v9185_v53 = vld [vmem:[%s11598_s1 + $0x118] sm:$0xff]  ;;  %v9192_v58 = vld [vmem:[%s11598_s1 + $0x150] sm:$0xff] }
  0x1e   : > { %1038 = vmatpush.bf16.msra.mxu2 %v9169_v19  ;;  %v9193_v54 = vld [vmem:[%s11598_s1 + $0x158] sm:$0xff]  ;;  %v9200_v59 = vld [vmem:[%s11598_s1 + $0x190] sm:$0xff]  ;;  %v9191_v62 = vld [vmem:[%s11598_s1 + $0x148] sm:$0xff] }
  0x1f   : > { %1051 = vmatpush.bf16.msra.mxu3 %v9177_v20  ;;  %v9201_v55 = vld [vmem:[%s11598_s1 + $0x198] sm:$0xff]  ;;  %v9208_v60 = vld [vmem:[%s11598_s1 + $0x1d0] sm:$0xff]  ;;  %v9199_v63 = vld [vmem:[%s11598_s1 + $0x188] sm:$0xff] }
  0x20   : > { %1013 = vmatpush.bf16.msra.mxu0 %v9152_v21  ;;  %v9209_v56 = vld [vmem:[%s11598_s1 + $0x1d8] sm:$0xff]  ;;  %v9207_v0 = vld [vmem:[%s11598_s1 + $0x1c8] sm:$0xff]  ;;  %v6811_v1 = vld [vmem:[%s10127_s15 + $0x1c0] sm:$0xf] }
  0x21   : > { %1026 = vmatpush.bf16.msra.mxu1 %v9160_v22  ;;  %v9274_v2 = vld [vmem:[%s10127_s15 + $0x1dc] sm:$0xf0]  ;;  %v9270_v3 = vld [vmem:[%s10127_s15 + $0x1c4] sm:$0xf]  ;;  %v6819_v9 = vld [vmem:[%s10127_s15 + $0x1c8] sm:$0xf] }
  0x22   : > { %1039 = vmatpush.bf16.msra.mxu2 %v9168_v23  ;;  %v6813_v4 = vld [vmem:[%s10127_s15 + $0x1e0] sm:$0xf0]  ;;  %v6812_v10 = vor.u32 %v9274_v2, %v6811_v1  ;;  %v9275_v12 = vld [vmem:[%s10127_s15 + $0x1e4] sm:$0xf0]  ;;  %v9271_v13 = vld [vmem:[%s10127_s15 + $0x1cc] sm:$0xf] }
  0x23   : > { %1052 = vmatpush.bf16.msra.mxu3 %v9176_v24  ;;  %v9182_v5 = vld [vmem:[%s11598_s1 + $0x100] sm:$0xff]  ;;  %v6816_v11 = vor.u32 %v9270_v3, %v6813_v4  ;;  %v6821_v14 = vld [vmem:[%s10127_s15 + $0x1e8] sm:$0xf0]  ;;  %v614_v17 = vld [vmem:[#allocation1 + $0x36] sm:$0xff]  ;;  %v6820_v19 = vor.u32 %v9275_v12, %v6819_v9 }
  0x24   : > { %1014 = vmatpush.bf16.msra.mxu0 %v9151_v25  ;;  %v9190_v6 = vld [vmem:[%s11598_s1 + $0x140] sm:$0xff]  ;;  %v613_v16 = vld [vmem:[#allocation1 + $0x2d] sm:$0xff]  ;;  %v6824_v20 = vor.u32 %v9271_v13, %v6821_v14 }
  0x25   : > { %1027 = vmatpush.bf16.msra.mxu1 %v9159_v26  ;;  %v9198_v7 = vld [vmem:[%s11598_s1 + $0x180] sm:$0xff]  ;;  %v6787_v26 = vld [vmem:[%s10127_s15 + $0x188] sm:$0xf]  ;;  %v9239_v2 = vld [vmem:[%s10127_s15 + $0xcc] sm:$0xf] }
  0x26   : > { %1040 = vmatpush.bf16.msra.mxu2 %v9167_v27  ;;  %v9206_v8 = vld [vmem:[%s11598_s1 + $0x1c0] sm:$0xff]  ;;  %v9267_v27 = vld [vmem:[%s10127_s15 + $0x1a4] sm:$0xf0]  ;;  %v6693_v3 = vld [vmem:[%s10127_s15 + $0xe8] sm:$0xf0] }
  0x27   : > { %1053 = vmatpush.bf16.msra.mxu3 %v9175_v28  ;;  %v612_v15 = vld [vmem:[#allocation1 + $0x24] sm:$0xff]  ;;  %v6779_v21 = vld [vmem:[%s10127_s15 + $0x180] sm:$0xf]  ;;  %v9231_v12 = vld [vmem:[%s10127_s15 + $0x8c] sm:$0xf] }
  0x28   : > { %1015 = vmatpush.bf16.msra.mxu0 %v9150_v29  ;;  %v615_v18 = vld [vmem:[#allocation1 + $0x3f] sm:$0xff]  ;;  %v6788_v29 = vor.u32 %v9267_v27, %v6787_v26 }
  0x29   : > { %1028 = vmatpush.bf16.msra.mxu1 %v9158_v30  ;;  %v9266_v22 = vld [vmem:[%s10127_s15 + $0x19c] sm:$0xf0]  ;;  %v9262_v23 = vld [vmem:[%s10127_s15 + $0x184] sm:$0xf]  ;;  %v9263_v30 = vld [vmem:[%s10127_s15 + $0x18c] sm:$0xf] }
  0x2a   : > { %1041 = vmatpush.bf16.msra.mxu2 %v9166_v31  ;;  %v6780_v24 = vor.u32 %v9266_v22, %v6779_v21  ;;  %v6781_v25 = vld [vmem:[%s10127_s15 + $0x1a0] sm:$0xf0]  ;;  %v6789_v31 = vld [vmem:[%s10127_s15 + $0x1a8] sm:$0xf0]  ;;  %v6651_v4 = vld [vmem:[%s10127_s15 + $0x80] sm:$0xf] }
  0x2b   : > { %1054 = vmatpush.bf16.msra.mxu3 %v9174_v32  ;;  %1016 = vmatmul.bf16.vlgmr.msra.gmra.mxu0 %v608_v39  ;;  %v6784_v28 = vor.u32 %v9262_v23, %v6781_v25  ;;  %v6792_v32 = vor.u32 %v9263_v30, %v6789_v31  ;;  %v9259_v39 = vld [vmem:[%s10127_s15 + $0x164] sm:$0xf0]  ;;  %v9223_v23 = vld [vmem:[%s10127_s15 + $0x4c] sm:$0xf]  ;;  %v9218_v30 = vld [vmem:[%s10127_s15 + $0x1c] sm:$0xf0] }
  0x2c   : > { %1060 = vmatpush.bf16.msrb.mxu0 %v9189_v33  ;;  %1029 = vmatmul.bf16.vlgmr.msra.gmra.mxu1 %v609_v42  ;;  %v6747_v33 = vld [vmem:[%s10127_s15 + $0x140] sm:$0xf]  ;;  %v9255_v42 = vld [vmem:[%s10127_s15 + $0x14c] sm:$0xf]  ;;  %v6627_v21 = vld [vmem:[%s10127_s15 + $0x48] sm:$0xf] }
  0x2d   : > { %1073 = vmatpush.bf16.msrb.mxu1 %v9197_v34  ;;  %1042 = vmatmul.bf16.vlgmr.msra.gmra.mxu2 %v610_v38  ;;  %v9258_v34 = vld [vmem:[%s10127_s15 + $0x15c] sm:$0xf0]  ;;  %v6755_v38 = vld [vmem:[%s10127_s15 + $0x148] sm:$0xf]  ;;  %v9214_v31 = vld [vmem:[%s10127_s15 + $0x4] sm:$0xf] }
  0x2e   : > { %1086 = vmatpush.bf16.msrb.mxu2 %v9205_v35  ;;  %1055 = vmatmul.bf16.vlgmr.msra.gmra.mxu3 %v611_v41  ;;  %v9254_v35 = vld [vmem:[%s10127_s15 + $0x144] sm:$0xf]  ;;  %v6756_v41 = vor.u32 %v9259_v39, %v6755_v38  ;;  %v9227_v22 = vld [vmem:[%s10127_s15 + $0x64] sm:$0xf0]  ;;  %v9215_v39 = vld [vmem:[%s10127_s15 + $0xc] sm:$0xf] }
  0x2f   : > { %1099 = vmatpush.bf16.msrb.mxu3 %v9213_v36  ;;  %v6748_v36 = vor.u32 %v9258_v34, %v6747_v33  ;;  %v6628_v27 = vor.u32 %v9227_v22, %v6627_v21  ;;  %v6589_v33 = vld [vmem:[%s10127_s15 + $0x20] sm:$0xf0]  ;;  %v6595_v34 = vld [vmem:[%s10127_s15 + $0x8] sm:$0xf]  ;;  %v9252_v21 = vld [vmem:[%s10127_s15 + $0x12c] sm:$0xf0] }
  0x30   : > { %1061 = vmatpush.bf16.msrb.mxu0 %v9188_v37  ;;  %v6749_v37 = vld [vmem:[%s10127_s15 + $0x160] sm:$0xf0] }
  0x31   : > { %1074 = vmatpush.bf16.msrb.mxu1 %v9196_v40  ;;  %v6752_v40 = vor.u32 %v9254_v35, %v6749_v37  ;;  %v9219_v35 = vld [vmem:[%s10127_s15 + $0x24] sm:$0xf0]  ;;  %v6592_v37 = vor.u32 %v9214_v31, %v6589_v33 }
  0x32   : > { %1087 = vmatpush.bf16.msrb.mxu2 %v9204_v43  ;;  %v6757_v43 = vld [vmem:[%s10127_s15 + $0x168] sm:$0xf0]  ;;  %v6596_v38 = vor.u32 %v9219_v35, %v6595_v34  ;;  %v6699_v34 = vld [vmem:[%s10127_s15 + $0xd0] sm:$0xf] }
  0x33   : > { %1100 = vmatpush.bf16.msrb.mxu3 %v9212_v44  ;;  %v6715_v44 = vld [vmem:[%s10127_s15 + $0x100] sm:$0xf]  ;;  %v9244_v35 = vld [vmem:[%s10127_s15 + $0xec] sm:$0xf0] }
  0x34   : > { %1062 = vmatpush.bf16.msrb.mxu0 %v9187_v45  ;;  %v6760_v45 = vor.u32 %v9255_v42, %v6757_v43 }
  0x35   : > { %1075 = vmatpush.bf16.msrb.mxu1 %v9195_v46  ;;  %v9250_v46 = vld [vmem:[%s10127_s15 + $0x11c] sm:$0xf0] }
  0x36   : > { %1088 = vmatpush.bf16.msrb.mxu2 %v9203_v47  ;;  %v9246_v47 = vld [vmem:[%s10127_s15 + $0x104] sm:$0xf] }
  0x37   : > { %1101 = vmatpush.bf16.msrb.mxu3 %v9211_v48  ;;  %v6717_v48 = vld [vmem:[%s10127_s15 + $0x120] sm:$0xf0] }
  0x38   : > { %1063 = vmatpush.bf16.msrb.mxu0 %v9186_v49  ;;  %v6716_v49 = vor.u32 %v9250_v46, %v6715_v44  ;;  %v9276_v44 = vld [vmem:[%s10127_s15 + $0x1ec] sm:$0xf0]  ;;  %v6829_v46 = vld [vmem:[%s10127_s15 + $0x1f0] sm:$0xf0] }
  0x39   : > { %1076 = vmatpush.bf16.msrb.mxu1 %v9194_v50  ;;  %v6720_v50 = vor.u32 %v9246_v47, %v6717_v48 }
  0x3a   : > { %1089 = vmatpush.bf16.msrb.mxu2 %v9202_v51  ;;  %v6723_v51 = vld [vmem:[%s10127_s15 + $0x108] sm:$0xf] }
  0x3b   : > { %1102 = vmatpush.bf16.msrb.mxu3 %v9210_v52  ;;  %v9251_v52 = vld [vmem:[%s10127_s15 + $0x124] sm:$0xf0] }
  0x3c   : > { %1064 = vmatpush.bf16.msrb.mxu0 %v9185_v53  ;;  %v9247_v53 = vld [vmem:[%s10127_s15 + $0x10c] sm:$0xf] }
  0x3d   : > { %1077 = vmatpush.bf16.msrb.mxu1 %v9193_v54  ;;  %v6724_v54 = vor.u32 %v9251_v52, %v6723_v51  ;;  %v9273_v51 = vld [vmem:[%s10127_s15 + $0x1dc] sm:$0xf] }
  0x3e   : > { %1090 = vmatpush.bf16.msrb.mxu2 %v9201_v55  ;;  %v6725_v55 = vld [vmem:[%s10127_s15 + $0x128] sm:$0xf0] }
  0x3f   : > { %1103 = vmatpush.bf16.msrb.mxu3 %v9209_v56  ;;  %v6728_v56 = vor.u32 %v9247_v53, %v6725_v55  ;;  %v6837_v53 = vld [vmem:[%s10127_s15 + $0x1f8] sm:$0xf0]  ;;  %v9268_v55 = vld [vmem:[%s10127_s15 + $0x1ac] sm:$0xf0] }
  0x40   : > { %1065 = vmatpush.bf16.msrb.mxu0 %v9184_v57  ;;  %v6683_v57 = vld [vmem:[%s10127_s15 + $0xc0] sm:$0xf] }
  0x41   : > { %1078 = vmatpush.bf16.msrb.mxu1 %v9192_v58  ;;  %v9242_v58 = vld [vmem:[%s10127_s15 + $0xdc] sm:$0xf0] }
  0x42   : > { %1091 = vmatpush.bf16.msrb.mxu2 %v9200_v59  ;;  %v9238_v59 = vld [vmem:[%s10127_s15 + $0xc4] sm:$0xf] }
  0x43   : > { %1104 = vmatpush.bf16.msrb.mxu3 %v9208_v60  ;;  %v6684_v60 = vor.u32 %v9242_v58, %v6683_v57  ;;  %v9264_v58 = vld [vmem:[%s10127_s15 + $0x194] sm:$0xf] }
  0x44   : > { %1066 = vmatpush.bf16.msrb.mxu0 %v9183_v61  ;;  %v6685_v61 = vld [vmem:[%s10127_s15 + $0xe0] sm:$0xf0] }
  0x45   : > { %1079 = vmatpush.bf16.msrb.mxu1 %v9191_v62  ;;  %v6691_v62 = vld [vmem:[%s10127_s15 + $0xc8] sm:$0xf] }
  0x46   : > { %1092 = vmatpush.bf16.msrb.mxu2 %v9199_v63  ;;  %v9243_v63 = vld [vmem:[%s10127_s15 + $0xe4] sm:$0xf0] }
  0x47   : > { %1105 = vmatpush.bf16.msrb.mxu3 %v9207_v0  ;;  %v6688_v0 = vor.u32 %v9238_v59, %v6685_v61  ;;  %v6692_v1 = vor.u32 %v9243_v63, %v6691_v62  ;;  %v6797_v59 = vld [vmem:[%s10127_s15 + $0x1b0] sm:$0xf0]  ;;  %v9269_v62 = vld [vmem:[%s10127_s15 + $0x1b4] sm:$0xf0]  ;;  %v9265_v63 = vld [vmem:[%s10127_s15 + $0x19c] sm:$0xf] }
  0x48   : > { %1067 = vmatpush.bf16.msrb.mxu0 %v9182_v5  ;;  %v6696_v5 = vor.u32 %v9239_v2, %v6693_v3  ;;  %v6800_v61 = vor.u32 %v9264_v58, %v6797_v59  ;;  %v6677_v59 = vld [vmem:[%s10127_s15 + $0xb8] sm:$0xf0] }
  0x49   : > { %1080 = vmatpush.bf16.msrb.mxu1 %v9190_v6  ;;  %v9234_v6 = vld [vmem:[%s10127_s15 + $0x9c] sm:$0xf0] }
  0x4a   : > { %1093 = vmatpush.bf16.msrb.mxu2 %v9198_v7  ;;  %v9230_v7 = vld [vmem:[%s10127_s15 + $0x84] sm:$0xf]  ;;  %v6652_v9 = vor.u32 %v9234_v6, %v6651_v4  ;;  %v9260_v6 = vld [vmem:[%s10127_s15 + $0x16c] sm:$0xf0] }
  0x4b   : > { %1106 = vmatpush.bf16.msrb.mxu3 %v9206_v8  ;;  %1068 = vmatmul.bf16.vlgmr.msrb.gmra.mxu0 %v612_v15  ;;  %v6653_v8 = vld [vmem:[%s10127_s15 + $0xa0] sm:$0xf0]  ;;  %v6661_v15 = vld [vmem:[%s10127_s15 + $0xa8] sm:$0xf0] }
  0x4c   : > { %1526 = vmatpush.bf16.msra.mxu0 %v6812_v10  ;;  %1081 = vmatmul.bf16.vlgmr.msrb.gmra.mxu1 %v613_v16  ;;  %v6659_v10 = vld [vmem:[%s10127_s15 + $0x88] sm:$0xf]  ;;  %v6656_v13 = vor.u32 %v9230_v7, %v6653_v8  ;;  %v6619_v16 = vld [vmem:[%s10127_s15 + $0x40] sm:$0xf]  ;;  %v9256_v7 = vld [vmem:[%s10127_s15 + $0x154] sm:$0xf] }
  0x4d   : > { %1539 = vmatpush.bf16.msra.mxu1 %v6816_v11  ;;  %1094 = vmatmul.bf16.vlgmr.msrb.gmra.mxu2 %v614_v17  ;;  %v9235_v11 = vld [vmem:[%s10127_s15 + $0xa4] sm:$0xf0]  ;;  %v9226_v17 = vld [vmem:[%s10127_s15 + $0x5c] sm:$0xf0] }
  0x4e   : > { %1107 = vmatmul.bf16.vlgmr.msrb.gmra.mxu3 %v615_v18  ;;  %1552 = vmatpush.bf16.msra.mxu2 %v6820_v19  ;;  %v6660_v14 = vor.u32 %v9235_v11, %v6659_v10  ;;  %v6664_v18 = vor.u32 %v9231_v12, %v6661_v15  ;;  %v9222_v19 = vld [vmem:[%s10127_s15 + $0x44] sm:$0xf]  ;;  %v6620_v25 = vor.u32 %v9226_v17, %v6619_v16  ;;  %v6765_v10 = vld [vmem:[%s10127_s15 + $0x170] sm:$0xf0]  ;;  %v6771_v11 = vld [vmem:[%s10127_s15 + $0x158] sm:$0xf] }
  0x4f   : > { %1565 = vmatpush.bf16.msra.mxu3 %v6824_v20  ;;  %v6621_v20 = vld [vmem:[%s10127_s15 + $0x60] sm:$0xf0]  ;;  %v9261_v12 = vld [vmem:[%s10127_s15 + $0x174] sm:$0xf0]  ;;  %v9257_v16 = vld [vmem:[%s10127_s15 + $0x15c] sm:$0xf] }
  0x50   : > { %1527 = vmatpush.bf16.msra.mxu0 %v6780_v24  ;;  %v6629_v24 = vld [vmem:[%s10127_s15 + $0x68] sm:$0xf0]  ;;  %v6624_v26 = vor.u32 %v9222_v19, %v6621_v20  ;;  %v6772_v15 = vor.u32 %v9261_v12, %v6771_v11  ;;  %v6773_v17 = vld [vmem:[%s10127_s15 + $0x178] sm:$0xf0]  ;;  %v9862_v19 = vld [vmem:[%s11599_s2] ss:$0 sm:$0xff] }
  0x51   : > { %1540 = vmatpush.bf16.msra.mxu1 %v6784_v28  ;;  %v6632_v28 = vor.u32 %v9223_v23, %v6629_v24  ;;  %v6731_v20 = vld [vmem:[%s10127_s15 + $0x110] sm:$0xf]  ;;  %v9248_v23 = vld [vmem:[%s10127_s15 + $0x114] sm:$0xf] }
  0x52   : > { %1553 = vmatpush.bf16.msra.mxu2 %v6788_v29  ;;  %v6587_v29 = vld [vmem:[%s10127_s15] sm:$0xf]  ;;  %v6732_v22 = vor.u32 %v9252_v21, %v6731_v20  ;;  %v6733_v24 = vld [vmem:[%s10127_s15 + $0x130] sm:$0xf0]  ;;  %v9220_v11 = vld [vmem:[%s10127_s15 + $0x2c] sm:$0xf0] }
  0x53   : > { %1566 = vmatpush.bf16.msra.mxu3 %v6792_v32  ;;  %v6588_v32 = vor.u32 %v9218_v30, %v6587_v29  ;;  %v6741_v29 = vld [vmem:[%s10127_s15 + $0x138] sm:$0xf0]  ;;  %v9216_v12 = vld [vmem:[%s10127_s15 + $0x14] sm:$0xf] }
  0x54   : > { %1528 = vmatpush.bf16.msra.mxu0 %v6748_v36 }
  0x55   : > { %1541 = vmatpush.bf16.msra.mxu1 %v6752_v40  ;;  %v6597_v40 = vld [vmem:[%s10127_s15 + $0x28] sm:$0xf0] }
  0x56   : > { %1554 = vmatpush.bf16.msra.mxu2 %v6756_v41  ;;  %v6827_v41 = vld [vmem:[%s10127_s15 + $0x1d0] sm:$0xf]  ;;  %v6600_v43 = vor.u32 %v9215_v39, %v6597_v40  ;;  %v6700_v39 = vor.u32 %v9244_v35, %v6699_v34  ;;  %v6701_v40 = vld [vmem:[%s10127_s15 + $0xf0] sm:$0xf0]  ;;  %v9864_v34 = vld [vmem:[%s11601_s4] ss:$0 sm:$0xff] }
  0x57   : > { %1567 = vmatpush.bf16.msra.mxu3 %v6760_v45  ;;  %v9272_v45 = vld [vmem:[%s10127_s15 + $0x1d4] sm:$0xf]  ;;  %v6828_v47 = vor.u32 %v9276_v44, %v6827_v41  ;;  %v6707_v41 = vld [vmem:[%s10127_s15 + $0xd8] sm:$0xf] }
  0x58   : > { %1529 = vmatpush.bf16.msra.mxu0 %v6716_v49  ;;  %v6832_v48 = vor.u32 %v9272_v45, %v6829_v46  ;;  %v6835_v49 = vld [vmem:[%s10127_s15 + $0x1d8] sm:$0xf]  ;;  %v9241_v46 = vld [vmem:[%s10127_s15 + $0xdc] sm:$0xf] }
  0x59   : > { %1542 = vmatpush.bf16.msra.mxu1 %v6720_v50  ;;  %v9277_v50 = vld [vmem:[%s10127_s15 + $0x1f4] sm:$0xf0] }
  0x5a   : > { %1555 = vmatpush.bf16.msra.mxu2 %v6724_v54  ;;  %v6836_v52 = vor.u32 %v9277_v50, %v6835_v49  ;;  %v6795_v54 = vld [vmem:[%s10127_s15 + $0x190] sm:$0xf] }
  0x5b   : > { %1568 = vmatpush.bf16.msra.mxu3 %v6728_v56  ;;  %v6840_v56 = vor.u32 %v9273_v51, %v6837_v53  ;;  %v6796_v57 = vor.u32 %v9268_v55, %v6795_v54  ;;  %v9236_v50 = vld [vmem:[%s10127_s15 + $0xac] sm:$0xf0]  ;;  %v6669_v51 = vld [vmem:[%s10127_s15 + $0xb0] sm:$0xf0]  ;;  %v6675_v54 = vld [vmem:[%s10127_s15 + $0x98] sm:$0xf] }
  0x5c   : > { %1530 = vmatpush.bf16.msra.mxu0 %v6684_v60  ;;  %v6803_v60 = vld [vmem:[%s10127_s15 + $0x198] sm:$0xf] }
  0x5d   : > { %1543 = vmatpush.bf16.msra.mxu1 %v6688_v0  ;;  %v6805_v0 = vld [vmem:[%s10127_s15 + $0x1b8] sm:$0xf0]  ;;  %v6804_v2 = vor.u32 %v9269_v62, %v6803_v60  ;;  %v9237_v55 = vld [vmem:[%s10127_s15 + $0xb4] sm:$0xf0]  ;;  %v6635_v60 = vld [vmem:[%s10127_s15 + $0x50] sm:$0xf] }
  0x5e   : > { %1556 = vmatpush.bf16.msra.mxu2 %v6692_v1  ;;  %v6808_v3 = vor.u32 %v9265_v63, %v6805_v0  ;;  %v6676_v58 = vor.u32 %v9237_v55, %v6675_v54  ;;  %v9224_v63 = vld [vmem:[%s10127_s15 + $0x54] sm:$0xf] }
  0x5f   : > { %1569 = vmatpush.bf16.msra.mxu3 %v6696_v5  ;;  %v6763_v5 = vld [vmem:[%s10127_s15 + $0x150] sm:$0xf]  ;;  %v6637_v0 = vld [vmem:[%s10127_s15 + $0x70] sm:$0xf0] }
  0x60   : > { %1531 = vmatpush.bf16.msra.mxu0 %v6652_v9  ;;  %v6764_v9 = vor.u32 %v9260_v6, %v6763_v5  ;;  %v9225_v5 = vld [vmem:[%s10127_s15 + $0x5c] sm:$0xf] }
  0x61   : > { %1544 = vmatpush.bf16.msra.mxu1 %v6656_v13  ;;  %v6645_v6 = vld [vmem:[%s10127_s15 + $0x78] sm:$0xf0] }
  0x62   : > { %1557 = vmatpush.bf16.msra.mxu2 %v6660_v14  ;;  %v6768_v14 = vor.u32 %v9256_v7, %v6765_v10  ;;  %v6640_v7 = vor.u32 %v9224_v63, %v6637_v0 }
  0x63   : > { %1570 = vmatpush.bf16.msra.mxu3 %v6664_v18  ;;  %v6776_v18 = vor.u32 %v9257_v16, %v6773_v17  ;;  %v9221_v16 = vld [vmem:[%s10127_s15 + $0x34] sm:$0xf0]  ;;  %v9217_v17 = vld [vmem:[%s10127_s15 + $0x1c] sm:$0xf] }
  0x64   : > { %1532 = vmatpush.bf16.msra.mxu0 %v6620_v25  ;;  %v6739_v25 = vld [vmem:[%s10127_s15 + $0x118] sm:$0xf] }
  0x65   : > { %1545 = vmatpush.bf16.msra.mxu1 %v6624_v26  ;;  %v6736_v26 = vor.u32 %v9248_v23, %v6733_v24 }
  0x66   : > { %1558 = vmatpush.bf16.msra.mxu2 %v6628_v27  ;;  %v9253_v27 = vld [vmem:[%s10127_s15 + $0x134] sm:$0xf0] }
  0x67   : > { %1571 = vmatpush.bf16.msra.mxu3 %v6632_v28  ;;  %v9249_v28 = vld [vmem:[%s10127_s15 + $0x11c] sm:$0xf]  ;;  %v6740_v31 = vor.u32 %v9253_v27, %v6739_v25 }
  0x68   : > { %1533 = vmatpush.bf16.msra.mxu0 %v6588_v32  ;;  %v6744_v32 = vor.u32 %v9249_v28, %v6741_v29 }
  0x69   : > { %1546 = vmatpush.bf16.msra.mxu1 %v6592_v37  ;;  %v9240_v37 = vld [vmem:[%s10127_s15 + $0xd4] sm:$0xf] }
  0x6a   : > { %1559 = vmatpush.bf16.msra.mxu2 %v6596_v38  ;;  %v6704_v44 = vor.u32 %v9240_v37, %v6701_v40 }
  0x6b   : > { %1572 = vmatpush.bf16.msra.mxu3 %v6600_v43  ;;  %v9245_v43 = vld [vmem:[%s10127_s15 + $0xf4] sm:$0xf0] }
  0x6c   : > { %1578 = vmatpush.bf16.msrb.mxu0 %v6828_v47  ;;  %v6708_v45 = vor.u32 %v9245_v43, %v6707_v41  ;;  %v6709_v47 = vld [vmem:[%s10127_s15 + $0xf8] sm:$0xf0] }
  0x6d   : > { %1591 = vmatpush.bf16.msrb.mxu1 %v6832_v48  ;;  %v6667_v48 = vld [vmem:[%s10127_s15 + $0x90] sm:$0xf]  ;;  %v6712_v49 = vor.u32 %v9241_v46, %v6709_v47 }
  0x6e   : > { %1604 = vmatpush.bf16.msrb.mxu2 %v6836_v52  ;;  %v6668_v52 = vor.u32 %v9236_v50, %v6667_v48 }
  0x6f   : > { %1617 = vmatpush.bf16.msrb.mxu3 %v6840_v56  ;;  %v9233_v56 = vld [vmem:[%s10127_s15 + $0x9c] sm:$0xf] }
  0x70   : > { %1579 = vmatpush.bf16.msrb.mxu0 %v6796_v57  ;;  %v6680_v62 = vor.u32 %v9233_v56, %v6677_v59 }
  0x71   : > { %1592 = vmatpush.bf16.msrb.mxu1 %v6800_v61  ;;  %v9228_v61 = vld [vmem:[%s10127_s15 + $0x6c] sm:$0xf0] }
  0x72   : > { %1605 = vmatpush.bf16.msrb.mxu2 %v6804_v2  ;;  %v6643_v2 = vld [vmem:[%s10127_s15 + $0x58] sm:$0xf] }
  0x73   : > { %1618 = vmatpush.bf16.msrb.mxu3 %v6808_v3  ;;  %v9229_v3 = vld [vmem:[%s10127_s15 + $0x74] sm:$0xf0] }
  0x74   : > { %1580 = vmatpush.bf16.msrb.mxu0 %v6764_v9  ;;  %v6644_v10 = vor.u32 %v9229_v3, %v6643_v2 }
  0x75   : > { %1593 = vmatpush.bf16.msrb.mxu1 %v6768_v14  ;;  %v6648_v14 = vor.u32 %v9225_v5, %v6645_v6 }
  0x76   : > { %1606 = vmatpush.bf16.msrb.mxu2 %v6772_v15  ;;  %v6611_v15 = vld [vmem:[%s10127_s15 + $0x18] sm:$0xf] }
  0x77   : > { %1619 = vmatpush.bf16.msrb.mxu3 %v6776_v18  ;;  %v6613_v18 = vld [vmem:[%s10127_s15 + $0x38] sm:$0xf0]  ;;  %v6612_v23 = vor.u32 %v9221_v16, %v6611_v15 }
  0x78   : > { %1581 = vmatpush.bf16.msrb.mxu0 %v6732_v22  ;;  %v6616_v24 = vor.u32 %v9217_v17, %v6613_v18 }
  0x79   : > { %1594 = vmatpush.bf16.msrb.mxu1 %v6736_v26 }
  0x7a   : > { %1607 = vmatpush.bf16.msrb.mxu2 %v6740_v31 }
  0x7b   : > { %1620 = vmatpush.bf16.msrb.mxu3 %v6744_v32 }
  0x7c   : > { %1582 = vmatpush.bf16.msrb.mxu0 %v6700_v39 }
  0x7d   : > { %1595 = vmatpush.bf16.msrb.mxu1 %v6704_v44 }
  0x7e   : > { %1608 = vmatpush.bf16.msrb.mxu2 %v6708_v45 }
  0x7f   : > { %1621 = vmatpush.bf16.msrb.mxu3 %v6712_v49 }
  0x80   : > { %1583 = vmatpush.bf16.msrb.mxu0 %v6668_v52 }
  0x82   : > { %1609 = vmatpush.bf16.msrb.mxu2 %v6676_v58 }
  0x83   : > { %1622 = vmatpush.bf16.msrb.mxu3 %v6680_v62 }
  0x86   : > { %1610 = vmatpush.bf16.msrb.mxu2 %v6644_v10 }
  0x87   : > { %1623 = vmatpush.bf16.msrb.mxu3 %v6648_v14 }
  0x8a   : > { %1611 = vmatpush.bf16.msrb.mxu2 %v6612_v23 }
  0x8b   : > { %1624 = vmatpush.bf16.msrb.mxu3 %v6616_v24 }
  0xa8   : > { %v10215_v36 = vpop.f32.mrf.mxu0 }
  0xa9   : > { %v10220_v42 = vpop.f32.mrf.mxu1  ;;  %v1018_v38 = vadd.f32 %v9862_v19, %v10215_v36  ;;  %v9232_v36 = vld [vmem:[%s10127_s15 + $0x94] sm:$0xf] }
  0xaa   : > { %v6672_v53 = vor.u32 %v9232_v36, %v6669_v51 }
  0xab   : > { %v1031_v57 = vadd.f32 %v10220_v42, %v1018_v38  ;;  %v6636_v42 = vor.u32 %v9228_v61, %v6635_v60 }
  0xac   : > { %1596 = vmatpush.bf16.msrb.mxu1 %v6672_v53 }
  0xad   : > { %1584 = vmatpush.bf16.msrb.mxu0 %v6636_v42 }
  0xb0   : > { %v10237_v1 = vpop.f32.mrf.mxu2  ;;  %v1019_v8 = vpop.f32.mrf.mxu0  ;;  %1597 = vmatpush.bf16.msrb.mxu1 %v6640_v7 }
  0xb1   : > { %v10239_v4 = vpop.f32.mrf.mxu3  ;;  %v1032_v13 = vpop.f32.mrf.mxu1  ;;  %v6603_v8 = vld [vmem:[%s10127_s15 + $0x10] sm:$0xf]  ;;  %v1044_v9 = vadd.f32 %v10237_v1, %v1031_v57 }
  0xb2   : > { %v6605_v13 = vld [vmem:[%s10127_s15 + $0x30] sm:$0xf0]  ;;  %v6604_v19 = vor.u32 %v9220_v11, %v6603_v8  ;;  %s9148_s15 = sshll.u32 %s11610_s18, 12 }
  0xb3   : > { %v6608_v20 = vor.u32 %v9216_v12, %v6605_v13  ;;  %v1057_v21 = vadd.f32 %v10239_v4, %v1044_v9  ;;  %v9863_v4 = vld [vmem:[%s11600_s3] ss:$0 sm:$0xff]  ;;  %s10303_s25 = scalar_lea.vmem %s11604_s7, %s9148_s15 }
  0xb4   : > { %1585 = vmatpush.bf16.msrb.mxu0 %v6604_v19  ;;  %v7067_v37 = vld [vmem:[%s10303_s25 + $0x1c0] sm:$0xf] }
  0xb5   : > { %1598 = vmatpush.bf16.msrb.mxu1 %v6608_v20  ;;  %v9338_v38 = vld [vmem:[%s10303_s25 + $0x1dc] sm:$0xf0] }
  0xb6   : > { %v7323_v41 = vld [vmem:[%s10303_s25 + $0x3c0] sm:$0xf]  ;;  %v7068_v50 = vor.u32 %v9338_v38, %v7067_v37 }
  0xb7   : > { %v9402_v43 = vld [vmem:[%s10303_s25 + $0x3dc] sm:$0xf0] }
  0xb8   : > { %v1045_v30 = vpop.f32.mrf.mxu2  ;;  %v7579_v44 = vld [vmem:[%s10303_s25 + $0x5c0] sm:$0xf]  ;;  %v7324_v36 = vor.u32 %v9402_v43, %v7323_v41 }
  0xb9   : > { %v1058_v33 = vpop.f32.mrf.mxu3  ;;  %v9466_v46 = vld [vmem:[%s10303_s25 + $0x5dc] sm:$0xf0] }
  0xba   : > { %v7835_v47 = vld [vmem:[%s10303_s25 + $0x7c0] sm:$0xf]  ;;  %v7580_v55 = vor.u32 %v9466_v46, %v7579_v44 }
  0xbb   : > { %v9530_v48 = vld [vmem:[%s10303_s25 + $0x7dc] sm:$0xf0] }
  0xbc   : > { %v7035_v51 = vld [vmem:[%s10303_s25 + $0x180] sm:$0xf]  ;;  %v7836_v56 = vor.u32 %v9530_v48, %v7835_v47 }
  0xbd   : > { %v9330_v52 = vld [vmem:[%s10303_s25 + $0x19c] sm:$0xf0] }
  0xbe   : > { %v7291_v53 = vld [vmem:[%s10303_s25 + $0x380] sm:$0xf]  ;;  %v7036_v61 = vor.u32 %v9330_v52, %v7035_v51 }
  0xbf   : > { %v9394_v54 = vld [vmem:[%s10303_s25 + $0x39c] sm:$0xf0] }
  0xc0   : > { %v7547_v57 = vld [vmem:[%s10303_s25 + $0x580] sm:$0xf]  ;;  %v7292_v62 = vor.u32 %v9394_v54, %v7291_v53 }
  0xc1   : > { %v9458_v58 = vld [vmem:[%s10303_s25 + $0x59c] sm:$0xf0] }
  0xc2   : > { %v7803_v59 = vld [vmem:[%s10303_s25 + $0x780] sm:$0xf]  ;;  %v7548_v5 = vor.u32 %v9458_v58, %v7547_v57 }
  0xc3   : > { %v9522_v60 = vld [vmem:[%s10303_s25 + $0x79c] sm:$0xf0] }
  0xc4   : > { %v7003_v63 = vld [vmem:[%s10303_s25 + $0x140] sm:$0xf]  ;;  %v7804_v6 = vor.u32 %v9522_v60, %v7803_v59 }
  0xc5   : > { %v9322_v0 = vld [vmem:[%s10303_s25 + $0x15c] sm:$0xf0] }
  0xc6   : > { %v7259_v2 = vld [vmem:[%s10303_s25 + $0x340] sm:$0xf]  ;;  %v7004_v10 = vor.u32 %v9322_v0, %v7003_v63 }
  0xc7   : > { %v9386_v3 = vld [vmem:[%s10303_s25 + $0x35c] sm:$0xf0] }
  0xc8   : > { %v1069_v22 = vpop.f32.mrf.mxu0  ;;  %v7515_v42 = vld [vmem:[%s10303_s25 + $0x540] sm:$0xf]  ;;  %v7260_v11 = vor.u32 %v9386_v3, %v7259_v2 }
  0xc9   : > { %v1082_v1 = vpop.f32.mrf.mxu1  ;;  %v1070_v25 = vadd.f32 %v1069_v22, %v1057_v21  ;;  %v9450_v7 = vld [vmem:[%s10303_s25 + $0x55c] sm:$0xf0] }
  0xca   : > { %v7771_v8 = vld [vmem:[%s10303_s25 + $0x740] sm:$0xf]  ;;  %v7516_v16 = vor.u32 %v9450_v7, %v7515_v42 }
  0xcb   : > { %v1083_v26 = vadd.f32 %v1082_v1, %v1070_v25  ;;  %v9514_v9 = vld [vmem:[%s10303_s25 + $0x75c] sm:$0xf0] }
  0xcc   : > { %v6971_v12 = vld [vmem:[%s10303_s25 + $0x100] sm:$0xf]  ;;  %v7772_v17 = vor.u32 %v9514_v9, %v7771_v8 }
  0xcd   : > { %v9314_v13 = vld [vmem:[%s10303_s25 + $0x11c] sm:$0xf0] }
  0xce   : > { %v7227_v14 = vld [vmem:[%s10303_s25 + $0x300] sm:$0xf]  ;;  %v6972_v22 = vor.u32 %v9314_v13, %v6971_v12 }
  0xcf   : > { %v9378_v15 = vld [vmem:[%s10303_s25 + $0x31c] sm:$0xf0] }
  0xd0   : > { %v1095_v27 = vpop.f32.mrf.mxu2  ;;  %v1071_v30 = vpop.f32.mrf.mxu0  ;;  %v7483_v18 = vld [vmem:[%s10303_s25 + $0x500] sm:$0xf]  ;;  %v7228_v1 = vor.u32 %v9378_v15, %v7227_v14 }
  0xd1   : > { %v1108_v28 = vpop.f32.mrf.mxu3  ;;  %v1096_v29 = vadd.f32 %v1095_v27, %v1083_v26  ;;  %v1084_v31 = vpop.f32.mrf.mxu1  ;;  %v9442_v19 = vld [vmem:[%s10303_s25 + $0x51c] sm:$0xf0] }
  0xd2   : > { %v7739_v20 = vld [vmem:[%s10303_s25 + $0x700] sm:$0xf]  ;;  %v7484_v27 = vor.u32 %v9442_v19, %v7483_v18 }
  0xd3   : > { %v1109_v32 = vadd.f32 %v1108_v28, %v1096_v29  ;;  %v9506_v21 = vld [vmem:[%s10303_s25 + $0x71c] sm:$0xf0] }
  0xd4   : > { %v6939_v23 = vld [vmem:[%s10303_s25 + $0xc0] sm:$0xf]  ;;  %v7740_v28 = vor.u32 %v9506_v21, %v7739_v20 }
  0xd5   : > { %v1112_v33 = vmax.f32 %v1109_v32, 0.0  ;;  %v9306_v24 = vld [vmem:[%s10303_s25 + $0xdc] sm:$0xf0] }
  0xd6   : > { %v7195_v25 = vld [vmem:[%s10303_s25 + $0x2c0] sm:$0xf] }
  0xd7   : > { %v1117_v35 = vmul.f32 %v9863_v4, %v1112_v33  ;;  %v9370_v26 = vld [vmem:[%s10303_s25 + $0x2dc] sm:$0xf0]  ;;  %v6940_v4 = vor.u32 %v9306_v24, %v6939_v23 }
  0xd8   : > { %v1097_v39 = vpop.f32.mrf.mxu2  ;;  %v7451_v29 = vld [vmem:[%s10303_s25 + $0x4c0] sm:$0xf]  ;;  %v7196_v33 = vor.u32 %v9370_v26, %v7195_v25 }
  0xd9   : > { %v1110_v40 = vpop.f32.mrf.mxu3  ;;  %v1122_v45 = vadd.f32 %v9864_v34, %v1117_v35  ;;  %v9434_v30 = vld [vmem:[%s10303_s25 + $0x4dc] sm:$0xf0] }
  0xda   : > { %v7707_v31 = vld [vmem:[%s10303_s25 + $0x6c0] sm:$0xf]  ;;  %v7452_v39 = vor.u32 %v9434_v30, %v7451_v29 }
  0xdb   : > { %v10316_v49 = vpack.c.bf16 %v1122_v45, %v1122_v45  ;;  %v9498_v32 = vld [vmem:[%s10303_s25 + $0x6dc] sm:$0xf0] }
  0xdc   : > { %v6907_v34 = vld [vmem:[%s10303_s25 + $0x80] sm:$0xf]  ;;  %v7708_v40 = vor.u32 %v9498_v32, %v7707_v31 }
  0xdd   : > { %1534 = vmatmul.bf16.vlgmr.msra.gmra.mxu0 %v10316_v49  ;;  %1547 = vmatmul.bf16.vlgmr.msra.gmra.mxu1 %v10316_v49  ;;  %v9298_v35 = vld [vmem:[%s10303_s25 + $0x9c] sm:$0xf0] }
  0xde   : > { %1560 = vmatmul.bf16.vlgmr.msra.gmra.mxu2 %v10316_v49  ;;  %1573 = vmatmul.bf16.vlgmr.msra.gmra.mxu3 %v10316_v49  ;;  %v7163_v37 = vld [vmem:[%s10303_s25 + $0x280] sm:$0xf]  ;;  %v6908_v46 = vor.u32 %v9298_v35, %v6907_v34 }
  0xdf   : > { %4736 = vmatpush.bf16.msra.mxu0 %v7068_v50  ;;  %4749 = vmatpush.bf16.msra.mxu1 %v7324_v36  ;;  %v9362_v38 = vld [vmem:[%s10303_s25 + $0x29c] sm:$0xf0] }
  0xe0   : > { %4762 = vmatpush.bf16.msra.mxu2 %v7580_v55  ;;  %4775 = vmatpush.bf16.msra.mxu3 %v7836_v56  ;;  %v7419_v41 = vld [vmem:[%s10303_s25 + $0x480] sm:$0xf]  ;;  %v7164_v47 = vor.u32 %v9362_v38, %v7163_v37 }
  0xe1   : > { %v9426_v43 = vld [vmem:[%s10303_s25 + $0x49c] sm:$0xf0] }
  0xe2   : > { %v7675_v44 = vld [vmem:[%s10303_s25 + $0x680] sm:$0xf]  ;;  %v7420_v52 = vor.u32 %v9426_v43, %v7419_v41 }
  0xe3   : > { %4737 = vmatpush.bf16.msra.mxu0 %v7036_v61  ;;  %4750 = vmatpush.bf16.msra.mxu1 %v7292_v62  ;;  %v9490_v45 = vld [vmem:[%s10303_s25 + $0x69c] sm:$0xf0] }
  0xe4   : > { %4763 = vmatpush.bf16.msra.mxu2 %v7548_v5  ;;  %4776 = vmatpush.bf16.msra.mxu3 %v7804_v6  ;;  %v6875_v48 = vld [vmem:[%s10303_s25 + $0x40] sm:$0xf]  ;;  %v7676_v53 = vor.u32 %v9490_v45, %v7675_v44 }
  0xe5   : > { %v9290_v50 = vld [vmem:[%s10303_s25 + $0x5c] sm:$0xf0] }
  0xe6   : > { %v7131_v36 = vld [vmem:[%s10303_s25 + $0x240] sm:$0xf]  ;;  %v6876_v58 = vor.u32 %v9290_v50, %v6875_v48 }
  0xe7   : > { %4738 = vmatpush.bf16.msra.mxu0 %v7004_v10  ;;  %4751 = vmatpush.bf16.msra.mxu1 %v7260_v11  ;;  %v9354_v51 = vld [vmem:[%s10303_s25 + $0x25c] sm:$0xf0] }
  0xe8   : > { %4764 = vmatpush.bf16.msra.mxu2 %v7516_v16  ;;  %4777 = vmatpush.bf16.msra.mxu3 %v7772_v17  ;;  %v9418_v54 = vld [vmem:[%s10303_s25 + $0x45c] sm:$0xf0]  ;;  %v7132_v59 = vor.u32 %v9354_v51, %v7131_v36 }
  0xe9   : > { %v7643_v55 = vld [vmem:[%s10303_s25 + $0x640] sm:$0xf] }
  0xea   : > { %v9482_v56 = vld [vmem:[%s10303_s25 + $0x65c] sm:$0xf0] }
  0xeb   : > { %4739 = vmatpush.bf16.msra.mxu0 %v6972_v22  ;;  %4752 = vmatpush.bf16.msra.mxu1 %v7228_v1  ;;  %v6843_v57 = vld [vmem:[%s10303_s25] sm:$0xf]  ;;  %v7644_v5 = vor.u32 %v9482_v56, %v7643_v55 }
  0xec   : > { %4765 = vmatpush.bf16.msra.mxu2 %v7484_v27  ;;  %4778 = vmatpush.bf16.msra.mxu3 %v7740_v28  ;;  %v9282_v60 = vld [vmem:[%s10303_s25 + $0x1c] sm:$0xf0] }
  0xed   : > { %1586 = vmatmul.bf16.vlgmr.msrb.gmra.mxu0 %v10316_v49  ;;  %1599 = vmatmul.bf16.vlgmr.msrb.gmra.mxu1 %v10316_v49  ;;  %v7099_v61 = vld [vmem:[%s10303_s25 + $0x200] sm:$0xf]  ;;  %v6844_v11 = vor.u32 %v9282_v60, %v6843_v57 }
  0xee   : > { %1612 = vmatmul.bf16.vlgmr.msrb.gmra.mxu2 %v10316_v49  ;;  %1625 = vmatmul.bf16.vlgmr.msrb.gmra.mxu3 %v10316_v49  ;;  %v7387_v49 = vld [vmem:[%s10303_s25 + $0x440] sm:$0xf] }
  0xef   : > { %4740 = vmatpush.bf16.msra.mxu0 %v6940_v4  ;;  %4753 = vmatpush.bf16.msra.mxu1 %v7196_v33  ;;  %v9346_v62 = vld [vmem:[%s10303_s25 + $0x21c] sm:$0xf0]  ;;  %v7388_v3 = vor.u32 %v9418_v54, %v7387_v49 }
  0xf0   : > { %4766 = vmatpush.bf16.msra.mxu2 %v7452_v39  ;;  %4779 = vmatpush.bf16.msra.mxu3 %v7708_v40  ;;  %v8091_v63 = vld [vmem:[%s10303_s25 + $0x9c0] sm:$0xf]  ;;  %v7100_v12 = vor.u32 %v9346_v62, %v7099_v61 }
  0xf1   : > { %v9594_v0 = vld [vmem:[%s10303_s25 + $0x9dc] sm:$0xf0] }
  0xf2   : > { %v8347_v2 = vld [vmem:[%s10303_s25 + $0xbc0] sm:$0xf]  ;;  %v8092_v16 = vor.u32 %v9594_v0, %v8091_v63 }
  0xf3   : > { %4741 = vmatpush.bf16.msra.mxu0 %v6908_v46  ;;  %4754 = vmatpush.bf16.msra.mxu1 %v7164_v47  ;;  %v9658_v6 = vld [vmem:[%s10303_s25 + $0xbdc] sm:$0xf0] }
  0xf4   : > { %4767 = vmatpush.bf16.msra.mxu2 %v7420_v52  ;;  %4780 = vmatpush.bf16.msra.mxu3 %v7676_v53  ;;  %v7355_v42 = vld [vmem:[%s10303_s25 + $0x400] sm:$0xf]  ;;  %v8348_v17 = vor.u32 %v9658_v6, %v8347_v2 }
  0xf5   : > { %v9410_v7 = vld [vmem:[%s10303_s25 + $0x41c] sm:$0xf0] }
  0xf6   : > { %v7611_v8 = vld [vmem:[%s10303_s25 + $0x600] sm:$0xf]  ;;  %v7356_v22 = vor.u32 %v9410_v7, %v7355_v42 }
  0xf7   : > { %v9474_v9 = vld [vmem:[%s10303_s25 + $0x61c] sm:$0xf0]  ;;  %4742 = vmatpush.bf16.msra.mxu0 %v6876_v58  ;;  %4755 = vmatpush.bf16.msra.mxu1 %v7132_v59 }
  0xf8   : > { %v8603_v10 = vld [vmem:[%s10303_s25 + $0xdc0] sm:$0xf]  ;;  %4768 = vmatpush.bf16.msra.mxu2 %v7388_v3  ;;  %4781 = vmatpush.bf16.msra.mxu3 %v7644_v5  ;;  %v7612_v1 = vor.u32 %v9474_v9, %v7611_v8 }
  0xf9   : > { %v9722_v13 = vld [vmem:[%s10303_s25 + $0xddc] sm:$0xf0] }
  0xfa   : > { %v8859_v14 = vld [vmem:[%s10303_s25 + $0xfc0] sm:$0xf]  ;;  %v8604_v23 = vor.u32 %v9722_v13, %v8603_v10 }
  0xfb   : > { %v9786_v15 = vld [vmem:[%s10303_s25 + $0xfdc] sm:$0xf0]  ;;  %4743 = vmatpush.bf16.msra.mxu0 %v6844_v11  ;;  %4756 = vmatpush.bf16.msra.mxu1 %v7100_v12 }
  0xfc   : > { %v8059_v18 = vld [vmem:[%s10303_s25 + $0x980] sm:$0xf]  ;;  %v8860_v24 = vor.u32 %v9786_v15, %v8859_v14  ;;  %4769 = vmatpush.bf16.msra.mxu2 %v7356_v22  ;;  %4782 = vmatpush.bf16.msra.mxu3 %v7612_v1 }
  0xfd   : > { %v9586_v19 = vld [vmem:[%s10303_s25 + $0x99c] sm:$0xf0] }
  0xfe   : > { %v8315_v20 = vld [vmem:[%s10303_s25 + $0xb80] sm:$0xf]  ;;  %v8060_v29 = vor.u32 %v9586_v19, %v8059_v18 }
  0xff   : > { %v9650_v21 = vld [vmem:[%s10303_s25 + $0xb9c] sm:$0xf0]  ;;  %4788 = vmatpush.bf16.msrb.mxu0 %v8092_v16  ;;  %4801 = vmatpush.bf16.msrb.mxu1 %v8348_v17 }
 0x100   : > { %v8571_v25 = vld [vmem:[%s10303_s25 + $0xd80] sm:$0xf]  ;;  %v8316_v30 = vor.u32 %v9650_v21, %v8315_v20  ;;  %4814 = vmatpush.bf16.msrb.mxu2 %v8604_v23  ;;  %4827 = vmatpush.bf16.msrb.mxu3 %v8860_v24 }
 0x101   : > { %v9714_v26 = vld [vmem:[%s10303_s25 + $0xd9c] sm:$0xf0] }
 0x102   : > { %v8827_v27 = vld [vmem:[%s10303_s25 + $0xf80] sm:$0xf]  ;;  %v8572_v34 = vor.u32 %v9714_v26, %v8571_v25 }
 0x103   : > { %v9778_v28 = vld [vmem:[%s10303_s25 + $0xf9c] sm:$0xf0]  ;;  %4789 = vmatpush.bf16.msrb.mxu0 %v8060_v29  ;;  %4802 = vmatpush.bf16.msrb.mxu1 %v8316_v30 }
 0x104   : > { %v8027_v31 = vld [vmem:[%s10303_s25 + $0x940] sm:$0xf]  ;;  %v8828_v35 = vor.u32 %v9778_v28, %v8827_v27  ;;  %4815 = vmatpush.bf16.msrb.mxu2 %v8572_v34 }
 0x105   : > { %v9578_v32 = vld [vmem:[%s10303_s25 + $0x95c] sm:$0xf0] }
 0x106   : > { %v8283_v4 = vld [vmem:[%s10303_s25 + $0xb40] sm:$0xf]  ;;  %v8028_v41 = vor.u32 %v9578_v32, %v8027_v31  ;;  %4828 = vmatpush.bf16.msrb.mxu3 %v8828_v35 }
 0x107   : > { %v9642_v33 = vld [vmem:[%s10303_s25 + $0xb5c] sm:$0xf0] }
 0x108   : > { %v8539_v37 = vld [vmem:[%s10303_s25 + $0xd40] sm:$0xf]  ;;  %v8284_v43 = vor.u32 %v9642_v33, %v8283_v4  ;;  %4790 = vmatpush.bf16.msrb.mxu0 %v8028_v41 }
 0x109   : > { %v9706_v38 = vld [vmem:[%s10303_s25 + $0xd5c] sm:$0xf0] }
 0x10a   : > { %v8795_v39 = vld [vmem:[%s10303_s25 + $0xf40] sm:$0xf]  ;;  %v8540_v48 = vor.u32 %v9706_v38, %v8539_v37  ;;  %4803 = vmatpush.bf16.msrb.mxu1 %v8284_v43 }
 0x10b   : > { %v9770_v40 = vld [vmem:[%s10303_s25 + $0xf5c] sm:$0xf0] }
 0x10c   : > { %v7995_v44 = vld [vmem:[%s10303_s25 + $0x900] sm:$0xf]  ;;  %v8796_v50 = vor.u32 %v9770_v40, %v8795_v39  ;;  %4816 = vmatpush.bf16.msrb.mxu2 %v8540_v48 }
 0x10d   : > { %v9570_v45 = vld [vmem:[%s10303_s25 + $0x91c] sm:$0xf0] }
 0x10e   : > { %v8251_v46 = vld [vmem:[%s10303_s25 + $0xb00] sm:$0xf]  ;;  %v7996_v49 = vor.u32 %v9570_v45, %v7995_v44  ;;  %4829 = vmatpush.bf16.msrb.mxu3 %v8796_v50 }
 0x10f   : > { %v9634_v47 = vld [vmem:[%s10303_s25 + $0xb1c] sm:$0xf0] }
 0x110   : > { %v8507_v36 = vld [vmem:[%s10303_s25 + $0xd00] sm:$0xf]  ;;  %v8252_v54 = vor.u32 %v9634_v47, %v8251_v46  ;;  %4791 = vmatpush.bf16.msrb.mxu0 %v7996_v49  ;;  %v9334_v47 = vld [vmem:[%s10303_s25 + $0x1c4] sm:$0xf] }
 0x111   : > { %v9698_v51 = vld [vmem:[%s10303_s25 + $0xd1c] sm:$0xf0] }
 0x112   : > { %v8763_v52 = vld [vmem:[%s10303_s25 + $0xf00] sm:$0xf]  ;;  %v8508_v59 = vor.u32 %v9698_v51, %v8507_v36  ;;  %4804 = vmatpush.bf16.msrb.mxu1 %v8252_v54  ;;  %v7069_v36 = vld [vmem:[%s10303_s25 + $0x1e0] sm:$0xf0] }
 0x113   : > { %v9762_v53 = vld [vmem:[%s10303_s25 + $0xf1c] sm:$0xf0]  ;;  %v9398_v51 = vld [vmem:[%s10303_s25 + $0x3c4] sm:$0xf] }
 0x114   : > { %v7963_v55 = vld [vmem:[%s10303_s25 + $0x8c0] sm:$0xf]  ;;  %v8764_v60 = vor.u32 %v9762_v53, %v8763_v52  ;;  %4817 = vmatpush.bf16.msrb.mxu2 %v8508_v59  ;;  %v7325_v52 = vld [vmem:[%s10303_s25 + $0x3e0] sm:$0xf0] }
 0x115   : > { %v9562_v56 = vld [vmem:[%s10303_s25 + $0x8dc] sm:$0xf0]  ;;  %v7037_v59 = vld [vmem:[%s10303_s25 + $0x1a0] sm:$0xf0] }
 0x116   : > { %v8219_v57 = vld [vmem:[%s10303_s25 + $0xac0] sm:$0xf]  ;;  %v7964_v61 = vor.u32 %v9562_v56, %v7963_v55  ;;  %4830 = vmatpush.bf16.msrb.mxu3 %v8764_v60  ;;  %v7072_v56 = vor.u32 %v9334_v47, %v7069_v36  ;;  %v9302_v36 = vld [vmem:[%s10303_s25 + $0xc4] sm:$0xf] }
 0x117   : > { %v9626_v58 = vld [vmem:[%s10303_s25 + $0xadc] sm:$0xf0] }
 0x118   : > { %v8220_v62 = vor.u32 %v9626_v58, %v8219_v57  ;;  %v7931_v63 = vld [vmem:[%s10303_s25 + $0x880] sm:$0xf]  ;;  %4792 = vmatpush.bf16.msrb.mxu0 %v7964_v61  ;;  %v7328_v57 = vor.u32 %v9398_v51, %v7325_v52  ;;  %v9326_v58 = vld [vmem:[%s10303_s25 + $0x184] sm:$0xf] }
 0x119   : > { %v9554_v0 = vld [vmem:[%s10303_s25 + $0x89c] sm:$0xf0] }
 0x11a   : > { %v8187_v2 = vld [vmem:[%s10303_s25 + $0xa80] sm:$0xf]  ;;  %4805 = vmatpush.bf16.msrb.mxu1 %v8220_v62  ;;  %v7932_v5 = vor.u32 %v9554_v0, %v7931_v63  ;;  %v9390_v62 = vld [vmem:[%s10303_s25 + $0x384] sm:$0xf] }
 0x11b   : > { %v9618_v3 = vld [vmem:[%s10303_s25 + $0xa9c] sm:$0xf0]  ;;  %v7293_v63 = vld [vmem:[%s10303_s25 + $0x3a0] sm:$0xf0] }
 0x11c   : > { %v8188_v6 = vor.u32 %v9618_v3, %v8187_v2  ;;  %4793 = vmatpush.bf16.msrb.mxu0 %v7932_v5  ;;  %v8475_v42 = vld [vmem:[%s10303_s25 + $0xcc0] sm:$0xf]  ;;  %v7040_v3 = vor.u32 %v9326_v58, %v7037_v59  ;;  %v9462_v5 = vld [vmem:[%s10303_s25 + $0x5c4] sm:$0xf] }
 0x11d   : > { %v9690_v7 = vld [vmem:[%s10303_s25 + $0xcdc] sm:$0xf0]  ;;  %v9438_v59 = vld [vmem:[%s10303_s25 + $0x504] sm:$0xf] }
 0x11e   : > { %4806 = vmatpush.bf16.msrb.mxu1 %v8188_v6  ;;  %v8731_v8 = vld [vmem:[%s10303_s25 + $0xec0] sm:$0xf]  ;;  %v8476_v9 = vor.u32 %v9690_v7, %v8475_v42  ;;  %v7581_v6 = vld [vmem:[%s10303_s25 + $0x5e0] sm:$0xf0] }
 0x11f   : > { %v9754_v10 = vld [vmem:[%s10303_s25 + $0xedc] sm:$0xf0]  ;;  %v9526_v42 = vld [vmem:[%s10303_s25 + $0x7c4] sm:$0xf] }
 0x120   : > { %v8732_v11 = vor.u32 %v9754_v10, %v8731_v8  ;;  %v7899_v12 = vld [vmem:[%s10303_s25 + $0x840] sm:$0xf]  ;;  %4818 = vmatpush.bf16.msrb.mxu2 %v8476_v9 }
 0x121   : > { %v9546_v13 = vld [vmem:[%s10303_s25 + $0x85c] sm:$0xf0] }
 0x122   : > { %v7900_v14 = vor.u32 %v9546_v13, %v7899_v12  ;;  %v8155_v15 = vld [vmem:[%s10303_s25 + $0xa40] sm:$0xf]  ;;  %4831 = vmatpush.bf16.msrb.mxu3 %v8732_v11  ;;  %v7296_v11 = vor.u32 %v9390_v62, %v7293_v63  ;;  %v7837_v12 = vld [vmem:[%s10303_s25 + $0x7e0] sm:$0xf0] }
 0x123   : > { %v9610_v16 = vld [vmem:[%s10303_s25 + $0xa5c] sm:$0xf0]  ;;  %v9318_v13 = vld [vmem:[%s10303_s25 + $0x144] sm:$0xf] }
 0x124   : > { %v8156_v17 = vor.u32 %v9610_v16, %v8155_v15  ;;  %v8443_v18 = vld [vmem:[%s10303_s25 + $0xc80] sm:$0xf]  ;;  %4794 = vmatpush.bf16.msrb.mxu0 %v7900_v14  ;;  %v7005_v14 = vld [vmem:[%s10303_s25 + $0x160] sm:$0xf0] }
 0x125   : > { %v9682_v19 = vld [vmem:[%s10303_s25 + $0xc9c] sm:$0xf0]  ;;  %v9382_v15 = vld [vmem:[%s10303_s25 + $0x344] sm:$0xf] }
 0x126   : > { %v8699_v20 = vld [vmem:[%s10303_s25 + $0xe80] sm:$0xf]  ;;  %v8444_v21 = vor.u32 %v9682_v19, %v8443_v18  ;;  %4807 = vmatpush.bf16.msrb.mxu1 %v8156_v17  ;;  %v7261_v16 = vld [vmem:[%s10303_s25 + $0x360] sm:$0xf0]  ;;  %v7584_v19 = vor.u32 %v9462_v5, %v7581_v6 }
 0x127   : > { %v9746_v22 = vld [vmem:[%s10303_s25 + $0xe9c] sm:$0xf0]  ;;  %v7485_v62 = vld [vmem:[%s10303_s25 + $0x520] sm:$0xf0] }
 0x128   : > { %v8700_v1 = vor.u32 %v9746_v22, %v8699_v20  ;;  %v7867_v23 = vld [vmem:[%s10303_s25 + $0x800] sm:$0xf]  ;;  %4819 = vmatpush.bf16.msrb.mxu2 %v8444_v21  ;;  %v7840_v20 = vor.u32 %v9526_v42, %v7837_v12  ;;  %v7008_v21 = vor.u32 %v9318_v13, %v7005_v14  ;;  %v9502_v63 = vld [vmem:[%s10303_s25 + $0x704] sm:$0xf] }
 0x129   : > { %v9538_v24 = vld [vmem:[%s10303_s25 + $0x81c] sm:$0xf0]  ;;  %v9294_v42 = vld [vmem:[%s10303_s25 + $0x84] sm:$0xf] }
 0x12a   : > { %v8123_v25 = vld [vmem:[%s10303_s25 + $0xa00] sm:$0xf]  ;;  %v7868_v26 = vor.u32 %v9538_v24, %v7867_v23  ;;  %4832 = vmatpush.bf16.msrb.mxu3 %v8700_v1  ;;  %v9454_v23 = vld [vmem:[%s10303_s25 + $0x584] sm:$0xf] }
 0x12b   : > { %v9602_v27 = vld [vmem:[%s10303_s25 + $0xa1c] sm:$0xf0]  ;;  %v7549_v24 = vld [vmem:[%s10303_s25 + $0x5a0] sm:$0xf0] }
 0x12c   : > { %v8124_v28 = vor.u32 %v9602_v27, %v8123_v25  ;;  %4795 = vmatpush.bf16.msrb.mxu0 %v7868_v26  ;;  %v8411_v29 = vld [vmem:[%s10303_s25 + $0xc40] sm:$0xf]  ;;  %v7264_v27 = vor.u32 %v9382_v15, %v7261_v16  ;;  %v9430_v13 = vld [vmem:[%s10303_s25 + $0x4c4] sm:$0xf] }
 0x12d   : > { %v9674_v30 = vld [vmem:[%s10303_s25 + $0xc5c] sm:$0xf0] }
 0x12e   : > { %4808 = vmatpush.bf16.msrb.mxu1 %v8124_v28  ;;  %v8412_v31 = vor.u32 %v9674_v30, %v8411_v29  ;;  %v8667_v32 = vld [vmem:[%s10303_s25 + $0xe40] sm:$0xf]  ;;  %v9518_v28 = vld [vmem:[%s10303_s25 + $0x784] sm:$0xf] }
 0x12f   : > { %v9738_v4 = vld [vmem:[%s10303_s25 + $0xe5c] sm:$0xf0]  ;;  %v7805_v29 = vld [vmem:[%s10303_s25 + $0x7a0] sm:$0xf0] }
 0x130   : > { %v8668_v33 = vor.u32 %v9738_v4, %v8667_v32  ;;  %4820 = vmatpush.bf16.msrb.mxu2 %v8412_v31  ;;  %v8379_v34 = vld [vmem:[%s10303_s25 + $0xc00] sm:$0xf]  ;;  %v9310_v30 = vld [vmem:[%s10303_s25 + $0x104] sm:$0xf] }
 0x131   : > { %v9666_v35 = vld [vmem:[%s10303_s25 + $0xc1c] sm:$0xf0]  ;;  %v6973_v31 = vld [vmem:[%s10303_s25 + $0x120] sm:$0xf0] }
 0x132   : > { %4833 = vmatpush.bf16.msrb.mxu3 %v8668_v33  ;;  %v8380_v37 = vor.u32 %v9666_v35, %v8379_v34  ;;  %v8635_v38 = vld [vmem:[%s10303_s25 + $0xe00] sm:$0xf]  ;;  %v9374_v32 = vld [vmem:[%s10303_s25 + $0x304] sm:$0xf] }
 0x133   : > { %v9730_v39 = vld [vmem:[%s10303_s25 + $0xe1c] sm:$0xf0]  ;;  %v7229_v4 = vld [vmem:[%s10303_s25 + $0x320] sm:$0xf0] }
 0x134   : > { %v8636_v40 = vor.u32 %v9730_v39, %v8635_v38  ;;  %4821 = vmatpush.bf16.msrb.mxu2 %v8380_v37  ;;  %v10452_v41 = vld [vmem:[%s451_s13] sm:$0xff]  ;;  %v7552_v37 = vor.u32 %v9454_v23, %v7549_v24  ;;  %v7808_v38 = vor.u32 %v9518_v28, %v7805_v29  ;;  %v7232_v47 = vor.u32 %v9374_v32, %v7229_v4 }
 0x135   : > { %v1190_v43 = vperm.slane %v10452_v41, 0  ;;  %v1191_v44 = vperm.slane %v10452_v41, 1  ;;  %v1192_v54 = vperm.slane %v10452_v41, 2  ;;  %v1193_v55 = vperm.slane %v10452_v41, 3  ;;  %v9446_v33 = vld [vmem:[%s10303_s25 + $0x544] sm:$0xf] }
 0x136   : > { %4834 = vmatpush.bf16.msrb.mxu3 %v8636_v40  ;;  %v1194_v22 = vperm.slane %v10452_v41, 4  ;;  %v1195_v1 = vperm.slane %v10452_v41, 5  ;;  %v7517_v39 = vld [vmem:[%s10303_s25 + $0x560] sm:$0xf0]  ;;  %v1197_v58 = vperm.slane %v10452_v41, 7 }
 0x137   : > { %v9510_v40 = vld [vmem:[%s10303_s25 + $0x744] sm:$0xf]  ;;  %v7520_v51 = vor.u32 %v9446_v33, %v7517_v39 }
 0x138   : > { %v6877_v23 = vld [vmem:[%s10303_s25 + $0x60] sm:$0xf0] }
 0x139   : > { %v9350_v28 = vld [vmem:[%s10303_s25 + $0x244] sm:$0xf] }
 0x13a   : > { %v7133_v29 = vld [vmem:[%s10303_s25 + $0x260] sm:$0xf0] }
 0x13b   : > { %v9422_v32 = vld [vmem:[%s10303_s25 + $0x484] sm:$0xf]  ;;  %v7136_v39 = vor.u32 %v9350_v28, %v7133_v29 }
 0x13c   : > { %v9774_v28 = vld [vmem:[%s10303_s25 + $0xf84] sm:$0xf] }
 0x13d   : > { %v8829_v29 = vld [vmem:[%s10303_s25 + $0xfa0] sm:$0xf0] }
 0x15a   : > { %v1535_v45 = vpop.f32.mrf.mxu0  ;;  %v1548_v46 = vpop.f32.mrf.mxu1 }
 0x15b   : > { %v1536_v48 = vadd.f32 %v1535_v45, %v1190_v43  ;;  %v1549_v50 = vadd.f32 %v1548_v46, %v1191_v44  ;;  %v7773_v43 = vld [vmem:[%s10303_s25 + $0x760] sm:$0xf0]  ;;  %v6976_v46 = vor.u32 %v9310_v30, %v6973_v31 }
 0x15c   : > { %v7776_v52 = vor.u32 %v9510_v40, %v7773_v43  ;;  %v9278_v40 = vld [vmem:[%s10303_s25 + $0x4] sm:$0xf] }
 0x15d   : > { %v1630_v53 = vmax.f32 %v1536_v48, 0.0  ;;  %v1631_v49 = vmax.f32 %v1549_v50, 0.0  ;;  %v6845_v43 = vld [vmem:[%s10303_s25 + $0x20] sm:$0xf0] }
 0x15f   : > { %v10464_v60 = vpack.c.bf16 %v1630_v53, %v1630_v53  ;;  %v10466_v61 = vpack.c.bf16 %v1631_v49, %v1631_v49  ;;  %v6941_v53 = vld [vmem:[%s10303_s25 + $0xe0] sm:$0xf0] }
 0x160   : > { %v9366_v49 = vld [vmem:[%s10303_s25 + $0x2c4] sm:$0xf]  ;;  %v6944_v5 = vor.u32 %v9302_v36, %v6941_v53 }
 0x161   : > { %v1561_v0 = vpop.f32.mrf.mxu2  ;;  %v1574_v2 = vpop.f32.mrf.mxu3  ;;  %4744 = vmatmul.bf16.vlgmr.msra.gmra.mxu0 %v10464_v60  ;;  %4757 = vmatmul.bf16.vlgmr.msra.gmra.mxu1 %v10466_v61  ;;  %v8349_v53 = vld [vmem:[%s10303_s25 + $0xbe0] sm:$0xf0] }
 0x162   : > { %v1562_v7 = vadd.f32 %v1561_v0, %v1192_v54  ;;  %v1575_v8 = vadd.f32 %v1574_v2, %v1193_v55  ;;  %4840 = vmatpush.bf16.msra.mxu0 %v7072_v56  ;;  %4853 = vmatpush.bf16.msra.mxu1 %v7328_v57  ;;  %v1537_v9 = vpop.f32.mrf.mxu0  ;;  %v1550_v10 = vpop.f32.mrf.mxu1  ;;  %v7197_v54 = vld [vmem:[%s10303_s25 + $0x2e0] sm:$0xf0]  ;;  %v1196_v57 = vperm.slane %v10452_v41, 6 }
 0x163   : > { %v7741_v0 = vld [vmem:[%s10303_s25 + $0x720] sm:$0xf0]  ;;  %v7200_v6 = vor.u32 %v9366_v49, %v7197_v54 }
 0x164   : > { %v1632_v17 = vmax.f32 %v1562_v7, 0.0  ;;  %v1633_v18 = vmax.f32 %v1575_v8, 0.0  ;;  %v6909_v7 = vld [vmem:[%s10303_s25 + $0xa0] sm:$0xf0]  ;;  %v7744_v12 = vor.u32 %v9502_v63, %v7741_v0 }
 0x165   : > { %v9358_v8 = vld [vmem:[%s10303_s25 + $0x284] sm:$0xf] }
 0x166   : > { %v10484_v25 = vpack.c.bf16 %v1632_v17, %v1632_v17  ;;  %v10486_v26 = vpack.c.bf16 %v1633_v18, %v1633_v18  ;;  %4841 = vmatpush.bf16.msra.mxu0 %v7040_v3  ;;  %4854 = vmatpush.bf16.msra.mxu1 %v7296_v11  ;;  %v7165_v9 = vld [vmem:[%s10303_s25 + $0x2a0] sm:$0xf0]  ;;  %v7488_v11 = vor.u32 %v9438_v59, %v7485_v62 }
 0x167   : > { %v7453_v18 = vld [vmem:[%s10303_s25 + $0x4e0] sm:$0xf0] }
 0x168   : > { %4770 = vmatmul.bf16.vlgmr.msra.gmra.mxu2 %v10484_v25  ;;  %4783 = vmatmul.bf16.vlgmr.msra.gmra.mxu3 %v10486_v26  ;;  %v7456_v30 = vor.u32 %v9430_v13, %v7453_v18  ;;  %v9414_v49 = vld [vmem:[%s10303_s25 + $0x444] sm:$0xf] }
 0x169   : > { %4866 = vmatpush.bf16.msra.mxu2 %v7584_v19  ;;  %4879 = vmatpush.bf16.msra.mxu3 %v7840_v20  ;;  %v1563_v34 = vpop.f32.mrf.mxu2  ;;  %v1576_v35 = vpop.f32.mrf.mxu3  ;;  %v9494_v19 = vld [vmem:[%s10303_s25 + $0x6c4] sm:$0xf] }
 0x16a   : > { %4842 = vmatpush.bf16.msra.mxu0 %v7008_v21  ;;  %4855 = vmatpush.bf16.msra.mxu1 %v7264_v27  ;;  %v1587_v44 = vpop.f32.mrf.mxu0  ;;  %v1600_v45 = vpop.f32.mrf.mxu1  ;;  %v7709_v20 = vld [vmem:[%s10303_s25 + $0x6e0] sm:$0xf0]  ;;  %v6912_v21 = vor.u32 %v9294_v42, %v6909_v7 }
 0x16b   : > { %v1588_v48 = vadd.f32 %v1587_v44, %v1194_v22  ;;  %v1601_v50 = vadd.f32 %v1600_v45, %v1195_v1  ;;  %v7168_v22 = vor.u32 %v9358_v8, %v7165_v9  ;;  %v9286_v1 = vld [vmem:[%s10303_s25 + $0x44] sm:$0xf]  ;;  %v7712_v31 = vor.u32 %v9494_v19, %v7709_v20 }
 0x16c   : > { %v7421_v34 = vld [vmem:[%s10303_s25 + $0x4a0] sm:$0xf0] }
 0x16d   : > { %v1634_v55 = vmax.f32 %v1588_v48, 0.0  ;;  %v1635_v56 = vmax.f32 %v1601_v50, 0.0  ;;  %4867 = vmatpush.bf16.msra.mxu2 %v7552_v37  ;;  %4880 = vmatpush.bf16.msra.mxu3 %v7808_v38  ;;  %v9486_v35 = vld [vmem:[%s10303_s25 + $0x684] sm:$0xf]  ;;  %v6880_v38 = vor.u32 %v9286_v1, %v6877_v23  ;;  %v7424_v36 = vor.u32 %v9422_v32, %v7421_v34 }
 0x16e   : > { %4843 = vmatpush.bf16.msra.mxu0 %v6976_v46  ;;  %4856 = vmatpush.bf16.msra.mxu1 %v7232_v47  ;;  %v7677_v37 = vld [vmem:[%s10303_s25 + $0x6a0] sm:$0xf0] }
 0x16f   : > { %v10510_v2 = vpack.c.bf16 %v1634_v55, %v1634_v55  ;;  %v10512_v3 = vpack.c.bf16 %v1635_v56, %v1635_v56  ;;  %v9342_v44 = vld [vmem:[%s10303_s25 + $0x204] sm:$0xf] }
 0x170   : > { %v7101_v45 = vld [vmem:[%s10303_s25 + $0x220] sm:$0xf0] }
 0x171   : > { %4868 = vmatpush.bf16.msra.mxu2 %v7520_v51  ;;  %4881 = vmatpush.bf16.msra.mxu3 %v7776_v52  ;;  %v1613_v41 = vpop.f32.mrf.mxu2  ;;  %v1626_v10 = vpop.f32.mrf.mxu3  ;;  %v9590_v46 = vld [vmem:[%s10303_s25 + $0x9c4] sm:$0xf]  ;;  %v7680_v51 = vor.u32 %v9486_v35, %v7677_v37 }
 0x172   : > { %v1614_v14 = vadd.f32 %v1613_v41, %v1196_v57  ;;  %v1627_v15 = vadd.f32 %v1626_v10, %v1197_v58  ;;  %4796 = vmatmul.bf16.vlgmr.msrb.gmra.mxu0 %v10510_v2  ;;  %4809 = vmatmul.bf16.vlgmr.msrb.gmra.mxu1 %v10512_v3  ;;  %v1589_v16 = vpop.f32.mrf.mxu0  ;;  %v1602_v17 = vpop.f32.mrf.mxu1  ;;  %v8093_v47 = vld [vmem:[%s10303_s25 + $0x9e0] sm:$0xf0]  ;;  %v6848_v57 = vor.u32 %v9278_v40, %v6845_v43 }
 0x173   : > { %4844 = vmatpush.bf16.msra.mxu0 %v6944_v5  ;;  %4857 = vmatpush.bf16.msra.mxu1 %v7200_v6  ;;  %v9654_v52 = vld [vmem:[%s10303_s25 + $0xbc4] sm:$0xf]  ;;  %v7104_v58 = vor.u32 %v9342_v44, %v7101_v45  ;;  %v8096_v59 = vor.u32 %v9590_v46, %v8093_v47 }
 0x174   : > { %v1636_v24 = vmax.f32 %v1614_v14, 0.0  ;;  %v1637_v27 = vmax.f32 %v1627_v15, 0.0  ;;  %v7389_v54 = vld [vmem:[%s10303_s25 + $0x460] sm:$0xf0]  ;;  %v8352_v62 = vor.u32 %v9654_v52, %v8349_v53 }
 0x175   : > { %4869 = vmatpush.bf16.msra.mxu2 %v7488_v11  ;;  %4882 = vmatpush.bf16.msra.mxu3 %v7744_v12  ;;  %v9478_v55 = vld [vmem:[%s10303_s25 + $0x644] sm:$0xf]  ;;  %v7392_v6 = vor.u32 %v9414_v49, %v7389_v54 }
 0x176   : > { %v10529_v4 = vpack.c.bf16 %v1636_v24, %v1636_v24  ;;  %v10531_v33 = vpack.c.bf16 %v1637_v27, %v1637_v27  ;;  %v7645_v56 = vld [vmem:[%s10303_s25 + $0x660] sm:$0xf0] }
 0x177   : > { %4845 = vmatpush.bf16.msra.mxu0 %v6912_v21  ;;  %4858 = vmatpush.bf16.msra.mxu1 %v7168_v22  ;;  %v9582_v63 = vld [vmem:[%s10303_s25 + $0x984] sm:$0xf]  ;;  %v7648_v42 = vor.u32 %v9478_v55, %v7645_v56 }
 0x178   : > { %4822 = vmatmul.bf16.vlgmr.msrb.gmra.mxu2 %v10529_v4  ;;  %4835 = vmatmul.bf16.vlgmr.msrb.gmra.mxu3 %v10531_v33  ;;  %v8061_v0 = vld [vmem:[%s10303_s25 + $0x9a0] sm:$0xf0] }
 0x179   : > { %4870 = vmatpush.bf16.msra.mxu2 %v7456_v30  ;;  %4883 = vmatpush.bf16.msra.mxu3 %v7712_v31  ;;  %v1615_v48 = vpop.f32.mrf.mxu2  ;;  %v1628_v50 = vpop.f32.mrf.mxu3  ;;  %v9646_v5 = vld [vmem:[%s10303_s25 + $0xb84] sm:$0xf]  ;;  %v8064_v15 = vor.u32 %v9582_v63, %v8061_v0 }
 0x17a   : > { %v8317_v7 = vld [vmem:[%s10303_s25 + $0xba0] sm:$0xf0] }
 0x17b   : > { %4846 = vmatpush.bf16.msra.mxu0 %v6880_v38  ;;  %4859 = vmatpush.bf16.msra.mxu1 %v7136_v39  ;;  %v9406_v8 = vld [vmem:[%s10303_s25 + $0x404] sm:$0xf]  ;;  %v8320_v16 = vor.u32 %v9646_v5, %v8317_v7  ;;  %v8832_v39 = vor.u32 %v9774_v28, %v8829_v29  ;;  %v7075_v28 = vld [vmem:[%s10303_s25 + $0x1c8] sm:$0xf] }
 0x17c   : > { %v7357_v9 = vld [vmem:[%s10303_s25 + $0x420] sm:$0xf0]  ;;  %v9339_v29 = vld [vmem:[%s10303_s25 + $0x1e4] sm:$0xf0] }
 0x17d   : > { %4871 = vmatpush.bf16.msra.mxu2 %v7424_v36  ;;  %4884 = vmatpush.bf16.msra.mxu3 %v7680_v51  ;;  %v9470_v41 = vld [vmem:[%s10303_s25 + $0x604] sm:$0xf]  ;;  %v7360_v18 = vor.u32 %v9406_v8, %v7357_v9 }
 0x17e   : > { %v7613_v10 = vld [vmem:[%s10303_s25 + $0x620] sm:$0xf0] }
 0x17f   : > { %v9718_v11 = vld [vmem:[%s10303_s25 + $0xdc4] sm:$0xf]  ;;  %4847 = vmatpush.bf16.msra.mxu0 %v6848_v57  ;;  %4860 = vmatpush.bf16.msra.mxu1 %v7104_v58  ;;  %v7616_v19 = vor.u32 %v9470_v41, %v7613_v10 }
 0x180   : > { %v8605_v12 = vld [vmem:[%s10303_s25 + $0xde0] sm:$0xf0] }
 0x181   : > { %v9782_v13 = vld [vmem:[%s10303_s25 + $0xfc4] sm:$0xf]  ;;  %4872 = vmatpush.bf16.msra.mxu2 %v7392_v6  ;;  %4885 = vmatpush.bf16.msra.mxu3 %v7648_v42  ;;  %v8608_v1 = vor.u32 %v9718_v11, %v8605_v12 }
 0x182   : > { %v8861_v14 = vld [vmem:[%s10303_s25 + $0xfe0] sm:$0xf0]  ;;  %4848 = vmatmul.bf16.vlgmr.msra.gmra.mxu0 %v10464_v60  ;;  %4861 = vmatmul.bf16.vlgmr.msra.gmra.mxu1 %v10466_v61 }
 0x183   : > { %4892 = vmatpush.bf16.msrb.mxu0 %v8096_v59  ;;  %4905 = vmatpush.bf16.msrb.mxu1 %v8352_v62  ;;  %v9574_v17 = vld [vmem:[%s10303_s25 + $0x944] sm:$0xf]  ;;  %v8864_v23 = vor.u32 %v9782_v13, %v8861_v14 }
 0x184   : > { %v8029_v20 = vld [vmem:[%s10303_s25 + $0x960] sm:$0xf0] }
 0x185   : > { %v9638_v21 = vld [vmem:[%s10303_s25 + $0xb44] sm:$0xf]  ;;  %v8032_v30 = vor.u32 %v9574_v17, %v8029_v20  ;;  %4873 = vmatpush.bf16.msra.mxu2 %v7360_v18  ;;  %4886 = vmatpush.bf16.msra.mxu3 %v7616_v19 }
 0x186   : > { %v8285_v22 = vld [vmem:[%s10303_s25 + $0xb60] sm:$0xf0] }
 0x187   : > { %v9710_v24 = vld [vmem:[%s10303_s25 + $0xd84] sm:$0xf]  ;;  %4893 = vmatpush.bf16.msrb.mxu0 %v8064_v15  ;;  %4906 = vmatpush.bf16.msrb.mxu1 %v8320_v16  ;;  %v8288_v31 = vor.u32 %v9638_v21, %v8285_v22 }
 0x188   : > { %v8573_v27 = vld [vmem:[%s10303_s25 + $0xda0] sm:$0xf0]  ;;  %4874 = vmatmul.bf16.vlgmr.msra.gmra.mxu2 %v10484_v25  ;;  %4887 = vmatmul.bf16.vlgmr.msra.gmra.mxu3 %v10486_v26 }
 0x189   : > { %v9566_v32 = vld [vmem:[%s10303_s25 + $0x904] sm:$0xf]  ;;  %4918 = vmatpush.bf16.msrb.mxu2 %v8608_v1  ;;  %4931 = vmatpush.bf16.msrb.mxu3 %v8864_v23  ;;  %v8576_v38 = vor.u32 %v9710_v24, %v8573_v27 }
 0x18a   : > { %v7997_v34 = vld [vmem:[%s10303_s25 + $0x920] sm:$0xf0] }
 0x18b   : > { %v9630_v35 = vld [vmem:[%s10303_s25 + $0xb04] sm:$0xf]  ;;  %4894 = vmatpush.bf16.msrb.mxu0 %v8032_v30  ;;  %4907 = vmatpush.bf16.msrb.mxu1 %v8288_v31  ;;  %v8000_v46 = vor.u32 %v9566_v32, %v7997_v34  ;;  %v7331_v32 = vld [vmem:[%s10303_s25 + $0x3c8] sm:$0xf] }
 0x18c   : > { %v8253_v37 = vld [vmem:[%s10303_s25 + $0xb20] sm:$0xf0]  ;;  %v9403_v34 = vld [vmem:[%s10303_s25 + $0x3e4] sm:$0xf0] }
 0x18d   : > { %v9702_v40 = vld [vmem:[%s10303_s25 + $0xd44] sm:$0xf]  ;;  %v8256_v47 = vor.u32 %v9630_v35, %v8253_v37  ;;  %4919 = vmatpush.bf16.msrb.mxu2 %v8576_v38  ;;  %4932 = vmatpush.bf16.msrb.mxu3 %v8832_v39 }
 0x18e   : > { %v8541_v43 = vld [vmem:[%s10303_s25 + $0xd60] sm:$0xf0] }
 0x18f   : > { %v9766_v44 = vld [vmem:[%s10303_s25 + $0xf44] sm:$0xf]  ;;  %v8544_v52 = vor.u32 %v9702_v40, %v8541_v43  ;;  %4895 = vmatpush.bf16.msrb.mxu0 %v8000_v46  ;;  %4908 = vmatpush.bf16.msrb.mxu1 %v8256_v47  ;;  %v7043_v46 = vld [vmem:[%s10303_s25 + $0x188] sm:$0xf] }
 0x190   : > { %v8797_v45 = vld [vmem:[%s10303_s25 + $0xf60] sm:$0xf0]  ;;  %v9331_v47 = vld [vmem:[%s10303_s25 + $0x1a4] sm:$0xf0] }
 0x191   : > { %v9558_v48 = vld [vmem:[%s10303_s25 + $0x8c4] sm:$0xf]  ;;  %v8800_v53 = vor.u32 %v9766_v44, %v8797_v45  ;;  %4920 = vmatpush.bf16.msrb.mxu2 %v8544_v52  ;;  %v7076_v44 = vor.u32 %v9339_v29, %v7075_v28  ;;  %v7332_v45 = vor.u32 %v9403_v34, %v7331_v32  ;;  %v6947_v28 = vld [vmem:[%s10303_s25 + $0xc8] sm:$0xf] }
 0x192   : > { %v7965_v50 = vld [vmem:[%s10303_s25 + $0x8e0] sm:$0xf0]  ;;  %v9307_v29 = vld [vmem:[%s10303_s25 + $0xe4] sm:$0xf0] }
 0x193   : > { %v9622_v36 = vld [vmem:[%s10303_s25 + $0xac4] sm:$0xf]  ;;  %v7968_v57 = vor.u32 %v9558_v48, %v7965_v50  ;;  %4933 = vmatpush.bf16.msrb.mxu3 %v8800_v53  ;;  %v7299_v48 = vld [vmem:[%s10303_s25 + $0x388] sm:$0xf] }
 0x194   : > { %v8221_v51 = vld [vmem:[%s10303_s25 + $0xae0] sm:$0xf0]  ;;  %v7203_v32 = vld [vmem:[%s10303_s25 + $0x2c8] sm:$0xf] }
 0x195   : > { %v9694_v49 = vld [vmem:[%s10303_s25 + $0xd04] sm:$0xf]  ;;  %v8224_v58 = vor.u32 %v9622_v36, %v8221_v51  ;;  %4896 = vmatpush.bf16.msrb.mxu0 %v7968_v57  ;;  %v9395_v51 = vld [vmem:[%s10303_s25 + $0x3a4] sm:$0xf0] }
 0x196   : > { %v8509_v54 = vld [vmem:[%s10303_s25 + $0xd20] sm:$0xf0]  ;;  %v7843_v57 = vld [vmem:[%s10303_s25 + $0x7c8] sm:$0xf] }
 0x197   : > { %v9758_v55 = vld [vmem:[%s10303_s25 + $0xf04] sm:$0xf]  ;;  %v8512_v5 = vor.u32 %v9694_v49, %v8509_v54  ;;  %4909 = vmatpush.bf16.msrb.mxu1 %v8224_v58  ;;  %v9531_v58 = vld [vmem:[%s10303_s25 + $0x7e4] sm:$0xf0] }
 0x198   : > { %v8765_v56 = vld [vmem:[%s10303_s25 + $0xf20] sm:$0xf0]  ;;  %v9371_v34 = vld [vmem:[%s10303_s25 + $0x2e4] sm:$0xf0] }
 0x199   : > { %v9550_v59 = vld [vmem:[%s10303_s25 + $0x884] sm:$0xf]  ;;  %v8768_v6 = vor.u32 %v9758_v55, %v8765_v56  ;;  %4921 = vmatpush.bf16.msrb.mxu2 %v8512_v5  ;;  %v7587_v55 = vld [vmem:[%s10303_s25 + $0x5c8] sm:$0xf] }
 0x19a   : > { %v7933_v62 = vld [vmem:[%s10303_s25 + $0x8a0] sm:$0xf0]  ;;  %v9467_v56 = vld [vmem:[%s10303_s25 + $0x5e4] sm:$0xf0] }
 0x19b   : > { %v9614_v63 = vld [vmem:[%s10303_s25 + $0xa84] sm:$0xf]  ;;  %v7936_v41 = vor.u32 %v9550_v59, %v7933_v62  ;;  %4934 = vmatpush.bf16.msrb.mxu3 %v8768_v6  ;;  %v7044_v59 = vor.u32 %v9331_v47, %v7043_v46  ;;  %v7300_v62 = vor.u32 %v9395_v51, %v7299_v48  ;;  %v7011_v5 = vld [vmem:[%s10303_s25 + $0x148] sm:$0xf] }
 0x19c   : > { %v8189_v0 = vld [vmem:[%s10303_s25 + $0xaa0] sm:$0xf0]  ;;  %v9323_v6 = vld [vmem:[%s10303_s25 + $0x164] sm:$0xf0] }
 0x19d   : > { %v9686_v42 = vld [vmem:[%s10303_s25 + $0xcc4] sm:$0xf]  ;;  %v8192_v10 = vor.u32 %v9614_v63, %v8189_v0  ;;  %4897 = vmatpush.bf16.msrb.mxu0 %v7936_v41  ;;  %v7555_v41 = vld [vmem:[%s10303_s25 + $0x588] sm:$0xf] }
 0x19e   : > { %v8477_v7 = vld [vmem:[%s10303_s25 + $0xce0] sm:$0xf0]  ;;  %v7171_v48 = vld [vmem:[%s10303_s25 + $0x288] sm:$0xf] }
 0x19f   : > { %v9750_v8 = vld [vmem:[%s10303_s25 + $0xec4] sm:$0xf]  ;;  %v8480_v15 = vor.u32 %v9686_v42, %v8477_v7  ;;  %4910 = vmatpush.bf16.msrb.mxu1 %v8192_v10  ;;  %v7588_v42 = vor.u32 %v9467_v56, %v7587_v55  ;;  %v7844_v7 = vor.u32 %v9531_v58, %v7843_v57  ;;  %v9459_v10 = vld [vmem:[%s10303_s25 + $0x5a4] sm:$0xf0] }
 0x1a0   : > { %v8733_v9 = vld [vmem:[%s10303_s25 + $0xee0] sm:$0xf0]  ;;  %v9435_v51 = vld [vmem:[%s10303_s25 + $0x4e4] sm:$0xf0] }
 0x1a1   : > { %v9542_v11 = vld [vmem:[%s10303_s25 + $0x844] sm:$0xf]  ;;  %v8736_v16 = vor.u32 %v9750_v8, %v8733_v9  ;;  %4922 = vmatpush.bf16.msrb.mxu2 %v8480_v15  ;;  %v7267_v8 = vld [vmem:[%s10303_s25 + $0x348] sm:$0xf] }
 0x1a2   : > { %v7901_v12 = vld [vmem:[%s10303_s25 + $0x860] sm:$0xf0]  ;;  %v9387_v9 = vld [vmem:[%s10303_s25 + $0x364] sm:$0xf0] }
 0x1a3   : > { %v9606_v13 = vld [vmem:[%s10303_s25 + $0xa44] sm:$0xf]  ;;  %v7904_v21 = vor.u32 %v9542_v11, %v7901_v12  ;;  %4935 = vmatpush.bf16.msrb.mxu3 %v8736_v16  ;;  %v7811_v11 = vld [vmem:[%s10303_s25 + $0x788] sm:$0xf] }
 0x1a4   : > { %v8157_v14 = vld [vmem:[%s10303_s25 + $0xa60] sm:$0xf0]  ;;  %v9523_v12 = vld [vmem:[%s10303_s25 + $0x7a4] sm:$0xf0] }
 0x1a5   : > { %v9678_v17 = vld [vmem:[%s10303_s25 + $0xc84] sm:$0xf]  ;;  %v8160_v22 = vor.u32 %v9606_v13, %v8157_v14  ;;  %4898 = vmatpush.bf16.msrb.mxu0 %v7904_v21  ;;  %v7012_v13 = vor.u32 %v9323_v6, %v7011_v5  ;;  %v7268_v14 = vor.u32 %v9387_v9, %v7267_v8  ;;  %v6979_v15 = vld [vmem:[%s10303_s25 + $0x108] sm:$0xf] }
 0x1a6   : > { %v8445_v18 = vld [vmem:[%s10303_s25 + $0xca0] sm:$0xf0]  ;;  %v9315_v16 = vld [vmem:[%s10303_s25 + $0x124] sm:$0xf0] }
 0x1a7   : > { %v9742_v19 = vld [vmem:[%s10303_s25 + $0xe84] sm:$0xf]  ;;  %v8448_v30 = vor.u32 %v9678_v17, %v8445_v18  ;;  %4911 = vmatpush.bf16.msrb.mxu1 %v8160_v22  ;;  %v7556_v17 = vor.u32 %v9459_v10, %v7555_v41  ;;  %v7812_v18 = vor.u32 %v9523_v12, %v7811_v11  ;;  %v7523_v21 = vld [vmem:[%s10303_s25 + $0x548] sm:$0xf] }
 0x1a8   : > { %v8701_v20 = vld [vmem:[%s10303_s25 + $0xea0] sm:$0xf0]  ;;  %v9451_v22 = vld [vmem:[%s10303_s25 + $0x564] sm:$0xf0] }
 0x1a9   : > { %v9534_v1 = vld [vmem:[%s10303_s25 + $0x804] sm:$0xf]  ;;  %v8704_v31 = vor.u32 %v9742_v19, %v8701_v20  ;;  %4923 = vmatpush.bf16.msrb.mxu2 %v8448_v30  ;;  %v7235_v19 = vld [vmem:[%s10303_s25 + $0x308] sm:$0xf]  ;;  %v7524_v30 = vor.u32 %v9451_v22, %v7523_v21 }
 0x1aa   : > { %v7869_v23 = vld [vmem:[%s10303_s25 + $0x820] sm:$0xf0]  ;;  %v9379_v20 = vld [vmem:[%s10303_s25 + $0x324] sm:$0xf0] }
 0x1ab   : > { %v9598_v24 = vld [vmem:[%s10303_s25 + $0xa04] sm:$0xf]  ;;  %v7872_v40 = vor.u32 %v9534_v1, %v7869_v23  ;;  %4936 = vmatpush.bf16.msrb.mxu3 %v8704_v31  ;;  %v7779_v1 = vld [vmem:[%s10303_s25 + $0x748] sm:$0xf] }
 0x1ac   : > { %v8125_v27 = vld [vmem:[%s10303_s25 + $0xa20] sm:$0xf0]  ;;  %v9515_v23 = vld [vmem:[%s10303_s25 + $0x764] sm:$0xf0] }
 0x1ad   : > { %v9670_v35 = vld [vmem:[%s10303_s25 + $0xc44] sm:$0xf]  ;;  %v8128_v43 = vor.u32 %v9598_v24, %v8125_v27  ;;  %4899 = vmatpush.bf16.msrb.mxu0 %v7872_v40  ;;  %v6980_v24 = vor.u32 %v9315_v16, %v6979_v15  ;;  %v7236_v27 = vor.u32 %v9379_v20, %v7235_v19  ;;  %v7780_v31 = vor.u32 %v9515_v23, %v7779_v1  ;;  %v6883_v55 = vld [vmem:[%s10303_s25 + $0x48] sm:$0xf] }
 0x1ae   : > { %v8413_v37 = vld [vmem:[%s10303_s25 + $0xc60] sm:$0xf0]  ;;  %v6948_v40 = vor.u32 %v9307_v29, %v6947_v28  ;;  %v9291_v56 = vld [vmem:[%s10303_s25 + $0x64] sm:$0xf0] }
 0x1af   : > { %v9734_v38 = vld [vmem:[%s10303_s25 + $0xe44] sm:$0xf]  ;;  %v8416_v50 = vor.u32 %v9670_v35, %v8413_v37  ;;  %4912 = vmatpush.bf16.msrb.mxu1 %v8128_v43  ;;  %v7491_v35 = vld [vmem:[%s10303_s25 + $0x508] sm:$0xf]  ;;  %v7204_v43 = vor.u32 %v9371_v34, %v7203_v32 }
 0x1b0   : > { %v8669_v39 = vld [vmem:[%s10303_s25 + $0xe60] sm:$0xf0]  ;;  %4900 = vmatmul.bf16.vlgmr.msrb.gmra.mxu0 %v10510_v2  ;;  %v9443_v37 = vld [vmem:[%s10303_s25 + $0x524] sm:$0xf0] }
 0x1b1   : > { %v8672_v36 = vor.u32 %v9734_v38, %v8669_v39  ;;  %v9662_v52 = vld [vmem:[%s10303_s25 + $0xc04] sm:$0xf]  ;;  %4944 = vmatpush.bf16.msra.mxu0 %v7076_v44  ;;  %4924 = vmatpush.bf16.msrb.mxu2 %v8416_v50  ;;  %v7747_v38 = vld [vmem:[%s10303_s25 + $0x708] sm:$0xf]  ;;  %v7492_v46 = vor.u32 %v9443_v37, %v7491_v35 }
 0x1b2   : > { %v8381_v53 = vld [vmem:[%s10303_s25 + $0xc20] sm:$0xf0]  ;;  %4913 = vmatmul.bf16.vlgmr.msrb.gmra.mxu1 %v10512_v3  ;;  %v9507_v39 = vld [vmem:[%s10303_s25 + $0x724] sm:$0xf0] }
 0x1b3   : > { %v9726_v49 = vld [vmem:[%s10303_s25 + $0xe04] sm:$0xf]  ;;  %4957 = vmatpush.bf16.msra.mxu1 %v7332_v45  ;;  %4937 = vmatpush.bf16.msrb.mxu3 %v8672_v36  ;;  %v8384_v63 = vor.u32 %v9662_v52, %v8381_v53  ;;  %v6915_v44 = vld [vmem:[%s10303_s25 + $0x88] sm:$0xf]  ;;  %v7748_v47 = vor.u32 %v9507_v39, %v7747_v38 }
 0x1b4   : > { %v8637_v54 = vld [vmem:[%s10303_s25 + $0xe20] sm:$0xf0]  ;;  %v9299_v45 = vld [vmem:[%s10303_s25 + $0xa4] sm:$0xf0] }
 0x1b5   : > { %v8640_v0 = vor.u32 %v9726_v49, %v8637_v54  ;;  %4945 = vmatpush.bf16.msra.mxu0 %v7044_v59  ;;  %4925 = vmatpush.bf16.msrb.mxu2 %v8384_v63  ;;  %v9363_v50 = vld [vmem:[%s10303_s25 + $0x2a4] sm:$0xf0]  ;;  %v6916_v49 = vor.u32 %v9299_v45, %v6915_v44 }
 0x1b6   : > { %v7459_v36 = vld [vmem:[%s10303_s25 + $0x4c8] sm:$0xf]  ;;  %v7172_v54 = vor.u32 %v9363_v50, %v7171_v48 }
 0x1b7   : > { %4958 = vmatpush.bf16.msra.mxu1 %v7300_v62  ;;  %4938 = vmatpush.bf16.msrb.mxu3 %v8640_v0  ;;  %v7715_v52 = vld [vmem:[%s10303_s25 + $0x6c8] sm:$0xf]  ;;  %v7460_v57 = vor.u32 %v9435_v51, %v7459_v36 }
 0x1b8   : > { %4926 = vmatmul.bf16.vlgmr.msrb.gmra.mxu2 %v10529_v4  ;;  %v9499_v53 = vld [vmem:[%s10303_s25 + $0x6e4] sm:$0xf0] }
 0x1b9   : > { %4970 = vmatpush.bf16.msra.mxu2 %v7588_v42  ;;  %4946 = vmatpush.bf16.msra.mxu0 %v7012_v13  ;;  %v7716_v58 = vor.u32 %v9499_v53, %v7715_v52  ;;  %v7139_v59 = vld [vmem:[%s10303_s25 + $0x248] sm:$0xf]  ;;  %v6884_v42 = vor.u32 %v9291_v56, %v6883_v55 }
 0x1ba   : > { %4939 = vmatmul.bf16.vlgmr.msrb.gmra.mxu3 %v10531_v33  ;;  %v9355_v62 = vld [vmem:[%s10303_s25 + $0x264] sm:$0xf0] }
 0x1bb   : > { %4983 = vmatpush.bf16.msra.mxu3 %v7844_v7  ;;  %4959 = vmatpush.bf16.msra.mxu1 %v7268_v14  ;;  %v7427_v63 = vld [vmem:[%s10303_s25 + $0x488] sm:$0xf]  ;;  %v7140_v7 = vor.u32 %v9355_v62, %v7139_v59 }
 0x1bc   : > { %v9427_v0 = vld [vmem:[%s10303_s25 + $0x4a4] sm:$0xf0] }
 0x1bd   : > { %4971 = vmatpush.bf16.msra.mxu2 %v7556_v17  ;;  %4947 = vmatpush.bf16.msra.mxu0 %v6980_v24  ;;  %v7683_v5 = vld [vmem:[%s10303_s25 + $0x688] sm:$0xf]  ;;  %v7428_v10 = vor.u32 %v9427_v0, %v7427_v63 }
 0x1be   : > { %v9491_v6 = vld [vmem:[%s10303_s25 + $0x6a4] sm:$0xf0] }
 0x1bf   : > { %4984 = vmatpush.bf16.msra.mxu3 %v7812_v18  ;;  %4960 = vmatpush.bf16.msra.mxu1 %v7236_v27  ;;  %v6851_v8 = vld [vmem:[%s10303_s25 + $0x8] sm:$0xf]  ;;  %v7684_v11 = vor.u32 %v9491_v6, %v7683_v5 }
 0x1c0   : > { %v9283_v9 = vld [vmem:[%s10303_s25 + $0x24] sm:$0xf0] }
 0x1c1   : > { %4972 = vmatpush.bf16.msra.mxu2 %v7524_v30  ;;  %4948 = vmatpush.bf16.msra.mxu0 %v6948_v40  ;;  %v7107_v41 = vld [vmem:[%s10303_s25 + $0x208] sm:$0xf]  ;;  %v6852_v21 = vor.u32 %v9283_v9, %v6851_v8 }
 0x1c2   : > { %v9347_v12 = vld [vmem:[%s10303_s25 + $0x224] sm:$0xf0] }
 0x1c3   : > { %4985 = vmatpush.bf16.msra.mxu3 %v7780_v31  ;;  %4961 = vmatpush.bf16.msra.mxu1 %v7204_v43  ;;  %v8099_v13 = vld [vmem:[%s10303_s25 + $0x9c8] sm:$0xf]  ;;  %v7108_v22 = vor.u32 %v9347_v12, %v7107_v41 }
 0x1c4   : > { %v9595_v14 = vld [vmem:[%s10303_s25 + $0x9e4] sm:$0xf0] }
 0x1c5   : > { %4973 = vmatpush.bf16.msra.mxu2 %v7492_v46  ;;  %4949 = vmatpush.bf16.msra.mxu0 %v6916_v49  ;;  %v8355_v15 = vld [vmem:[%s10303_s25 + $0xbc8] sm:$0xf]  ;;  %v8100_v1 = vor.u32 %v9595_v14, %v8099_v13 }
 0x1c6   : > { %v9659_v16 = vld [vmem:[%s10303_s25 + $0xbe4] sm:$0xf0] }
 0x1c7   : > { %4986 = vmatpush.bf16.msra.mxu3 %v7748_v47  ;;  %4962 = vmatpush.bf16.msra.mxu1 %v7172_v54  ;;  %v7395_v17 = vld [vmem:[%s10303_s25 + $0x448] sm:$0xf]  ;;  %v8356_v23 = vor.u32 %v9659_v16, %v8355_v15 }
 0x1c8   : > { %v9419_v18 = vld [vmem:[%s10303_s25 + $0x464] sm:$0xf0] }
 0x1c9   : > { %4974 = vmatpush.bf16.msra.mxu2 %v7460_v57  ;;  %v7651_v19 = vld [vmem:[%s10303_s25 + $0x648] sm:$0xf]  ;;  %4950 = vmatpush.bf16.msra.mxu0 %v6884_v42  ;;  %v7396_v29 = vor.u32 %v9419_v18, %v7395_v17 }
 0x1ca   : > { %v9483_v20 = vld [vmem:[%s10303_s25 + $0x664] sm:$0xf0] }
 0x1cb   : > { %4987 = vmatpush.bf16.msra.mxu3 %v7716_v58  ;;  %4963 = vmatpush.bf16.msra.mxu1 %v7140_v7  ;;  %v8067_v24 = vld [vmem:[%s10303_s25 + $0x988] sm:$0xf]  ;;  %v7652_v30 = vor.u32 %v9483_v20, %v7651_v19 }
 0x1cc   : > { %v9587_v27 = vld [vmem:[%s10303_s25 + $0x9a4] sm:$0xf0] }
 0x1cd   : > { %4975 = vmatpush.bf16.msra.mxu2 %v7428_v10  ;;  %v8323_v28 = vld [vmem:[%s10303_s25 + $0xb88] sm:$0xf]  ;;  %4951 = vmatpush.bf16.msra.mxu0 %v6852_v21  ;;  %v8068_v44 = vor.u32 %v9587_v27, %v8067_v24 }
 0x1ce   : > { %v9651_v31 = vld [vmem:[%s10303_s25 + $0xba4] sm:$0xf0] }
 0x1cf   : > { %4988 = vmatpush.bf16.msra.mxu3 %v7684_v11  ;;  %v7363_v32 = vld [vmem:[%s10303_s25 + $0x408] sm:$0xf]  ;;  %4964 = vmatpush.bf16.msra.mxu1 %v7108_v22  ;;  %v8324_v45 = vor.u32 %v9651_v31, %v8323_v28 }
 0x1d0   : > { %v9411_v34 = vld [vmem:[%s10303_s25 + $0x424] sm:$0xf0]  ;;  %4952 = vmatmul.bf16.vlgmr.msra.gmra.mxu0 %v10464_v60 }
 0x1d1   : > { %v7619_v35 = vld [vmem:[%s10303_s25 + $0x608] sm:$0xf]  ;;  %4996 = vmatpush.bf16.msrb.mxu0 %v8100_v1  ;;  %4976 = vmatpush.bf16.msra.mxu2 %v7396_v29  ;;  %v7364_v46 = vor.u32 %v9411_v34, %v7363_v32 }
 0x1d2   : > { %v9475_v37 = vld [vmem:[%s10303_s25 + $0x624] sm:$0xf0]  ;;  %4965 = vmatmul.bf16.vlgmr.msra.gmra.mxu1 %v10466_v61 }
 0x1d3   : > { %v8611_v38 = vld [vmem:[%s10303_s25 + $0xdc8] sm:$0xf]  ;;  %5009 = vmatpush.bf16.msrb.mxu1 %v8356_v23  ;;  %4989 = vmatpush.bf16.msra.mxu3 %v7652_v30  ;;  %v7620_v47 = vor.u32 %v9475_v37, %v7619_v35 }
 0x1d4   : > { %v9723_v39 = vld [vmem:[%s10303_s25 + $0xde4] sm:$0xf0] }
 0x1d5   : > { %v8867_v40 = vld [vmem:[%s10303_s25 + $0xfc8] sm:$0xf]  ;;  %v8612_v36 = vor.u32 %v9723_v39, %v8611_v38  ;;  %4997 = vmatpush.bf16.msrb.mxu0 %v8068_v44  ;;  %4977 = vmatpush.bf16.msra.mxu2 %v7364_v46 }
 0x1d6   : > { %v9787_v43 = vld [vmem:[%s10303_s25 + $0xfe4] sm:$0xf0] }
 0x1d7   : > { %v8035_v48 = vld [vmem:[%s10303_s25 + $0x948] sm:$0xf]  ;;  %v8868_v51 = vor.u32 %v9787_v43, %v8867_v40  ;;  %5010 = vmatpush.bf16.msrb.mxu1 %v8324_v45  ;;  %4990 = vmatpush.bf16.msra.mxu3 %v7620_v47 }
 0x1d8   : > { %v9579_v50 = vld [vmem:[%s10303_s25 + $0x964] sm:$0xf0]  ;;  %4978 = vmatmul.bf16.vlgmr.msra.gmra.mxu2 %v10484_v25 }
 0x1d9   : > { %v8291_v52 = vld [vmem:[%s10303_s25 + $0xb48] sm:$0xf]  ;;  %v8036_v57 = vor.u32 %v9579_v50, %v8035_v48  ;;  %5022 = vmatpush.bf16.msrb.mxu2 %v8612_v36 }
 0x1da   : > { %v9643_v53 = vld [vmem:[%s10303_s25 + $0xb64] sm:$0xf0]  ;;  %4991 = vmatmul.bf16.vlgmr.msra.gmra.mxu3 %v10486_v26 }
 0x1db   : > { %v8579_v49 = vld [vmem:[%s10303_s25 + $0xd88] sm:$0xf]  ;;  %v8292_v58 = vor.u32 %v9643_v53, %v8291_v52  ;;  %5035 = vmatpush.bf16.msrb.mxu3 %v8868_v51  ;;  %4998 = vmatpush.bf16.msrb.mxu0 %v8036_v57  ;;  %v9335_v57 = vld [vmem:[%s10303_s25 + $0x1cc] sm:$0xf] }
 0x1dc   : > { %v9715_v54 = vld [vmem:[%s10303_s25 + $0xda4] sm:$0xf0] }
 0x1dd   : > { %v8835_v55 = vld [vmem:[%s10303_s25 + $0xf88] sm:$0xf]  ;;  %v8580_v63 = vor.u32 %v9715_v54, %v8579_v49  ;;  %5011 = vmatpush.bf16.msrb.mxu1 %v8292_v58  ;;  %v7077_v58 = vld [vmem:[%s10303_s25 + $0x1e8] sm:$0xf0] }
 0x1de   : > { %v9779_v56 = vld [vmem:[%s10303_s25 + $0xfa4] sm:$0xf0] }
 0x1df   : > { %v8003_v59 = vld [vmem:[%s10303_s25 + $0x908] sm:$0xf]  ;;  %v8836_v0 = vor.u32 %v9779_v56, %v8835_v55  ;;  %5023 = vmatpush.bf16.msrb.mxu2 %v8580_v63 }
 0x1e0   : > { %v9571_v62 = vld [vmem:[%s10303_s25 + $0x924] sm:$0xf0] }
 0x1e1   : > { %v8259_v5 = vld [vmem:[%s10303_s25 + $0xb08] sm:$0xf]  ;;  %v8004_v41 = vor.u32 %v9571_v62, %v8003_v59  ;;  %5036 = vmatpush.bf16.msrb.mxu3 %v8836_v0  ;;  %v9399_v59 = vld [vmem:[%s10303_s25 + $0x3cc] sm:$0xf] }
 0x1e2   : > { %v9635_v6 = vld [vmem:[%s10303_s25 + $0xb24] sm:$0xf0]  ;;  %v7333_v62 = vld [vmem:[%s10303_s25 + $0x3e8] sm:$0xf0] }
 0x1e3   : > { %v8547_v42 = vld [vmem:[%s10303_s25 + $0xd48] sm:$0xf]  ;;  %v8260_v10 = vor.u32 %v9635_v6, %v8259_v5  ;;  %4999 = vmatpush.bf16.msrb.mxu0 %v8004_v41  ;;  %v7336_v41 = vor.u32 %v9399_v59, %v7333_v62 }
 0x1e4   : > { %v9707_v7 = vld [vmem:[%s10303_s25 + $0xd64] sm:$0xf0] }
 0x1e5   : > { %v8803_v8 = vld [vmem:[%s10303_s25 + $0xf48] sm:$0xf]  ;;  %v8548_v13 = vor.u32 %v9707_v7, %v8547_v42  ;;  %5012 = vmatpush.bf16.msrb.mxu1 %v8260_v10  ;;  %v7045_v10 = vld [vmem:[%s10303_s25 + $0x1a8] sm:$0xf0] }
 0x1e6   : > { %v9771_v9 = vld [vmem:[%s10303_s25 + $0xf64] sm:$0xf0] }
 0x1e7   : > { %v7971_v11 = vld [vmem:[%s10303_s25 + $0x8c8] sm:$0xf]  ;;  %v8804_v14 = vor.u32 %v9771_v9, %v8803_v8  ;;  %5024 = vmatpush.bf16.msrb.mxu2 %v8548_v13  ;;  %v9327_v8 = vld [vmem:[%s10303_s25 + $0x18c] sm:$0xf]  ;;  %v7080_v9 = vor.u32 %v9335_v57, %v7077_v58 }
 0x1e8   : > { %v9563_v12 = vld [vmem:[%s10303_s25 + $0x8e4] sm:$0xf0]  ;;  %v7781_v57 = vld [vmem:[%s10303_s25 + $0x768] sm:$0xf0] }
 0x1e9   : > { %v8227_v15 = vld [vmem:[%s10303_s25 + $0xac8] sm:$0xf]  ;;  %v7972_v21 = vor.u32 %v9563_v12, %v7971_v11  ;;  %5037 = vmatpush.bf16.msrb.mxu3 %v8804_v14  ;;  %v9391_v11 = vld [vmem:[%s10303_s25 + $0x38c] sm:$0xf] }
 0x1ea   : > { %v9627_v16 = vld [vmem:[%s10303_s25 + $0xae4] sm:$0xf0]  ;;  %v7301_v12 = vld [vmem:[%s10303_s25 + $0x3a8] sm:$0xf0] }
 0x1eb   : > { %v8515_v17 = vld [vmem:[%s10303_s25 + $0xd08] sm:$0xf]  ;;  %v8228_v22 = vor.u32 %v9627_v16, %v8227_v15  ;;  %5000 = vmatpush.bf16.msrb.mxu0 %v7972_v21  ;;  %v9527_v21 = vld [vmem:[%s10303_s25 + $0x7cc] sm:$0xf] }
 0x1ec   : > { %v9699_v18 = vld [vmem:[%s10303_s25 + $0xd24] sm:$0xf0] }
 0x1ed   : > { %v8771_v19 = vld [vmem:[%s10303_s25 + $0xf08] sm:$0xf]  ;;  %v8516_v24 = vor.u32 %v9699_v18, %v8515_v17  ;;  %5013 = vmatpush.bf16.msrb.mxu1 %v8228_v22  ;;  %v7845_v22 = vld [vmem:[%s10303_s25 + $0x7e8] sm:$0xf0] }
 0x1ee   : > { %v9763_v20 = vld [vmem:[%s10303_s25 + $0xf24] sm:$0xf0] }
 0x1ef   : > { %v7939_v1 = vld [vmem:[%s10303_s25 + $0x888] sm:$0xf]  ;;  %v8772_v27 = vor.u32 %v9763_v20, %v8771_v19  ;;  %5025 = vmatpush.bf16.msrb.mxu2 %v8516_v24  ;;  %v9463_v19 = vld [vmem:[%s10303_s25 + $0x5cc] sm:$0xf]  ;;  %v7304_v24 = vor.u32 %v9391_v11, %v7301_v12 }
 0x1f0   : > { %v9555_v23 = vld [vmem:[%s10303_s25 + $0x8a4] sm:$0xf0]  ;;  %v7589_v20 = vld [vmem:[%s10303_s25 + $0x5e8] sm:$0xf0] }
 0x1f1   : > { %v8195_v28 = vld [vmem:[%s10303_s25 + $0xa88] sm:$0xf]  ;;  %v7940_v35 = vor.u32 %v9555_v23, %v7939_v1  ;;  %5038 = vmatpush.bf16.msrb.mxu3 %v8772_v27  ;;  %v10774_v1 = vld [vmem:[%s10763_s19] sm:$0xff]  ;;  %v7048_v23 = vor.u32 %v9327_v8, %v7045_v10  ;;  %v9439_v8 = vld [vmem:[%s10303_s25 + $0x50c] sm:$0xf] }
 0x1f2   : > { %v9619_v29 = vld [vmem:[%s10303_s25 + $0xaa4] sm:$0xf0]  ;;  %v7749_v10 = vld [vmem:[%s10303_s25 + $0x728] sm:$0xf0] }
 0x1f3   : > { %v8483_v30 = vld [vmem:[%s10303_s25 + $0xcc8] sm:$0xf]  ;;  %v8196_v37 = vor.u32 %v9619_v29, %v8195_v28  ;;  %5001 = vmatpush.bf16.msrb.mxu0 %v7940_v35  ;;  %v9319_v29 = vld [vmem:[%s10303_s25 + $0x14c] sm:$0xf] }
 0x1f4   : > { %v9691_v31 = vld [vmem:[%s10303_s25 + $0xce4] sm:$0xf0]  ;;  %v7269_v35 = vld [vmem:[%s10303_s25 + $0x368] sm:$0xf0] }
 0x1f5   : > { %v8739_v32 = vld [vmem:[%s10303_s25 + $0xec8] sm:$0xf]  ;;  %v8484_v40 = vor.u32 %v9691_v31, %v8483_v30  ;;  %5014 = vmatpush.bf16.msrb.mxu1 %v8196_v37  ;;  %v7013_v30 = vld [vmem:[%s10303_s25 + $0x168] sm:$0xf0]  ;;  %v2160_v37 = vperm.slane %v10774_v1, 0 }
 0x1f6   : > { %v9755_v34 = vld [vmem:[%s10303_s25 + $0xee4] sm:$0xf0]  ;;  %v9383_v31 = vld [vmem:[%s10303_s25 + $0x34c] sm:$0xf] }
 0x1f7   : > { %v7907_v38 = vld [vmem:[%s10303_s25 + $0x848] sm:$0xf]  ;;  %v8740_v43 = vor.u32 %v9755_v34, %v8739_v32  ;;  %5026 = vmatpush.bf16.msrb.mxu2 %v8484_v40  ;;  %v7592_v32 = vor.u32 %v9463_v19, %v7589_v20  ;;  %v7848_v34 = vor.u32 %v9527_v21, %v7845_v22  ;;  %v9519_v40 = vld [vmem:[%s10303_s25 + $0x78c] sm:$0xf] }
 0x1f8   : > { %v9547_v39 = vld [vmem:[%s10303_s25 + $0x864] sm:$0xf0]  ;;  %v9359_v19 = vld [vmem:[%s10303_s25 + $0x28c] sm:$0xf] }
 0x1f9   : > { %v8163_v44 = vld [vmem:[%s10303_s25 + $0xa48] sm:$0xf]  ;;  %v7908_v36 = vor.u32 %v9547_v39, %v7907_v38  ;;  %5039 = vmatpush.bf16.msrb.mxu3 %v8740_v43  ;;  %v9455_v38 = vld [vmem:[%s10303_s25 + $0x58c] sm:$0xf] }
 0x1fa   : > { %v9611_v45 = vld [vmem:[%s10303_s25 + $0xa64] sm:$0xf0]  ;;  %v7557_v39 = vld [vmem:[%s10303_s25 + $0x5a8] sm:$0xf0] }
 0x1fb   : > { %v8451_v46 = vld [vmem:[%s10303_s25 + $0xc88] sm:$0xf]  ;;  %v8164_v51 = vor.u32 %v9611_v45, %v8163_v44  ;;  %5002 = vmatpush.bf16.msrb.mxu0 %v7908_v36  ;;  %v7813_v43 = vld [vmem:[%s10303_s25 + $0x7a8] sm:$0xf0]  ;;  %v7016_v44 = vor.u32 %v9319_v29, %v7013_v30  ;;  %v7272_v45 = vor.u32 %v9383_v31, %v7269_v35  ;;  %v4771_v31 = vpop.f32.mrf.mxu2 }
 0x1fc   : > { %v9683_v47 = vld [vmem:[%s10303_s25 + $0xca4] sm:$0xf0]  ;;  %v7173_v20 = vld [vmem:[%s10303_s25 + $0x2a8] sm:$0xf0] }
 0x1fd   : > { %v8707_v48 = vld [vmem:[%s10303_s25 + $0xe88] sm:$0xf]  ;;  %v8452_v54 = vor.u32 %v9683_v47, %v8451_v46  ;;  %5015 = vmatpush.bf16.msrb.mxu1 %v8164_v51  ;;  %v4745_v46 = vpop.f32.mrf.mxu0  ;;  %v4758_v47 = vpop.f32.mrf.mxu1  ;;  %v7560_v51 = vor.u32 %v9455_v38, %v7557_v39  ;;  %v9431_v21 = vld [vmem:[%s10303_s25 + $0x4cc] sm:$0xf] }
 0x1fe   : > { %v9747_v50 = vld [vmem:[%s10303_s25 + $0xea4] sm:$0xf0]  ;;  %v4746_v36 = vadd.f32 %v4745_v46, %v2160_v37  ;;  %v7461_v22 = vld [vmem:[%s10303_s25 + $0x4e8] sm:$0xf0] }
 0x1ff   : > { %v7875_v52 = vld [vmem:[%s10303_s25 + $0x808] sm:$0xf]  ;;  %v8708_v55 = vor.u32 %v9747_v50, %v8707_v48  ;;  %5027 = vmatpush.bf16.msrb.mxu2 %v8452_v54  ;;  %v9311_v48 = vld [vmem:[%s10303_s25 + $0x10c] sm:$0xf] }
 0x200   : > { %v9539_v53 = vld [vmem:[%s10303_s25 + $0x824] sm:$0xf0]  ;;  %v6981_v50 = vld [vmem:[%s10303_s25 + $0x128] sm:$0xf0]  ;;  %v4759_v58 = vadd.f32 %v4758_v47, %v4746_v36 }
 0x201   : > { %v8131_v49 = vld [vmem:[%s10303_s25 + $0xa08] sm:$0xf]  ;;  %v7876_v42 = vor.u32 %v9539_v53, %v7875_v52  ;;  %5040 = vmatpush.bf16.msrb.mxu3 %v8708_v55  ;;  %v7816_v52 = vor.u32 %v9519_v40, %v7813_v43  ;;  %v9375_v53 = vld [vmem:[%s10303_s25 + $0x30c] sm:$0xf]  ;;  %v6984_v59 = vor.u32 %v9311_v48, %v6981_v50 }
 0x202   : > { %v9603_v56 = vld [vmem:[%s10303_s25 + $0xa24] sm:$0xf0]  ;;  %v9447_v54 = vld [vmem:[%s10303_s25 + $0x54c] sm:$0xf]  ;;  %v4772_v40 = vadd.f32 %v4771_v31, %v4759_v58 }
 0x203   : > { %v8419_v63 = vld [vmem:[%s10303_s25 + $0xc48] sm:$0xf]  ;;  %v8132_v7 = vor.u32 %v9603_v56, %v8131_v49  ;;  %5003 = vmatpush.bf16.msrb.mxu0 %v7876_v42  ;;  %v7237_v49 = vld [vmem:[%s10303_s25 + $0x328] sm:$0xf0] }
 0x204   : > { %v9675_v0 = vld [vmem:[%s10303_s25 + $0xc64] sm:$0xf0]  ;;  %v7525_v55 = vld [vmem:[%s10303_s25 + $0x568] sm:$0xf0]  ;;  %v7240_v62 = vor.u32 %v9375_v53, %v7237_v49 }
 0x205   : > { %v8675_v5 = vld [vmem:[%s10303_s25 + $0xe48] sm:$0xf]  ;;  %v8420_v13 = vor.u32 %v9675_v0, %v8419_v63  ;;  %5016 = vmatpush.bf16.msrb.mxu1 %v8132_v7  ;;  %v9511_v56 = vld [vmem:[%s10303_s25 + $0x74c] sm:$0xf] }
 0x206   : > { %v9739_v6 = vld [vmem:[%s10303_s25 + $0xe64] sm:$0xf0]  ;;  %5004 = vmatmul.bf16.vlgmr.msrb.gmra.mxu0 %v10510_v2  ;;  %v9303_v63 = vld [vmem:[%s10303_s25 + $0xcc] sm:$0xf] }
 0x207   : > { %v8676_v14 = vor.u32 %v9739_v6, %v8675_v5  ;;  %v8387_v15 = vld [vmem:[%s10303_s25 + $0xc08] sm:$0xf]  ;;  %5048 = vmatpush.bf16.msra.mxu0 %v7080_v9  ;;  %5028 = vmatpush.bf16.msrb.mxu2 %v8420_v13  ;;  %v6949_v0 = vld [vmem:[%s10303_s25 + $0xe8] sm:$0xf0]  ;;  %v7528_v5 = vor.u32 %v9447_v54, %v7525_v55  ;;  %v7784_v6 = vor.u32 %v9511_v56, %v7781_v57  ;;  %v4747_v13 = vpop.f32.mrf.mxu0 }
 0x208   : > { %v9667_v16 = vld [vmem:[%s10303_s25 + $0xc24] sm:$0xf0]  ;;  %5017 = vmatmul.bf16.vlgmr.msrb.gmra.mxu1 %v10512_v3  ;;  %v9367_v42 = vld [vmem:[%s10303_s25 + $0x2cc] sm:$0xf]  ;;  %v6952_v11 = vor.u32 %v9303_v63, %v6949_v0 }
 0x209   : > { %v8643_v17 = vld [vmem:[%s10303_s25 + $0xe08] sm:$0xf]  ;;  %5061 = vmatpush.bf16.msra.mxu1 %v7336_v41  ;;  %5041 = vmatpush.bf16.msrb.mxu3 %v8676_v14  ;;  %v8388_v27 = vor.u32 %v9667_v16, %v8387_v15  ;;  %v7205_v7 = vld [vmem:[%s10303_s25 + $0x2e8] sm:$0xf0]  ;;  %v4760_v14 = vpop.f32.mrf.mxu1 }
 0x20a   : > { %v9731_v18 = vld [vmem:[%s10303_s25 + $0xe24] sm:$0xf0]  ;;  %v7493_v9 = vld [vmem:[%s10303_s25 + $0x528] sm:$0xf0]  ;;  %v7208_v12 = vor.u32 %v9367_v42, %v7205_v7 }
 0x20b   : > { %v8644_v28 = vor.u32 %v9731_v18, %v8643_v17  ;;  %5049 = vmatpush.bf16.msra.mxu0 %v7048_v23  ;;  %5029 = vmatpush.bf16.msrb.mxu2 %v8388_v27  ;;  %v9503_v41 = vld [vmem:[%s10303_s25 + $0x70c] sm:$0xf]  ;;  %v7496_v17 = vor.u32 %v9439_v8, %v7493_v9  ;;  %v4773_v9 = vpop.f32.mrf.mxu2 }
 0x20c   : > { %v9295_v15 = vld [vmem:[%s10303_s25 + $0x8c] sm:$0xf]  ;;  %v7752_v18 = vor.u32 %v9503_v41, %v7749_v10 }
 0x20d   : > { %5062 = vmatpush.bf16.msra.mxu1 %v7304_v24  ;;  %5042 = vmatpush.bf16.msrb.mxu3 %v8644_v28  ;;  %v6917_v16 = vld [vmem:[%s10303_s25 + $0xa8] sm:$0xf0]  ;;  %v7176_v28 = vor.u32 %v9359_v19, %v7173_v20 }
 0x20e   : > { %5030 = vmatmul.bf16.vlgmr.msrb.gmra.mxu2 %v10529_v4  ;;  %v9495_v23 = vld [vmem:[%s10303_s25 + $0x6cc] sm:$0xf]  ;;  %v6920_v27 = vor.u32 %v9295_v15, %v6917_v16 }
 0x20f   : > { %5074 = vmatpush.bf16.msra.mxu2 %v7592_v32  ;;  %5050 = vmatpush.bf16.msra.mxu0 %v7016_v44  ;;  %v7717_v24 = vld [vmem:[%s10303_s25 + $0x6e8] sm:$0xf0]  ;;  %v4784_v32 = vpop.f32.mrf.mxu3 }
 0x210   : > { %5043 = vmatmul.bf16.vlgmr.msrb.gmra.mxu3 %v10531_v33  ;;  %v9287_v29 = vld [vmem:[%s10303_s25 + $0x4c] sm:$0xf]  ;;  %v7720_v35 = vor.u32 %v9495_v23, %v7717_v24  ;;  %v4785_v46 = vadd.f32 %v4784_v32, %v4772_v40 }
 0x211   : > { %5087 = vmatpush.bf16.msra.mxu3 %v7848_v34  ;;  %5063 = vmatpush.bf16.msra.mxu1 %v7272_v45  ;;  %v6885_v30 = vld [vmem:[%s10303_s25 + $0x68] sm:$0xf0]  ;;  %v7464_v34 = vor.u32 %v9431_v21, %v7461_v22  ;;  %v4810_v53 = vpop.f32.mrf.mxu1 }
 0x212   : > { %v9351_v37 = vld [vmem:[%s10303_s25 + $0x24c] sm:$0xf]  ;;  %v6888_v47 = vor.u32 %v9287_v29, %v6885_v30 }
 0x213   : > { %5075 = vmatpush.bf16.msra.mxu2 %v7560_v51  ;;  %5051 = vmatpush.bf16.msra.mxu0 %v6984_v59  ;;  %v7141_v38 = vld [vmem:[%s10303_s25 + $0x268] sm:$0xf0] }
 0x214   : > { %v9423_v39 = vld [vmem:[%s10303_s25 + $0x48c] sm:$0xf]  ;;  %v7144_v48 = vor.u32 %v9351_v37, %v7141_v38 }
 0x215   : > { %5088 = vmatpush.bf16.msra.mxu3 %v7816_v52  ;;  %5064 = vmatpush.bf16.msra.mxu1 %v7240_v62  ;;  %v7429_v43 = vld [vmem:[%s10303_s25 + $0x4a8] sm:$0xf0]  ;;  %v4797_v52 = vpop.f32.mrf.mxu0 }
 0x216   : > { %v9487_v44 = vld [vmem:[%s10303_s25 + $0x68c] sm:$0xf]  ;;  %v7432_v49 = vor.u32 %v9423_v39, %v7429_v43  ;;  %v4798_v58 = vadd.f32 %v4797_v52, %v4785_v46 }
 0x217   : > { %5076 = vmatpush.bf16.msra.mxu2 %v7528_v5  ;;  %5052 = vmatpush.bf16.msra.mxu0 %v6952_v11  ;;  %v7685_v45 = vld [vmem:[%s10303_s25 + $0x6a8] sm:$0xf0]  ;;  %v4786_v41 = vpop.f32.mrf.mxu3 }
 0x218   : > { %v9279_v50 = vld [vmem:[%s10303_s25 + $0xc] sm:$0xf]  ;;  %v7688_v54 = vor.u32 %v9487_v44, %v7685_v45  ;;  %v4811_v42 = vadd.f32 %v4810_v53, %v4798_v58  ;;  %v2161_v53 = vperm.slane %v10774_v1, 1 }
 0x219   : > { %5089 = vmatpush.bf16.msra.mxu3 %v7784_v6  ;;  %5065 = vmatpush.bf16.msra.mxu1 %v7208_v12  ;;  %v6853_v36 = vld [vmem:[%s10303_s25 + $0x28] sm:$0xf0]  ;;  %v4812_v29 = vpop.f32.mrf.mxu1 }
 0x21a   : > { %v9343_v51 = vld [vmem:[%s10303_s25 + $0x20c] sm:$0xf]  ;;  %v6856_v7 = vor.u32 %v9279_v50, %v6853_v36 }
 0x21b   : > { %5077 = vmatpush.bf16.msra.mxu2 %v7496_v17  ;;  %5053 = vmatpush.bf16.msra.mxu0 %v6920_v27  ;;  %v7109_v55 = vld [vmem:[%s10303_s25 + $0x228] sm:$0xf0] }
 0x21c   : > { %v9591_v56 = vld [vmem:[%s10303_s25 + $0x9cc] sm:$0xf]  ;;  %v7112_v8 = vor.u32 %v9343_v51, %v7109_v55 }
 0x21d   : > { %5090 = vmatpush.bf16.msra.mxu3 %v7752_v18  ;;  %5066 = vmatpush.bf16.msra.mxu1 %v7176_v28  ;;  %v8101_v57 = vld [vmem:[%s10303_s25 + $0x9e8] sm:$0xf0]  ;;  %v4799_v28 = vpop.f32.mrf.mxu0 }
 0x21e   : > { %v9655_v59 = vld [vmem:[%s10303_s25 + $0xbcc] sm:$0xf]  ;;  %v8104_v10 = vor.u32 %v9591_v56, %v8101_v57 }
 0x21f   : > { %5078 = vmatpush.bf16.msra.mxu2 %v7464_v34  ;;  %v8357_v62 = vld [vmem:[%s10303_s25 + $0xbe8] sm:$0xf0]  ;;  %5054 = vmatpush.bf16.msra.mxu0 %v6888_v47  ;;  %v4836_v50 = vpop.f32.mrf.mxu3 }
 0x220   : > { %v9415_v63 = vld [vmem:[%s10303_s25 + $0x44c] sm:$0xf]  ;;  %v8360_v11 = vor.u32 %v9655_v59, %v8357_v62 }
 0x221   : > { %5091 = vmatpush.bf16.msra.mxu3 %v7720_v35  ;;  %v7397_v0 = vld [vmem:[%s10303_s25 + $0x468] sm:$0xf0]  ;;  %5067 = vmatpush.bf16.msra.mxu1 %v7144_v48  ;;  %v4823_v48 = vpop.f32.mrf.mxu2 }
 0x222   : > { %v9479_v5 = vld [vmem:[%s10303_s25 + $0x64c] sm:$0xf]  ;;  %v7400_v15 = vor.u32 %v9415_v63, %v7397_v0  ;;  %v4824_v36 = vadd.f32 %v4823_v48, %v4811_v42  ;;  %v4862_v42 = vpop.f32.mrf.mxu1 }
 0x223   : > { %v7653_v6 = vld [vmem:[%s10303_s25 + $0x668] sm:$0xf0]  ;;  %5079 = vmatpush.bf16.msra.mxu2 %v7432_v49  ;;  %5055 = vmatpush.bf16.msra.mxu0 %v6856_v7 }
 0x224   : > { %v9583_v12 = vld [vmem:[%s10303_s25 + $0x98c] sm:$0xf]  ;;  %v7656_v16 = vor.u32 %v9479_v5, %v7653_v6  ;;  %v10861_v62 = vadd.f32 %v4836_v50, %v4824_v36 }
 0x225   : > { %5092 = vmatpush.bf16.msra.mxu3 %v7688_v54  ;;  %v8069_v13 = vld [vmem:[%s10303_s25 + $0x9a8] sm:$0xf0]  ;;  %5068 = vmatpush.bf16.msra.mxu1 %v7112_v8  ;;  %v4849_v6 = vpop.f32.mrf.mxu0 }
 0x226   : > { %v9647_v14 = vld [vmem:[%s10303_s25 + $0xb8c] sm:$0xf]  ;;  %v8072_v30 = vor.u32 %v9583_v12, %v8069_v13  ;;  %5056 = vmatmul.bf16.vlgmr.msra.gmra.mxu0 %v10464_v60  ;;  %v4850_v7 = vadd.f32 %v4849_v6, %v2161_v53 }
 0x227   : > { %v8325_v17 = vld [vmem:[%s10303_s25 + $0xba8] sm:$0xf0]  ;;  %5100 = vmatpush.bf16.msrb.mxu0 %v8104_v10  ;;  %5080 = vmatpush.bf16.msra.mxu2 %v7400_v15 }
 0x228   : > { %v9407_v18 = vld [vmem:[%s10303_s25 + $0x40c] sm:$0xf]  ;;  %v8328_v31 = vor.u32 %v9647_v14, %v8325_v17  ;;  %5069 = vmatmul.bf16.vlgmr.msra.gmra.mxu1 %v10466_v61 }
 0x229   : > { %v7365_v19 = vld [vmem:[%s10303_s25 + $0x428] sm:$0xf0]  ;;  %5113 = vmatpush.bf16.msrb.mxu1 %v8360_v11  ;;  %5093 = vmatpush.bf16.msra.mxu3 %v7656_v16  ;;  %v4863_v16 = vadd.f32 %v4862_v42, %v4850_v7  ;;  %v7083_v42 = vld [vmem:[%s10303_s25 + $0x1d0] sm:$0xf] }
 0x22a   : > { %v9471_v20 = vld [vmem:[%s10303_s25 + $0x60c] sm:$0xf]  ;;  %v7368_v32 = vor.u32 %v9407_v18, %v7365_v19  ;;  %v9340_v7 = vld [vmem:[%s10303_s25 + $0x1ec] sm:$0xf0] }
 0x22b   : > { %v7621_v21 = vld [vmem:[%s10303_s25 + $0x628] sm:$0xf0]  ;;  %5101 = vmatpush.bf16.msrb.mxu0 %v8072_v30 }
 0x22c   : > { %v9719_v22 = vld [vmem:[%s10303_s25 + $0xdcc] sm:$0xf]  ;;  %v7624_v34 = vor.u32 %v9471_v20, %v7621_v21  ;;  %5081 = vmatpush.bf16.msra.mxu2 %v7368_v32  ;;  %v4825_v20 = vpop.f32.mrf.mxu2  ;;  %v4838_v21 = vpop.f32.mrf.mxu3 }
 0x22d   : > { %v8613_v23 = vld [vmem:[%s10303_s25 + $0xde8] sm:$0xf0]  ;;  %5114 = vmatpush.bf16.msrb.mxu1 %v8328_v31  ;;  %v7307_v20 = vld [vmem:[%s10303_s25 + $0x390] sm:$0xf] }
 0x22e   : > { %v9783_v24 = vld [vmem:[%s10303_s25 + $0xfcc] sm:$0xf]  ;;  %v8616_v38 = vor.u32 %v9719_v22, %v8613_v23  ;;  %5094 = vmatpush.bf16.msra.mxu3 %v7624_v34 }
 0x22f   : > { %v8869_v27 = vld [vmem:[%s10303_s25 + $0xfe8] sm:$0xf0]  ;;  %5082 = vmatmul.bf16.vlgmr.msra.gmra.mxu2 %v10484_v25 }
 0x230   : > { %v9575_v35 = vld [vmem:[%s10303_s25 + $0x94c] sm:$0xf]  ;;  %v8872_v39 = vor.u32 %v9783_v24, %v8869_v27  ;;  %5126 = vmatpush.bf16.msrb.mxu2 %v8616_v38  ;;  %v4851_v38 = vpop.f32.mrf.mxu0 }
 0x231   : > { %v8037_v37 = vld [vmem:[%s10303_s25 + $0x968] sm:$0xf0]  ;;  %5095 = vmatmul.bf16.vlgmr.msra.gmra.mxu3 %v10486_v26 }
 0x232   : > { %v9639_v40 = vld [vmem:[%s10303_s25 + $0xb4c] sm:$0xf]  ;;  %v8040_v51 = vor.u32 %v9575_v35, %v8037_v37  ;;  %5139 = vmatpush.bf16.msrb.mxu3 %v8872_v39  ;;  %v4864_v39 = vpop.f32.mrf.mxu1 }
 0x233   : > { %v8293_v43 = vld [vmem:[%s10303_s25 + $0xb68] sm:$0xf0] }
 0x234   : > { %v9711_v44 = vld [vmem:[%s10303_s25 + $0xd8c] sm:$0xf]  ;;  %v8296_v52 = vor.u32 %v9639_v40, %v8293_v43  ;;  %5102 = vmatpush.bf16.msrb.mxu0 %v8040_v51 }
 0x235   : > { %v8581_v45 = vld [vmem:[%s10303_s25 + $0xda8] sm:$0xf0] }
 0x236   : > { %v9775_v46 = vld [vmem:[%s10303_s25 + $0xf8c] sm:$0xf]  ;;  %v8584_v55 = vor.u32 %v9711_v44, %v8581_v45  ;;  %5115 = vmatpush.bf16.msrb.mxu1 %v8296_v52 }
 0x237   : > { %v8837_v47 = vld [vmem:[%s10303_s25 + $0xfa8] sm:$0xf0] }
 0x238   : > { %v9567_v49 = vld [vmem:[%s10303_s25 + $0x90c] sm:$0xf]  ;;  %v8840_v56 = vor.u32 %v9775_v46, %v8837_v47  ;;  %5127 = vmatpush.bf16.msrb.mxu2 %v8584_v55 }
 0x239   : > { %v8005_v54 = vld [vmem:[%s10303_s25 + $0x928] sm:$0xf0] }
 0x23a   : > { %v9631_v57 = vld [vmem:[%s10303_s25 + $0xb0c] sm:$0xf]  ;;  %v8008_v8 = vor.u32 %v9567_v49, %v8005_v54  ;;  %5140 = vmatpush.bf16.msrb.mxu3 %v8840_v56  ;;  %v4875_v49 = vpop.f32.mrf.mxu2  ;;  %v4888_v54 = vpop.f32.mrf.mxu3 }
 0x23b   : > { %v8261_v58 = vld [vmem:[%s10303_s25 + $0xb28] sm:$0xf0] }
 0x23c   : > { %v9703_v59 = vld [vmem:[%s10303_s25 + $0xd4c] sm:$0xf]  ;;  %v8264_v9 = vor.u32 %v9631_v57, %v8261_v58  ;;  %5103 = vmatpush.bf16.msrb.mxu0 %v8008_v8  ;;  %v7339_v8 = vld [vmem:[%s10303_s25 + $0x3d0] sm:$0xf] }
 0x23d   : > { %v8549_v63 = vld [vmem:[%s10303_s25 + $0xd68] sm:$0xf0] }
 0x23e   : > { %v9767_v0 = vld [vmem:[%s10303_s25 + $0xf4c] sm:$0xf]  ;;  %v8552_v11 = vor.u32 %v9703_v59, %v8549_v63  ;;  %5116 = vmatpush.bf16.msrb.mxu1 %v8264_v9  ;;  %v4876_v63 = vadd.f32 %v4875_v49, %v4863_v16  ;;  %v9404_v9 = vld [vmem:[%s10303_s25 + $0x3ec] sm:$0xf0]  ;;  %v7084_v16 = vor.u32 %v9340_v7, %v7083_v42 }
 0x23f   : > { %v8805_v5 = vld [vmem:[%s10303_s25 + $0xf68] sm:$0xf0]  ;;  %v9452_v42 = vld [vmem:[%s10303_s25 + $0x56c] sm:$0xf0] }
 0x240   : > { %v9559_v41 = vld [vmem:[%s10303_s25 + $0x8cc] sm:$0xf]  ;;  %v8808_v12 = vor.u32 %v9767_v0, %v8805_v5  ;;  %5128 = vmatpush.bf16.msrb.mxu2 %v8552_v11  ;;  %v7787_v7 = vld [vmem:[%s10303_s25 + $0x750] sm:$0xf] }
 0x241   : > { %v7973_v10 = vld [vmem:[%s10303_s25 + $0x8e8] sm:$0xf0] }
 0x242   : > { %v9623_v13 = vld [vmem:[%s10303_s25 + $0xacc] sm:$0xf]  ;;  %v7976_v22 = vor.u32 %v9559_v41, %v7973_v10  ;;  %5141 = vmatpush.bf16.msrb.mxu3 %v8808_v12  ;;  %v10901_v10 = vadd.f32 %v4888_v54, %v4876_v63  ;;  %v9380_v63 = vld [vmem:[%s10303_s25 + $0x32c] sm:$0xf0] }
 0x243   : > { %v8229_v14 = vld [vmem:[%s10303_s25 + $0xae8] sm:$0xf0] }
 0x244   : > { %v9695_v15 = vld [vmem:[%s10303_s25 + $0xd0c] sm:$0xf]  ;;  %v8232_v23 = vor.u32 %v9623_v13, %v8229_v14  ;;  %5104 = vmatpush.bf16.msrb.mxu0 %v7976_v22 }
 0x245   : > { %v8517_v17 = vld [vmem:[%s10303_s25 + $0xd28] sm:$0xf0] }
 0x246   : > { %v9759_v18 = vld [vmem:[%s10303_s25 + $0xf0c] sm:$0xf]  ;;  %v8520_v28 = vor.u32 %v9695_v15, %v8517_v17  ;;  %5117 = vmatpush.bf16.msrb.mxu1 %v8232_v23  ;;  %v7340_v17 = vor.u32 %v9404_v9, %v7339_v8  ;;  %v9396_v23 = vld [vmem:[%s10303_s25 + $0x3ac] sm:$0xf0] }
 0x247   : > { %v8773_v19 = vld [vmem:[%s10303_s25 + $0xf28] sm:$0xf0]  ;;  %v7308_v39 = vor.u32 %v9396_v23, %v7307_v20  ;;  %v9516_v8 = vld [vmem:[%s10303_s25 + $0x76c] sm:$0xf0] }
 0x248   : > { %v9551_v24 = vld [vmem:[%s10303_s25 + $0x88c] sm:$0xf]  ;;  %v8776_v29 = vor.u32 %v9759_v18, %v8773_v19  ;;  %5129 = vmatpush.bf16.msrb.mxu2 %v8520_v28  ;;  %v7051_v18 = vld [vmem:[%s10303_s25 + $0x190] sm:$0xf] }
 0x249   : > { %v7941_v27 = vld [vmem:[%s10303_s25 + $0x8a8] sm:$0xf0]  ;;  %v9332_v19 = vld [vmem:[%s10303_s25 + $0x1ac] sm:$0xf0] }
 0x24a   : > { %v9615_v30 = vld [vmem:[%s10303_s25 + $0xa8c] sm:$0xf]  ;;  %v7944_v40 = vor.u32 %v9551_v24, %v7941_v27  ;;  %5142 = vmatpush.bf16.msrb.mxu3 %v8776_v29  ;;  %v7052_v38 = vor.u32 %v9332_v19, %v7051_v18  ;;  %v9372_v18 = vld [vmem:[%s10303_s25 + $0x2ec] sm:$0xf0] }
 0x24b   : > { %v8197_v31 = vld [vmem:[%s10303_s25 + $0xaa8] sm:$0xf0]  ;;  %v9444_v19 = vld [vmem:[%s10303_s25 + $0x52c] sm:$0xf0] }
 0x24c   : > { %v9687_v32 = vld [vmem:[%s10303_s25 + $0xccc] sm:$0xf]  ;;  %v8200_v43 = vor.u32 %v9615_v30, %v8197_v31  ;;  %5105 = vmatpush.bf16.msrb.mxu0 %v7944_v40  ;;  %v7595_v30 = vld [vmem:[%s10303_s25 + $0x5d0] sm:$0xf]  ;;  %v4877_v31 = vpop.f32.mrf.mxu2 }
 0x24d   : > { %v8485_v34 = vld [vmem:[%s10303_s25 + $0xce8] sm:$0xf0]  ;;  %v7755_v20 = vld [vmem:[%s10303_s25 + $0x710] sm:$0xf] }
 0x24e   : > { %v9751_v35 = vld [vmem:[%s10303_s25 + $0xecc] sm:$0xf]  ;;  %v8488_v46 = vor.u32 %v9687_v32, %v8485_v34  ;;  %5118 = vmatpush.bf16.msrb.mxu1 %v8200_v43  ;;  %v4890_v32 = vpop.f32.mrf.mxu3  ;;  %v9468_v34 = vld [vmem:[%s10303_s25 + $0x5ec] sm:$0xf0] }
 0x24f   : > { %v8741_v37 = vld [vmem:[%s10303_s25 + $0xee8] sm:$0xf0]  ;;  %v9364_v31 = vld [vmem:[%s10303_s25 + $0x2ac] sm:$0xf0] }
 0x250   : > { %v9543_v44 = vld [vmem:[%s10303_s25 + $0x84c] sm:$0xf]  ;;  %v8744_v47 = vor.u32 %v9751_v35, %v8741_v37  ;;  %5130 = vmatpush.bf16.msrb.mxu2 %v8488_v46  ;;  %v7851_v35 = vld [vmem:[%s10303_s25 + $0x7d0] sm:$0xf]  ;;  %v7596_v46 = vor.u32 %v9468_v34, %v7595_v30 }
 0x251   : > { %v7909_v45 = vld [vmem:[%s10303_s25 + $0x868] sm:$0xf0]  ;;  %v9532_v37 = vld [vmem:[%s10303_s25 + $0x7ec] sm:$0xf0] }
 0x252   : > { %v9607_v48 = vld [vmem:[%s10303_s25 + $0xa4c] sm:$0xf]  ;;  %v7912_v55 = vor.u32 %v9543_v44, %v7909_v45  ;;  %5143 = vmatpush.bf16.msrb.mxu3 %v8744_v47  ;;  %v7019_v44 = vld [vmem:[%s10303_s25 + $0x150] sm:$0xf]  ;;  %v7852_v47 = vor.u32 %v9532_v37, %v7851_v35 }
 0x253   : > { %v8165_v50 = vld [vmem:[%s10303_s25 + $0xa68] sm:$0xf0]  ;;  %v9324_v45 = vld [vmem:[%s10303_s25 + $0x16c] sm:$0xf0] }
 0x254   : > { %v9679_v36 = vld [vmem:[%s10303_s25 + $0xc8c] sm:$0xf]  ;;  %v8168_v56 = vor.u32 %v9607_v48, %v8165_v50  ;;  %5106 = vmatpush.bf16.msrb.mxu0 %v7912_v55  ;;  %v7275_v48 = vld [vmem:[%s10303_s25 + $0x350] sm:$0xf]  ;;  %v7020_v49 = vor.u32 %v9324_v45, %v7019_v44 }
 0x255   : > { %v8453_v51 = vld [vmem:[%s10303_s25 + $0xca8] sm:$0xf0]  ;;  %v9388_v50 = vld [vmem:[%s10303_s25 + $0x36c] sm:$0xf0] }
 0x256   : > { %v9743_v52 = vld [vmem:[%s10303_s25 + $0xe8c] sm:$0xf]  ;;  %v8456_v0 = vor.u32 %v9679_v36, %v8453_v51  ;;  %5119 = vmatpush.bf16.msrb.mxu1 %v8168_v56  ;;  %v7563_v36 = vld [vmem:[%s10303_s25 + $0x590] sm:$0xf]  ;;  %v7276_v54 = vor.u32 %v9388_v50, %v7275_v48 }
 0x257   : > { %v8709_v53 = vld [vmem:[%s10303_s25 + $0xea8] sm:$0xf0]  ;;  %v9460_v51 = vld [vmem:[%s10303_s25 + $0x5ac] sm:$0xf0] }
 0x258   : > { %v9535_v57 = vld [vmem:[%s10303_s25 + $0x80c] sm:$0xf]  ;;  %v8712_v5 = vor.u32 %v9743_v52, %v8709_v53  ;;  %5131 = vmatpush.bf16.msrb.mxu2 %v8456_v0  ;;  %v7819_v52 = vld [vmem:[%s10303_s25 + $0x790] sm:$0xf] }
 0x259   : > { %v7877_v58 = vld [vmem:[%s10303_s25 + $0x828] sm:$0xf0]  ;;  %v9524_v53 = vld [vmem:[%s10303_s25 + $0x7ac] sm:$0xf0] }
 0x25a   : > { %v9599_v59 = vld [vmem:[%s10303_s25 + $0xa0c] sm:$0xf]  ;;  %v7880_v14 = vor.u32 %v9535_v57, %v7877_v58  ;;  %5144 = vmatpush.bf16.msrb.mxu3 %v8712_v5  ;;  %v6987_v55 = vld [vmem:[%s10303_s25 + $0x110] sm:$0xf]  ;;  %v7564_v57 = vor.u32 %v9460_v51, %v7563_v36  ;;  %v7820_v58 = vor.u32 %v9524_v53, %v7819_v52  ;;  %v4901_v5 = vpop.f32.mrf.mxu0  ;;  %v4927_v51 = vpop.f32.mrf.mxu2 }
 0x25b   : > { %v8133_v6 = vld [vmem:[%s10303_s25 + $0xa28] sm:$0xf0]  ;;  %v9316_v56 = vld [vmem:[%s10303_s25 + $0x12c] sm:$0xf0]  ;;  %v4902_v9 = vadd.f32 %v4901_v5, %v10901_v10  ;;  %v4940_v52 = vpop.f32.mrf.mxu3 }
 0x25c   : > { %v9671_v41 = vld [vmem:[%s10303_s25 + $0xc4c] sm:$0xf]  ;;  %v8136_v15 = vor.u32 %v9599_v59, %v8133_v6  ;;  %5107 = vmatpush.bf16.msrb.mxu0 %v7880_v14  ;;  %v7243_v59 = vld [vmem:[%s10303_s25 + $0x310] sm:$0xf]  ;;  %v4914_v6 = vpop.f32.mrf.mxu1 }
 0x25d   : > { %v8421_v11 = vld [vmem:[%s10303_s25 + $0xc68] sm:$0xf0]  ;;  %v7531_v0 = vld [vmem:[%s10303_s25 + $0x550] sm:$0xf]  ;;  %v4915_v14 = vadd.f32 %v4914_v6, %v4902_v9 }
 0x25e   : > { %v9735_v12 = vld [vmem:[%s10303_s25 + $0xe4c] sm:$0xf]  ;;  %v8424_v21 = vor.u32 %v9671_v41, %v8421_v11  ;;  %5120 = vmatpush.bf16.msrb.mxu1 %v8136_v15  ;;  %v6988_v41 = vor.u32 %v9316_v56, %v6987_v55  ;;  %v7244_v11 = vor.u32 %v9380_v63, %v7243_v59  ;;  %v7532_v15 = vor.u32 %v9452_v42, %v7531_v0  ;;  %v7499_v10 = vld [vmem:[%s10303_s25 + $0x510] sm:$0xf] }
 0x25f   : > { %v8677_v13 = vld [vmem:[%s10303_s25 + $0xe68] sm:$0xf0]  ;;  %5108 = vmatmul.bf16.vlgmr.msrb.gmra.mxu0 %v10510_v2  ;;  %v7179_v30 = vld [vmem:[%s10303_s25 + $0x290] sm:$0xf]  ;;  %v4928_v55 = vadd.f32 %v4927_v51, %v4915_v14 }
 0x260   : > { %v8680_v22 = vor.u32 %v9735_v12, %v8677_v13  ;;  %v9663_v24 = vld [vmem:[%s10303_s25 + $0xc0c] sm:$0xf]  ;;  %5152 = vmatpush.bf16.msra.mxu0 %v7084_v16  ;;  %5132 = vmatpush.bf16.msrb.mxu2 %v8424_v21  ;;  %v6955_v12 = vld [vmem:[%s10303_s25 + $0xd0] sm:$0xf]  ;;  %v7788_v16 = vor.u32 %v9516_v8, %v7787_v7 }
 0x261   : > { %v8389_v27 = vld [vmem:[%s10303_s25 + $0xc28] sm:$0xf0]  ;;  %5121 = vmatmul.bf16.vlgmr.msrb.gmra.mxu1 %v10512_v3  ;;  %v9308_v13 = vld [vmem:[%s10303_s25 + $0xec] sm:$0xf0]  ;;  %v10966_v0 = vadd.f32 %v4940_v52, %v4928_v55 }
 0x262   : > { %v9727_v28 = vld [vmem:[%s10303_s25 + $0xe0c] sm:$0xf]  ;;  %5165 = vmatpush.bf16.msra.mxu1 %v7340_v17  ;;  %5145 = vmatpush.bf16.msrb.mxu3 %v8680_v22  ;;  %v8392_v40 = vor.u32 %v9663_v24, %v8389_v27  ;;  %v7211_v17 = vld [vmem:[%s10303_s25 + $0x2d0] sm:$0xf]  ;;  %v6956_v22 = vor.u32 %v9308_v13, %v6955_v12  ;;  %v4903_v34 = vpop.f32.mrf.mxu0 }
 0x263   : > { %v8645_v29 = vld [vmem:[%s10303_s25 + $0xe28] sm:$0xf0]  ;;  %v9508_v21 = vld [vmem:[%s10303_s25 + $0x72c] sm:$0xf0]  ;;  %v7212_v23 = vor.u32 %v9372_v18, %v7211_v17 }
 0x264   : > { %v8648_v43 = vor.u32 %v9727_v28, %v8645_v29  ;;  %5153 = vmatpush.bf16.msra.mxu0 %v7052_v38  ;;  %5133 = vmatpush.bf16.msrb.mxu2 %v8392_v40  ;;  %v6923_v24 = vld [vmem:[%s10303_s25 + $0x90] sm:$0xf]  ;;  %v7500_v28 = vor.u32 %v9444_v19, %v7499_v10  ;;  %v7756_v29 = vor.u32 %v9508_v21, %v7755_v20  ;;  %v4916_v35 = vpop.f32.mrf.mxu1 }
 0x265   : > { %v9300_v27 = vld [vmem:[%s10303_s25 + $0xac] sm:$0xf0] }
 0x266   : > { %5166 = vmatpush.bf16.msra.mxu1 %v7308_v39  ;;  %5146 = vmatpush.bf16.msrb.mxu3 %v8648_v43  ;;  %v7467_v32 = vld [vmem:[%s10303_s25 + $0x4d0] sm:$0xf]  ;;  %v6924_v40 = vor.u32 %v9300_v27, %v6923_v24  ;;  %v7180_v43 = vor.u32 %v9364_v31, %v7179_v30  ;;  %v4942_v24 = vpop.f32.mrf.mxu3 }
 0x267   : > { %5134 = vmatmul.bf16.vlgmr.msrb.gmra.mxu2 %v10529_v4  ;;  %v9436_v37 = vld [vmem:[%s10303_s25 + $0x4ec] sm:$0xf0] }
 0x268   : > { %5178 = vmatpush.bf16.msra.mxu2 %v7596_v46  ;;  %5154 = vmatpush.bf16.msra.mxu0 %v7020_v49  ;;  %v7723_v38 = vld [vmem:[%s10303_s25 + $0x6d0] sm:$0xf]  ;;  %v7468_v46 = vor.u32 %v9436_v37, %v7467_v32 }
 0x269   : > { %5147 = vmatmul.bf16.vlgmr.msrb.gmra.mxu3 %v10531_v33  ;;  %v9500_v39 = vld [vmem:[%s10303_s25 + $0x6ec] sm:$0xf0] }
 0x26a   : > { %5191 = vmatpush.bf16.msra.mxu3 %v7852_v47  ;;  %5167 = vmatpush.bf16.msra.mxu1 %v7276_v54  ;;  %v6891_v44 = vld [vmem:[%s10303_s25 + $0x50] sm:$0xf]  ;;  %v7724_v47 = vor.u32 %v9500_v39, %v7723_v38 }
 0x26b   : > { %v9292_v45 = vld [vmem:[%s10303_s25 + $0x6c] sm:$0xf0] }
 0x26c   : > { %5179 = vmatpush.bf16.msra.mxu2 %v7564_v57  ;;  %5155 = vmatpush.bf16.msra.mxu0 %v6988_v41  ;;  %v7147_v48 = vld [vmem:[%s10303_s25 + $0x250] sm:$0xf]  ;;  %v6892_v56 = vor.u32 %v9292_v45, %v6891_v44 }
 0x26d   : > { %v9356_v50 = vld [vmem:[%s10303_s25 + $0x26c] sm:$0xf0] }
 0x26e   : > { %5192 = vmatpush.bf16.msra.mxu3 %v7820_v58  ;;  %5168 = vmatpush.bf16.msra.mxu1 %v7244_v11  ;;  %v7435_v36 = vld [vmem:[%s10303_s25 + $0x490] sm:$0xf]  ;;  %v7148_v57 = vor.u32 %v9356_v50, %v7147_v48 }
 0x26f   : > { %v9428_v53 = vld [vmem:[%s10303_s25 + $0x4ac] sm:$0xf0] }
 0x270   : > { %5180 = vmatpush.bf16.msra.mxu2 %v7532_v15  ;;  %5156 = vmatpush.bf16.msra.mxu0 %v6956_v22  ;;  %v7691_v49 = vld [vmem:[%s10303_s25 + $0x690] sm:$0xf]  ;;  %v7436_v5 = vor.u32 %v9428_v53, %v7435_v36 }
 0x271   : > { %v9492_v54 = vld [vmem:[%s10303_s25 + $0x6ac] sm:$0xf0] }
 0x272   : > { %5193 = vmatpush.bf16.msra.mxu3 %v7788_v16  ;;  %5169 = vmatpush.bf16.msra.mxu1 %v7212_v23  ;;  %v6859_v58 = vld [vmem:[%s10303_s25 + $0x10] sm:$0xf]  ;;  %v7692_v6 = vor.u32 %v9492_v54, %v7691_v49  ;;  %v4929_v23 = vpop.f32.mrf.mxu2  ;;  %v2162_v49 = vperm.slane %v10774_v1, 2  ;;  %v4966_v1 = vpop.f32.mrf.mxu1 }
 0x273   : > { %v9284_v59 = vld [vmem:[%s10303_s25 + $0x2c] sm:$0xf0] }
 0x274   : > { %5181 = vmatpush.bf16.msra.mxu2 %v7500_v28  ;;  %5157 = vmatpush.bf16.msra.mxu0 %v6924_v40  ;;  %v7115_v63 = vld [vmem:[%s10303_s25 + $0x210] sm:$0xf]  ;;  %v6860_v15 = vor.u32 %v9284_v59, %v6859_v58 }
 0x275   : > { %v9348_v42 = vld [vmem:[%s10303_s25 + $0x22c] sm:$0xf0] }
 0x276   : > { %5194 = vmatpush.bf16.msra.mxu3 %v7756_v29  ;;  %5170 = vmatpush.bf16.msra.mxu1 %v7180_v43  ;;  %v8107_v7 = vld [vmem:[%s10303_s25 + $0x9d0] sm:$0xf]  ;;  %v7116_v16 = vor.u32 %v9348_v42, %v7115_v63  ;;  %v4953_v42 = vpop.f32.mrf.mxu0 }
 0x277   : > { %v9596_v8 = vld [vmem:[%s10303_s25 + $0x9ec] sm:$0xf0] }
 0x278   : > { %5182 = vmatpush.bf16.msra.mxu2 %v7468_v46  ;;  %v8363_v9 = vld [vmem:[%s10303_s25 + $0xbd0] sm:$0xf]  ;;  %5158 = vmatpush.bf16.msra.mxu0 %v6892_v56  ;;  %v8108_v17 = vor.u32 %v9596_v8, %v8107_v7 }
 0x279   : > { %v9660_v41 = vld [vmem:[%s10303_s25 + $0xbec] sm:$0xf0] }
 0x27a   : > { %5195 = vmatpush.bf16.msra.mxu3 %v7724_v47  ;;  %v7403_v11 = vld [vmem:[%s10303_s25 + $0x450] sm:$0xf]  ;;  %5171 = vmatpush.bf16.msra.mxu1 %v7148_v57  ;;  %v8364_v18 = vor.u32 %v9660_v41, %v8363_v9  ;;  %v4954_v41 = vadd.f32 %v4953_v42, %v2162_v49 }
 0x27b   : > { %v9420_v12 = vld [vmem:[%s10303_s25 + $0x46c] sm:$0xf0] }
 0x27c   : > { %v7659_v13 = vld [vmem:[%s10303_s25 + $0x650] sm:$0xf]  ;;  %5183 = vmatpush.bf16.msra.mxu2 %v7436_v5  ;;  %v7404_v21 = vor.u32 %v9420_v12, %v7403_v11  ;;  %5159 = vmatpush.bf16.msra.mxu0 %v6860_v15  ;;  %v4967_v15 = vadd.f32 %v4966_v1, %v4954_v41  ;;  %v9400_v41 = vld [vmem:[%s10303_s25 + $0x3d4] sm:$0xf] }
 0x27d   : > { %v9484_v14 = vld [vmem:[%s10303_s25 + $0x66c] sm:$0xf0] }
 0x27e   : > { %5196 = vmatpush.bf16.msra.mxu3 %v7692_v6  ;;  %v8075_v10 = vld [vmem:[%s10303_s25 + $0x990] sm:$0xf]  ;;  %v7660_v22 = vor.u32 %v9484_v14, %v7659_v13  ;;  %5172 = vmatpush.bf16.msra.mxu1 %v7116_v16 }
 0x27f   : > { %v9588_v19 = vld [vmem:[%s10303_s25 + $0x9ac] sm:$0xf0]  ;;  %5160 = vmatmul.bf16.vlgmr.msra.gmra.mxu0 %v10464_v60 }
 0x280   : > { %v8331_v20 = vld [vmem:[%s10303_s25 + $0xb90] sm:$0xf]  ;;  %5204 = vmatpush.bf16.msrb.mxu0 %v8108_v17  ;;  %v8076_v38 = vor.u32 %v9588_v19, %v8075_v10  ;;  %5184 = vmatpush.bf16.msra.mxu2 %v7404_v21 }
 0x281   : > { %v9652_v27 = vld [vmem:[%s10303_s25 + $0xbac] sm:$0xf0]  ;;  %5173 = vmatmul.bf16.vlgmr.msra.gmra.mxu1 %v10466_v61 }
 0x282   : > { %v7371_v28 = vld [vmem:[%s10303_s25 + $0x410] sm:$0xf]  ;;  %5217 = vmatpush.bf16.msrb.mxu1 %v8364_v18  ;;  %v8332_v39 = vor.u32 %v9652_v27, %v8331_v20  ;;  %5197 = vmatpush.bf16.msra.mxu3 %v7660_v22 }
 0x283   : > { %v9412_v29 = vld [vmem:[%s10303_s25 + $0x42c] sm:$0xf0] }
 0x284   : > { %v7627_v30 = vld [vmem:[%s10303_s25 + $0x610] sm:$0xf]  ;;  %v7372_v40 = vor.u32 %v9412_v29, %v7371_v28  ;;  %5205 = vmatpush.bf16.msrb.mxu0 %v8076_v38 }
 0x285   : > { %v9476_v31 = vld [vmem:[%s10303_s25 + $0x62c] sm:$0xf0] }
 0x286   : > { %v8619_v32 = vld [vmem:[%s10303_s25 + $0xdd0] sm:$0xf]  ;;  %v7628_v43 = vor.u32 %v9476_v31, %v7627_v30  ;;  %5218 = vmatpush.bf16.msrb.mxu1 %v8332_v39  ;;  %5185 = vmatpush.bf16.msra.mxu2 %v7372_v40 }
 0x287   : > { %v9724_v34 = vld [vmem:[%s10303_s25 + $0xdec] sm:$0xf0] }
 0x288   : > { %v8875_v35 = vld [vmem:[%s10303_s25 + $0xfd0] sm:$0xf]  ;;  %v8620_v46 = vor.u32 %v9724_v34, %v8619_v32  ;;  %5198 = vmatpush.bf16.msra.mxu3 %v7628_v43 }
 0x289   : > { %v9788_v37 = vld [vmem:[%s10303_s25 + $0xfec] sm:$0xf0]  ;;  %5186 = vmatmul.bf16.vlgmr.msra.gmra.mxu2 %v10484_v25 }
 0x28a   : > { %v8043_v44 = vld [vmem:[%s10303_s25 + $0x950] sm:$0xf]  ;;  %v8876_v47 = vor.u32 %v9788_v37, %v8875_v35  ;;  %5230 = vmatpush.bf16.msrb.mxu2 %v8620_v46  ;;  %v4955_v35 = vpop.f32.mrf.mxu0  ;;  %v4968_v37 = vpop.f32.mrf.mxu1 }
 0x28b   : > { %v9580_v45 = vld [vmem:[%s10303_s25 + $0x96c] sm:$0xf0]  ;;  %5199 = vmatmul.bf16.vlgmr.msra.gmra.mxu3 %v10486_v26  ;;  %v7597_v35 = vld [vmem:[%s10303_s25 + $0x5f0] sm:$0xf0] }
 0x28c   : > { %v8299_v48 = vld [vmem:[%s10303_s25 + $0xb50] sm:$0xf]  ;;  %v8044_v54 = vor.u32 %v9580_v45, %v8043_v44  ;;  %5243 = vmatpush.bf16.msrb.mxu3 %v8876_v47  ;;  %v9528_v37 = vld [vmem:[%s10303_s25 + $0x7d4] sm:$0xf] }
 0x28d   : > { %v9644_v50 = vld [vmem:[%s10303_s25 + $0xb6c] sm:$0xf0] }
 0x28e   : > { %v8587_v36 = vld [vmem:[%s10303_s25 + $0xd90] sm:$0xf]  ;;  %v8300_v55 = vor.u32 %v9644_v50, %v8299_v48  ;;  %5206 = vmatpush.bf16.msrb.mxu0 %v8044_v54 }
 0x28f   : > { %v9716_v51 = vld [vmem:[%s10303_s25 + $0xdac] sm:$0xf0] }
 0x290   : > { %v8843_v52 = vld [vmem:[%s10303_s25 + $0xf90] sm:$0xf]  ;;  %v8588_v58 = vor.u32 %v9716_v51, %v8587_v36  ;;  %5219 = vmatpush.bf16.msrb.mxu1 %v8300_v55 }
 0x291   : > { %v9780_v53 = vld [vmem:[%s10303_s25 + $0xfac] sm:$0xf0] }
 0x292   : > { %v8011_v56 = vld [vmem:[%s10303_s25 + $0x910] sm:$0xf]  ;;  %v8844_v59 = vor.u32 %v9780_v53, %v8843_v52  ;;  %5231 = vmatpush.bf16.msrb.mxu2 %v8588_v58  ;;  %v4979_v52 = vpop.f32.mrf.mxu2  ;;  %v4992_v53 = vpop.f32.mrf.mxu3 }
 0x293   : > { %v9572_v57 = vld [vmem:[%s10303_s25 + $0x92c] sm:$0xf0] }
 0x294   : > { %v8267_v63 = vld [vmem:[%s10303_s25 + $0xb10] sm:$0xf]  ;;  %v8012_v11 = vor.u32 %v9572_v57, %v8011_v56  ;;  %5244 = vmatpush.bf16.msrb.mxu3 %v8844_v59  ;;  %v4980_v56 = vadd.f32 %v4979_v52, %v4967_v15  ;;  %v7565_v52 = vld [vmem:[%s10303_s25 + $0x5b0] sm:$0xf0] }
 0x295   : > { %v9636_v5 = vld [vmem:[%s10303_s25 + $0xb2c] sm:$0xf0] }
 0x296   : > { %v8555_v6 = vld [vmem:[%s10303_s25 + $0xd50] sm:$0xf]  ;;  %v8268_v12 = vor.u32 %v9636_v5, %v8267_v63  ;;  %5207 = vmatpush.bf16.msrb.mxu0 %v8012_v11  ;;  %v7341_v11 = vld [vmem:[%s10303_s25 + $0x3f0] sm:$0xf0] }
 0x297   : > { %v9708_v7 = vld [vmem:[%s10303_s25 + $0xd6c] sm:$0xf0] }
 0x298   : > { %v8811_v8 = vld [vmem:[%s10303_s25 + $0xf50] sm:$0xf]  ;;  %v8556_v16 = vor.u32 %v9708_v7, %v8555_v6  ;;  %5220 = vmatpush.bf16.msrb.mxu1 %v8268_v12  ;;  %v11037_v6 = vadd.f32 %v4992_v53, %v4980_v56  ;;  %v9520_v53 = vld [vmem:[%s10303_s25 + $0x794] sm:$0xf] }
 0x299   : > { %v9772_v9 = vld [vmem:[%s10303_s25 + $0xf6c] sm:$0xf0]  ;;  %v9312_v56 = vld [vmem:[%s10303_s25 + $0x114] sm:$0xf] }
 0x29a   : > { %v7979_v13 = vld [vmem:[%s10303_s25 + $0x8d0] sm:$0xf]  ;;  %v8812_v17 = vor.u32 %v9772_v9, %v8811_v8  ;;  %5232 = vmatpush.bf16.msrb.mxu2 %v8556_v16  ;;  %v9336_v8 = vld [vmem:[%s10303_s25 + $0x1d4] sm:$0xf] }
 0x29b   : > { %v9564_v14 = vld [vmem:[%s10303_s25 + $0x8ec] sm:$0xf0]  ;;  %v7085_v9 = vld [vmem:[%s10303_s25 + $0x1f0] sm:$0xf0] }
 0x29c   : > { %v8235_v18 = vld [vmem:[%s10303_s25 + $0xad0] sm:$0xf]  ;;  %v7980_v23 = vor.u32 %v9564_v14, %v7979_v13  ;;  %5245 = vmatpush.bf16.msrb.mxu3 %v8812_v17 }
 0x29d   : > { %v9628_v10 = vld [vmem:[%s10303_s25 + $0xaec] sm:$0xf0] }
 0x29e   : > { %v8523_v19 = vld [vmem:[%s10303_s25 + $0xd10] sm:$0xf]  ;;  %v8236_v24 = vor.u32 %v9628_v10, %v8235_v18  ;;  %5208 = vmatpush.bf16.msrb.mxu0 %v7980_v23  ;;  %v7088_v18 = vor.u32 %v9336_v8, %v7085_v9  ;;  %v7344_v10 = vor.u32 %v9400_v41, %v7341_v11  ;;  %v7533_v8 = vld [vmem:[%s10303_s25 + $0x570] sm:$0xf0] }
 0x29f   : > { %v9700_v20 = vld [vmem:[%s10303_s25 + $0xd2c] sm:$0xf0]  ;;  %v9512_v9 = vld [vmem:[%s10303_s25 + $0x754] sm:$0xf] }
 0x2a0   : > { %v8779_v21 = vld [vmem:[%s10303_s25 + $0xf10] sm:$0xf]  ;;  %v8524_v29 = vor.u32 %v9700_v20, %v8523_v19  ;;  %5221 = vmatpush.bf16.msrb.mxu1 %v8236_v24  ;;  %v9328_v19 = vld [vmem:[%s10303_s25 + $0x194] sm:$0xf]  ;;  %v4981_v24 = vpop.f32.mrf.mxu2 }
 0x2a1   : > { %v9764_v22 = vld [vmem:[%s10303_s25 + $0xf2c] sm:$0xf0]  ;;  %v7053_v20 = vld [vmem:[%s10303_s25 + $0x1b0] sm:$0xf0] }
 0x2a2   : > { %v7947_v27 = vld [vmem:[%s10303_s25 + $0x890] sm:$0xf]  ;;  %v8780_v30 = vor.u32 %v9764_v22, %v8779_v21  ;;  %5233 = vmatpush.bf16.msrb.mxu2 %v8524_v29  ;;  %v9392_v21 = vld [vmem:[%s10303_s25 + $0x394] sm:$0xf] }
 0x2a3   : > { %v9556_v28 = vld [vmem:[%s10303_s25 + $0x8ac] sm:$0xf0]  ;;  %v7789_v41 = vld [vmem:[%s10303_s25 + $0x770] sm:$0xf0] }
 0x2a4   : > { %v8203_v31 = vld [vmem:[%s10303_s25 + $0xa90] sm:$0xf]  ;;  %v7948_v43 = vor.u32 %v9556_v28, %v7947_v27  ;;  %5246 = vmatpush.bf16.msrb.mxu3 %v8780_v30  ;;  %v4994_v27 = vpop.f32.mrf.mxu3  ;;  %v7309_v28 = vld [vmem:[%s10303_s25 + $0x3b0] sm:$0xf0] }
 0x2a5   : > { %v9620_v32 = vld [vmem:[%s10303_s25 + $0xaac] sm:$0xf0]  ;;  %v9296_v27 = vld [vmem:[%s10303_s25 + $0x94] sm:$0xf] }
 0x2a6   : > { %v8491_v34 = vld [vmem:[%s10303_s25 + $0xcd0] sm:$0xf]  ;;  %v8204_v44 = vor.u32 %v9620_v32, %v8203_v31  ;;  %5209 = vmatpush.bf16.msrb.mxu0 %v7948_v43 }
 0x2a7   : > { %v9692_v38 = vld [vmem:[%s10303_s25 + $0xcec] sm:$0xf0] }
 0x2a8   : > { %v8747_v39 = vld [vmem:[%s10303_s25 + $0xed0] sm:$0xf]  ;;  %v8492_v47 = vor.u32 %v9692_v38, %v8491_v34  ;;  %5222 = vmatpush.bf16.msrb.mxu1 %v8204_v44  ;;  %v9464_v34 = vld [vmem:[%s10303_s25 + $0x5d4] sm:$0xf] }
 0x2a9   : > { %v9756_v40 = vld [vmem:[%s10303_s25 + $0xeec] sm:$0xf0]  ;;  %v7853_v38 = vld [vmem:[%s10303_s25 + $0x7f0] sm:$0xf0] }
 0x2aa   : > { %v7915_v45 = vld [vmem:[%s10303_s25 + $0x850] sm:$0xf]  ;;  %v8748_v48 = vor.u32 %v9756_v40, %v8747_v39  ;;  %5234 = vmatpush.bf16.msrb.mxu2 %v8492_v47  ;;  %v7056_v39 = vor.u32 %v9328_v19, %v7053_v20  ;;  %v7312_v40 = vor.u32 %v9392_v21, %v7309_v28  ;;  %v7600_v47 = vor.u32 %v9464_v34, %v7597_v35  ;;  %v7213_v19 = vld [vmem:[%s10303_s25 + $0x2f0] sm:$0xf0] }
 0x2ab   : > { %v9548_v46 = vld [vmem:[%s10303_s25 + $0x86c] sm:$0xf0]  ;;  %v7501_v20 = vld [vmem:[%s10303_s25 + $0x530] sm:$0xf0] }
 0x2ac   : > { %v8171_v50 = vld [vmem:[%s10303_s25 + $0xa50] sm:$0xf]  ;;  %v7916_v57 = vor.u32 %v9548_v46, %v7915_v45  ;;  %5247 = vmatpush.bf16.msrb.mxu3 %v8748_v48  ;;  %v9320_v45 = vld [vmem:[%s10303_s25 + $0x154] sm:$0xf]  ;;  %v7856_v48 = vor.u32 %v9528_v37, %v7853_v38 }
 0x2ad   : > { %v9612_v36 = vld [vmem:[%s10303_s25 + $0xa6c] sm:$0xf0]  ;;  %v7021_v46 = vld [vmem:[%s10303_s25 + $0x170] sm:$0xf0] }
 0x2ae   : > { %v8459_v51 = vld [vmem:[%s10303_s25 + $0xc90] sm:$0xf]  ;;  %v8172_v58 = vor.u32 %v9612_v36, %v8171_v50  ;;  %5210 = vmatpush.bf16.msrb.mxu0 %v7916_v57  ;;  %v9384_v50 = vld [vmem:[%s10303_s25 + $0x354] sm:$0xf] }
 0x2af   : > { %v9684_v49 = vld [vmem:[%s10303_s25 + $0xcac] sm:$0xf0]  ;;  %v7277_v36 = vld [vmem:[%s10303_s25 + $0x370] sm:$0xf0] }
 0x2b0   : > { %v8715_v54 = vld [vmem:[%s10303_s25 + $0xe90] sm:$0xf]  ;;  %v8460_v42 = vor.u32 %v9684_v49, %v8459_v51  ;;  %5223 = vmatpush.bf16.msrb.mxu1 %v8172_v58  ;;  %v9456_v51 = vld [vmem:[%s10303_s25 + $0x594] sm:$0xf] }
 0x2b1   : > { %v9748_v55 = vld [vmem:[%s10303_s25 + $0xeac] sm:$0xf0]  ;;  %v7821_v49 = vld [vmem:[%s10303_s25 + $0x7b0] sm:$0xf0]  ;;  %v7568_v58 = vor.u32 %v9456_v51, %v7565_v52  ;;  %v5031_v52 = vpop.f32.mrf.mxu2 }
 0x2b2   : > { %v7883_v59 = vld [vmem:[%s10303_s25 + $0x810] sm:$0xf]  ;;  %v8716_v1 = vor.u32 %v9748_v55, %v8715_v54  ;;  %5235 = vmatpush.bf16.msrb.mxu2 %v8460_v42  ;;  %v7024_v54 = vor.u32 %v9320_v45, %v7021_v46  ;;  %v7280_v55 = vor.u32 %v9384_v50, %v7277_v36  ;;  %v6989_v57 = vld [vmem:[%s10303_s25 + $0x130] sm:$0xf0] }
 0x2b3   : > { %v9540_v63 = vld [vmem:[%s10303_s25 + $0x82c] sm:$0xf0]  ;;  %v9448_v42 = vld [vmem:[%s10303_s25 + $0x554] sm:$0xf] }
 0x2b4   : > { %v8139_v5 = vld [vmem:[%s10303_s25 + $0xa10] sm:$0xf]  ;;  %v7884_v16 = vor.u32 %v9540_v63, %v7883_v59  ;;  %5248 = vmatpush.bf16.msrb.mxu3 %v8716_v1  ;;  %v7824_v59 = vor.u32 %v9520_v53, %v7821_v49  ;;  %v9376_v63 = vld [vmem:[%s10303_s25 + $0x314] sm:$0xf]  ;;  %v5005_v1 = vpop.f32.mrf.mxu0  ;;  %v5044_v53 = vpop.f32.mrf.mxu3 }
 0x2b5   : > { %v9604_v7 = vld [vmem:[%s10303_s25 + $0xa2c] sm:$0xf0]  ;;  %v5006_v11 = vadd.f32 %v5005_v1, %v11037_v6  ;;  %v9440_v6 = vld [vmem:[%s10303_s25 + $0x514] sm:$0xf] }
 0x2b6   : > { %v8427_v12 = vld [vmem:[%s10303_s25 + $0xc50] sm:$0xf]  ;;  %v8140_v17 = vor.u32 %v9604_v7, %v8139_v5  ;;  %5211 = vmatpush.bf16.msrb.mxu0 %v7884_v16  ;;  %v7245_v5 = vld [vmem:[%s10303_s25 + $0x330] sm:$0xf0]  ;;  %v5018_v7 = vpop.f32.mrf.mxu1 }
 0x2b7   : > { %v9676_v13 = vld [vmem:[%s10303_s25 + $0xc6c] sm:$0xf0]  ;;  %v5019_v16 = vadd.f32 %v5018_v7, %v5006_v11  ;;  %v9504_v21 = vld [vmem:[%s10303_s25 + $0x714] sm:$0xf] }
 0x2b8   : > { %v8683_v14 = vld [vmem:[%s10303_s25 + $0xe50] sm:$0xf]  ;;  %v8428_v22 = vor.u32 %v9676_v13, %v8427_v12  ;;  %5224 = vmatpush.bf16.msrb.mxu1 %v8140_v17  ;;  %v6992_v12 = vor.u32 %v9312_v56, %v6989_v57  ;;  %v7248_v13 = vor.u32 %v9376_v63, %v7245_v5  ;;  %v7536_v17 = vor.u32 %v9448_v42, %v7533_v8  ;;  %v6925_v28 = vld [vmem:[%s10303_s25 + $0xb0] sm:$0xf0] }
 0x2b9   : > { %v9740_v15 = vld [vmem:[%s10303_s25 + $0xe6c] sm:$0xf0]  ;;  %5212 = vmatmul.bf16.vlgmr.msrb.gmra.mxu0 %v10510_v2  ;;  %v9432_v34 = vld [vmem:[%s10303_s25 + $0x4d4] sm:$0xf]  ;;  %v5032_v56 = vadd.f32 %v5031_v52, %v5019_v16 }
 0x2ba   : > { %v8684_v23 = vor.u32 %v9740_v15, %v8683_v14  ;;  %v8395_v29 = vld [vmem:[%s10303_s25 + $0xc10] sm:$0xf]  ;;  %5256 = vmatpush.bf16.msra.mxu0 %v7088_v18  ;;  %5236 = vmatpush.bf16.msrb.mxu2 %v8428_v22  ;;  %v9304_v14 = vld [vmem:[%s10303_s25 + $0xd4] sm:$0xf]  ;;  %v7792_v18 = vor.u32 %v9512_v9, %v7789_v41 }
 0x2bb   : > { %v9668_v30 = vld [vmem:[%s10303_s25 + $0xc2c] sm:$0xf0]  ;;  %5225 = vmatmul.bf16.vlgmr.msrb.gmra.mxu1 %v10512_v3  ;;  %v6957_v15 = vld [vmem:[%s10303_s25 + $0xf0] sm:$0xf0]  ;;  %v11108_v42 = vadd.f32 %v5044_v53, %v5032_v56 }
 0x2bc   : > { %v8651_v31 = vld [vmem:[%s10303_s25 + $0xe10] sm:$0xf]  ;;  %5269 = vmatpush.bf16.msra.mxu1 %v7344_v10  ;;  %5249 = vmatpush.bf16.msrb.mxu3 %v8684_v23  ;;  %v8396_v43 = vor.u32 %v9668_v30, %v8395_v29  ;;  %v9368_v10 = vld [vmem:[%s10303_s25 + $0x2d4] sm:$0xf]  ;;  %v6960_v23 = vor.u32 %v9304_v14, %v6957_v15  ;;  %v7504_v29 = vor.u32 %v9440_v6, %v7501_v20  ;;  %v5007_v35 = vpop.f32.mrf.mxu0 }
 0x2bd   : > { %v9732_v32 = vld [vmem:[%s10303_s25 + $0xe2c] sm:$0xf0]  ;;  %v7757_v22 = vld [vmem:[%s10303_s25 + $0x730] sm:$0xf0]  ;;  %v7216_v24 = vor.u32 %v9368_v10, %v7213_v19 }
 0x2be   : > { %v8652_v44 = vor.u32 %v9732_v32, %v8651_v31  ;;  %5257 = vmatpush.bf16.msra.mxu0 %v7056_v39  ;;  %5237 = vmatpush.bf16.msrb.mxu2 %v8396_v43  ;;  %v7760_v30 = vor.u32 %v9504_v21, %v7757_v22  ;;  %v9360_v31 = vld [vmem:[%s10303_s25 + $0x294] sm:$0xf]  ;;  %v5020_v37 = vpop.f32.mrf.mxu1  ;;  %v6928_v43 = vor.u32 %v9296_v27, %v6925_v28  ;;  %v5046_v27 = vpop.f32.mrf.mxu3 }
 0x2bf   : > { %v7181_v32 = vld [vmem:[%s10303_s25 + $0x2b0] sm:$0xf0] }
 0x2c0   : > { %5270 = vmatpush.bf16.msra.mxu1 %v7312_v40  ;;  %5250 = vmatpush.bf16.msrb.mxu3 %v8652_v44  ;;  %v7469_v38 = vld [vmem:[%s10303_s25 + $0x4f0] sm:$0xf0]  ;;  %v7184_v44 = vor.u32 %v9360_v31, %v7181_v32 }
 0x2c1   : > { %5238 = vmatmul.bf16.vlgmr.msrb.gmra.mxu2 %v10529_v4  ;;  %v9496_v39 = vld [vmem:[%s10303_s25 + $0x6d4] sm:$0xf] }
 0x2c2   : > { %5282 = vmatpush.bf16.msra.mxu2 %v7600_v47  ;;  %5258 = vmatpush.bf16.msra.mxu0 %v7024_v54  ;;  %v7725_v40 = vld [vmem:[%s10303_s25 + $0x6f0] sm:$0xf0]  ;;  %v7472_v47 = vor.u32 %v9432_v34, %v7469_v38 }
 0x2c3   : > { %5251 = vmatmul.bf16.vlgmr.msrb.gmra.mxu3 %v10531_v33  ;;  %v9288_v45 = vld [vmem:[%s10303_s25 + $0x54] sm:$0xf] }
 0x2c4   : > { %5295 = vmatpush.bf16.msra.mxu3 %v7856_v48  ;;  %5271 = vmatpush.bf16.msra.mxu1 %v7280_v55  ;;  %v6893_v46 = vld [vmem:[%s10303_s25 + $0x70] sm:$0xf0]  ;;  %v7728_v48 = vor.u32 %v9496_v39, %v7725_v40 }
 0x2c5   : > { %v9352_v50 = vld [vmem:[%s10303_s25 + $0x254] sm:$0xf]  ;;  %v6896_v57 = vor.u32 %v9288_v45, %v6893_v46 }
 0x2c6   : > { %5283 = vmatpush.bf16.msra.mxu2 %v7568_v58  ;;  %5259 = vmatpush.bf16.msra.mxu0 %v6992_v12  ;;  %v7149_v36 = vld [vmem:[%s10303_s25 + $0x270] sm:$0xf0] }
 0x2c7   : > { %v9424_v51 = vld [vmem:[%s10303_s25 + $0x494] sm:$0xf]  ;;  %v7152_v58 = vor.u32 %v9352_v50, %v7149_v36 }
 0x2c8   : > { %5296 = vmatpush.bf16.msra.mxu3 %v7824_v59  ;;  %5272 = vmatpush.bf16.msra.mxu1 %v7248_v13  ;;  %v7437_v49 = vld [vmem:[%s10303_s25 + $0x4b0] sm:$0xf0] }
 0x2c9   : > { %v9488_v54 = vld [vmem:[%s10303_s25 + $0x694] sm:$0xf]  ;;  %v7440_v1 = vor.u32 %v9424_v51, %v7437_v49 }
 0x2ca   : > { %5284 = vmatpush.bf16.msra.mxu2 %v7536_v17  ;;  %5260 = vmatpush.bf16.msra.mxu0 %v6960_v23  ;;  %v7693_v55 = vld [vmem:[%s10303_s25 + $0x6b0] sm:$0xf0] }
 0x2cb   : > { %v9280_v59 = vld [vmem:[%s10303_s25 + $0x14] sm:$0xf]  ;;  %v7696_v7 = vor.u32 %v9488_v54, %v7693_v55  ;;  %v11142_v54 = vld [vmem:[%s10763_s19] sm:$0xff] }
 0x2cc   : > { %5297 = vmatpush.bf16.msra.mxu3 %v7792_v18  ;;  %5273 = vmatpush.bf16.msra.mxu1 %v7216_v24  ;;  %v6861_v63 = vld [vmem:[%s10303_s25 + $0x30] sm:$0xf0]  ;;  %v5033_v24 = vpop.f32.mrf.mxu2  ;;  %v2163_v55 = vperm.slane %v11142_v54, 3 }
 0x2cd   : > { %v9344_v5 = vld [vmem:[%s10303_s25 + $0x214] sm:$0xf]  ;;  %v6864_v17 = vor.u32 %v9280_v59, %v6861_v63 }
 0x2ce   : > { %5285 = vmatpush.bf16.msra.mxu2 %v7504_v29  ;;  %5261 = vmatpush.bf16.msra.mxu0 %v6928_v43  ;;  %v7117_v8 = vld [vmem:[%s10303_s25 + $0x230] sm:$0xf0] }
 0x2cf   : > { %v9592_v9 = vld [vmem:[%s10303_s25 + $0x9d4] sm:$0xf]  ;;  %v7120_v18 = vor.u32 %v9344_v5, %v7117_v8 }
 0x2d0   : > { %5298 = vmatpush.bf16.msra.mxu3 %v7760_v30  ;;  %5274 = vmatpush.bf16.msra.mxu1 %v7184_v44  ;;  %v8109_v41 = vld [vmem:[%s10303_s25 + $0x9f0] sm:$0xf0] }
 0x2d1   : > { %v9656_v11 = vld [vmem:[%s10303_s25 + $0xbd4] sm:$0xf]  ;;  %v8112_v10 = vor.u32 %v9592_v9, %v8109_v41  ;;  %v5057_v9 = vpop.f32.mrf.mxu0  ;;  %v5070_v41 = vpop.f32.mrf.mxu1 }
 0x2d2   : > { %5286 = vmatpush.bf16.msra.mxu2 %v7472_v47  ;;  %v8365_v12 = vld [vmem:[%s10303_s25 + $0xbf0] sm:$0xf0]  ;;  %5262 = vmatpush.bf16.msra.mxu0 %v6896_v57 }
 0x2d3   : > { %v9416_v13 = vld [vmem:[%s10303_s25 + $0x454] sm:$0xf]  ;;  %v8368_v19 = vor.u32 %v9656_v11, %v8365_v12 }
 0x2d4   : > { %5299 = vmatpush.bf16.msra.mxu3 %v7728_v48  ;;  %v7405_v14 = vld [vmem:[%s10303_s25 + $0x470] sm:$0xf0]  ;;  %5275 = vmatpush.bf16.msra.mxu1 %v7152_v58 }
 0x2d5   : > { %v9480_v15 = vld [vmem:[%s10303_s25 + $0x654] sm:$0xf]  ;;  %v7408_v22 = vor.u32 %v9416_v13, %v7405_v14  ;;  %v5058_v14 = vadd.f32 %v5057_v9, %v2163_v55  ;;  %v5083_v55 = vpop.f32.mrf.mxu2 }
 0x2d6   : > { %v7661_v16 = vld [vmem:[%s10303_s25 + $0x670] sm:$0xf0]  ;;  %5287 = vmatpush.bf16.msra.mxu2 %v7440_v1  ;;  %5263 = vmatpush.bf16.msra.mxu0 %v6864_v17 }
 0x2d7   : > { %v9584_v6 = vld [vmem:[%s10303_s25 + $0x994] sm:$0xf]  ;;  %v7664_v23 = vor.u32 %v9480_v15, %v7661_v16 }
 0x2d8   : > { %5300 = vmatpush.bf16.msra.mxu3 %v7696_v7  ;;  %v8077_v20 = vld [vmem:[%s10303_s25 + $0x9b0] sm:$0xf0]  ;;  %5276 = vmatpush.bf16.msra.mxu1 %v7120_v18 }
 0x2d9   : > { %v9648_v21 = vld [vmem:[%s10303_s25 + $0xb94] sm:$0xf]  ;;  %v8080_v39 = vor.u32 %v9584_v6, %v8077_v20  ;;  %5264 = vmatmul.bf16.vlgmr.msra.gmra.mxu0 %v10464_v60 }
 0x2da   : > { %v8333_v28 = vld [vmem:[%s10303_s25 + $0xbb0] sm:$0xf0]  ;;  %5308 = vmatpush.bf16.msrb.mxu0 %v8112_v10  ;;  %5288 = vmatpush.bf16.msra.mxu2 %v7408_v22  ;;  %v5071_v10 = vadd.f32 %v5070_v41, %v5058_v14  ;;  %v7091_v14 = vld [vmem:[%s10303_s25 + $0x1d8] sm:$0xf] }
 0x2db   : > { %v9408_v29 = vld [vmem:[%s10303_s25 + $0x414] sm:$0xf]  ;;  %v8336_v40 = vor.u32 %v9648_v21, %v8333_v28  ;;  %5277 = vmatmul.bf16.vlgmr.msra.gmra.mxu1 %v10466_v61 }
 0x2dc   : > { %v7373_v30 = vld [vmem:[%s10303_s25 + $0x430] sm:$0xf0]  ;;  %5321 = vmatpush.bf16.msrb.mxu1 %v8368_v19  ;;  %5301 = vmatpush.bf16.msra.mxu3 %v7664_v23 }
 0x2dd   : > { %v9472_v31 = vld [vmem:[%s10303_s25 + $0x614] sm:$0xf]  ;;  %v7376_v43 = vor.u32 %v9408_v29, %v7373_v30 }
 0x2de   : > { %v7629_v32 = vld [vmem:[%s10303_s25 + $0x630] sm:$0xf0]  ;;  %5309 = vmatpush.bf16.msrb.mxu0 %v8080_v39  ;;  %v5059_v39 = vpop.f32.mrf.mxu0 }
 0x2df   : > { %v9720_v34 = vld [vmem:[%s10303_s25 + $0xdd4] sm:$0xf]  ;;  %v7632_v44 = vor.u32 %v9472_v31, %v7629_v32  ;;  %5289 = vmatpush.bf16.msra.mxu2 %v7376_v43 }
 0x2e0   : > { %v8621_v35 = vld [vmem:[%s10303_s25 + $0xdf0] sm:$0xf0]  ;;  %5322 = vmatpush.bf16.msrb.mxu1 %v8336_v40  ;;  %v5072_v40 = vpop.f32.mrf.mxu1 }
 0x2e1   : > { %v9784_v37 = vld [vmem:[%s10303_s25 + $0xfd4] sm:$0xf]  ;;  %v8624_v47 = vor.u32 %v9720_v34, %v8621_v35  ;;  %5302 = vmatpush.bf16.msra.mxu3 %v7632_v44  ;;  %v7603_v40 = vld [vmem:[%s10303_s25 + $0x5d8] sm:$0xf] }
 0x2e2   : > { %v8877_v38 = vld [vmem:[%s10303_s25 + $0xff0] sm:$0xf0]  ;;  %5290 = vmatmul.bf16.vlgmr.msra.gmra.mxu2 %v10484_v25 }
 0x2e3   : > { %v9576_v45 = vld [vmem:[%s10303_s25 + $0x954] sm:$0xf]  ;;  %v8880_v48 = vor.u32 %v9784_v37, %v8877_v38  ;;  %5334 = vmatpush.bf16.msrb.mxu2 %v8624_v47 }
 0x2e4   : > { %v8045_v46 = vld [vmem:[%s10303_s25 + $0x970] sm:$0xf0]  ;;  %5303 = vmatmul.bf16.vlgmr.msra.gmra.mxu3 %v10486_v26 }
 0x2e5   : > { %v9640_v50 = vld [vmem:[%s10303_s25 + $0xb54] sm:$0xf]  ;;  %v8048_v56 = vor.u32 %v9576_v45, %v8045_v46  ;;  %5347 = vmatpush.bf16.msrb.mxu3 %v8880_v48 }
 0x2e6   : > { %v8301_v36 = vld [vmem:[%s10303_s25 + $0xb70] sm:$0xf0] }
 0x2e7   : > { %v9712_v51 = vld [vmem:[%s10303_s25 + $0xd94] sm:$0xf]  ;;  %v8304_v57 = vor.u32 %v9640_v50, %v8301_v36  ;;  %5310 = vmatpush.bf16.msrb.mxu0 %v8048_v56  ;;  %v5096_v56 = vpop.f32.mrf.mxu3 }
 0x2e8   : > { %v8589_v52 = vld [vmem:[%s10303_s25 + $0xdb0] sm:$0xf0] }
 0x2e9   : > { %v9776_v53 = vld [vmem:[%s10303_s25 + $0xf94] sm:$0xf]  ;;  %v8592_v63 = vor.u32 %v9712_v51, %v8589_v52  ;;  %5323 = vmatpush.bf16.msrb.mxu1 %v8304_v57 }
 0x2ea   : > { %v8845_v49 = vld [vmem:[%s10303_s25 + $0xfb0] sm:$0xf0] }
 0x2eb   : > { %v9568_v58 = vld [vmem:[%s10303_s25 + $0x914] sm:$0xf]  ;;  %v8848_v5 = vor.u32 %v9776_v53, %v8845_v49  ;;  %5335 = vmatpush.bf16.msrb.mxu2 %v8592_v63  ;;  %v5084_v63 = vadd.f32 %v5083_v55, %v5071_v10  ;;  %v9389_v55 = vld [vmem:[%s10303_s25 + $0x374] sm:$0xf0] }
 0x2ec   : > { %v8013_v59 = vld [vmem:[%s10303_s25 + $0x930] sm:$0xf0] }
 0x2ed   : > { %v9632_v1 = vld [vmem:[%s10303_s25 + $0xb14] sm:$0xf]  ;;  %v8016_v15 = vor.u32 %v9568_v58, %v8013_v59  ;;  %5348 = vmatpush.bf16.msrb.mxu3 %v8848_v5  ;;  %v11182_v41 = vadd.f32 %v5096_v56, %v5084_v63  ;;  %v7571_v56 = vld [vmem:[%s10303_s25 + $0x598] sm:$0xf] }
 0x2ee   : > { %v8269_v7 = vld [vmem:[%s10303_s25 + $0xb30] sm:$0xf0] }
 0x2ef   : > { %v9704_v8 = vld [vmem:[%s10303_s25 + $0xd54] sm:$0xf]  ;;  %v8272_v16 = vor.u32 %v9632_v1, %v8269_v7  ;;  %5311 = vmatpush.bf16.msrb.mxu0 %v8016_v15  ;;  %v9341_v15 = vld [vmem:[%s10303_s25 + $0x1f4] sm:$0xf0] }
 0x2f0   : > { %v8557_v11 = vld [vmem:[%s10303_s25 + $0xd70] sm:$0xf0] }
 0x2f1   : > { %v9768_v12 = vld [vmem:[%s10303_s25 + $0xf54] sm:$0xf]  ;;  %v8560_v19 = vor.u32 %v9704_v8, %v8557_v11  ;;  %5324 = vmatpush.bf16.msrb.mxu1 %v8272_v16  ;;  %v7347_v16 = vld [vmem:[%s10303_s25 + $0x3d8] sm:$0xf] }
 0x2f2   : > { %v8813_v13 = vld [vmem:[%s10303_s25 + $0xf70] sm:$0xf0] }
 0x2f3   : > { %v9560_v17 = vld [vmem:[%s10303_s25 + $0x8d4] sm:$0xf]  ;;  %v8816_v6 = vor.u32 %v9768_v12, %v8813_v13  ;;  %5336 = vmatpush.bf16.msrb.mxu2 %v8560_v19 }
 0x2f4   : > { %v7981_v18 = vld [vmem:[%s10303_s25 + $0x8f0] sm:$0xf0] }
 0x2f5   : > { %v9624_v20 = vld [vmem:[%s10303_s25 + $0xad4] sm:$0xf]  ;;  %v7984_v28 = vor.u32 %v9560_v17, %v7981_v18  ;;  %5349 = vmatpush.bf16.msrb.mxu3 %v8816_v6  ;;  %v9405_v17 = vld [vmem:[%s10303_s25 + $0x3f4] sm:$0xf0] }
 0x2f6   : > { %v8237_v21 = vld [vmem:[%s10303_s25 + $0xaf0] sm:$0xf0] }
 0x2f7   : > { %v9696_v22 = vld [vmem:[%s10303_s25 + $0xd14] sm:$0xf]  ;;  %v8240_v29 = vor.u32 %v9624_v20, %v8237_v21  ;;  %5312 = vmatpush.bf16.msrb.mxu0 %v7984_v28  ;;  %v7315_v28 = vld [vmem:[%s10303_s25 + $0x398] sm:$0xf] }
 0x2f8   : > { %v8525_v23 = vld [vmem:[%s10303_s25 + $0xd30] sm:$0xf0] }
 0x2f9   : > { %v9760_v24 = vld [vmem:[%s10303_s25 + $0xf14] sm:$0xf]  ;;  %v8528_v32 = vor.u32 %v9696_v22, %v8525_v23  ;;  %5325 = vmatpush.bf16.msrb.mxu1 %v8240_v29  ;;  %v7092_v22 = vor.u32 %v9341_v15, %v7091_v14  ;;  %v7348_v23 = vor.u32 %v9405_v17, %v7347_v16  ;;  %v5109_v14 = vpop.f32.mrf.mxu0  ;;  %v5122_v15 = vpop.f32.mrf.mxu1  ;;  %v9453_v16 = vld [vmem:[%s10303_s25 + $0x574] sm:$0xf0] }
 0x2fa   : > { %v8781_v27 = vld [vmem:[%s10303_s25 + $0xf30] sm:$0xf0]  ;;  %v7795_v17 = vld [vmem:[%s10303_s25 + $0x758] sm:$0xf] }
 0x2fb   : > { %v9552_v30 = vld [vmem:[%s10303_s25 + $0x894] sm:$0xf]  ;;  %v8784_v34 = vor.u32 %v9760_v24, %v8781_v27  ;;  %5337 = vmatpush.bf16.msrb.mxu2 %v8528_v32  ;;  %v7059_v24 = vld [vmem:[%s10303_s25 + $0x198] sm:$0xf]  ;;  %v5098_v32 = vpop.f32.mrf.mxu3 }
 0x2fc   : > { %v7949_v31 = vld [vmem:[%s10303_s25 + $0x8b0] sm:$0xf0]  ;;  %v9333_v27 = vld [vmem:[%s10303_s25 + $0x1b4] sm:$0xf0] }
 0x2fd   : > { %v9616_v35 = vld [vmem:[%s10303_s25 + $0xa94] sm:$0xf]  ;;  %v7952_v46 = vor.u32 %v9552_v30, %v7949_v31  ;;  %5350 = vmatpush.bf16.msrb.mxu3 %v8784_v34  ;;  %v5085_v31 = vpop.f32.mrf.mxu2  ;;  %v9397_v34 = vld [vmem:[%s10303_s25 + $0x3b4] sm:$0xf0] }
 0x2fe   : > { %v8205_v37 = vld [vmem:[%s10303_s25 + $0xab0] sm:$0xf0]  ;;  %v9509_v31 = vld [vmem:[%s10303_s25 + $0x734] sm:$0xf0] }
 0x2ff   : > { %v9688_v38 = vld [vmem:[%s10303_s25 + $0xcd4] sm:$0xf]  ;;  %v8208_v47 = vor.u32 %v9616_v35, %v8205_v37  ;;  %5313 = vmatpush.bf16.msrb.mxu0 %v7952_v46  ;;  %v7060_v46 = vor.u32 %v9333_v27, %v7059_v24  ;;  %v7219_v27 = vld [vmem:[%s10303_s25 + $0x2d8] sm:$0xf] }
 0x300   : > { %v8493_v43 = vld [vmem:[%s10303_s25 + $0xcf0] sm:$0xf0] }
 0x301   : > { %v9752_v44 = vld [vmem:[%s10303_s25 + $0xed4] sm:$0xf]  ;;  %v8496_v36 = vor.u32 %v9688_v38, %v8493_v43  ;;  %5326 = vmatpush.bf16.msrb.mxu1 %v8208_v47  ;;  %v9469_v43 = vld [vmem:[%s10303_s25 + $0x5f4] sm:$0xf0]  ;;  %v7316_v47 = vor.u32 %v9397_v34, %v7315_v28 }
 0x302   : > { %v8749_v45 = vld [vmem:[%s10303_s25 + $0xef0] sm:$0xf0]  ;;  %v9373_v28 = vld [vmem:[%s10303_s25 + $0x2f4] sm:$0xf0] }
 0x303   : > { %v9544_v48 = vld [vmem:[%s10303_s25 + $0x854] sm:$0xf]  ;;  %v8752_v51 = vor.u32 %v9752_v44, %v8749_v45  ;;  %5338 = vmatpush.bf16.msrb.mxu2 %v8496_v36  ;;  %v7859_v44 = vld [vmem:[%s10303_s25 + $0x7d8] sm:$0xf]  ;;  %v7220_v34 = vor.u32 %v9373_v28, %v7219_v27 }
 0x304   : > { %v7917_v50 = vld [vmem:[%s10303_s25 + $0x870] sm:$0xf0]  ;;  %v9533_v45 = vld [vmem:[%s10303_s25 + $0x7f4] sm:$0xf0] }
 0x305   : > { %v9608_v52 = vld [vmem:[%s10303_s25 + $0xa54] sm:$0xf]  ;;  %v7920_v5 = vor.u32 %v9544_v48, %v7917_v50  ;;  %5351 = vmatpush.bf16.msrb.mxu3 %v8752_v51  ;;  %v7027_v36 = vld [vmem:[%s10303_s25 + $0x158] sm:$0xf] }
 0x306   : > { %v8173_v53 = vld [vmem:[%s10303_s25 + $0xa70] sm:$0xf0]  ;;  %v9325_v51 = vld [vmem:[%s10303_s25 + $0x174] sm:$0xf0] }
 0x307   : > { %v9680_v49 = vld [vmem:[%s10303_s25 + $0xc94] sm:$0xf]  ;;  %v8176_v1 = vor.u32 %v9608_v52, %v8173_v53  ;;  %5314 = vmatpush.bf16.msrb.mxu0 %v7920_v5  ;;  %v7604_v52 = vor.u32 %v9469_v43, %v7603_v40  ;;  %v7860_v53 = vor.u32 %v9533_v45, %v7859_v44  ;;  %v7028_v63 = vor.u32 %v9325_v51, %v7027_v36  ;;  %v7187_v40 = vld [vmem:[%s10303_s25 + $0x298] sm:$0xf]  ;;  %v5111_v45 = vpop.f32.mrf.mxu0 }
 0x308   : > { %v8461_v57 = vld [vmem:[%s10303_s25 + $0xcb0] sm:$0xf0]  ;;  %v9365_v43 = vld [vmem:[%s10303_s25 + $0x2b4] sm:$0xf0] }
 0x309   : > { %v9744_v58 = vld [vmem:[%s10303_s25 + $0xe94] sm:$0xf]  ;;  %v8464_v11 = vor.u32 %v9680_v49, %v8461_v57  ;;  %5327 = vmatpush.bf16.msrb.mxu1 %v8176_v1  ;;  %v7283_v49 = vld [vmem:[%s10303_s25 + $0x358] sm:$0xf]  ;;  %v7188_v51 = vor.u32 %v9365_v43, %v7187_v40 }
 0x30a   : > { %v8717_v59 = vld [vmem:[%s10303_s25 + $0xeb0] sm:$0xf0]  ;;  %v9461_v57 = vld [vmem:[%s10303_s25 + $0x5b4] sm:$0xf0]  ;;  %v7284_v5 = vor.u32 %v9389_v55, %v7283_v49 }
 0x30b   : > { %v9536_v7 = vld [vmem:[%s10303_s25 + $0x814] sm:$0xf]  ;;  %v8720_v12 = vor.u32 %v9744_v58, %v8717_v59  ;;  %5339 = vmatpush.bf16.msrb.mxu2 %v8464_v11  ;;  %v7827_v58 = vld [vmem:[%s10303_s25 + $0x798] sm:$0xf] }
 0x30c   : > { %v7885_v8 = vld [vmem:[%s10303_s25 + $0x830] sm:$0xf0]  ;;  %v9525_v59 = vld [vmem:[%s10303_s25 + $0x7b4] sm:$0xf0] }
 0x30d   : > { %v9600_v9 = vld [vmem:[%s10303_s25 + $0xa14] sm:$0xf]  ;;  %v7888_v20 = vor.u32 %v9536_v7, %v7885_v8  ;;  %5352 = vmatpush.bf16.msrb.mxu3 %v8720_v12  ;;  %v6995_v1 = vld [vmem:[%s10303_s25 + $0x118] sm:$0xf]  ;;  %v7572_v8 = vor.u32 %v9461_v57, %v7571_v56 }
 0x30e   : > { %v8141_v13 = vld [vmem:[%s10303_s25 + $0xa30] sm:$0xf0]  ;;  %v9317_v7 = vld [vmem:[%s10303_s25 + $0x134] sm:$0xf0] }
 0x30f   : > { %v9672_v18 = vld [vmem:[%s10303_s25 + $0xc54] sm:$0xf]  ;;  %v8144_v21 = vor.u32 %v9600_v9, %v8141_v13  ;;  %5315 = vmatpush.bf16.msrb.mxu0 %v7888_v20  ;;  %v7828_v9 = vor.u32 %v9525_v59, %v7827_v58  ;;  %v7251_v11 = vld [vmem:[%s10303_s25 + $0x318] sm:$0xf]  ;;  %v5135_v59 = vpop.f32.mrf.mxu2 }
 0x310   : > { %v8429_v10 = vld [vmem:[%s10303_s25 + $0xc70] sm:$0xf0]  ;;  %v9381_v12 = vld [vmem:[%s10303_s25 + $0x334] sm:$0xf0] }
 0x311   : > { %v9736_v19 = vld [vmem:[%s10303_s25 + $0xe54] sm:$0xf]  ;;  %v8432_v29 = vor.u32 %v9672_v18, %v8429_v10  ;;  %5328 = vmatpush.bf16.msrb.mxu1 %v8144_v21  ;;  %v7539_v13 = vld [vmem:[%s10303_s25 + $0x558] sm:$0xf]  ;;  %v5110_v10 = vadd.f32 %v5109_v14, %v11182_v41 }
 0x312   : > { %v8685_v6 = vld [vmem:[%s10303_s25 + $0xe70] sm:$0xf0]  ;;  %5316 = vmatmul.bf16.vlgmr.msrb.gmra.mxu0 %v10510_v2  ;;  %v9517_v18 = vld [vmem:[%s10303_s25 + $0x774] sm:$0xf0] }
 0x313   : > { %v8688_v30 = vor.u32 %v9736_v19, %v8685_v6  ;;  %v9664_v35 = vld [vmem:[%s10303_s25 + $0xc14] sm:$0xf]  ;;  %5360 = vmatpush.bf16.msra.mxu0 %v7092_v22  ;;  %5340 = vmatpush.bf16.msrb.mxu2 %v8432_v29  ;;  %v6996_v19 = vor.u32 %v9317_v7, %v6995_v1  ;;  %v7252_v6 = vor.u32 %v9381_v12, %v7251_v11  ;;  %v6963_v20 = vld [vmem:[%s10303_s25 + $0xd8] sm:$0xf] }
 0x314   : > { %v8397_v37 = vld [vmem:[%s10303_s25 + $0xc30] sm:$0xf0]  ;;  %5329 = vmatmul.bf16.vlgmr.msrb.gmra.mxu1 %v10512_v3  ;;  %v9309_v21 = vld [vmem:[%s10303_s25 + $0xf4] sm:$0xf0]  ;;  %v5123_v22 = vadd.f32 %v5122_v15, %v5110_v10  ;;  %v7796_v24 = vor.u32 %v9517_v18, %v7795_v17 }
 0x315   : > { %v9728_v38 = vld [vmem:[%s10303_s25 + $0xe14] sm:$0xf]  ;;  %5373 = vmatpush.bf16.msra.mxu1 %v7348_v23  ;;  %5353 = vmatpush.bf16.msrb.mxu3 %v8688_v30  ;;  %v8400_v48 = vor.u32 %v9664_v35, %v8397_v37  ;;  %v7540_v23 = vor.u32 %v9453_v16, %v7539_v13  ;;  %v7507_v41 = vld [vmem:[%s10303_s25 + $0x518] sm:$0xf]  ;;  %v6964_v32 = vor.u32 %v9309_v21, %v6963_v20 }
 0x316   : > { %v8653_v39 = vld [vmem:[%s10303_s25 + $0xe30] sm:$0xf0]  ;;  %v9445_v29 = vld [vmem:[%s10303_s25 + $0x534] sm:$0xf0] }
 0x317   : > { %v8656_v50 = vor.u32 %v9728_v38, %v8653_v39  ;;  %5361 = vmatpush.bf16.msra.mxu0 %v7060_v46  ;;  %5341 = vmatpush.bf16.msrb.mxu2 %v8400_v48  ;;  %v7763_v30 = vld [vmem:[%s10303_s25 + $0x718] sm:$0xf]  ;;  %v7508_v38 = vor.u32 %v9445_v29, %v7507_v41  ;;  %v5124_v46 = vpop.f32.mrf.mxu1 }
 0x318   : > { %v6931_v35 = vld [vmem:[%s10303_s25 + $0x98] sm:$0xf]  ;;  %v7764_v39 = vor.u32 %v9509_v31, %v7763_v30 }
 0x319   : > { %5374 = vmatpush.bf16.msra.mxu1 %v7316_v47  ;;  %5354 = vmatpush.bf16.msrb.mxu3 %v8656_v50  ;;  %v9301_v37 = vld [vmem:[%s10303_s25 + $0xb4] sm:$0xf0] }
 0x31a   : > { %5342 = vmatmul.bf16.vlgmr.msrb.gmra.mxu2 %v10529_v4  ;;  %v7475_v44 = vld [vmem:[%s10303_s25 + $0x4d8] sm:$0xf]  ;;  %v6932_v36 = vor.u32 %v9301_v37, %v6931_v35  ;;  %v5137_v37 = vpop.f32.mrf.mxu2 }
 0x31b   : > { %5386 = vmatpush.bf16.msra.mxu2 %v7604_v52  ;;  %5362 = vmatpush.bf16.msra.mxu0 %v7028_v63  ;;  %v9437_v47 = vld [vmem:[%s10303_s25 + $0x4f4] sm:$0xf0]  ;;  %v5148_v63 = vpop.f32.mrf.mxu3 }
 0x31c   : > { %5355 = vmatmul.bf16.vlgmr.msrb.gmra.mxu3 %v10531_v33  ;;  %v7731_v48 = vld [vmem:[%s10303_s25 + $0x6d8] sm:$0xf]  ;;  %v7476_v49 = vor.u32 %v9437_v47, %v7475_v44 }
 0x31d   : > { %5399 = vmatpush.bf16.msra.mxu3 %v7860_v53  ;;  %5375 = vmatpush.bf16.msra.mxu1 %v7284_v5  ;;  %v9501_v50 = vld [vmem:[%s10303_s25 + $0x6f4] sm:$0xf0] }
 0x31e   : > { %v6899_v52 = vld [vmem:[%s10303_s25 + $0x58] sm:$0xf]  ;;  %v7732_v55 = vor.u32 %v9501_v50, %v7731_v48 }
 0x31f   : > { %5387 = vmatpush.bf16.msra.mxu2 %v7572_v8  ;;  %5363 = vmatpush.bf16.msra.mxu0 %v6996_v19  ;;  %v9293_v53 = vld [vmem:[%s10303_s25 + $0x74] sm:$0xf0]  ;;  %v5136_v8 = vadd.f32 %v5135_v59, %v5123_v22 }
 0x320   : > { %v7155_v56 = vld [vmem:[%s10303_s25 + $0x258] sm:$0xf] }
 0x321   : > { %5400 = vmatpush.bf16.msra.mxu3 %v7828_v9  ;;  %5376 = vmatpush.bf16.msra.mxu1 %v7252_v6  ;;  %v9357_v57 = vld [vmem:[%s10303_s25 + $0x274] sm:$0xf0]  ;;  %v6900_v9 = vor.u32 %v9293_v53, %v6899_v52  ;;  %v11253_v15 = vadd.f32 %v5148_v63, %v5136_v8  ;;  %v2164_v8 = vperm.slane %v11142_v54, 4  ;;  %v5174_v54 = vpop.f32.mrf.mxu1 }
 0x322   : > { %v7443_v58 = vld [vmem:[%s10303_s25 + $0x498] sm:$0xf]  ;;  %v7156_v11 = vor.u32 %v9357_v57, %v7155_v56 }
 0x323   : > { %5388 = vmatpush.bf16.msra.mxu2 %v7540_v23  ;;  %5364 = vmatpush.bf16.msra.mxu0 %v6964_v32  ;;  %v9429_v5 = vld [vmem:[%s10303_s25 + $0x4b4] sm:$0xf0] }
 0x324   : > { %v7699_v1 = vld [vmem:[%s10303_s25 + $0x698] sm:$0xf]  ;;  %v7444_v16 = vor.u32 %v9429_v5, %v7443_v58 }
 0x325   : > { %5401 = vmatpush.bf16.msra.mxu3 %v7796_v24  ;;  %5377 = vmatpush.bf16.msra.mxu1 %v7220_v34  ;;  %v9493_v7 = vld [vmem:[%s10303_s25 + $0x6b4] sm:$0xf0] }
 0x326   : > { %v6867_v12 = vld [vmem:[%s10303_s25 + $0x18] sm:$0xf]  ;;  %v7700_v17 = vor.u32 %v9493_v7, %v7699_v1 }
 0x327   : > { %5389 = vmatpush.bf16.msra.mxu2 %v7508_v38  ;;  %5365 = vmatpush.bf16.msra.mxu0 %v6932_v36  ;;  %v9285_v13 = vld [vmem:[%s10303_s25 + $0x34] sm:$0xf0]  ;;  %v5150_v38 = vpop.f32.mrf.mxu3 }
 0x328   : > { %v7123_v14 = vld [vmem:[%s10303_s25 + $0x218] sm:$0xf]  ;;  %v6868_v27 = vor.u32 %v9285_v13, %v6867_v12 }
 0x329   : > { %5402 = vmatpush.bf16.msra.mxu3 %v7764_v39  ;;  %5378 = vmatpush.bf16.msra.mxu1 %v7188_v51  ;;  %v9349_v18 = vld [vmem:[%s10303_s25 + $0x234] sm:$0xf0] }
 0x32a   : > { %v8115_v10 = vld [vmem:[%s10303_s25 + $0x9d8] sm:$0xf]  ;;  %v7124_v28 = vor.u32 %v9349_v18, %v7123_v14 }
 0x32b   : > { %5390 = vmatpush.bf16.msra.mxu2 %v7476_v49  ;;  %v9597_v19 = vld [vmem:[%s10303_s25 + $0x9f4] sm:$0xf0]  ;;  %5366 = vmatpush.bf16.msra.mxu0 %v6900_v9 }
 0x32c   : > { %v8371_v6 = vld [vmem:[%s10303_s25 + $0xbd8] sm:$0xf]  ;;  %v8116_v41 = vor.u32 %v9597_v19, %v8115_v10  ;;  %v5161_v19 = vpop.f32.mrf.mxu0 }
 0x32d   : > { %5403 = vmatpush.bf16.msra.mxu3 %v7732_v55  ;;  %v9661_v20 = vld [vmem:[%s10303_s25 + $0xbf4] sm:$0xf0]  ;;  %5379 = vmatpush.bf16.msra.mxu1 %v7156_v11 }
 0x32e   : > { %v7411_v21 = vld [vmem:[%s10303_s25 + $0x458] sm:$0xf]  ;;  %v8372_v29 = vor.u32 %v9661_v20, %v8371_v6 }
 0x32f   : > { %v9421_v22 = vld [vmem:[%s10303_s25 + $0x474] sm:$0xf0]  ;;  %5391 = vmatpush.bf16.msra.mxu2 %v7444_v16  ;;  %5367 = vmatpush.bf16.msra.mxu0 %v6868_v27 }
 0x330   : > { %v7667_v23 = vld [vmem:[%s10303_s25 + $0x658] sm:$0xf]  ;;  %v7412_v34 = vor.u32 %v9421_v22, %v7411_v21  ;;  %v5162_v22 = vadd.f32 %v5161_v19, %v2164_v8  ;;  %v5187_v8 = vpop.f32.mrf.mxu2 }
 0x331   : > { %v9485_v24 = vld [vmem:[%s10303_s25 + $0x674] sm:$0xf0]  ;;  %5404 = vmatpush.bf16.msra.mxu3 %v7700_v17  ;;  %5380 = vmatpush.bf16.msra.mxu1 %v7124_v28 }
 0x332   : > { %v8083_v30 = vld [vmem:[%s10303_s25 + $0x998] sm:$0xf]  ;;  %v7668_v35 = vor.u32 %v9485_v24, %v7667_v23  ;;  %5368 = vmatmul.bf16.vlgmr.msra.gmra.mxu0 %v10464_v60 }
 0x333   : > { %v9589_v31 = vld [vmem:[%s10303_s25 + $0x9b4] sm:$0xf0]  ;;  %5412 = vmatpush.bf16.msrb.mxu0 %v8116_v41  ;;  %5392 = vmatpush.bf16.msra.mxu2 %v7412_v34  ;;  %v5175_v41 = vadd.f32 %v5174_v54, %v5162_v22  ;;  %v9337_v22 = vld [vmem:[%s10303_s25 + $0x1dc] sm:$0xf] }
 0x334   : > { %v8339_v32 = vld [vmem:[%s10303_s25 + $0xb98] sm:$0xf]  ;;  %v8084_v36 = vor.u32 %v9589_v31, %v8083_v30  ;;  %5381 = vmatmul.bf16.vlgmr.msra.gmra.mxu1 %v10466_v61 }
 0x335   : > { %v9653_v39 = vld [vmem:[%s10303_s25 + $0xbb4] sm:$0xf0]  ;;  %5425 = vmatpush.bf16.msrb.mxu1 %v8372_v29  ;;  %5405 = vmatpush.bf16.msra.mxu3 %v7668_v35 }
 0x336   : > { %v7379_v40 = vld [vmem:[%s10303_s25 + $0x418] sm:$0xf]  ;;  %v8340_v51 = vor.u32 %v9653_v39, %v8339_v32 }
 0x337   : > { %v9413_v43 = vld [vmem:[%s10303_s25 + $0x434] sm:$0xf0]  ;;  %5413 = vmatpush.bf16.msrb.mxu0 %v8084_v36  ;;  %v5163_v36 = vpop.f32.mrf.mxu0 }
 0x338   : > { %v7635_v44 = vld [vmem:[%s10303_s25 + $0x618] sm:$0xf]  ;;  %v7380_v52 = vor.u32 %v9413_v43, %v7379_v40 }
 0x339   : > { %v9477_v45 = vld [vmem:[%s10303_s25 + $0x634] sm:$0xf0]  ;;  %5426 = vmatpush.bf16.msrb.mxu1 %v8340_v51  ;;  %v5176_v51 = vpop.f32.mrf.mxu1 }
 0x33a   : > { %v8627_v46 = vld [vmem:[%s10303_s25 + $0xdd8] sm:$0xf]  ;;  %v7636_v53 = vor.u32 %v9477_v45, %v7635_v44  ;;  %5393 = vmatpush.bf16.msra.mxu2 %v7380_v52  ;;  %v9465_v51 = vld [vmem:[%s10303_s25 + $0x5dc] sm:$0xf] }
 0x33b   : > { %v9725_v47 = vld [vmem:[%s10303_s25 + $0xdf4] sm:$0xf0] }
 0x33c   : > { %v8883_v48 = vld [vmem:[%s10303_s25 + $0xfd8] sm:$0xf]  ;;  %v8628_v56 = vor.u32 %v9725_v47, %v8627_v46  ;;  %5406 = vmatpush.bf16.msra.mxu3 %v7636_v53 }
 0x33d   : > { %v9789_v50 = vld [vmem:[%s10303_s25 + $0xff4] sm:$0xf0]  ;;  %5394 = vmatmul.bf16.vlgmr.msra.gmra.mxu2 %v10484_v25 }
 0x33e   : > { %v8051_v49 = vld [vmem:[%s10303_s25 + $0x958] sm:$0xf]  ;;  %v8884_v57 = vor.u32 %v9789_v50, %v8883_v48  ;;  %5438 = vmatpush.bf16.msrb.mxu2 %v8628_v56 }
 0x33f   : > { %v9581_v55 = vld [vmem:[%s10303_s25 + $0x974] sm:$0xf0]  ;;  %5407 = vmatmul.bf16.vlgmr.msra.gmra.mxu3 %v10486_v26 }
 0x340   : > { %v8307_v58 = vld [vmem:[%s10303_s25 + $0xb58] sm:$0xf]  ;;  %v8052_v9 = vor.u32 %v9581_v55, %v8051_v49  ;;  %5451 = vmatpush.bf16.msrb.mxu3 %v8884_v57 }
 0x341   : > { %v9645_v59 = vld [vmem:[%s10303_s25 + $0xb74] sm:$0xf0] }
 0x342   : > { %v8595_v63 = vld [vmem:[%s10303_s25 + $0xd98] sm:$0xf]  ;;  %v8308_v11 = vor.u32 %v9645_v59, %v8307_v58  ;;  %5414 = vmatpush.bf16.msrb.mxu0 %v8052_v9  ;;  %v5200_v9 = vpop.f32.mrf.mxu3 }
 0x343   : > { %v9717_v5 = vld [vmem:[%s10303_s25 + $0xdb4] sm:$0xf0] }
 0x344   : > { %v8851_v1 = vld [vmem:[%s10303_s25 + $0xf98] sm:$0xf]  ;;  %v8596_v14 = vor.u32 %v9717_v5, %v8595_v63  ;;  %5427 = vmatpush.bf16.msrb.mxu1 %v8308_v11 }
 0x345   : > { %v9781_v7 = vld [vmem:[%s10303_s25 + $0xfb4] sm:$0xf0] }
 0x346   : > { %v8019_v12 = vld [vmem:[%s10303_s25 + $0x918] sm:$0xf]  ;;  %v8852_v16 = vor.u32 %v9781_v7, %v8851_v1  ;;  %5439 = vmatpush.bf16.msrb.mxu2 %v8596_v14  ;;  %v5188_v14 = vadd.f32 %v5187_v8, %v5175_v41  ;;  %v7285_v8 = vld [vmem:[%s10303_s25 + $0x378] sm:$0xf0] }
 0x347   : > { %v9573_v13 = vld [vmem:[%s10303_s25 + $0x934] sm:$0xf0] }
 0x348   : > { %v8275_v17 = vld [vmem:[%s10303_s25 + $0xb18] sm:$0xf]  ;;  %v8020_v23 = vor.u32 %v9573_v13, %v8019_v12  ;;  %5452 = vmatpush.bf16.msrb.mxu3 %v8852_v16  ;;  %v11324_v54 = vadd.f32 %v5200_v9, %v5188_v14  ;;  %v9457_v9 = vld [vmem:[%s10303_s25 + $0x59c] sm:$0xf] }
 0x349   : > { %v9637_v18 = vld [vmem:[%s10303_s25 + $0xb34] sm:$0xf0] }
 0x34a   : > { %v8563_v10 = vld [vmem:[%s10303_s25 + $0xd58] sm:$0xf]  ;;  %v8276_v24 = vor.u32 %v9637_v18, %v8275_v17  ;;  %5415 = vmatpush.bf16.msrb.mxu0 %v8020_v23  ;;  %v7093_v23 = vld [vmem:[%s10303_s25 + $0x1f8] sm:$0xf0] }
 0x34b   : > { %v9709_v6 = vld [vmem:[%s10303_s25 + $0xd74] sm:$0xf0] }
 0x34c   : > { %v8819_v20 = vld [vmem:[%s10303_s25 + $0xf58] sm:$0xf]  ;;  %v8564_v29 = vor.u32 %v9709_v6, %v8563_v10  ;;  %5428 = vmatpush.bf16.msrb.mxu1 %v8276_v24  ;;  %v9401_v24 = vld [vmem:[%s10303_s25 + $0x3dc] sm:$0xf] }
 0x34d   : > { %v9773_v21 = vld [vmem:[%s10303_s25 + $0xf74] sm:$0xf0] }
 0x34e   : > { %v7987_v27 = vld [vmem:[%s10303_s25 + $0x8d8] sm:$0xf]  ;;  %v8820_v30 = vor.u32 %v9773_v21, %v8819_v20  ;;  %5440 = vmatpush.bf16.msrb.mxu2 %v8564_v29 }
 0x34f   : > { %v9565_v28 = vld [vmem:[%s10303_s25 + $0x8f4] sm:$0xf0] }
 0x350   : > { %v8243_v31 = vld [vmem:[%s10303_s25 + $0xad8] sm:$0xf]  ;;  %v7988_v39 = vor.u32 %v9565_v28, %v7987_v27  ;;  %5453 = vmatpush.bf16.msrb.mxu3 %v8820_v30  ;;  %v7349_v27 = vld [vmem:[%s10303_s25 + $0x3f8] sm:$0xf0] }
 0x351   : > { %v9629_v32 = vld [vmem:[%s10303_s25 + $0xaf4] sm:$0xf0] }
 0x352   : > { %v8531_v34 = vld [vmem:[%s10303_s25 + $0xd18] sm:$0xf]  ;;  %v8244_v40 = vor.u32 %v9629_v32, %v8243_v31  ;;  %5416 = vmatpush.bf16.msrb.mxu0 %v7988_v39  ;;  %v9393_v39 = vld [vmem:[%s10303_s25 + $0x39c] sm:$0xf] }
 0x353   : > { %v9701_v35 = vld [vmem:[%s10303_s25 + $0xd34] sm:$0xf0] }
 0x354   : > { %v8787_v37 = vld [vmem:[%s10303_s25 + $0xf18] sm:$0xf]  ;;  %v8532_v45 = vor.u32 %v9701_v35, %v8531_v34  ;;  %5429 = vmatpush.bf16.msrb.mxu1 %v8244_v40  ;;  %v7096_v34 = vor.u32 %v9337_v22, %v7093_v23  ;;  %v7352_v35 = vor.u32 %v9401_v24, %v7349_v27  ;;  %v5213_v22 = vpop.f32.mrf.mxu0  ;;  %v5226_v23 = vpop.f32.mrf.mxu1  ;;  %v7541_v24 = vld [vmem:[%s10303_s25 + $0x578] sm:$0xf0] }
 0x355   : > { %v9765_v38 = vld [vmem:[%s10303_s25 + $0xf34] sm:$0xf0]  ;;  %v9513_v27 = vld [vmem:[%s10303_s25 + $0x75c] sm:$0xf] }
 0x356   : > { %v7955_v43 = vld [vmem:[%s10303_s25 + $0x898] sm:$0xf]  ;;  %v8788_v46 = vor.u32 %v9765_v38, %v8787_v37  ;;  %5441 = vmatpush.bf16.msrb.mxu2 %v8532_v45  ;;  %v9329_v37 = vld [vmem:[%s10303_s25 + $0x19c] sm:$0xf]  ;;  %v5202_v45 = vpop.f32.mrf.mxu3 }
 0x357   : > { %v9557_v44 = vld [vmem:[%s10303_s25 + $0x8b4] sm:$0xf0]  ;;  %v7061_v38 = vld [vmem:[%s10303_s25 + $0x1b8] sm:$0xf0] }
 0x358   : > { %v8211_v47 = vld [vmem:[%s10303_s25 + $0xa98] sm:$0xf]  ;;  %v7956_v55 = vor.u32 %v9557_v44, %v7955_v43  ;;  %5454 = vmatpush.bf16.msrb.mxu3 %v8788_v46  ;;  %v5189_v44 = vpop.f32.mrf.mxu2  ;;  %v7317_v46 = vld [vmem:[%s10303_s25 + $0x3b8] sm:$0xf0] }
 0x359   : > { %v9621_v48 = vld [vmem:[%s10303_s25 + $0xab4] sm:$0xf0]  ;;  %v7765_v44 = vld [vmem:[%s10303_s25 + $0x738] sm:$0xf0] }
 0x35a   : > { %v8499_v50 = vld [vmem:[%s10303_s25 + $0xcd8] sm:$0xf]  ;;  %v8212_v56 = vor.u32 %v9621_v48, %v8211_v47  ;;  %5417 = vmatpush.bf16.msrb.mxu0 %v7956_v55  ;;  %v7064_v55 = vor.u32 %v9329_v37, %v7061_v38  ;;  %v9369_v38 = vld [vmem:[%s10303_s25 + $0x2dc] sm:$0xf] }
 0x35b   : > { %v9693_v52 = vld [vmem:[%s10303_s25 + $0xcf4] sm:$0xf0] }
 0x35c   : > { %v8755_v53 = vld [vmem:[%s10303_s25 + $0xed8] sm:$0xf]  ;;  %v8500_v59 = vor.u32 %v9693_v52, %v8499_v50  ;;  %5430 = vmatpush.bf16.msrb.mxu1 %v8212_v56  ;;  %v7605_v52 = vld [vmem:[%s10303_s25 + $0x5f8] sm:$0xf0]  ;;  %v7320_v56 = vor.u32 %v9393_v39, %v7317_v46 }
 0x35d   : > { %v9757_v49 = vld [vmem:[%s10303_s25 + $0xef4] sm:$0xf0]  ;;  %v7221_v39 = vld [vmem:[%s10303_s25 + $0x2f8] sm:$0xf0] }
 0x35e   : > { %v7923_v57 = vld [vmem:[%s10303_s25 + $0x858] sm:$0xf]  ;;  %v8756_v63 = vor.u32 %v9757_v49, %v8755_v53  ;;  %5442 = vmatpush.bf16.msrb.mxu2 %v8500_v59  ;;  %v9529_v53 = vld [vmem:[%s10303_s25 + $0x7dc] sm:$0xf]  ;;  %v7224_v46 = vor.u32 %v9369_v38, %v7221_v39 }
 0x35f   : > { %v9549_v58 = vld [vmem:[%s10303_s25 + $0x874] sm:$0xf0]  ;;  %v7861_v49 = vld [vmem:[%s10303_s25 + $0x7f8] sm:$0xf0] }
 0x360   : > { %v8179_v5 = vld [vmem:[%s10303_s25 + $0xa58] sm:$0xf]  ;;  %v7924_v16 = vor.u32 %v9549_v58, %v7923_v57  ;;  %5455 = vmatpush.bf16.msrb.mxu3 %v8756_v63  ;;  %v9321_v59 = vld [vmem:[%s10303_s25 + $0x15c] sm:$0xf] }
 0x361   : > { %v9613_v1 = vld [vmem:[%s10303_s25 + $0xa74] sm:$0xf0]  ;;  %v7029_v63 = vld [vmem:[%s10303_s25 + $0x178] sm:$0xf0] }
 0x362   : > { %v8467_v7 = vld [vmem:[%s10303_s25 + $0xc98] sm:$0xf]  ;;  %v8180_v17 = vor.u32 %v9613_v1, %v8179_v5  ;;  %5418 = vmatpush.bf16.msrb.mxu0 %v7924_v16  ;;  %v7608_v5 = vor.u32 %v9465_v51, %v7605_v52  ;;  %v7864_v1 = vor.u32 %v9529_v53, %v7861_v49  ;;  %v7032_v14 = vor.u32 %v9321_v59, %v7029_v63  ;;  %v9361_v51 = vld [vmem:[%s10303_s25 + $0x29c] sm:$0xf]  ;;  %v5215_v49 = vpop.f32.mrf.mxu0 }
 0x363   : > { %v9685_v11 = vld [vmem:[%s10303_s25 + $0xcb4] sm:$0xf0]  ;;  %v7189_v52 = vld [vmem:[%s10303_s25 + $0x2b8] sm:$0xf0] }
 0x364   : > { %v8723_v12 = vld [vmem:[%s10303_s25 + $0xe98] sm:$0xf]  ;;  %v8468_v6 = vor.u32 %v9685_v11, %v8467_v7  ;;  %5431 = vmatpush.bf16.msrb.mxu1 %v8180_v17  ;;  %v9385_v7 = vld [vmem:[%s10303_s25 + $0x35c] sm:$0xf]  ;;  %v7192_v63 = vor.u32 %v9361_v51, %v7189_v52 }
 0x365   : > { %v9749_v13 = vld [vmem:[%s10303_s25 + $0xeb4] sm:$0xf0]  ;;  %v7573_v11 = vld [vmem:[%s10303_s25 + $0x5b8] sm:$0xf0]  ;;  %v7288_v16 = vor.u32 %v9385_v7, %v7285_v8 }
 0x366   : > { %v7891_v18 = vld [vmem:[%s10303_s25 + $0x818] sm:$0xf]  ;;  %v8724_v20 = vor.u32 %v9749_v13, %v8723_v12  ;;  %5443 = vmatpush.bf16.msrb.mxu2 %v8468_v6  ;;  %v9521_v12 = vld [vmem:[%s10303_s25 + $0x79c] sm:$0xf] }
 0x367   : > { %v9541_v10 = vld [vmem:[%s10303_s25 + $0x834] sm:$0xf0]  ;;  %v7829_v13 = vld [vmem:[%s10303_s25 + $0x7b8] sm:$0xf0] }
 0x368   : > { %v8147_v19 = vld [vmem:[%s10303_s25 + $0xa18] sm:$0xf]  ;;  %v7892_v31 = vor.u32 %v9541_v10, %v7891_v18  ;;  %5456 = vmatpush.bf16.msrb.mxu3 %v8724_v20  ;;  %v9313_v17 = vld [vmem:[%s10303_s25 + $0x11c] sm:$0xf]  ;;  %v7576_v10 = vor.u32 %v9457_v9, %v7573_v11 }
 0x369   : > { %v9605_v21 = vld [vmem:[%s10303_s25 + $0xa34] sm:$0xf0]  ;;  %v6997_v18 = vld [vmem:[%s10303_s25 + $0x138] sm:$0xf0] }
 0x36a   : > { %v8435_v28 = vld [vmem:[%s10303_s25 + $0xc58] sm:$0xf]  ;;  %v8148_v32 = vor.u32 %v9605_v21, %v8147_v19  ;;  %5419 = vmatpush.bf16.msrb.mxu0 %v7892_v31  ;;  %v7832_v19 = vor.u32 %v9521_v12, %v7829_v13  ;;  %v9377_v6 = vld [vmem:[%s10303_s25 + $0x31c] sm:$0xf]  ;;  %v5239_v13 = vpop.f32.mrf.mxu2 }
 0x36b   : > { %v9677_v41 = vld [vmem:[%s10303_s25 + $0xc74] sm:$0xf0]  ;;  %v7253_v20 = vld [vmem:[%s10303_s25 + $0x338] sm:$0xf0] }
 0x36c   : > { %v8691_v29 = vld [vmem:[%s10303_s25 + $0xe58] sm:$0xf]  ;;  %v8436_v40 = vor.u32 %v9677_v41, %v8435_v28  ;;  %5432 = vmatpush.bf16.msrb.mxu1 %v8148_v32  ;;  %v9449_v21 = vld [vmem:[%s10303_s25 + $0x55c] sm:$0xf]  ;;  %v5214_v41 = vadd.f32 %v5213_v22, %v11324_v54 }
 0x36d   : > { %v9741_v30 = vld [vmem:[%s10303_s25 + $0xe74] sm:$0xf0]  ;;  %5420 = vmatmul.bf16.vlgmr.msrb.gmra.mxu0 %v10510_v2  ;;  %v7797_v28 = vld [vmem:[%s10303_s25 + $0x778] sm:$0xf0] }
 0x36e   : > { %v8692_v43 = vor.u32 %v9741_v30, %v8691_v29  ;;  %v8403_v47 = vld [vmem:[%s10303_s25 + $0xc18] sm:$0xf]  ;;  %5464 = vmatpush.bf16.msra.mxu0 %v7096_v34  ;;  %5444 = vmatpush.bf16.msrb.mxu2 %v8436_v40  ;;  %v7000_v29 = vor.u32 %v9313_v17, %v6997_v18  ;;  %v7256_v30 = vor.u32 %v9377_v6, %v7253_v20  ;;  %v9305_v31 = vld [vmem:[%s10303_s25 + $0xdc] sm:$0xf] }
 0x36f   : > { %v9669_v48 = vld [vmem:[%s10303_s25 + $0xc34] sm:$0xf0]  ;;  %5433 = vmatmul.bf16.vlgmr.msrb.gmra.mxu1 %v10512_v3  ;;  %v6965_v32 = vld [vmem:[%s10303_s25 + $0xf8] sm:$0xf0]  ;;  %v5227_v34 = vadd.f32 %v5226_v23, %v5214_v41  ;;  %v7800_v37 = vor.u32 %v9513_v27, %v7797_v28 }
 0x370   : > { %v8659_v50 = vld [vmem:[%s10303_s25 + $0xe18] sm:$0xf]  ;;  %5477 = vmatpush.bf16.msra.mxu1 %v7352_v35  ;;  %5457 = vmatpush.bf16.msrb.mxu3 %v8692_v43  ;;  %v8404_v57 = vor.u32 %v9669_v48, %v8403_v47  ;;  %v7544_v35 = vor.u32 %v9449_v21, %v7541_v24  ;;  %v9441_v54 = vld [vmem:[%s10303_s25 + $0x51c] sm:$0xf]  ;;  %v6968_v45 = vor.u32 %v9305_v31, %v6965_v32 }
 0x371   : > { %v9733_v36 = vld [vmem:[%s10303_s25 + $0xe34] sm:$0xf0]  ;;  %v7509_v40 = vld [vmem:[%s10303_s25 + $0x538] sm:$0xf0] }
 0x372   : > { %v8660_v58 = vor.u32 %v9733_v36, %v8659_v50  ;;  %5465 = vmatpush.bf16.msra.mxu0 %v7064_v55  ;;  %5445 = vmatpush.bf16.msrb.mxu2 %v8404_v57  ;;  %v9505_v43 = vld [vmem:[%s10303_s25 + $0x71c] sm:$0xf]  ;;  %v7512_v50 = vor.u32 %v9441_v54, %v7509_v40  ;;  %v5228_v55 = vpop.f32.mrf.mxu1 }
 0x373   : > { %v9297_v47 = vld [vmem:[%s10303_s25 + $0x9c] sm:$0xf]  ;;  %v7768_v36 = vor.u32 %v9505_v43, %v7765_v44 }
 0x374   : > { %5478 = vmatpush.bf16.msra.mxu1 %v7320_v56  ;;  %5458 = vmatpush.bf16.msrb.mxu3 %v8660_v58  ;;  %v6933_v48 = vld [vmem:[%s10303_s25 + $0xb8] sm:$0xf0] }
 0x375   : > { %5446 = vmatmul.bf16.vlgmr.msrb.gmra.mxu2 %v10529_v4  ;;  %v9433_v53 = vld [vmem:[%s10303_s25 + $0x4dc] sm:$0xf]  ;;  %v6936_v59 = vor.u32 %v9297_v47, %v6933_v48  ;;  %v5241_v48 = vpop.f32.mrf.mxu2 }
 0x376   : > { %5490 = vmatpush.bf16.msra.mxu2 %v7608_v5  ;;  %5466 = vmatpush.bf16.msra.mxu0 %v7032_v14  ;;  %v7477_v56 = vld [vmem:[%s10303_s25 + $0x4f8] sm:$0xf0]  ;;  %v5252_v14 = vpop.f32.mrf.mxu3 }
 0x377   : > { %5459 = vmatmul.bf16.vlgmr.msrb.gmra.mxu3 %v10531_v33  ;;  %v9497_v57 = vld [vmem:[%s10303_s25 + $0x6dc] sm:$0xf]  ;;  %v7480_v7 = vor.u32 %v9433_v53, %v7477_v56 }
 0x378   : > { %5503 = vmatpush.bf16.msra.mxu3 %v7864_v1  ;;  %5479 = vmatpush.bf16.msra.mxu1 %v7288_v16  ;;  %v7733_v58 = vld [vmem:[%s10303_s25 + $0x6f8] sm:$0xf0] }
 0x379   : > { %v9289_v5 = vld [vmem:[%s10303_s25 + $0x5c] sm:$0xf]  ;;  %v7736_v8 = vor.u32 %v9497_v57, %v7733_v58 }
 0x37a   : > { %5491 = vmatpush.bf16.msra.mxu2 %v7576_v10  ;;  %5467 = vmatpush.bf16.msra.mxu0 %v7000_v29  ;;  %v6901_v1 = vld [vmem:[%s10303_s25 + $0x78] sm:$0xf0]  ;;  %v5240_v10 = vadd.f32 %v5239_v13, %v5227_v34 }
 0x37b   : > { %v9353_v9 = vld [vmem:[%s10303_s25 + $0x25c] sm:$0xf] }
 0x37c   : > { %5504 = vmatpush.bf16.msra.mxu3 %v7832_v19  ;;  %5480 = vmatpush.bf16.msra.mxu1 %v7256_v30  ;;  %v7157_v11 = vld [vmem:[%s10303_s25 + $0x278] sm:$0xf0]  ;;  %v6904_v19 = vor.u32 %v9289_v5, %v6901_v1  ;;  %v11395_v23 = vadd.f32 %v5252_v14, %v5240_v10  ;;  %v11429_v10 = vld [vmem:[%s10763_s19] sm:$0xff] }
 0x37d   : > { %v9425_v12 = vld [vmem:[%s10303_s25 + $0x49c] sm:$0xf]  ;;  %v7160_v6 = vor.u32 %v9353_v9, %v7157_v11 }
 0x37e   : > { %5492 = vmatpush.bf16.msra.mxu2 %v7544_v35  ;;  %5468 = vmatpush.bf16.msra.mxu0 %v6968_v45  ;;  %v7445_v16 = vld [vmem:[%s10303_s25 + $0x4b8] sm:$0xf0] }
 0x37f   : > { %v9489_v17 = vld [vmem:[%s10303_s25 + $0x69c] sm:$0xf]  ;;  %v7448_v24 = vor.u32 %v9425_v12, %v7445_v16 }
 0x380   : > { %5505 = vmatpush.bf16.msra.mxu3 %v7800_v37  ;;  %5481 = vmatpush.bf16.msra.mxu1 %v7224_v46  ;;  %v7701_v18 = vld [vmem:[%s10303_s25 + $0x6b8] sm:$0xf0] }
 0x381   : > { %v9281_v20 = vld [vmem:[%s10303_s25 + $0x1c] sm:$0xf]  ;;  %v7704_v27 = vor.u32 %v9489_v17, %v7701_v18 }
 0x382   : > { %5493 = vmatpush.bf16.msra.mxu2 %v7512_v50  ;;  %5469 = vmatpush.bf16.msra.mxu0 %v6936_v59  ;;  %v6869_v21 = vld [vmem:[%s10303_s25 + $0x38] sm:$0xf0]  ;;  %v5254_v50 = vpop.f32.mrf.mxu3 }
 0x383   : > { %v9345_v22 = vld [vmem:[%s10303_s25 + $0x21c] sm:$0xf]  ;;  %v6872_v38 = vor.u32 %v9281_v20, %v6869_v21 }
 0x384   : > { %5506 = vmatpush.bf16.msra.mxu3 %v7768_v36  ;;  %5482 = vmatpush.bf16.msra.mxu1 %v7192_v63  ;;  %v7125_v28 = vld [vmem:[%s10303_s25 + $0x238] sm:$0xf0] }
 0x385   : > { %v9593_v41 = vld [vmem:[%s10303_s25 + $0x9dc] sm:$0xf]  ;;  %v7128_v39 = vor.u32 %v9345_v22, %v7125_v28 }
 0x386   : > { %5494 = vmatpush.bf16.msra.mxu2 %v7480_v7  ;;  %v8117_v29 = vld [vmem:[%s10303_s25 + $0x9f8] sm:$0xf0]  ;;  %5470 = vmatpush.bf16.msra.mxu0 %v6904_v19 }
 0x387   : > { %v9657_v30 = vld [vmem:[%s10303_s25 + $0xbdc] sm:$0xf]  ;;  %v8120_v54 = vor.u32 %v9593_v41, %v8117_v29  ;;  %v5265_v41 = vpop.f32.mrf.mxu0  ;;  %v5278_v29 = vpop.f32.mrf.mxu1 }
 0x388   : > { %5507 = vmatpush.bf16.msra.mxu3 %v7736_v8  ;;  %v8373_v31 = vld [vmem:[%s10303_s25 + $0xbf8] sm:$0xf0]  ;;  %5483 = vmatpush.bf16.msra.mxu1 %v7160_v6 }
 0x389   : > { %v9417_v32 = vld [vmem:[%s10303_s25 + $0x45c] sm:$0xf]  ;;  %v8376_v40 = vor.u32 %v9657_v30, %v8373_v31 }
 0x38a   : > { %v7413_v34 = vld [vmem:[%s10303_s25 + $0x478] sm:$0xf0]  ;;  %5495 = vmatpush.bf16.msra.mxu2 %v7448_v24  ;;  %5471 = vmatpush.bf16.msra.mxu0 %v6872_v38 }
 0x38b   : > { %v9481_v35 = vld [vmem:[%s10303_s25 + $0x65c] sm:$0xf]  ;;  %v7416_v46 = vor.u32 %v9417_v32, %v7413_v34 }
 0x38c   : > { %v7669_v37 = vld [vmem:[%s10303_s25 + $0x678] sm:$0xf0]  ;;  %5508 = vmatpush.bf16.msra.mxu3 %v7704_v27  ;;  %5484 = vmatpush.bf16.msra.mxu1 %v7128_v39 }
 0x38d   : > { %v9585_v43 = vld [vmem:[%s10303_s25 + $0x99c] sm:$0xf]  ;;  %v7672_v47 = vor.u32 %v9481_v35, %v7669_v37  ;;  %5472 = vmatmul.bf16.vlgmr.msra.gmra.mxu0 %v10464_v60  ;;  %v2165_v60 = vperm.slane %v11429_v10, 5 }
 0x38e   : > { %v8085_v44 = vld [vmem:[%s10303_s25 + $0x9b8] sm:$0xf0]  ;;  %5516 = vmatpush.bf16.msrb.mxu0 %v8120_v54  ;;  %5496 = vmatpush.bf16.msra.mxu2 %v7416_v46 }
 0x38f   : > { %v9649_v45 = vld [vmem:[%s10303_s25 + $0xb9c] sm:$0xf]  ;;  %v8088_v59 = vor.u32 %v9585_v43, %v8085_v44  ;;  %5485 = vmatmul.bf16.vlgmr.msra.gmra.mxu1 %v10466_v61  ;;  %v5266_v34 = vadd.f32 %v5265_v41, %v2165_v60 }
 0x390   : > { %v8341_v36 = vld [vmem:[%s10303_s25 + $0xbb8] sm:$0xf0]  ;;  %5529 = vmatpush.bf16.msrb.mxu1 %v8376_v40  ;;  %5509 = vmatpush.bf16.msra.mxu3 %v7672_v47 }
 0x391   : > { %v9409_v51 = vld [vmem:[%s10303_s25 + $0x41c] sm:$0xf]  ;;  %v8344_v63 = vor.u32 %v9649_v45, %v8341_v36  ;;  %v11444_v54 = vadd.f32 %v5278_v29, %v5266_v34 }
 0x392   : > { %v7381_v52 = vld [vmem:[%s10303_s25 + $0x438] sm:$0xf0]  ;;  %5517 = vmatpush.bf16.msrb.mxu0 %v8088_v59 }
 0x393   : > { %v9473_v53 = vld [vmem:[%s10303_s25 + $0x61c] sm:$0xf]  ;;  %v7384_v5 = vor.u32 %v9409_v51, %v7381_v52 }
 0x394   : > { %v7637_v49 = vld [vmem:[%s10303_s25 + $0x638] sm:$0xf0]  ;;  %5530 = vmatpush.bf16.msrb.mxu1 %v8344_v63 }
 0x395   : > { %v9721_v55 = vld [vmem:[%s10303_s25 + $0xddc] sm:$0xf]  ;;  %v7640_v1 = vor.u32 %v9473_v53, %v7637_v49  ;;  %5497 = vmatpush.bf16.msra.mxu2 %v7384_v5 }
 0x396   : > { %v8629_v56 = vld [vmem:[%s10303_s25 + $0xdf8] sm:$0xf0] }
 0x397   : > { %v9785_v57 = vld [vmem:[%s10303_s25 + $0xfdc] sm:$0xf]  ;;  %v8632_v9 = vor.u32 %v9721_v55, %v8629_v56  ;;  %5510 = vmatpush.bf16.msra.mxu3 %v7640_v1 }
 0x398   : > { %v8885_v58 = vld [vmem:[%s10303_s25 + $0xff8] sm:$0xf0]  ;;  %5498 = vmatmul.bf16.vlgmr.msra.gmra.mxu2 %v10484_v25 }
 0x399   : > { %v9577_v7 = vld [vmem:[%s10303_s25 + $0x95c] sm:$0xf]  ;;  %v8888_v11 = vor.u32 %v9785_v57, %v8885_v58  ;;  %5542 = vmatpush.bf16.msrb.mxu2 %v8632_v9  ;;  %v5267_v57 = vpop.f32.mrf.mxu0  ;;  %v5280_v58 = vpop.f32.mrf.mxu1 }
 0x39a   : > { %v8053_v8 = vld [vmem:[%s10303_s25 + $0x978] sm:$0xf0]  ;;  %5511 = vmatmul.bf16.vlgmr.msra.gmra.mxu3 %v10486_v26  ;;  %v9794_v57 = vld [vmem:[%s11481_s21 + $0x20] sm:$0xff] }
 0x39b   : > { %v9641_v12 = vld [vmem:[%s10303_s25 + $0xb5c] sm:$0xf]  ;;  %v8056_v61 = vor.u32 %v9577_v7, %v8053_v8  ;;  %5555 = vmatpush.bf16.msrb.mxu3 %v8888_v11  ;;  %v9802_v58 = vld [vmem:[%s11481_s21 + $0x60] sm:$0xff] }
 0x39c   : > { %v8309_v13 = vld [vmem:[%s10303_s25 + $0xb78] sm:$0xf0] }
 0x39d   : > { %v9713_v14 = vld [vmem:[%s10303_s25 + $0xd9c] sm:$0xf]  ;;  %v8312_v19 = vor.u32 %v9641_v12, %v8309_v13  ;;  %5518 = vmatpush.bf16.msrb.mxu0 %v8056_v61 }
 0x39e   : > { %v8597_v16 = vld [vmem:[%s10303_s25 + $0xdb8] sm:$0xf0] }
 0x39f   : > { %v9777_v17 = vld [vmem:[%s10303_s25 + $0xf9c] sm:$0xf]  ;;  %v8600_v21 = vor.u32 %v9713_v14, %v8597_v16  ;;  %5531 = vmatpush.bf16.msrb.mxu1 %v8312_v19 }
 0x3a0   : > { %v8853_v18 = vld [vmem:[%s10303_s25 + $0xfb8] sm:$0xf0] }
 0x3a1   : > { %v9569_v6 = vld [vmem:[%s10303_s25 + $0x91c] sm:$0xf]  ;;  %v8856_v22 = vor.u32 %v9777_v17, %v8853_v18  ;;  %5543 = vmatpush.bf16.msrb.mxu2 %v8600_v21  ;;  %v11465_v17 = vpop.f32.mrf.mxu2  ;;  %v11467_v18 = vpop.f32.mrf.mxu3 }
 0x3a2   : > { %v8021_v20 = vld [vmem:[%s10303_s25 + $0x938] sm:$0xf0] }
 0x3a3   : > { %v9633_v24 = vld [vmem:[%s10303_s25 + $0xb1c] sm:$0xf]  ;;  %v8024_v35 = vor.u32 %v9569_v6, %v8021_v20  ;;  %5556 = vmatpush.bf16.msrb.mxu3 %v8856_v22 }
 0x3a4   : > { %v8277_v27 = vld [vmem:[%s10303_s25 + $0xb38] sm:$0xf0] }
 0x3a5   : > { %v9705_v28 = vld [vmem:[%s10303_s25 + $0xd5c] sm:$0xf]  ;;  %v8280_v37 = vor.u32 %v9633_v24, %v8277_v27  ;;  %5519 = vmatpush.bf16.msrb.mxu0 %v8024_v35 }
 0x3a6   : > { %v8565_v30 = vld [vmem:[%s10303_s25 + $0xd78] sm:$0xf0] }
 0x3a7   : > { %v9769_v31 = vld [vmem:[%s10303_s25 + $0xf5c] sm:$0xf]  ;;  %v8568_v25 = vor.u32 %v9705_v28, %v8565_v30  ;;  %5532 = vmatpush.bf16.msrb.mxu1 %v8280_v37 }
 0x3a8   : > { %v8821_v32 = vld [vmem:[%s10303_s25 + $0xf78] sm:$0xf0] }
 0x3a9   : > { %v9561_v38 = vld [vmem:[%s10303_s25 + $0x8dc] sm:$0xf]  ;;  %v8824_v40 = vor.u32 %v9769_v31, %v8821_v32  ;;  %5544 = vmatpush.bf16.msrb.mxu2 %v8568_v25 }
 0x3aa   : > { %v7989_v39 = vld [vmem:[%s10303_s25 + $0x8f8] sm:$0xf0] }
 0x3ab   : > { %v9625_v43 = vld [vmem:[%s10303_s25 + $0xadc] sm:$0xf]  ;;  %v7992_v48 = vor.u32 %v9561_v38, %v7989_v39  ;;  %5557 = vmatpush.bf16.msrb.mxu3 %v8824_v40  ;;  %v5293_v40 = vpop.f32.mrf.mxu2 }
 0x3ac   : > { %v8245_v26 = vld [vmem:[%s10303_s25 + $0xaf8] sm:$0xf0]  ;;  %v9827_v40 = vld [vmem:[%s11481_s21 + $0x128] sm:$0xff] }
 0x3ad   : > { %v9697_v44 = vld [vmem:[%s10303_s25 + $0xd1c] sm:$0xf]  ;;  %v8248_v50 = vor.u32 %v9625_v43, %v8245_v26  ;;  %5520 = vmatpush.bf16.msrb.mxu0 %v7992_v48  ;;  %v5306_v43 = vpop.f32.mrf.mxu3  ;;  %v9804_v48 = vld [vmem:[%s11481_s21 + $0x70] sm:$0xff] }
 0x3ae   : > { %v8533_v45 = vld [vmem:[%s10303_s25 + $0xd38] sm:$0xf0]  ;;  %v9835_v43 = vld [vmem:[%s11481_s21 + $0x168] sm:$0xff] }
 0x3af   : > { %v9761_v46 = vld [vmem:[%s10303_s25 + $0xf1c] sm:$0xf]  ;;  %v8536_v52 = vor.u32 %v9697_v44, %v8533_v45  ;;  %5533 = vmatpush.bf16.msrb.mxu1 %v8248_v50 }
 0x3b0   : > { %v8789_v47 = vld [vmem:[%s10303_s25 + $0xf38] sm:$0xf0] }
 0x3b1   : > { %v9553_v36 = vld [vmem:[%s10303_s25 + $0x89c] sm:$0xf]  ;;  %v8792_v53 = vor.u32 %v9761_v46, %v8789_v47  ;;  %5545 = vmatpush.bf16.msrb.mxu2 %v8536_v52  ;;  %v9796_v47 = vld [vmem:[%s11481_s21 + $0x30] sm:$0xff] }
 0x3b2   : > { %v7957_v51 = vld [vmem:[%s10303_s25 + $0x8b8] sm:$0xf0] }
 0x3b3   : > { %v9617_v49 = vld [vmem:[%s10303_s25 + $0xa9c] sm:$0xf]  ;;  %v7960_v1 = vor.u32 %v9553_v36, %v7957_v51  ;;  %5558 = vmatpush.bf16.msrb.mxu3 %v8792_v53  ;;  %v9795_v53 = vld [vmem:[%s11481_s21 + $0x28] sm:$0xff] }
 0x3b4   : > { %v8213_v55 = vld [vmem:[%s10303_s25 + $0xab8] sm:$0xf0] }
 0x3b5   : > { %v9689_v56 = vld [vmem:[%s10303_s25 + $0xcdc] sm:$0xf]  ;;  %v8216_v7 = vor.u32 %v9617_v49, %v8213_v55  ;;  %5521 = vmatpush.bf16.msrb.mxu0 %v7960_v1  ;;  %v9803_v49 = vld [vmem:[%s11481_s21 + $0x68] sm:$0xff]  ;;  %v9812_v55 = vld [vmem:[%s11481_s21 + $0xb0] sm:$0xff] }
 0x3b6   : > { %v8501_v59 = vld [vmem:[%s10303_s25 + $0xcf8] sm:$0xf0]  ;;  %v9818_v1 = vld [vmem:[%s11481_s21 + $0xe0] sm:$0xff] }
 0x3b7   : > { %v9753_v63 = vld [vmem:[%s10303_s25 + $0xedc] sm:$0xf]  ;;  %v8504_v11 = vor.u32 %v9689_v56, %v8501_v59  ;;  %5534 = vmatpush.bf16.msrb.mxu1 %v8216_v7  ;;  %v9820_v56 = vld [vmem:[%s11481_s21 + $0xf0] sm:$0xff]  ;;  %v9811_v59 = vld [vmem:[%s11481_s21 + $0xa8] sm:$0xff] }
 0x3b8   : > { %v8757_v5 = vld [vmem:[%s10303_s25 + $0xef8] sm:$0xf0] }
 0x3b9   : > { %v9545_v8 = vld [vmem:[%s10303_s25 + $0x85c] sm:$0xf]  ;;  %v8760_v12 = vor.u32 %v9753_v63, %v8757_v5  ;;  %5546 = vmatpush.bf16.msrb.mxu2 %v8504_v11  ;;  %v9819_v63 = vld [vmem:[%s11481_s21 + $0xe8] sm:$0xff]  ;;  %v9800_v11 = vld [vmem:[%s11481_s21 + $0x50] sm:$0xff] }
 0x3ba   : > { %v7925_v9 = vld [vmem:[%s10303_s25 + $0x878] sm:$0xf0] }
 0x3bb   : > { %v9609_v13 = vld [vmem:[%s10303_s25 + $0xa5c] sm:$0xf]  ;;  %v7928_v6 = vor.u32 %v9545_v8, %v7925_v9  ;;  %5559 = vmatpush.bf16.msrb.mxu3 %v8760_v12  ;;  %v9792_v9 = vld [vmem:[%s11481_s21 + $0x10] sm:$0xff] }
 0x3bc   : > { %v8181_v14 = vld [vmem:[%s10303_s25 + $0xa78] sm:$0xf0] }
 0x3bd   : > { %v9681_v16 = vld [vmem:[%s10303_s25 + $0xc9c] sm:$0xf]  ;;  %v8184_v20 = vor.u32 %v9609_v13, %v8181_v14  ;;  %5522 = vmatpush.bf16.msrb.mxu0 %v7928_v6  ;;  %v11521_v14 = vpop.f32.mrf.mxu2  ;;  %v9816_v6 = vld [vmem:[%s11481_s21 + $0xd0] sm:$0xff] }
 0x3be   : > { %v8469_v60 = vld [vmem:[%s10303_s25 + $0xcb8] sm:$0xf0] }
 0x3bf   : > { %v9745_v61 = vld [vmem:[%s10303_s25 + $0xe9c] sm:$0xf]  ;;  %v8472_v22 = vor.u32 %v9681_v16, %v8469_v60  ;;  %5535 = vmatpush.bf16.msrb.mxu1 %v8184_v20  ;;  %v11523_v16 = vpop.f32.mrf.mxu3  ;;  %v9791_v60 = vld [vmem:[%s11481_s21 + $0x8] sm:$0xff]  ;;  %v9790_v20 = vld [vmem:[%s11481_s21] sm:$0xff] }
 0x3c0   : > { %v8725_v19 = vld [vmem:[%s10303_s25 + $0xeb8] sm:$0xf0] }
 0x3c1   : > { %v9537_v21 = vld [vmem:[%s10303_s25 + $0x81c] sm:$0xf]  ;;  %v8728_v24 = vor.u32 %v9745_v61, %v8725_v19  ;;  %5547 = vmatpush.bf16.msrb.mxu2 %v8472_v22  ;;  %v9799_v61 = vld [vmem:[%s11481_s21 + $0x48] sm:$0xff]  ;;  %v9808_v19 = vld [vmem:[%s11481_s21 + $0x90] sm:$0xff]  ;;  %v5568_v22 = vmax.f32 %v10861_v62, 0.0 }
 0x3c2   : > { %v7893_v27 = vld [vmem:[%s10303_s25 + $0x838] sm:$0xf0]  ;;  %v9828_v62 = vld [vmem:[%s11481_s21 + $0x130] sm:$0xff] }
 0x3c3   : > { %v9601_v28 = vld [vmem:[%s10303_s25 + $0xa1c] sm:$0xf]  ;;  %v7896_v34 = vor.u32 %v9537_v21, %v7893_v27  ;;  %5560 = vmatpush.bf16.msrb.mxu3 %v8728_v24  ;;  %v9798_v21 = vld [vmem:[%s11481_s21 + $0x40] sm:$0xff]  ;;  %v5569_v24 = vmax.f32 %v10966_v0, 0.0  ;;  %v9836_v0 = vld [vmem:[%s11481_s21 + $0x170] sm:$0xff] }
 0x3c4   : > { %v8149_v41 = vld [vmem:[%s10303_s25 + $0xa38] sm:$0xf0] }
 0x3c5   : > { %v9673_v29 = vld [vmem:[%s10303_s25 + $0xc5c] sm:$0xf]  ;;  %v8152_v35 = vor.u32 %v9601_v28, %v8149_v41  ;;  %5523 = vmatpush.bf16.msrb.mxu0 %v7896_v34  ;;  %v9807_v41 = vld [vmem:[%s11481_s21 + $0x88] sm:$0xff]  ;;  %v5577_v34 = vpack.c.bf16 %v5569_v24, %v5569_v24 }
 0x3c6   : > { %v8437_v30 = vld [vmem:[%s10303_s25 + $0xc78] sm:$0xf0] }
 0x3c7   : > { %v9737_v31 = vld [vmem:[%s10303_s25 + $0xe5c] sm:$0xf]  ;;  %v8440_v39 = vor.u32 %v9673_v29, %v8437_v30  ;;  %5536 = vmatpush.bf16.msrb.mxu1 %v8152_v35  ;;  %v9815_v29 = vld [vmem:[%s11481_s21 + $0xc8] sm:$0xff]  ;;  %v5345_v30 = vpop.f32.mrf.mxu2  ;;  %v9806_v35 = vld [vmem:[%s11481_s21 + $0x80] sm:$0xff] }
 0x3c8   : > { %v8693_v32 = vld [vmem:[%s10303_s25 + $0xe78] sm:$0xf0]  ;;  %5524 = vmatmul.bf16.vlgmr.msrb.gmra.mxu0 %v10510_v2  ;;  %v11503_v2 = vpop.f32.mrf.mxu0 }
 0x3c9   : > { %v9797_v37 = vld [vmem:[%s11481_s21 + $0x38] sm:$0xff]  ;;  %v8696_v25 = vor.u32 %v9737_v31, %v8693_v32  ;;  %5548 = vmatpush.bf16.msrb.mxu2 %v8440_v39  ;;  %v5358_v31 = vpop.f32.mrf.mxu3  ;;  %v5576_v32 = vpack.c.bf16 %v5568_v22, %v5568_v22  ;;  %v5571_v39 = vmax.f32 %v11253_v15, 0.0 }
 0x3ca   : > { %v9805_v38 = vld [vmem:[%s11481_s21 + $0x78] sm:$0xff]  ;;  %6100 = vmatpush.bf16.msra.mxu0 %v9797_v37  ;;  %5537 = vmatmul.bf16.vlgmr.msrb.gmra.mxu1 %v10512_v3  ;;  %v11505_v3 = vpop.f32.mrf.mxu1  ;;  %v9814_v37 = vld [vmem:[%s11481_s21 + $0xc0] sm:$0xff] }
 0x3cb   : > { %v9665_v26 = vld [vmem:[%s10303_s25 + $0xc1c] sm:$0xf]  ;;  %6113 = vmatpush.bf16.msra.mxu1 %v9805_v38  ;;  %5561 = vmatpush.bf16.msrb.mxu3 %v8696_v25  ;;  %v5570_v38 = vmax.f32 %v11108_v42, 0.0  ;;  %v9844_v42 = vld [vmem:[%s11481_s21 + $0x1b0] sm:$0xff] }
 0x3cc   : > { %v8405_v44 = vld [vmem:[%s10303_s25 + $0xc38] sm:$0xf0] }
 0x3cd   : > { %v9729_v45 = vld [vmem:[%s10303_s25 + $0xe1c] sm:$0xf]  ;;  %v8408_v50 = vor.u32 %v9665_v26, %v8405_v44  ;;  %v5578_v26 = vpack.c.bf16 %v5570_v38, %v5570_v38  ;;  %v5579_v44 = vpack.c.bf16 %v5571_v39, %v5571_v39  ;;  %v9851_v38 = vld [vmem:[%s11481_s21 + $0x1e8] sm:$0xff] }
 0x3ce   : > { %v8661_v46 = vld [vmem:[%s10303_s25 + $0xe38] sm:$0xf0]  ;;  %6101 = vmatpush.bf16.msra.mxu0 %v9796_v47  ;;  %v9826_v47 = vld [vmem:[%s11481_s21 + $0x120] sm:$0xff] }
 0x3cf   : > { %v8664_v36 = vor.u32 %v9729_v45, %v8661_v46  ;;  %v9813_v51 = vld [vmem:[%s11481_s21 + $0xb8] sm:$0xff]  ;;  %6114 = vmatpush.bf16.msra.mxu1 %v9804_v48  ;;  %5549 = vmatpush.bf16.msrb.mxu2 %v8408_v50  ;;  %v5292_v45 = vadd.f32 %v11465_v17, %v11444_v54  ;;  %v9834_v48 = vld [vmem:[%s11481_s21 + $0x160] sm:$0xff] }
 0x3d0   : > { %v9821_v52 = vld [vmem:[%s11481_s21 + $0xf8] sm:$0xff]  ;;  %v5319_v7 = vpop.f32.mrf.mxu0 }
 0x3d1   : > { %5562 = vmatpush.bf16.msrb.mxu3 %v8664_v36  ;;  %v9793_v5 = vld [vmem:[%s11481_s21 + $0x18] sm:$0xff]  ;;  %v5305_v50 = vadd.f32 %v11467_v18, %v5292_v45  ;;  %v9843_v36 = vld [vmem:[%s11481_s21 + $0x1a8] sm:$0xff]  ;;  %v9824_v18 = vld [vmem:[%s11481_s21 + $0x110] sm:$0xff]  ;;  %v5572_v7 = vmax.f32 %v11395_v23, 0.0 }
 0x3d2   : > { %5550 = vmatmul.bf16.vlgmr.msrb.gmra.mxu2 %v10529_v4  ;;  %6102 = vmatpush.bf16.msra.mxu0 %v9795_v53  ;;  %v9801_v4 = vld [vmem:[%s11481_s21 + $0x58] sm:$0xff]  ;;  %v5332_v8 = vpop.f32.mrf.mxu1 }
 0x3d3   : > { %6126 = vmatpush.bf16.msra.mxu2 %v9813_v51  ;;  %6115 = vmatpush.bf16.msra.mxu1 %v9803_v49  ;;  %v9809_v12 = vld [vmem:[%s11481_s21 + $0x98] sm:$0xff]  ;;  %v5318_v54 = vadd.f32 %v11503_v2, %v5305_v50 }
 0x3d4   : > { %5563 = vmatmul.bf16.vlgmr.msrb.gmra.mxu3 %v10531_v33  ;;  %v9810_v33 = vld [vmem:[%s11481_s21 + $0xa0] sm:$0xff]  ;;  %v9817_v13 = vld [vmem:[%s11481_s21 + $0xd8] sm:$0xff] }
 0x3d5   : > { %6139 = vmatpush.bf16.msra.mxu3 %v9821_v52  ;;  %v9829_v27 = vld [vmem:[%s11481_s21 + $0x138] sm:$0xff]  ;;  %v9842_v52 = vld [vmem:[%s11481_s21 + $0x1a0] sm:$0xff] }
 0x3d6   : > { %6103 = vmatpush.bf16.msra.mxu0 %v9794_v57  ;;  %v9837_v28 = vld [vmem:[%s11481_s21 + $0x178] sm:$0xff] }
 0x3d7   : > { %6127 = vmatpush.bf16.msra.mxu2 %v9812_v55  ;;  %6116 = vmatpush.bf16.msra.mxu1 %v9802_v58  ;;  %v9845_v25 = vld [vmem:[%s11481_s21 + $0x1b8] sm:$0xff]  ;;  %v5331_v55 = vadd.f32 %v11505_v3, %v5318_v54  ;;  %v5395_v58 = vpop.f32.mrf.mxu2 }
 0x3d8   : > { %v5369_v15 = vpop.f32.mrf.mxu0  ;;  %v9825_v17 = vld [vmem:[%s11481_s21 + $0x118] sm:$0xff] }
 0x3d9   : > { %6140 = vmatpush.bf16.msra.mxu3 %v9820_v56  ;;  %v9833_v51 = vld [vmem:[%s11481_s21 + $0x158] sm:$0xff]  ;;  %v9832_v56 = vld [vmem:[%s11481_s21 + $0x150] sm:$0xff]  ;;  %v5344_v2 = vadd.f32 %v11521_v14, %v5331_v55  ;;  %v5580_v14 = vpack.c.bf16 %v5572_v7, %v5572_v7 }
 0x3da   : > { %6104 = vmatpush.bf16.msra.mxu0 %v9793_v5  ;;  %v5382_v46 = vpop.f32.mrf.mxu1  ;;  %v9841_v57 = vld [vmem:[%s11481_s21 + $0x198] sm:$0xff]  ;;  %v9831_v5 = vld [vmem:[%s11481_s21 + $0x148] sm:$0xff] }
 0x3db   : > { %6128 = vmatpush.bf16.msra.mxu2 %v9811_v59  ;;  %6117 = vmatpush.bf16.msra.mxu1 %v9801_v4  ;;  %v5408_v59 = vpop.f32.mrf.mxu3  ;;  %v5357_v3 = vadd.f32 %v11523_v16, %v5344_v2  ;;  %v9840_v4 = vld [vmem:[%s11481_s21 + $0x190] sm:$0xff]  ;;  %v9853_v31 = vld [vmem:[%s11481_s21 + $0x1f8] sm:$0xff] }
 0x3dd   : > { %6141 = vmatpush.bf16.msra.mxu3 %v9819_v63  ;;  %v9823_v63 = vld [vmem:[%s11481_s21 + $0x108] sm:$0xff]  ;;  %v5573_v8 = vmax.f32 %v5357_v3, 0.0 }
 0x3de   : > { %6105 = vmatpush.bf16.msra.mxu0 %v9792_v9  ;;  %v9839_v9 = vld [vmem:[%s11481_s21 + $0x188] sm:$0xff] }
 0x3df   : > { %6129 = vmatpush.bf16.msra.mxu2 %v9810_v33  ;;  %6118 = vmatpush.bf16.msra.mxu1 %v9800_v11  ;;  %v9822_v33 = vld [vmem:[%s11481_s21 + $0x100] sm:$0xff]  ;;  %v5397_v11 = vpop.f32.mrf.mxu2  ;;  %v5581_v16 = vpack.c.bf16 %v5573_v8, %v5573_v8 }
 0x3e0   : > { %v5371_v53 = vpop.f32.mrf.mxu0 }
 0x3e1   : > { %6142 = vmatpush.bf16.msra.mxu3 %v9818_v1  ;;  %v9830_v1 = vld [vmem:[%s11481_s21 + $0x140] sm:$0xff] }
 0x3e2   : > { %6106 = vmatpush.bf16.msra.mxu0 %v9791_v60  ;;  %v5384_v49 = vpop.f32.mrf.mxu1  ;;  %v9838_v60 = vld [vmem:[%s11481_s21 + $0x180] sm:$0xff] }
 0x3e3   : > { %6130 = vmatpush.bf16.msra.mxu2 %v9809_v12  ;;  %6119 = vmatpush.bf16.msra.mxu1 %v9799_v61  ;;  %v5410_v12 = vpop.f32.mrf.mxu3 }
 0x3e5   : > { %6143 = vmatpush.bf16.msra.mxu3 %v9817_v13  ;;  %v2166_v13 = vperm.slane %v11429_v10, 6 }
 0x3e6   : > { %6107 = vmatpush.bf16.msra.mxu0 %v9790_v20 }
 0x3e7   : > { %6131 = vmatpush.bf16.msra.mxu2 %v9808_v19  ;;  %6120 = vmatpush.bf16.msra.mxu1 %v9798_v21  ;;  %v5370_v61 = vadd.f32 %v5369_v15, %v2166_v13 }
 0x3e9   : > { %6144 = vmatpush.bf16.msra.mxu3 %v9816_v6  ;;  %6108 = vmatmul.bf16.vlgmr.msra.gmra.mxu0 %v5576_v32  ;;  %v5383_v19 = vadd.f32 %v5382_v46, %v5370_v61  ;;  %v9847_v46 = vld [vmem:[%s11481_s21 + $0x1c8] sm:$0xff] }
 0x3ea   : > { %6152 = vmatpush.bf16.msrb.mxu0 %v9829_v27  ;;  %6121 = vmatmul.bf16.vlgmr.msra.gmra.mxu1 %v5577_v34  ;;  %v5421_v23 = vpop.f32.mrf.mxu0 }
 0x3eb   : > { %6165 = vmatpush.bf16.msrb.mxu1 %v9837_v28  ;;  %6132 = vmatpush.bf16.msra.mxu2 %v9807_v41  ;;  %v5396_v20 = vadd.f32 %v5395_v58, %v5383_v19 }
 0x3ec   : > { %v5434_v6 = vpop.f32.mrf.mxu1 }
 0x3ed   : > { %6145 = vmatpush.bf16.msra.mxu3 %v9815_v29  ;;  %v5409_v21 = vadd.f32 %v5408_v59, %v5396_v20 }
 0x3ee   : > { %6153 = vmatpush.bf16.msrb.mxu0 %v9828_v62  ;;  %v9852_v62 = vld [vmem:[%s11481_s21 + $0x1f0] sm:$0xff] }
 0x3ef   : > { %6166 = vmatpush.bf16.msrb.mxu1 %v9836_v0  ;;  %6133 = vmatpush.bf16.msra.mxu2 %v9806_v35  ;;  %v5422_v22 = vadd.f32 %v5421_v23, %v5409_v21 }
 0x3f1   : > { %6146 = vmatpush.bf16.msra.mxu3 %v9814_v37  ;;  %v5435_v28 = vadd.f32 %v5434_v6, %v5422_v22 }
 0x3f2   : > { %6134 = vmatmul.bf16.vlgmr.msra.gmra.mxu2 %v5578_v26  ;;  %6154 = vmatpush.bf16.msrb.mxu0 %v9827_v40  ;;  %v5423_v24 = vpop.f32.mrf.mxu0  ;;  %v9850_v40 = vld [vmem:[%s11481_s21 + $0x1e0] sm:$0xff]  ;;  %v9848_v26 = vld [vmem:[%s11481_s21 + $0x1d0] sm:$0xff] }
 0x3f3   : > { %6178 = vmatpush.bf16.msrb.mxu2 %v9845_v25  ;;  %6167 = vmatpush.bf16.msrb.mxu1 %v9835_v43  ;;  %v9849_v43 = vld [vmem:[%s11481_s21 + $0x1d8] sm:$0xff] }
 0x3f4   : > { %6147 = vmatmul.bf16.vlgmr.msra.gmra.mxu3 %v5579_v44  ;;  %v5436_v27 = vpop.f32.mrf.mxu1 }
 0x3f5   : > { %6191 = vmatpush.bf16.msrb.mxu3 %v9853_v31 }
 0x3f6   : > { %6155 = vmatpush.bf16.msrb.mxu0 %v9826_v47  ;;  %v9846_v47 = vld [vmem:[%s11481_s21 + $0x1c0] sm:$0xff] }
 0x3f7   : > { %6179 = vmatpush.bf16.msrb.mxu2 %v9844_v42  ;;  %6168 = vmatpush.bf16.msrb.mxu1 %v9834_v48 }
 0x3f8   : > { %v5447_v41 = vpop.f32.mrf.mxu2 }
 0x3f9   : > { %v5448_v30 = vadd.f32 %v5447_v41, %v5435_v28  ;;  %6192 = vmatpush.bf16.msrb.mxu3 %v9852_v62 }
 0x3fa   : > { %6156 = vmatpush.bf16.msrb.mxu0 %v9825_v17  ;;  %v5460_v29 = vpop.f32.mrf.mxu3 }
 0x3fb   : > { %6180 = vmatpush.bf16.msrb.mxu2 %v9843_v36  ;;  %6169 = vmatpush.bf16.msrb.mxu1 %v9833_v51  ;;  %v5461_v32 = vadd.f32 %v5460_v29, %v5448_v30  ;;  %v2167_v36 = vperm.slane %v11429_v10, 7  ;;  %v9865_v10 = vld [vmem:[%s468_s23] ss:$0 sm:$0xff] }
 0x3fd   : > { %v5574_v34 = vmax.f32 %v5461_v32, 0.0  ;;  %6193 = vmatpush.bf16.msrb.mxu3 %v9851_v38 }
 0x3fe   : > { %6157 = vmatpush.bf16.msrb.mxu0 %v9824_v18 }
 0x3ff   : > { %6181 = vmatpush.bf16.msrb.mxu2 %v9842_v52  ;;  %6170 = vmatpush.bf16.msrb.mxu1 %v9832_v56  ;;  %v5582_v0 = vpack.c.bf16 %v5574_v34, %v5574_v34 }
 0x400   : > { %v5449_v35 = vpop.f32.mrf.mxu2 }
 0x401   : > { %6194 = vmatpush.bf16.msrb.mxu3 %v9850_v40 }
 0x402   : > { %6158 = vmatpush.bf16.msrb.mxu0 %v9823_v63  ;;  %v5462_v37 = vpop.f32.mrf.mxu3 }
 0x403   : > { %6182 = vmatpush.bf16.msrb.mxu2 %v9841_v57  ;;  %6171 = vmatpush.bf16.msrb.mxu1 %v9831_v5 }
 0x405   : > { %6195 = vmatpush.bf16.msrb.mxu3 %v9849_v43 }
 0x406   : > { %6159 = vmatpush.bf16.msrb.mxu0 %v9822_v33 }
 0x407   : > { %6183 = vmatpush.bf16.msrb.mxu2 %v9840_v4  ;;  %6172 = vmatpush.bf16.msrb.mxu1 %v9830_v1 }
 0x409   : > { %6160 = vmatmul.bf16.vlgmr.msrb.gmra.mxu0 %v5580_v14  ;;  %6196 = vmatpush.bf16.msrb.mxu3 %v9848_v26 }
 0x40a   : > { %6173 = vmatmul.bf16.vlgmr.msrb.gmra.mxu1 %v5581_v16  ;;  %v5473_v39 = vpop.f32.mrf.mxu0 }
 0x40b   : > { %6184 = vmatpush.bf16.msrb.mxu2 %v9839_v9  ;;  %v5474_v54 = vadd.f32 %v5473_v39, %v2167_v36 }
 0x40c   : > { %v5486_v25 = vpop.f32.mrf.mxu1 }
 0x40d   : > { %6197 = vmatpush.bf16.msrb.mxu3 %v9847_v46  ;;  %v5487_v17 = vadd.f32 %v5486_v25, %v5474_v54 }
 0x40f   : > { %6185 = vmatpush.bf16.msrb.mxu2 %v9838_v60 }
 0x411   : > { %6198 = vmatpush.bf16.msrb.mxu3 %v9846_v47 }
 0x412   : > { %6186 = vmatmul.bf16.vlgmr.msrb.gmra.mxu2 %v5582_v0  ;;  %v5475_v44 = vpop.f32.mrf.mxu0 }
 0x414   : > { %v5488_v45 = vpop.f32.mrf.mxu1 }
 0x41b   : > { %v5499_v42 = vpop.f32.mrf.mxu2 }
 0x41c   : > { %v5500_v53 = vadd.f32 %v5499_v42, %v5487_v17 }
 0x41d   : > { %v5512_v15 = vpop.f32.mrf.mxu3 }
 0x41e   : > { %v5513_v49 = vadd.f32 %v5512_v15, %v5500_v53 }
 0x423   : > { %v5501_v48 = vpop.f32.mrf.mxu2 }
 0x425   : > { %v5514_v50 = vpop.f32.mrf.mxu3 }
 0x445   : > { %v5525_v51 = vpop.f32.mrf.mxu0 }
 0x446   : > { %v5526_v55 = vadd.f32 %v5525_v51, %v5513_v49 }
 0x447   : > { %v5538_v52 = vpop.f32.mrf.mxu1 }
 0x448   : > { %v5539_v2 = vadd.f32 %v5538_v52, %v5526_v55 }
 0x44d   : > { %v5527_v18 = vpop.f32.mrf.mxu0 }
 0x44f   : > { %v5540_v56 = vpop.f32.mrf.mxu1 }
 0x455   : > { %v5551_v57 = vpop.f32.mrf.mxu2 }
 0x456   : > { %v5552_v59 = vadd.f32 %v5551_v57, %v5539_v2 }
 0x457   : > { %v5564_v58 = vpop.f32.mrf.mxu3 }
 0x458   : > { %v5565_v63 = vadd.f32 %v5564_v58, %v5552_v59 }
 0x45a   : > { %v5575_v5 = vmax.f32 %v5565_v63, 0.0 }
 0x45c   : > { %v5583_v3 = vpack.c.bf16 %v5575_v5, %v5575_v5 }
 0x45d   : > { %v5553_v4 = vpop.f32.mrf.mxu2 }
 0x45e   : > { %6199 = vmatmul.bf16.vlgmr.msrb.gmra.mxu3 %v5583_v3 }
 0x45f   : > { %v5566_v33 = vpop.f32.mrf.mxu3 }
 0x466   : > { %v6109_v1 = vpop.f32.mrf.mxu0 }
 0x467   : > { %v6122_v7 = vpop.f32.mrf.mxu1  ;;  %v6110_v8 = vadd.f32 %v9865_v10, %v6109_v1 }
 0x469   : > { %v6123_v9 = vadd.f32 %v6122_v7, %v6110_v8 }
 0x46e   : > { %v6111_v11 = vpop.f32.mrf.mxu0 }
 0x46f   : > { %v6124_v12 = vpop.f32.mrf.mxu1 }
 0x475   : > { %v6135_v13 = vpop.f32.mrf.mxu2 }
 0x476   : > { %v6136_v16 = vadd.f32 %v6135_v13, %v6123_v9 }
 0x477   : > { %v6148_v14 = vpop.f32.mrf.mxu3 }
 0x478   : > { %v6149_v60 = vadd.f32 %v6148_v14, %v6136_v16 }
 0x47d   : > { %v6137_v61 = vpop.f32.mrf.mxu2 }
 0x47f   : > { %v6150_v19 = vpop.f32.mrf.mxu3 }
 0x486   : > { %v6161_v23 = vpop.f32.mrf.mxu0 }
 0x487   : > { %v6174_v6 = vpop.f32.mrf.mxu1  ;;  %v6162_v20 = vadd.f32 %v6161_v23, %v6149_v60 }
 0x489   : > { %v6175_v21 = vadd.f32 %v6174_v6, %v6162_v20 }
 0x48e   : > { %v6163_v22 = vpop.f32.mrf.mxu0 }
 0x48f   : > { %v6176_v24 = vpop.f32.mrf.mxu1 }
 0x495   : > { %v6187_v27 = vpop.f32.mrf.mxu2 }
 0x496   : > { %v6188_v41 = vadd.f32 %v6187_v27, %v6175_v21 }
 0x49d   : > { %v6189_v28 = vpop.f32.mrf.mxu2 }
 0x4e1   : > { %v6200_v29 = vpop.f32.mrf.mxu3 }
 0x4e2   : > { %v6201_v30 = vadd.f32 %v6200_v29, %v6188_v41 }
 0x4e4   : > { %6204 = vst [vmem:[%s472_s30] sm:$0x3] %v6201_v30 }
 0x4e9   : > { %v6202_v31 = vpop.f32.mrf.mxu3 }
 0x4ea PF: > { %s21_s17 = sadd.s32 1, %s9874_s17  }
 0x4eb   : > { %p18_p4 = scmp.ge.s32.totalorder %s21_s17, 4  }
 0x4ed   :  { %20 = sbr.rel (!%p18_p4) target bundleno = 1 (0x1), region = 109 }

</bundles_post_ra>
